<compile_context>
chip_gen: v5e
topology: v5e:2x2
jax: 0.10.0
libtpu: 0.0.40
codegen_flags: <defaults>
</compile_context>

<pallas_src>
import numpy as np

import jax
import jax.numpy as jnp
from jax.experimental import pallas as pl
from jax.experimental.pallas import tpu as pltpu


# ------------------------------ fused kernel -------------------------------- #

def _net3_kernel(x_ref, w1, w2, w3, rse, rso, cse, cso, w4, w5, w6, w7, w8,
                 o_ref,
                 a0, a1, a2, a3, a4, a5, a6, a7, a8):
    f32 = jnp.float32

    def conv(in_ref, w_ref, out_ref, relu=True):
        # in_ref: [Hin, Cin*Win] packed activation, w_ref: [kh, Cin*Win, Cout*Wout]
        kh = w_ref.shape[0]
        ho = in_ref.shape[0] - kh + 1
        acc = jnp.dot(in_ref[pl.ds(0, ho), :], w_ref[0],
                      preferred_element_type=f32)
        for i in range(1, kh):
            acc = acc + jnp.dot(in_ref[pl.ds(i, ho), :], w_ref[i],
                                preferred_element_type=f32)
        if relu:
            acc = jnp.maximum(acc, 0.0)
        if out_ref is None:
            return acc
        out_ref[...] = acc.astype(out_ref.dtype)
        return None

    # Stage this image into the MXU compute dtype.
    a0[...] = x_ref[0].astype(a0.dtype)                      # [28, 28]

    conv(a0, w1, a1)          # 28x28x1  -> 26x26x10   ([26, 260])
    conv(a1, w2, a2)          # 26x26x10 -> 24x24x16   ([24, 384])
    conv(a2, w3, a3)          # 24x24x16 -> 22x22x16   ([22, 352])

    # 2x2 / stride-2 max pool via selection matmuls (rows, then packed cols).
    x3 = a3[...]
    r_even = jnp.dot(rse[...], x3, preferred_element_type=f32)
    r_odd = jnp.dot(rso[...], x3, preferred_element_type=f32)
    rmax = jnp.maximum(r_even, r_odd).astype(a3.dtype)       # [11, 352]
    c_even = jnp.dot(rmax, cse[...], preferred_element_type=f32)
    c_odd = jnp.dot(rmax, cso[...], preferred_element_type=f32)
    a4[...] = jnp.maximum(c_even, c_odd).astype(a4.dtype)    # [11, 176]

    conv(a4, w4, a5)          # 1x1 conv, 16 -> 16     ([11, 176])
    conv(a5, w5, a6)          # 11x11x16 -> 9x9x24     ([ 9, 216])
    conv(a6, w6, a7)          # 9x9x24   -> 7x7x24     ([ 7, 168])
    conv(a7, w7, a8)          # 1x1 conv, 24 -> 16     ([ 7, 112])
    logits = conv(a8, w8, None, relu=False)                  # [1, 128], cols>=10 are 0

    # Masked log-softmax over the 10 valid logits, stored as a lane-dense row.
    col = jax.lax.broadcasted_iota(jnp.int32, (1, 128), 1)
    valid = col < 10
    masked = jnp.where(valid, logits, -1e30)
    m = jnp.max(masked, axis=-1, keepdims=True)
    s = logits - m
    ex = jnp.where(valid, jnp.exp(s), 0.0)
    lse = jnp.log(jnp.sum(ex, axis=-1, keepdims=True))
    o_ref[0] = (s - lse).astype(o_ref.dtype)


# --------------------------- weight preprocessing --------------------------- #

_CONV_SHAPES = [           # PyTorch [Cout, Cin, KH, KW], all bias=False
    (10, 1, 3, 3),         # convblock1
    (16, 10, 3, 3),        # convblock2
    (16, 16, 3, 3),        # convblock3
    (16, 16, 1, 1),        # convblock4
    (24, 16, 3, 3),        # convblock5
    (24, 24, 3, 3),        # convblock6
    (16, 24, 1, 1),        # convblock7
    (10, 16, 7, 7),        # convblock8 (no ReLU)
]


def _toeplitz_conv_mat(w_oihw, w_in, pad_cols_to=None):
    """[Cout,Cin,KH,KW] -> [KH, Cin*Win, Cout*Wout] Toeplitz matmul weights.

    Activation packing is a2d[h, ci*Win + w] = act[h, w, ci]; the conv then is
    out2d[ho, :] = sum_i a2d[ho+i, :] @ wm[i].
    """
    w = np.asarray(jax.device_get(w_oihw), dtype=np.float32)
    cout, cin, kh, kw = w.shape
    w_out = w_in - kw + 1
    ncols = cout * w_out
    if pad_cols_to is not None:
        ncols = max(ncols, pad_cols_to)
    wm = np.zeros((kh, cin * w_in, ncols), np.float32)
    r_wo = np.arange(w_out)
    for i in range(kh):
        for j in range(kw):
            rows = np.arange(cin)[:, None, None] * w_in + r_wo[None, :, None] + j
            cols = np.arange(cout)[None, None, :] * w_out + r_wo[None, :, None]
            vals = np.broadcast_to(w[:, :, i, j].T[:, None, :], (cin, w_out, cout))
            wm[i, rows, cols] = vals
    return wm


def _pool_select_mats(c, h_in, w_in):
    """Selection matrices realizing a 2x2/stride-2 max pool on [H, C*W]."""
    h_out, w_out = h_in // 2, w_in // 2
    row_e = np.zeros((h_out, h_in), np.float32)
    row_o = np.zeros((h_out, h_in), np.float32)
    row_e[np.arange(h_out), 2 * np.arange(h_out)] = 1.0
    row_o[np.arange(h_out), 2 * np.arange(h_out) + 1] = 1.0
    col_e = np.zeros((c * w_in, c * w_out), np.float32)
    col_o = np.zeros((c * w_in, c * w_out), np.float32)
    ci = np.repeat(np.arange(c), w_out)
    wo = np.tile(np.arange(w_out), c)
    col_e[ci * w_in + 2 * wo, ci * w_out + wo] = 1.0
    col_o[ci * w_in + 2 * wo + 1, ci * w_out + wo] = 1.0
    return row_e, row_o, col_e, col_o


def prepare_net3_params(conv_weights, mm_dtype=jnp.bfloat16):
    """Pack PyTorch-layout conv weights into the kernel's matmul operands."""
    for w, s in zip(conv_weights, _CONV_SHAPES):
        assert tuple(w.shape) == s, (w.shape, s)
    w1m = _toeplitz_conv_mat(conv_weights[0], 28)   # -> W 26
    w2m = _toeplitz_conv_mat(conv_weights[1], 26)   # -> 24
    w3m = _toeplitz_conv_mat(conv_weights[2], 24)   # -> 22
    rse, rso, cse, cso = _pool_select_mats(16, 22, 22)   # 22x22x16 -> 11x11x16
    w4m = _toeplitz_conv_mat(conv_weights[3], 11)   # 1x1
    w5m = _toeplitz_conv_mat(conv_weights[4], 11)   # -> 9
    w6m = _toeplitz_conv_mat(conv_weights[5], 9)    # -> 7
    w7m = _toeplitz_conv_mat(conv_weights[6], 7)    # 1x1
    w8m = _toeplitz_conv_mat(conv_weights[7], 7, pad_cols_to=128)   # -> 1 (padded 10->128)
    mats = (w1m, w2m, w3m, rse, rso, cse, cso, w4m, w5m, w6m, w7m, w8m)
    return tuple(jnp.asarray(m, dtype=mm_dtype) for m in mats)


# --------------------------------- wrapper ---------------------------------- #

def _zero_index_map(nd):
    zeros = (0,) * nd
    return lambda i: zeros


_SCRATCH_DIMS = [
    (28, 28),    # a0  staged input            [H, Cin*W]
    (26, 260),   # a1  conv1 out  26x26x10
    (24, 384),   # a2  conv2 out  24x24x16
    (22, 352),   # a3  conv3 out  22x22x16
    (11, 176),   # a4  pool  out  11x11x16
    (11, 176),   # a5  conv4 out  11x11x16
    (9, 216),    # a6  conv5 out   9x 9x24
    (7, 168),    # a7  conv6 out   7x 7x24
    (7, 112),    # a8  conv7 out   7x 7x16
]


def net3_forward(x_nchw, packed):
    """x_nchw: [N, 1, 28, 28] (PyTorch layout). Returns log-probs [N, 10]."""
    n = x_nchw.shape[0]
    assert tuple(x_nchw.shape[1:]) == (1, 28, 28), x_nchw.shape
    x = x_nchw.reshape(n, 28, 28).astype(jnp.float32)   # packed [H, Cin*W] (Cin=1)
    act_dt = packed[0].dtype

    out = pl.pallas_call(
        _net3_kernel,
        out_shape=jax.ShapeDtypeStruct((n, 1, 128), jnp.float32),
        grid_spec=pltpu.PrefetchScalarGridSpec(
            num_scalar_prefetch=0,
            grid=(n,),
            in_specs=[pl.BlockSpec((1, 28, 28), lambda i: (i, 0, 0))]
                     + [pl.BlockSpec(p.shape, _zero_index_map(p.ndim))
                        for p in packed],
            out_specs=pl.BlockSpec((1, 1, 128), lambda i: (i, 0, 0)),
            scratch_shapes=[pltpu.VMEM(s, act_dt) for s in _SCRATCH_DIMS],
        ),
        compiler_params=pltpu.CompilerParams(
            dimension_semantics=("parallel",),
            vmem_limit_bytes=32 * 1024 * 1024,
        ),
    )(x, *packed)
    return out.reshape(n, 128)[:, :10]


# ---------------------------- reference & params ---------------------------- #

def init_params(key):
    params = []
    for i, s in enumerate(_CONV_SHAPES):
        k = jax.random.fold_in(key, i)
        fan_in = s[1] * s[2] * s[3]
        params.append(jax.random.normal(k, s, jnp.float32) * (2.0 / fan_in) ** 0.5)
    return params


def net3_reference(x_nchw, conv_ws):
    """Plain-JAX/XLA reference matching the PyTorch module exactly."""
    def conv(x, w, relu=True):
        y = jax.lax.conv_general_dilated(
            x, w, (1, 1), 'VALID',
            dimension_numbers=('NCHW', 'OIHW', 'NCHW'),
            precision=jax.lax.Precision.HIGHEST)
        return jnp.maximum(y, 0.0) if relu else y

    x = x_nchw.astype(jnp.float32)
    x = conv(x, conv_ws[0]); x = conv(x, conv_ws[1]); x = conv(x, conv_ws[2])
    x = jax.lax.reduce_window(x, -jnp.inf, jax.lax.max,
                              (1, 1, 2, 2), (1, 1, 2, 2), 'VALID')
    x = conv(x, conv_ws[3]); x = conv(x, conv_ws[4])
    x = conv(x, conv_ws[5]); x = conv(x, conv_ws[6])
    x = conv(x, conv_ws[7], relu=False)
    return jax.nn.log_softmax(x.reshape(-1, 10), axis=-1)


# ----------------------------------- main ----------------------------------- #

if __name__ == "__main__":
    key = jax.random.PRNGKey(0)
    x = jax.random.normal(key, (2, 1, 28, 28), jnp.float32)   # NCHW, like PyTorch
    conv_ws = init_params(jax.random.PRNGKey(1))

    fwd = jax.jit(net3_forward)

    # Production path: bf16 MXU operands, f32 accumulation.
    packed_bf16 = prepare_net3_params(conv_ws, mm_dtype=jnp.bfloat16)
    out = jax.block_until_ready(fwd(x, packed_bf16))
    assert out.shape == (2, 10), out.shape
    assert bool(jnp.all(jnp.isfinite(out)))
    assert bool(jnp.allclose(jnp.sum(jnp.exp(out), axis=-1), 1.0, atol=1e-5))

    # f32-operand path cross-checked against the plain-JAX reference.
    packed_f32 = prepare_net3_params(conv_ws, mm_dtype=jnp.float32)
    out_f32 = jax.block_until_ready(fwd(x, packed_f32))
    ref = jax.block_until_ready(jax.jit(net3_reference)(x, conv_ws))
    max_err = float(jnp.max(jnp.abs(out_f32 - ref)))
    assert bool(jnp.allclose(out_f32, ref, atol=5e-3, rtol=5e-3)), max_err

    print("KERNEL_OK")
</pallas_src>

<mosaic_0001>
module attributes {stable_mosaic.version = 11 : i64} {
  func.func @_net3_kernel(%arg0: i32, %arg1: memref<1x28x28xf32, #tpu.memory_space<vmem>>, %arg2: memref<3x28x260xbf16, #tpu.memory_space<vmem>>, %arg3: memref<3x260x384xbf16, #tpu.memory_space<vmem>>, %arg4: memref<3x384x352xbf16, #tpu.memory_space<vmem>>, %arg5: memref<11x22xbf16, #tpu.memory_space<vmem>>, %arg6: memref<11x22xbf16, #tpu.memory_space<vmem>>, %arg7: memref<352x176xbf16, #tpu.memory_space<vmem>>, %arg8: memref<352x176xbf16, #tpu.memory_space<vmem>>, %arg9: memref<1x176x176xbf16, #tpu.memory_space<vmem>>, %arg10: memref<3x176x216xbf16, #tpu.memory_space<vmem>>, %arg11: memref<3x216x168xbf16, #tpu.memory_space<vmem>>, %arg12: memref<1x168x112xbf16, #tpu.memory_space<vmem>>, %arg13: memref<7x112x128xbf16, #tpu.memory_space<vmem>>, %arg14: memref<1x1x128xf32, #tpu.memory_space<vmem>>, %arg15: memref<28x28xbf16, #tpu.memory_space<vmem>>, %arg16: memref<26x260xbf16, #tpu.memory_space<vmem>>, %arg17: memref<24x384xbf16, #tpu.memory_space<vmem>>, %arg18: memref<22x352xbf16, #tpu.memory_space<vmem>>, %arg19: memref<11x176xbf16, #tpu.memory_space<vmem>>, %arg20: memref<11x176xbf16, #tpu.memory_space<vmem>>, %arg21: memref<9x216xbf16, #tpu.memory_space<vmem>>, %arg22: memref<7x168xbf16, #tpu.memory_space<vmem>>, %arg23: memref<7x112xbf16, #tpu.memory_space<vmem>>) attributes {dimension_semantics = [#tpu.dimension_semantics<parallel>], iteration_bounds = array<i64: 2>, scalar_prefetch = 0 : i64, scratch_operands = 9 : i64, tpu.core_type = #tpu.core_type<tc>, window_params = [{transform_indices = @transform_0, window_bounds = array<i64: 1, 28, 28>}, {pipeline_mode = #tpu.pipeline_mode<synchronous>, transform_indices = @transform_1, window_bounds = array<i64: 3, 28, 260>}, {pipeline_mode = #tpu.pipeline_mode<synchronous>, transform_indices = @transform_2, window_bounds = array<i64: 3, 260, 384>}, {pipeline_mode = #tpu.pipeline_mode<synchronous>, transform_indices = @transform_3, window_bounds = array<i64: 3, 384, 352>}, {pipeline_mode = #tpu.pipeline_mode<synchronous>, transform_indices = @transform_4, window_bounds = array<i64: 11, 22>}, {pipeline_mode = #tpu.pipeline_mode<synchronous>, transform_indices = @transform_5, window_bounds = array<i64: 11, 22>}, {pipeline_mode = #tpu.pipeline_mode<synchronous>, transform_indices = @transform_6, window_bounds = array<i64: 352, 176>}, {pipeline_mode = #tpu.pipeline_mode<synchronous>, transform_indices = @transform_7, window_bounds = array<i64: 352, 176>}, {pipeline_mode = #tpu.pipeline_mode<synchronous>, transform_indices = @transform_8, window_bounds = array<i64: 1, 176, 176>}, {pipeline_mode = #tpu.pipeline_mode<synchronous>, transform_indices = @transform_9, window_bounds = array<i64: 3, 176, 216>}, {pipeline_mode = #tpu.pipeline_mode<synchronous>, transform_indices = @transform_10, window_bounds = array<i64: 3, 216, 168>}, {pipeline_mode = #tpu.pipeline_mode<synchronous>, transform_indices = @transform_11, window_bounds = array<i64: 1, 168, 112>}, {pipeline_mode = #tpu.pipeline_mode<synchronous>, transform_indices = @transform_12, window_bounds = array<i64: 7, 112, 128>}, {transform_indices = @transform_13, window_bounds = array<i64: 1, 1, 128>}]} {
    %c0 = arith.constant 0 : index
    %c0_0 = arith.constant 0 : index
    %c0_1 = arith.constant 0 : index
    %0 = vector.load %arg1[%c0, %c0_0, %c0_1] : memref<1x28x28xf32, #tpu.memory_space<vmem>>, vector<1x28x28xf32>
    %1 = vector.shape_cast %0 : vector<1x28x28xf32> to vector<28x28xf32>
    %2 = arith.truncf %1 : vector<28x28xf32> to vector<28x28xbf16>
    %c0_2 = arith.constant 0 : index
    %c0_3 = arith.constant 0 : index
    %3 = vector.load %arg15[%c0_2, %c0_3] : memref<28x28xbf16, #tpu.memory_space<vmem>>, vector<28x28xbf16>
    tpu.vector_store %arg15[%c0_2, %c0_3], %2 {strides = array<i32>} : memref<28x28xbf16, #tpu.memory_space<vmem>>, vector<28x28xbf16>,
    %c0_4 = arith.constant 0 : index
    %c0_5 = arith.constant 0 : index
    %4 = vector.load %arg15[%c0_4, %c0_5] : memref<28x28xbf16, #tpu.memory_space<vmem>>, vector<26x28xbf16>
    %c0_6 = arith.constant 0 : index
    %c0_7 = arith.constant 0 : index
    %c0_8 = arith.constant 0 : index
    %5 = vector.load %arg2[%c0_6, %c0_7, %c0_8] : memref<3x28x260xbf16, #tpu.memory_space<vmem>>, vector<1x28x260xbf16>
    %6 = vector.shape_cast %5 : vector<1x28x260xbf16> to vector<28x260xbf16>
    %cst = arith.constant dense<0.000000e+00> : vector<26x260xf32>
    %7 = tpu.matmul %4, %6, %cst {dimension_numbers = #tpu.dot_dimension_numbers<[1], [0], [0], [1], [0, 0, 1, 1], [], []>} : vector<26x28xbf16>, vector<28x260xbf16>, vector<26x260xf32> -> vector<26x260xf32>
    %c1 = arith.constant 1 : index
    %c0_9 = arith.constant 0 : index
    %8 = vector.load %arg15[%c1, %c0_9] : memref<28x28xbf16, #tpu.memory_space<vmem>>, vector<26x28xbf16>
    %c1_10 = arith.constant 1 : index
    %c0_11 = arith.constant 0 : index
    %c0_12 = arith.constant 0 : index
    %9 = vector.load %arg2[%c1_10, %c0_11, %c0_12] : memref<3x28x260xbf16, #tpu.memory_space<vmem>>, vector<1x28x260xbf16>
    %10 = vector.shape_cast %9 : vector<1x28x260xbf16> to vector<28x260xbf16>
    %cst_13 = arith.constant dense<0.000000e+00> : vector<26x260xf32>
    %11 = tpu.matmul %8, %10, %cst_13 {dimension_numbers = #tpu.dot_dimension_numbers<[1], [0], [0], [1], [0, 0, 1, 1], [], []>} : vector<26x28xbf16>, vector<28x260xbf16>, vector<26x260xf32> -> vector<26x260xf32>
    %12 = arith.addf %7, %11 : vector<26x260xf32>
    %c2 = arith.constant 2 : index
    %c0_14 = arith.constant 0 : index
    %13 = vector.load %arg15[%c2, %c0_14] : memref<28x28xbf16, #tpu.memory_space<vmem>>, vector<26x28xbf16>
    %c2_15 = arith.constant 2 : index
    %c0_16 = arith.constant 0 : index
    %c0_17 = arith.constant 0 : index
    %14 = vector.load %arg2[%c2_15, %c0_16, %c0_17] : memref<3x28x260xbf16, #tpu.memory_space<vmem>>, vector<1x28x260xbf16>
    %15 = vector.shape_cast %14 : vector<1x28x260xbf16> to vector<28x260xbf16>
    %cst_18 = arith.constant dense<0.000000e+00> : vector<26x260xf32>
    %16 = tpu.matmul %13, %15, %cst_18 {dimension_numbers = #tpu.dot_dimension_numbers<[1], [0], [0], [1], [0, 0, 1, 1], [], []>} : vector<26x28xbf16>, vector<28x260xbf16>, vector<26x260xf32> -> vector<26x260xf32>
    %17 = arith.addf %12, %16 : vector<26x260xf32>
    %cst_19 = arith.constant 0.000000e+00 : f32
    %18 = vector.broadcast %cst_19 : f32 to vector<26x260xf32>
    %19 = arith.maximumf %17, %18 : vector<26x260xf32>
    %20 = arith.truncf %19 : vector<26x260xf32> to vector<26x260xbf16>
    %c0_20 = arith.constant 0 : index
    %c0_21 = arith.constant 0 : index
    %21 = vector.load %arg16[%c0_20, %c0_21] : memref<26x260xbf16, #tpu.memory_space<vmem>>, vector<26x260xbf16>
    tpu.vector_store %arg16[%c0_20, %c0_21], %20 {strides = array<i32>} : memref<26x260xbf16, #tpu.memory_space<vmem>>, vector<26x260xbf16>,
    %c0_22 = arith.constant 0 : index
    %c0_23 = arith.constant 0 : index
    %22 = vector.load %arg16[%c0_22, %c0_23] : memref<26x260xbf16, #tpu.memory_space<vmem>>, vector<24x260xbf16>
    %c0_24 = arith.constant 0 : index
    %c0_25 = arith.constant 0 : index
    %c0_26 = arith.constant 0 : index
    %23 = vector.load %arg3[%c0_24, %c0_25, %c0_26] : memref<3x260x384xbf16, #tpu.memory_space<vmem>>, vector<1x260x384xbf16>
    %24 = vector.shape_cast %23 : vector<1x260x384xbf16> to vector<260x384xbf16>
    %cst_27 = arith.constant dense<0.000000e+00> : vector<24x384xf32>
    %25 = tpu.matmul %22, %24, %cst_27 {dimension_numbers = #tpu.dot_dimension_numbers<[1], [0], [0], [1], [0, 0, 1, 1], [], []>} : vector<24x260xbf16>, vector<260x384xbf16>, vector<24x384xf32> -> vector<24x384xf32>
    %c1_28 = arith.constant 1 : index
    %c0_29 = arith.constant 0 : index
    %26 = vector.load %arg16[%c1_28, %c0_29] : memref<26x260xbf16, #tpu.memory_space<vmem>>, vector<24x260xbf16>
    %c1_30 = arith.constant 1 : index
    %c0_31 = arith.constant 0 : index
    %c0_32 = arith.constant 0 : index
    %27 = vector.load %arg3[%c1_30, %c0_31, %c0_32] : memref<3x260x384xbf16, #tpu.memory_space<vmem>>, vector<1x260x384xbf16>
    %28 = vector.shape_cast %27 : vector<1x260x384xbf16> to vector<260x384xbf16>
    %cst_33 = arith.constant dense<0.000000e+00> : vector<24x384xf32>
    %29 = tpu.matmul %26, %28, %cst_33 {dimension_numbers = #tpu.dot_dimension_numbers<[1], [0], [0], [1], [0, 0, 1, 1], [], []>} : vector<24x260xbf16>, vector<260x384xbf16>, vector<24x384xf32> -> vector<24x384xf32>
    %30 = arith.addf %25, %29 : vector<24x384xf32>
    %c2_34 = arith.constant 2 : index
    %c0_35 = arith.constant 0 : index
    %31 = vector.load %arg16[%c2_34, %c0_35] : memref<26x260xbf16, #tpu.memory_space<vmem>>, vector<24x260xbf16>
    %c2_36 = arith.constant 2 : index
    %c0_37 = arith.constant 0 : index
    %c0_38 = arith.constant 0 : index
    %32 = vector.load %arg3[%c2_36, %c0_37, %c0_38] : memref<3x260x384xbf16, #tpu.memory_space<vmem>>, vector<1x260x384xbf16>
    %33 = vector.shape_cast %32 : vector<1x260x384xbf16> to vector<260x384xbf16>
    %cst_39 = arith.constant dense<0.000000e+00> : vector<24x384xf32>
    %34 = tpu.matmul %31, %33, %cst_39 {dimension_numbers = #tpu.dot_dimension_numbers<[1], [0], [0], [1], [0, 0, 1, 1], [], []>} : vector<24x260xbf16>, vector<260x384xbf16>, vector<24x384xf32> -> vector<24x384xf32>
    %35 = arith.addf %30, %34 : vector<24x384xf32>
    %cst_40 = arith.constant 0.000000e+00 : f32
    %36 = vector.broadcast %cst_40 : f32 to vector<24x384xf32>
    %37 = arith.maximumf %35, %36 : vector<24x384xf32>
    %38 = arith.truncf %37 : vector<24x384xf32> to vector<24x384xbf16>
    %c0_41 = arith.constant 0 : index
    %c0_42 = arith.constant 0 : index
    %39 = vector.load %arg17[%c0_41, %c0_42] : memref<24x384xbf16, #tpu.memory_space<vmem>>, vector<24x384xbf16>
    tpu.vector_store %arg17[%c0_41, %c0_42], %38 {strides = array<i32>} : memref<24x384xbf16, #tpu.memory_space<vmem>>, vector<24x384xbf16>,
    %c0_43 = arith.constant 0 : index
    %c0_44 = arith.constant 0 : index
    %40 = vector.load %arg17[%c0_43, %c0_44] : memref<24x384xbf16, #tpu.memory_space<vmem>>, vector<22x384xbf16>
    %c0_45 = arith.constant 0 : index
    %c0_46 = arith.constant 0 : index
    %c0_47 = arith.constant 0 : index
    %41 = vector.load %arg4[%c0_45, %c0_46, %c0_47] : memref<3x384x352xbf16, #tpu.memory_space<vmem>>, vector<1x384x352xbf16>
    %42 = vector.shape_cast %41 : vector<1x384x352xbf16> to vector<384x352xbf16>
    %cst_48 = arith.constant dense<0.000000e+00> : vector<22x352xf32>
    %43 = tpu.matmul %40, %42, %cst_48 {dimension_numbers = #tpu.dot_dimension_numbers<[1], [0], [0], [1], [0, 0, 1, 1], [], []>} : vector<22x384xbf16>, vector<384x352xbf16>, vector<22x352xf32> -> vector<22x352xf32>
    %c1_49 = arith.constant 1 : index
    %c0_50 = arith.constant 0 : index
    %44 = vector.load %arg17[%c1_49, %c0_50] : memref<24x384xbf16, #tpu.memory_space<vmem>>, vector<22x384xbf16>
    %c1_51 = arith.constant 1 : index
    %c0_52 = arith.constant 0 : index
    %c0_53 = arith.constant 0 : index
    %45 = vector.load %arg4[%c1_51, %c0_52, %c0_53] : memref<3x384x352xbf16, #tpu.memory_space<vmem>>, vector<1x384x352xbf16>
    %46 = vector.shape_cast %45 : vector<1x384x352xbf16> to vector<384x352xbf16>
    %cst_54 = arith.constant dense<0.000000e+00> : vector<22x352xf32>
    %47 = tpu.matmul %44, %46, %cst_54 {dimension_numbers = #tpu.dot_dimension_numbers<[1], [0], [0], [1], [0, 0, 1, 1], [], []>} : vector<22x384xbf16>, vector<384x352xbf16>, vector<22x352xf32> -> vector<22x352xf32>
    %48 = arith.addf %43, %47 : vector<22x352xf32>
    %c2_55 = arith.constant 2 : index
    %c0_56 = arith.constant 0 : index
    %49 = vector.load %arg17[%c2_55, %c0_56] : memref<24x384xbf16, #tpu.memory_space<vmem>>, vector<22x384xbf16>
    %c2_57 = arith.constant 2 : index
    %c0_58 = arith.constant 0 : index
    %c0_59 = arith.constant 0 : index
    %50 = vector.load %arg4[%c2_57, %c0_58, %c0_59] : memref<3x384x352xbf16, #tpu.memory_space<vmem>>, vector<1x384x352xbf16>
    %51 = vector.shape_cast %50 : vector<1x384x352xbf16> to vector<384x352xbf16>
    %cst_60 = arith.constant dense<0.000000e+00> : vector<22x352xf32>
    %52 = tpu.matmul %49, %51, %cst_60 {dimension_numbers = #tpu.dot_dimension_numbers<[1], [0], [0], [1], [0, 0, 1, 1], [], []>} : vector<22x384xbf16>, vector<384x352xbf16>, vector<22x352xf32> -> vector<22x352xf32>
    %53 = arith.addf %48, %52 : vector<22x352xf32>
    %cst_61 = arith.constant 0.000000e+00 : f32
    %54 = vector.broadcast %cst_61 : f32 to vector<22x352xf32>
    %55 = arith.maximumf %53, %54 : vector<22x352xf32>
    %56 = arith.truncf %55 : vector<22x352xf32> to vector<22x352xbf16>
    %c0_62 = arith.constant 0 : index
    %c0_63 = arith.constant 0 : index
    %57 = vector.load %arg18[%c0_62, %c0_63] : memref<22x352xbf16, #tpu.memory_space<vmem>>, vector<22x352xbf16>
    tpu.vector_store %arg18[%c0_62, %c0_63], %56 {strides = array<i32>} : memref<22x352xbf16, #tpu.memory_space<vmem>>, vector<22x352xbf16>,
    %c0_64 = arith.constant 0 : index
    %c0_65 = arith.constant 0 : index
    %58 = vector.load %arg18[%c0_64, %c0_65] : memref<22x352xbf16, #tpu.memory_space<vmem>>, vector<22x352xbf16>
    %c0_66 = arith.constant 0 : index
    %c0_67 = arith.constant 0 : index
    %59 = vector.load %arg5[%c0_66, %c0_67] : memref<11x22xbf16, #tpu.memory_space<vmem>>, vector<11x22xbf16>
    %cst_68 = arith.constant dense<0.000000e+00> : vector<11x352xf32>
    %60 = tpu.matmul %59, %58, %cst_68 {dimension_numbers = #tpu.dot_dimension_numbers<[1], [0], [0], [1], [0, 0, 1, 1], [], []>} : vector<11x22xbf16>, vector<22x352xbf16>, vector<11x352xf32> -> vector<11x352xf32>
    %c0_69 = arith.constant 0 : index
    %c0_70 = arith.constant 0 : index
    %61 = vector.load %arg6[%c0_69, %c0_70] : memref<11x22xbf16, #tpu.memory_space<vmem>>, vector<11x22xbf16>
    %cst_71 = arith.constant dense<0.000000e+00> : vector<11x352xf32>
    %62 = tpu.matmul %61, %58, %cst_71 {dimension_numbers = #tpu.dot_dimension_numbers<[1], [0], [0], [1], [0, 0, 1, 1], [], []>} : vector<11x22xbf16>, vector<22x352xbf16>, vector<11x352xf32> -> vector<11x352xf32>
    %63 = arith.maximumf %60, %62 : vector<11x352xf32>
    %64 = arith.truncf %63 : vector<11x352xf32> to vector<11x352xbf16>
    %c0_72 = arith.constant 0 : index
    %c0_73 = arith.constant 0 : index
    %65 = vector.load %arg7[%c0_72, %c0_73] : memref<352x176xbf16, #tpu.memory_space<vmem>>, vector<352x176xbf16>
    %cst_74 = arith.constant dense<0.000000e+00> : vector<11x176xf32>
    %66 = tpu.matmul %64, %65, %cst_74 {dimension_numbers = #tpu.dot_dimension_numbers<[1], [0], [0], [1], [0, 0, 1, 1], [], []>} : vector<11x352xbf16>, vector<352x176xbf16>, vector<11x176xf32> -> vector<11x176xf32>
    %c0_75 = arith.constant 0 : index
    %c0_76 = arith.constant 0 : index
    %67 = vector.load %arg8[%c0_75, %c0_76] : memref<352x176xbf16, #tpu.memory_space<vmem>>, vector<352x176xbf16>
    %cst_77 = arith.constant dense<0.000000e+00> : vector<11x176xf32>
    %68 = tpu.matmul %64, %67, %cst_77 {dimension_numbers = #tpu.dot_dimension_numbers<[1], [0], [0], [1], [0, 0, 1, 1], [], []>} : vector<11x352xbf16>, vector<352x176xbf16>, vector<11x176xf32> -> vector<11x176xf32>
    %69 = arith.maximumf %66, %68 : vector<11x176xf32>
    %70 = arith.truncf %69 : vector<11x176xf32> to vector<11x176xbf16>
    %c0_78 = arith.constant 0 : index
    %c0_79 = arith.constant 0 : index
    %71 = vector.load %arg19[%c0_78, %c0_79] : memref<11x176xbf16, #tpu.memory_space<vmem>>, vector<11x176xbf16>
    tpu.vector_store %arg19[%c0_78, %c0_79], %70 {strides = array<i32>} : memref<11x176xbf16, #tpu.memory_space<vmem>>, vector<11x176xbf16>,
    %c0_80 = arith.constant 0 : index
    %c0_81 = arith.constant 0 : index
    %72 = vector.load %arg19[%c0_80, %c0_81] : memref<11x176xbf16, #tpu.memory_space<vmem>>, vector<11x176xbf16>
    %c0_82 = arith.constant 0 : index
    %c0_83 = arith.constant 0 : index
    %c0_84 = arith.constant 0 : index
    %73 = vector.load %arg9[%c0_82, %c0_83, %c0_84] : memref<1x176x176xbf16, #tpu.memory_space<vmem>>, vector<1x176x176xbf16>
    %74 = vector.shape_cast %73 : vector<1x176x176xbf16> to vector<176x176xbf16>
    %cst_85 = arith.constant dense<0.000000e+00> : vector<11x176xf32>
    %75 = tpu.matmul %72, %74, %cst_85 {dimension_numbers = #tpu.dot_dimension_numbers<[1], [0], [0], [1], [0, 0, 1, 1], [], []>} : vector<11x176xbf16>, vector<176x176xbf16>, vector<11x176xf32> -> vector<11x176xf32>
    %cst_86 = arith.constant 0.000000e+00 : f32
    %76 = vector.broadcast %cst_86 : f32 to vector<11x176xf32>
    %77 = arith.maximumf %75, %76 : vector<11x176xf32>
    %78 = arith.truncf %77 : vector<11x176xf32> to vector<11x176xbf16>
    %c0_87 = arith.constant 0 : index
    %c0_88 = arith.constant 0 : index
    %79 = vector.load %arg20[%c0_87, %c0_88] : memref<11x176xbf16, #tpu.memory_space<vmem>>, vector<11x176xbf16>
    tpu.vector_store %arg20[%c0_87, %c0_88], %78 {strides = array<i32>} : memref<11x176xbf16, #tpu.memory_space<vmem>>, vector<11x176xbf16>,
    %c0_89 = arith.constant 0 : index
    %c0_90 = arith.constant 0 : index
    %80 = vector.load %arg20[%c0_89, %c0_90] : memref<11x176xbf16, #tpu.memory_space<vmem>>, vector<9x176xbf16>
    %c0_91 = arith.constant 0 : index
    %c0_92 = arith.constant 0 : index
    %c0_93 = arith.constant 0 : index
    %81 = vector.load %arg10[%c0_91, %c0_92, %c0_93] : memref<3x176x216xbf16, #tpu.memory_space<vmem>>, vector<1x176x216xbf16>
    %82 = vector.shape_cast %81 : vector<1x176x216xbf16> to vector<176x216xbf16>
    %cst_94 = arith.constant dense<0.000000e+00> : vector<9x216xf32>
    %83 = tpu.matmul %80, %82, %cst_94 {dimension_numbers = #tpu.dot_dimension_numbers<[1], [0], [0], [1], [0, 0, 1, 1], [], []>} : vector<9x176xbf16>, vector<176x216xbf16>, vector<9x216xf32> -> vector<9x216xf32>
    %c1_95 = arith.constant 1 : index
    %c0_96 = arith.constant 0 : index
    %84 = vector.load %arg20[%c1_95, %c0_96] : memref<11x176xbf16, #tpu.memory_space<vmem>>, vector<9x176xbf16>
    %c1_97 = arith.constant 1 : index
    %c0_98 = arith.constant 0 : index
    %c0_99 = arith.constant 0 : index
    %85 = vector.load %arg10[%c1_97, %c0_98, %c0_99] : memref<3x176x216xbf16, #tpu.memory_space<vmem>>, vector<1x176x216xbf16>
    %86 = vector.shape_cast %85 : vector<1x176x216xbf16> to vector<176x216xbf16>
    %cst_100 = arith.constant dense<0.000000e+00> : vector<9x216xf32>
    %87 = tpu.matmul %84, %86, %cst_100 {dimension_numbers = #tpu.dot_dimension_numbers<[1], [0], [0], [1], [0, 0, 1, 1], [], []>} : vector<9x176xbf16>, vector<176x216xbf16>, vector<9x216xf32> -> vector<9x216xf32>
    %88 = arith.addf %83, %87 : vector<9x216xf32>
    %c2_101 = arith.constant 2 : index
    %c0_102 = arith.constant 0 : index
    %89 = vector.load %arg20[%c2_101, %c0_102] : memref<11x176xbf16, #tpu.memory_space<vmem>>, vector<9x176xbf16>
    %c2_103 = arith.constant 2 : index
    %c0_104 = arith.constant 0 : index
    %c0_105 = arith.constant 0 : index
    %90 = vector.load %arg10[%c2_103, %c0_104, %c0_105] : memref<3x176x216xbf16, #tpu.memory_space<vmem>>, vector<1x176x216xbf16>
    %91 = vector.shape_cast %90 : vector<1x176x216xbf16> to vector<176x216xbf16>
    %cst_106 = arith.constant dense<0.000000e+00> : vector<9x216xf32>
    %92 = tpu.matmul %89, %91, %cst_106 {dimension_numbers = #tpu.dot_dimension_numbers<[1], [0], [0], [1], [0, 0, 1, 1], [], []>} : vector<9x176xbf16>, vector<176x216xbf16>, vector<9x216xf32> -> vector<9x216xf32>
    %93 = arith.addf %88, %92 : vector<9x216xf32>
    %cst_107 = arith.constant 0.000000e+00 : f32
    %94 = vector.broadcast %cst_107 : f32 to vector<9x216xf32>
    %95 = arith.maximumf %93, %94 : vector<9x216xf32>
    %96 = arith.truncf %95 : vector<9x216xf32> to vector<9x216xbf16>
    %c0_108 = arith.constant 0 : index
    %c0_109 = arith.constant 0 : index
    %97 = vector.load %arg21[%c0_108, %c0_109] : memref<9x216xbf16, #tpu.memory_space<vmem>>, vector<9x216xbf16>
    tpu.vector_store %arg21[%c0_108, %c0_109], %96 {strides = array<i32>} : memref<9x216xbf16, #tpu.memory_space<vmem>>, vector<9x216xbf16>,
    %c0_110 = arith.constant 0 : index
    %c0_111 = arith.constant 0 : index
    %98 = vector.load %arg21[%c0_110, %c0_111] : memref<9x216xbf16, #tpu.memory_space<vmem>>, vector<7x216xbf16>
    %c0_112 = arith.constant 0 : index
    %c0_113 = arith.constant 0 : index
    %c0_114 = arith.constant 0 : index
    %99 = vector.load %arg11[%c0_112, %c0_113, %c0_114] : memref<3x216x168xbf16, #tpu.memory_space<vmem>>, vector<1x216x168xbf16>
    %100 = vector.shape_cast %99 : vector<1x216x168xbf16> to vector<216x168xbf16>
    %cst_115 = arith.constant dense<0.000000e+00> : vector<7x168xf32>
    %101 = tpu.matmul %98, %100, %cst_115 {dimension_numbers = #tpu.dot_dimension_numbers<[1], [0], [0], [1], [0, 0, 1, 1], [], []>} : vector<7x216xbf16>, vector<216x168xbf16>, vector<7x168xf32> -> vector<7x168xf32>
    %c1_116 = arith.constant 1 : index
    %c0_117 = arith.constant 0 : index
    %102 = vector.load %arg21[%c1_116, %c0_117] : memref<9x216xbf16, #tpu.memory_space<vmem>>, vector<7x216xbf16>
    %c1_118 = arith.constant 1 : index
    %c0_119 = arith.constant 0 : index
    %c0_120 = arith.constant 0 : index
    %103 = vector.load %arg11[%c1_118, %c0_119, %c0_120] : memref<3x216x168xbf16, #tpu.memory_space<vmem>>, vector<1x216x168xbf16>
    %104 = vector.shape_cast %103 : vector<1x216x168xbf16> to vector<216x168xbf16>
    %cst_121 = arith.constant dense<0.000000e+00> : vector<7x168xf32>
    %105 = tpu.matmul %102, %104, %cst_121 {dimension_numbers = #tpu.dot_dimension_numbers<[1], [0], [0], [1], [0, 0, 1, 1], [], []>} : vector<7x216xbf16>, vector<216x168xbf16>, vector<7x168xf32> -> vector<7x168xf32>
    %106 = arith.addf %101, %105 : vector<7x168xf32>
    %c2_122 = arith.constant 2 : index
    %c0_123 = arith.constant 0 : index
    %107 = vector.load %arg21[%c2_122, %c0_123] : memref<9x216xbf16, #tpu.memory_space<vmem>>, vector<7x216xbf16>
    %c2_124 = arith.constant 2 : index
    %c0_125 = arith.constant 0 : index
    %c0_126 = arith.constant 0 : index
    %108 = vector.load %arg11[%c2_124, %c0_125, %c0_126] : memref<3x216x168xbf16, #tpu.memory_space<vmem>>, vector<1x216x168xbf16>
    %109 = vector.shape_cast %108 : vector<1x216x168xbf16> to vector<216x168xbf16>
    %cst_127 = arith.constant dense<0.000000e+00> : vector<7x168xf32>
    %110 = tpu.matmul %107, %109, %cst_127 {dimension_numbers = #tpu.dot_dimension_numbers<[1], [0], [0], [1], [0, 0, 1, 1], [], []>} : vector<7x216xbf16>, vector<216x168xbf16>, vector<7x168xf32> -> vector<7x168xf32>
    %111 = arith.addf %106, %110 : vector<7x168xf32>
    %cst_128 = arith.constant 0.000000e+00 : f32
    %112 = vector.broadcast %cst_128 : f32 to vector<7x168xf32>
    %113 = arith.maximumf %111, %112 : vector<7x168xf32>
    %114 = arith.truncf %113 : vector<7x168xf32> to vector<7x168xbf16>
    %c0_129 = arith.constant 0 : index
    %c0_130 = arith.constant 0 : index
    %115 = vector.load %arg22[%c0_129, %c0_130] : memref<7x168xbf16, #tpu.memory_space<vmem>>, vector<7x168xbf16>
    tpu.vector_store %arg22[%c0_129, %c0_130], %114 {strides = array<i32>} : memref<7x168xbf16, #tpu.memory_space<vmem>>, vector<7x168xbf16>,
    %c0_131 = arith.constant 0 : index
    %c0_132 = arith.constant 0 : index
    %116 = vector.load %arg22[%c0_131, %c0_132] : memref<7x168xbf16, #tpu.memory_space<vmem>>, vector<7x168xbf16>
    %c0_133 = arith.constant 0 : index
    %c0_134 = arith.constant 0 : index
    %c0_135 = arith.constant 0 : index
    %117 = vector.load %arg12[%c0_133, %c0_134, %c0_135] : memref<1x168x112xbf16, #tpu.memory_space<vmem>>, vector<1x168x112xbf16>
    %118 = vector.shape_cast %117 : vector<1x168x112xbf16> to vector<168x112xbf16>
    %cst_136 = arith.constant dense<0.000000e+00> : vector<7x112xf32>
    %119 = tpu.matmul %116, %118, %cst_136 {dimension_numbers = #tpu.dot_dimension_numbers<[1], [0], [0], [1], [0, 0, 1, 1], [], []>} : vector<7x168xbf16>, vector<168x112xbf16>, vector<7x112xf32> -> vector<7x112xf32>
    %cst_137 = arith.constant 0.000000e+00 : f32
    %120 = vector.broadcast %cst_137 : f32 to vector<7x112xf32>
    %121 = arith.maximumf %119, %120 : vector<7x112xf32>
    %122 = arith.truncf %121 : vector<7x112xf32> to vector<7x112xbf16>
    %c0_138 = arith.constant 0 : index
    %c0_139 = arith.constant 0 : index
    %123 = vector.load %arg23[%c0_138, %c0_139] : memref<7x112xbf16, #tpu.memory_space<vmem>>, vector<7x112xbf16>
    tpu.vector_store %arg23[%c0_138, %c0_139], %122 {strides = array<i32>} : memref<7x112xbf16, #tpu.memory_space<vmem>>, vector<7x112xbf16>,
    %c0_140 = arith.constant 0 : index
    %c0_141 = arith.constant 0 : index
    %124 = vector.load %arg23[%c0_140, %c0_141] : memref<7x112xbf16, #tpu.memory_space<vmem>>, vector<1x112xbf16>
    %c0_142 = arith.constant 0 : index
    %c0_143 = arith.constant 0 : index
    %c0_144 = arith.constant 0 : index
    %125 = vector.load %arg13[%c0_142, %c0_143, %c0_144] : memref<7x112x128xbf16, #tpu.memory_space<vmem>>, vector<1x112x128xbf16>
    %126 = vector.shape_cast %125 : vector<1x112x128xbf16> to vector<112x128xbf16>
    %cst_145 = arith.constant dense<0.000000e+00> : vector<1x128xf32>
    %127 = tpu.matmul %124, %126, %cst_145 {dimension_numbers = #tpu.dot_dimension_numbers<[1], [0], [0], [1], [0, 0, 1, 1], [], []>} : vector<1x112xbf16>, vector<112x128xbf16>, vector<1x128xf32> -> vector<1x128xf32>
    %c1_146 = arith.constant 1 : index
    %c0_147 = arith.constant 0 : index
    %128 = vector.load %arg23[%c1_146, %c0_147] : memref<7x112xbf16, #tpu.memory_space<vmem>>, vector<1x112xbf16>
    %c1_148 = arith.constant 1 : index
    %c0_149 = arith.constant 0 : index
    %c0_150 = arith.constant 0 : index
    %129 = vector.load %arg13[%c1_148, %c0_149, %c0_150] : memref<7x112x128xbf16, #tpu.memory_space<vmem>>, vector<1x112x128xbf16>
    %130 = vector.shape_cast %129 : vector<1x112x128xbf16> to vector<112x128xbf16>
    %cst_151 = arith.constant dense<0.000000e+00> : vector<1x128xf32>
    %131 = tpu.matmul %128, %130, %cst_151 {dimension_numbers = #tpu.dot_dimension_numbers<[1], [0], [0], [1], [0, 0, 1, 1], [], []>} : vector<1x112xbf16>, vector<112x128xbf16>, vector<1x128xf32> -> vector<1x128xf32>
    %132 = arith.addf %127, %131 : vector<1x128xf32>
    %c2_152 = arith.constant 2 : index
    %c0_153 = arith.constant 0 : index
    %133 = vector.load %arg23[%c2_152, %c0_153] : memref<7x112xbf16, #tpu.memory_space<vmem>>, vector<1x112xbf16>
    %c2_154 = arith.constant 2 : index
    %c0_155 = arith.constant 0 : index
    %c0_156 = arith.constant 0 : index
    %134 = vector.load %arg13[%c2_154, %c0_155, %c0_156] : memref<7x112x128xbf16, #tpu.memory_space<vmem>>, vector<1x112x128xbf16>
    %135 = vector.shape_cast %134 : vector<1x112x128xbf16> to vector<112x128xbf16>
    %cst_157 = arith.constant dense<0.000000e+00> : vector<1x128xf32>
    %136 = tpu.matmul %133, %135, %cst_157 {dimension_numbers = #tpu.dot_dimension_numbers<[1], [0], [0], [1], [0, 0, 1, 1], [], []>} : vector<1x112xbf16>, vector<112x128xbf16>, vector<1x128xf32> -> vector<1x128xf32>
    %137 = arith.addf %132, %136 : vector<1x128xf32>
    %c3 = arith.constant 3 : index
    %c0_158 = arith.constant 0 : index
    %138 = vector.load %arg23[%c3, %c0_158] : memref<7x112xbf16, #tpu.memory_space<vmem>>, vector<1x112xbf16>
    %c3_159 = arith.constant 3 : index
    %c0_160 = arith.constant 0 : index
    %c0_161 = arith.constant 0 : index
    %139 = vector.load %arg13[%c3_159, %c0_160, %c0_161] : memref<7x112x128xbf16, #tpu.memory_space<vmem>>, vector<1x112x128xbf16>
    %140 = vector.shape_cast %139 : vector<1x112x128xbf16> to vector<112x128xbf16>
    %cst_162 = arith.constant dense<0.000000e+00> : vector<1x128xf32>
    %141 = tpu.matmul %138, %140, %cst_162 {dimension_numbers = #tpu.dot_dimension_numbers<[1], [0], [0], [1], [0, 0, 1, 1], [], []>} : vector<1x112xbf16>, vector<112x128xbf16>, vector<1x128xf32> -> vector<1x128xf32>
    %142 = arith.addf %137, %141 : vector<1x128xf32>
    %c4 = arith.constant 4 : index
    %c0_163 = arith.constant 0 : index
    %143 = vector.load %arg23[%c4, %c0_163] : memref<7x112xbf16, #tpu.memory_space<vmem>>, vector<1x112xbf16>
    %c4_164 = arith.constant 4 : index
    %c0_165 = arith.constant 0 : index
    %c0_166 = arith.constant 0 : index
    %144 = vector.load %arg13[%c4_164, %c0_165, %c0_166] : memref<7x112x128xbf16, #tpu.memory_space<vmem>>, vector<1x112x128xbf16>
    %145 = vector.shape_cast %144 : vector<1x112x128xbf16> to vector<112x128xbf16>
    %cst_167 = arith.constant dense<0.000000e+00> : vector<1x128xf32>
    %146 = tpu.matmul %143, %145, %cst_167 {dimension_numbers = #tpu.dot_dimension_numbers<[1], [0], [0], [1], [0, 0, 1, 1], [], []>} : vector<1x112xbf16>, vector<112x128xbf16>, vector<1x128xf32> -> vector<1x128xf32>
    %147 = arith.addf %142, %146 : vector<1x128xf32>
    %c5 = arith.constant 5 : index
    %c0_168 = arith.constant 0 : index
    %148 = vector.load %arg23[%c5, %c0_168] : memref<7x112xbf16, #tpu.memory_space<vmem>>, vector<1x112xbf16>
    %c5_169 = arith.constant 5 : index
    %c0_170 = arith.constant 0 : index
    %c0_171 = arith.constant 0 : index
    %149 = vector.load %arg13[%c5_169, %c0_170, %c0_171] : memref<7x112x128xbf16, #tpu.memory_space<vmem>>, vector<1x112x128xbf16>
    %150 = vector.shape_cast %149 : vector<1x112x128xbf16> to vector<112x128xbf16>
    %cst_172 = arith.constant dense<0.000000e+00> : vector<1x128xf32>
    %151 = tpu.matmul %148, %150, %cst_172 {dimension_numbers = #tpu.dot_dimension_numbers<[1], [0], [0], [1], [0, 0, 1, 1], [], []>} : vector<1x112xbf16>, vector<112x128xbf16>, vector<1x128xf32> -> vector<1x128xf32>
    %152 = arith.addf %147, %151 : vector<1x128xf32>
    %c6 = arith.constant 6 : index
    %c0_173 = arith.constant 0 : index
    %153 = vector.load %arg23[%c6, %c0_173] : memref<7x112xbf16, #tpu.memory_space<vmem>>, vector<1x112xbf16>
    %c6_174 = arith.constant 6 : index
    %c0_175 = arith.constant 0 : index
    %c0_176 = arith.constant 0 : index
    %154 = vector.load %arg13[%c6_174, %c0_175, %c0_176] : memref<7x112x128xbf16, #tpu.memory_space<vmem>>, vector<1x112x128xbf16>
    %155 = vector.shape_cast %154 : vector<1x112x128xbf16> to vector<112x128xbf16>
    %cst_177 = arith.constant dense<0.000000e+00> : vector<1x128xf32>
    %156 = tpu.matmul %153, %155, %cst_177 {dimension_numbers = #tpu.dot_dimension_numbers<[1], [0], [0], [1], [0, 0, 1, 1], [], []>} : vector<1x112xbf16>, vector<112x128xbf16>, vector<1x128xf32> -> vector<1x128xf32>
    %157 = arith.addf %152, %156 : vector<1x128xf32>
    %158 = tpu.iota {dimensions = array<i32: 1>} : vector<1x128xi32>
    %c10_i32 = arith.constant 10 : i32
    %159 = vector.broadcast %c10_i32 : i32 to vector<1x128xi32>
    %160 = arith.cmpi slt, %158, %159 : vector<1x128xi32>
    %cst_178 = arith.constant -1.000000e+30 : f32
    %161 = vector.broadcast %cst_178 : f32 to vector<1x128xf32>
    %162 = arith.select %160, %157, %161 : vector<1x128xi1>, vector<1x128xf32>
    %cst_179 = arith.constant dense<0xFF800000> : vector<1xf32>
    %163 = vector.multi_reduction <maximumf>, %162, %cst_179 [1] : vector<1x128xf32> to vector<1xf32>
    %164 = vector.shape_cast %163 : vector<1xf32> to vector<1x1xf32>
    %165 = vector.broadcast %164 : vector<1x1xf32> to vector<1x128xf32>
    %166 = arith.subf %157, %165 : vector<1x128xf32>
    %167 = math.exp %166 : vector<1x128xf32>
    %cst_180 = arith.constant 0.000000e+00 : f32
    %168 = vector.broadcast %cst_180 : f32 to vector<1x128xf32>
    %169 = arith.select %160, %167, %168 : vector<1x128xi1>, vector<1x128xf32>
    %cst_181 = arith.constant dense<0.000000e+00> : vector<1xf32>
    %170 = vector.multi_reduction <add>, %169, %cst_181 [1] : vector<1x128xf32> to vector<1xf32>
    %171 = vector.shape_cast %170 : vector<1xf32> to vector<1x1xf32>
    %172 = math.log %171 : vector<1x1xf32>
    %173 = vector.broadcast %172 : vector<1x1xf32> to vector<1x128xf32>
    %174 = arith.subf %166, %173 : vector<1x128xf32>
    %c0_182 = arith.constant 0 : index
    %c0_183 = arith.constant 0 : index
    %c0_184 = arith.constant 0 : index
    %175 = vector.load %arg14[%c0_182, %c0_183, %c0_184] : memref<1x1x128xf32, #tpu.memory_space<vmem>>, vector<1x1x128xf32>
    %176 = vector.shape_cast %175 : vector<1x1x128xf32> to vector<1x128xf32>
    %177 = vector.shape_cast %174 : vector<1x128xf32> to vector<1x1x128xf32>
    tpu.vector_store %arg14[%c0_182, %c0_183, %c0_184], %177 {strides = array<i32>} : memref<1x1x128xf32, #tpu.memory_space<vmem>>, vector<1x1x128xf32>,
    return
  }
  func.func @transform_0(%arg0: i32) -> (i32, i32, i32) {
    %c0_i32 = arith.constant 0 : i32
    %c0_i32_0 = arith.constant 0 : i32
    %c0_i32_1 = arith.constant 0 : i32
    return %arg0, %c0_i32, %c0_i32_0 : i32, i32, i32
  }
  func.func @transform_1(%arg0: i32) -> (i32, i32, i32) {
    %c0_i32 = arith.constant 0 : i32
    %c0_i32_0 = arith.constant 0 : i32
    %c0_i32_1 = arith.constant 0 : i32
    %c0_i32_2 = arith.constant 0 : i32
    return %c0_i32, %c0_i32_0, %c0_i32_1 : i32, i32, i32
  }
  func.func @transform_2(%arg0: i32) -> (i32, i32, i32) {
    %c0_i32 = arith.constant 0 : i32
    %c0_i32_0 = arith.constant 0 : i32
    %c0_i32_1 = arith.constant 0 : i32
    %c0_i32_2 = arith.constant 0 : i32
    return %c0_i32, %c0_i32_0, %c0_i32_1 : i32, i32, i32
  }
  func.func @transform_3(%arg0: i32) -> (i32, i32, i32) {
    %c0_i32 = arith.constant 0 : i32
    %c0_i32_0 = arith.constant 0 : i32
    %c0_i32_1 = arith.constant 0 : i32
    %c0_i32_2 = arith.constant 0 : i32
    return %c0_i32, %c0_i32_0, %c0_i32_1 : i32, i32, i32
  }
  func.func @transform_4(%arg0: i32) -> (i32, i32) {
    %c0_i32 = arith.constant 0 : i32
    %c0_i32_0 = arith.constant 0 : i32
    %c0_i32_1 = arith.constant 0 : i32
    return %c0_i32, %c0_i32_0 : i32, i32
  }
  func.func @transform_5(%arg0: i32) -> (i32, i32) {
    %c0_i32 = arith.constant 0 : i32
    %c0_i32_0 = arith.constant 0 : i32
    %c0_i32_1 = arith.constant 0 : i32
    return %c0_i32, %c0_i32_0 : i32, i32
  }
  func.func @transform_6(%arg0: i32) -> (i32, i32) {
    %c0_i32 = arith.constant 0 : i32
    %c0_i32_0 = arith.constant 0 : i32
    %c0_i32_1 = arith.constant 0 : i32
    return %c0_i32, %c0_i32_0 : i32, i32
  }
  func.func @transform_7(%arg0: i32) -> (i32, i32) {
    %c0_i32 = arith.constant 0 : i32
    %c0_i32_0 = arith.constant 0 : i32
    %c0_i32_1 = arith.constant 0 : i32
    return %c0_i32, %c0_i32_0 : i32, i32
  }
  func.func @transform_8(%arg0: i32) -> (i32, i32, i32) {
    %c0_i32 = arith.constant 0 : i32
    %c0_i32_0 = arith.constant 0 : i32
    %c0_i32_1 = arith.constant 0 : i32
    %c0_i32_2 = arith.constant 0 : i32
    return %c0_i32, %c0_i32_0, %c0_i32_1 : i32, i32, i32
  }
  func.func @transform_9(%arg0: i32) -> (i32, i32, i32) {
    %c0_i32 = arith.constant 0 : i32
    %c0_i32_0 = arith.constant 0 : i32
    %c0_i32_1 = arith.constant 0 : i32
    %c0_i32_2 = arith.constant 0 : i32
    return %c0_i32, %c0_i32_0, %c0_i32_1 : i32, i32, i32
  }
  func.func @transform_10(%arg0: i32) -> (i32, i32, i32) {
    %c0_i32 = arith.constant 0 : i32
    %c0_i32_0 = arith.constant 0 : i32
    %c0_i32_1 = arith.constant 0 : i32
    %c0_i32_2 = arith.constant 0 : i32
    return %c0_i32, %c0_i32_0, %c0_i32_1 : i32, i32, i32
  }
  func.func @transform_11(%arg0: i32) -> (i32, i32, i32) {
    %c0_i32 = arith.constant 0 : i32
    %c0_i32_0 = arith.constant 0 : i32
    %c0_i32_1 = arith.constant 0 : i32
    %c0_i32_2 = arith.constant 0 : i32
    return %c0_i32, %c0_i32_0, %c0_i32_1 : i32, i32, i32
  }
  func.func @transform_12(%arg0: i32) -> (i32, i32, i32) {
    %c0_i32 = arith.constant 0 : i32
    %c0_i32_0 = arith.constant 0 : i32
    %c0_i32_1 = arith.constant 0 : i32
    %c0_i32_2 = arith.constant 0 : i32
    return %c0_i32, %c0_i32_0, %c0_i32_1 : i32, i32, i32
  }
  func.func @transform_13(%arg0: i32) -> (i32, i32, i32) {
    %c0_i32 = arith.constant 0 : i32
    %c0_i32_0 = arith.constant 0 : i32
    %c0_i32_1 = arith.constant 0 : i32
    return %arg0, %c0_i32, %c0_i32_0 : i32, i32, i32
  }
}

</mosaic_0001>

<bundles_post_ra>
// kernel: net3_forward.1
= control target key start
LH: loop header
LB: loop body
LE: loop exit
PB: predicated region body
PF: predicated region fallthrough
CT: control target
= control target key end

     0   :  { %18 = vsyncpa [#allocation12], 0  ;;  %s17110_s0 = inlined_call_operand.vmem [shape: f32[2,28,28], index: 0, kind: input, shape index: {}]   ;;  %s17111_s1 = inlined_call_operand.vmem [shape: bf16[3,28,260], index: 1, kind: input, shape index: {}]   ;;  %s17112_s2 = inlined_call_operand.vmem [shape: bf16[3,260,384], index: 2, kind: input, shape index: {}]   ;;  %s17113_s3 = inlined_call_operand.vmem [shape: bf16[3,384,352], index: 3, kind: input, shape index: {}]   ;;  %s17114_s4 = inlined_call_operand.vmem [shape: bf16[11,22], index: 4, kind: input, shape index: {}]   ;;  %s17115_s5 = inlined_call_operand.vmem [shape: bf16[11,22], index: 5, kind: input, shape index: {}]   ;;  %s17116_s6 = inlined_call_operand.vmem [shape: bf16[352,176], index: 6, kind: input, shape index: {}]   ;;  %s17117_s7 = inlined_call_operand.vmem [shape: bf16[352,176], index: 7, kind: input, shape index: {}]   ;;  %s17118_s8 = inlined_call_operand.vmem [shape: bf16[1,176,176], index: 8, kind: input, shape index: {}]   ;;  %s17119_s9 = inlined_call_operand.vmem [shape: bf16[3,176,216], index: 9, kind: input, shape index: {}]   ;;  %s17120_s10 = inlined_call_operand.vmem [shape: bf16[3,216,168], index: 10, kind: input, shape index: {}]   ;;  %s17121_s11 = inlined_call_operand.vmem [shape: bf16[1,168,112], index: 11, kind: input, shape index: {}]   ;;  %s17122_s12 = inlined_call_operand.vmem [shape: bf16[7,112,128], index: 12, kind: input, shape index: {}]   ;;  %s17123_s13 = inlined_call_operand.hbm [shape: f32[2,1,128], index: 13, kind: output, shape index: {}]  }
   0x1   :  { %20 = vsyncpa [#allocation12 + $0x1], 0  ;;  %s12124_s25 = smov 0   ;;  %s12126_s26 = smov 0  }
   0x2   :  { %s12128_s27 = smov 0   ;;  %s12130_s28 = smov 0  }
   0x3 LB: > { %17128 = sst [smem:[#allocation14_spill]] %s12048_s27  ;;  %s12145_s29 = sadd.s32 4294967295, %s12052_s28   ;;  %s12052_s28 = sphi %s12130_s28, %s17141_s28   ;;  %s12048_s27 = sphi %s12128_s27, %s17146_s27   ;;  %s12044_s26 = sphi %s12126_s26, %s17145_s26   ;;  %s12040_s25 = sphi %s12124_s25, %s17144_s25  }
   0x4   : > { %s7820_s30 = sadd.s32 4294967294, %s12052_s28   ;;  %s12149_s14 = sadd.s32 1, %s12052_s28  }
   0x5   : > { %17129 = sst [smem:[#allocation15_spill]] %s12149_s14  ;;  %s311_s15 = sadd.s32 1, %s12048_s27 }
   0x6   : > { %s308_s16 = ssub.s32 %s12052_s28, %s12149_s14  ;;  %p321_p0 = scmp.ne.s32.totalorder %s12048_s27, %s12044_s26 }
   0x7   : > { %p309_p1 = scmp.eq.s32.totalorder %s308_s16, 0  ;;  %p322_p2 = scmp.eq.s32.totalorder %s12145_s29, 1 }
   0x8   : > { %p327_p3 = scmp.ne.s32.totalorder %s12044_s26, %s12040_s25  ;;  %p328_p4 = scmp.eq.s32.totalorder %s7820_s30, 1 }
   0x9   : > { %s12160_s17 = scalar_select %p309_p1, %s12048_s27, %s311_s15  }
   0xa   : > { %p12162_p5 = por %p322_p2, %p321_p0  ;;  %p12166_p6 = por %p328_p4, %p327_p3 }
   0xb   : > { %17130 = sst [smem:[#allocation16_spill]] %s12160_s17  ;;  %p7823_p7 = scmp.ge.s32.totalorder %s12052_s28, 1 }
   0xc   : > { %s17132_s19 = scalar_select %p12166_p6, 1, 0 }
   0xd   : > { %p390_p8 = scmp.lt.s32.totalorder %s12052_s28, 3 }
   0xe   : > { %17133 = sst [smem:[#allocation17_spill]] %s17132_s19 }
   0xf   : > { %p391_p9 = pnand %p7823_p7, %p390_p8 }
  0x10   : > { %p433_p10 = scmp.lt.s32.totalorder (!%p391_p9), %s12145_s29, 1  ;;  %s431_s23 = sand.u32 (!%p391_p9), 1, %s12044_s26  }
  0x11   : > { %394 = sbr.rel (%p391_p9) target bundleno = 2456 (0x998), region = 72  ;;  %s432_s15 = scalar_lea.vmem (!%p391_p9), [#allocation11], %s431_s23 }
  0x12   : > { %s7763_s16 = sshll.u32 (!%p391_p9), %s432_s15, 4  ;;  %s7753_s14 = scalar_lea.sflag (!%p391_p9), [#allocation12], %s431_s23  ;;  %s7764_s16 = int_to_ptr.vmem [resolvable:$true] %s7763_s16 }
  0x16   : > { %v7878_v0 = vld [vmem:[%s17111_s1 + $0x18] sm:$0xf]  ;;  %v11239_v1 = vld [vmem:[%s17111_s1 + $0x20] sm:$0x30]  ;;  %vm537_vm0 = vcmask 1045504   ;;  %s434_s27 = scalar_select %p433_p10, %s12145_s29, 1 }
  0x17   : > { %v7879_v2 = vor.u32 %v11239_v1, %v7878_v0  ;;  %v7866_v3 = vld [vmem:[%s17111_s1] sm:$0xf]  ;;  %v11236_v4 = vld [vmem:[%s17111_s1 + $0x8] sm:$0xf0]  ;;  %v7848_v5 = vld [vmem:[%s17111_s1 + $0x48] sm:$0xf] }
  0x18   : > { %v11245_v6 = vld [vmem:[%s17111_s1 + $0x50] sm:$0x30]  ;;  %v11244_v7 = vld [vmem:[%s17111_s1 + $0x4c] sm:$0xf]  ;;  %v7850_v8 = vld [vmem:[%s17111_s1 + $0x54] sm:$0x30]  ;;  %v7867_v14 = vor.u32 %v11236_v4, %v7866_v3 }
  0x19   : > { %v642_v9 = vsel %vm537_vm0, %v7879_v2, 0  ;;  %v7849_v10 = vor.u32 %v11245_v6, %v7848_v5  ;;  %v7853_v11 = vor.u32 %v11244_v7, %v7850_v8  ;;  %v7856_v12 = vld [vmem:[%s17111_s1 + $0x50] sm:$0xf]  ;;  %v11246_v13 = vld [vmem:[%s17111_s1 + $0x58] sm:$0x30]  ;;  %s11234_s21 = sshll.u32 %s434_s27, 5 }
  0x1a   : > { %656 = vmatpush.bf16.msra.mxu3 %v642_v9  ;;  %v7857_v15 = vor.u32 %v11246_v13, %v7856_v12  ;;  %v7836_v16 = vld [vmem:[%s17111_s1 + $0x30] sm:$0xf]  ;;  %v11242_v17 = vld [vmem:[%s17111_s1 + $0x38] sm:$0xf0]  ;;  %v11241_v20 = vld [vmem:[%s17111_s1 + $0x34] sm:$0xf]  ;;  %s437_s17 = scalar_lea.vmem %s17110_s0, %s11234_s21 }
  0x1b   : > { %v539_v18 = vsel %vm537_vm0, %v7849_v10, 0  ;;  %v542_v19 = vsel %vm537_vm0, %v7853_v11, 0  ;;  %v7837_v22 = vor.u32 %v11242_v17, %v7836_v16  ;;  %v7838_v23 = vld [vmem:[%s17111_s1 + $0x3c] sm:$0xf0]  ;;  %v7844_v24 = vld [vmem:[%s17111_s1 + $0x38] sm:$0xf] }
  0x1c   : > { %553 = vmatpush.bf16.msra.mxu0 %v539_v18  ;;  %572 = vmatpush.bf16.msra.mxu1 %v542_v19  ;;  %v545_v21 = vsel %vm537_vm0, %v7857_v15, 0  ;;  %v439_v25 = vld [vmem:[%s437_s17] sm:$0xff]  ;;  %v440_v26 = vld [vmem:[%s437_s17 + $0x8] sm:$0xff]  ;;  %v441_v27 = vld [vmem:[%s437_s17 + $0x10] sm:$0xff]  ;;  %v7841_v28 = vor.u32 %v11241_v20, %v7838_v23  ;;  %vm447_vm1 = vcmask 224256   ;;  %vm451_vm2 = vcmask 222208  }
  0x1d   : > { %591 = vmatpush.bf16.msra.mxu2 %v545_v21  ;;  %v443_v29 = vpack.c.bf16 %v439_v25, %v439_v25  ;;  %v444_v30 = vpack.c.bf16 %v440_v26, %v440_v26  ;;  %v445_v31 = vpack.c.bf16 %v441_v27, %v441_v27  ;;  %v11243_v32 = vld [vmem:[%s17111_s1 + $0x40] sm:$0xf0]  ;;  %v442_v33 = vld [vmem:[%s437_s17 + $0x18] sm:$0xf]  ;;  %vm530_vm3 = vcmask 228352   ;;  %s7761_s17 = scalar_lea.hbm %s17123_s13, %s12145_s29  ;;  %s12010_s29 = scalar_lea.hbm %s17123_s13, 2 }
  0x1e   : > { %657 = vmatpush.bf16.msra.mxu3 %v7867_v14  ;;  %v7845_v34 = vor.u32 %v11243_v32, %v7844_v24  ;;  %v446_v35 = vpack.c.bf16 %v442_v33, %v442_v33  ;;  %v11250_v36 = vld [vmem:[%s17111_s1 + $0x7c] sm:$0xf]  ;;  %v7918_v37 = vld [vmem:[%s17111_s1 + $0x84] sm:$0x30]  ;;  %v7886_v41 = vld [vmem:[%s17111_s1 + $0x20] sm:$0xf] }
  0x1f   : > { %448 = vst.msk [vmem:[#allocation2] sm:$0xf] %vm447_vm1, %v443_v29  ;;  %v11238_v38 = vld [vmem:[%s17111_s1 + $0x1c] sm:$0xf]  ;;  %v7921_v39 = vor.u32 %v11250_v36, %v7918_v37  ;;  %v7880_v40 = vld [vmem:[%s17111_s1 + $0x24] sm:$0x30] }
  0x20   : > { %554 = vmatpush.bf16.msra.mxu0 %v7837_v22  ;;  %573 = vmatpush.bf16.msra.mxu1 %v7841_v28  ;;  %449 = vst.msk [vmem:[#allocation2 + $0x4] sm:$0xf] %vm447_vm1, %v444_v30  ;;  %v11240_v42 = vld [vmem:[%s17111_s1 + $0x28] sm:$0x30]  ;;  %v7883_v43 = vor.u32 %v11238_v38, %v7880_v40  ;;  %v7916_v45 = vld [vmem:[%s17111_s1 + $0x78] sm:$0xf] }
  0x21   : > { %592 = vmatpush.bf16.msra.mxu2 %v7845_v34  ;;  %450 = vst.msk [vmem:[#allocation2 + $0x8] sm:$0xf] %vm447_vm1, %v445_v31  ;;  %v7887_v44 = vor.u32 %v11240_v42, %v7886_v41  ;;  %v11251_v46 = vld [vmem:[%s17111_s1 + $0x80] sm:$0x30]  ;;  %v763_v49 = vsel %vm537_vm0, %v7921_v39, 0  ;;  %vm720_vm5 = vcmask 1046528  }
  0x22   : > { %452 = vst.msk [vmem:[#allocation2 + $0xc] sm:$0x3] %vm451_vm2, %v446_v35  ;;  %v11247_v47 = vld [vmem:[%s17111_s1 + $0x64] sm:$0xf]  ;;  %v7917_v50 = vor.u32 %v11251_v46, %v7916_v45  ;;  %v7906_v51 = vld [vmem:[%s17111_s1 + $0x6c] sm:$0xf0]  ;;  %793 = vmatpush.bf16.msrb.mxu3 %v763_v49 }
  0x23   : > { %v645_v54 = vsel %vm537_vm0, %v7883_v43, 0  ;;  %v648_v55 = vsel %vm537_vm0, %v7887_v44, 0  ;;  %v7909_v59 = vor.u32 %v11247_v47, %v7906_v51  ;;  %v11235_v63 = vld [vmem:[%s17111_s1 + $0x4] sm:$0xf]  ;;  %v7868_v0 = vld [vmem:[%s17111_s1 + $0xc] sm:$0xf0] }
  0x24   : > { %675 = vmatpush.bf16.msrb.mxu0 %v645_v54  ;;  %v760_v58 = vsel %vm537_vm0, %v7917_v50, 0  ;;  %694 = vmatpush.bf16.msrb.mxu1 %v648_v55  ;;  %v7874_v1 = vld [vmem:[%s17111_s1 + $0x8] sm:$0xf]  ;;  %v11237_v2 = vld [vmem:[%s17111_s1 + $0x10] sm:$0xf0]  ;;  %v7871_v4 = vor.u32 %v11235_v63, %v7868_v0  ;;  %vm858_vm6 = vcmask 27648  }
  0x25   : > { %774 = vmatpush.bf16.msrb.mxu2 %v760_v58  ;;  %v7904_v5 = vld [vmem:[%s17111_s1 + $0x60] sm:$0xf]  ;;  %v11248_v6 = vld [vmem:[%s17111_s1 + $0x68] sm:$0xf0]  ;;  %v7875_v8 = vor.u32 %v11237_v2, %v7874_v1  ;;  %vm485_vm4 = vsmask.f32 7424 }
  0x26   : > { %794 = vmatpush.bf16.msrb.mxu3 %v7909_v59  ;;  %v7905_v9 = vor.u32 %v11248_v6, %v7904_v5  ;;  %v11944_v17 = vld [vmem:[#allocation2] sm:$0xe]  ;;  %v11252_v24 = vld [vmem:[%s17111_s1 + $0x88] sm:$0x30]  ;;  %v7912_v27 = vld [vmem:[%s17111_s1 + $0x68] sm:$0xf] }
  0x27   : > { %v12256_v48 = vld [vmem:[#allocation2] sm:$0xff]   ;;  %v11249_v28 = vld [vmem:[%s17111_s1 + $0x70] sm:$0xf0]  ;;  %v11322_v46 = vld [vmem:[%s17112_s2 + $0x238] sm:$0xf]  ;;  %vm1354_vm7 = vcmask 1041408  }
  0x28   : > { %7888 = vmatmul.msk.bf16.vlgmr.msra.gmra.mxu3 %vm530_vm3, %v12256_v48  ;;  %v455_v52 = vld [vmem:[#allocation2 + $0x8] sm:$0xf]  ;;  %v489_v53 = vshll.u32 %v12256_v48, 16  ;;  %v487_v61 = vshrl.u32 %v12256_v48, 16  ;;  %676 = vmatpush.bf16.msrb.mxu0 %v7871_v4  ;;  %v11943_v16 = vld [vmem:[#allocation2] sm:$0xf0]  ;;  %v7913_v30 = vor.u32 %v11249_v28, %v7912_v27 }
  0x29   : > { %v465_v56 = vld [vmem:[#allocation2 + $0xc] sm:$0x3]  ;;  %v481_v57 = vunpack.c.l.b16 %v455_v52  ;;  %695 = vmatpush.bf16.msrb.mxu1 %v7875_v8  ;;  %775 = vmatpush.bf16.msrb.mxu2 %v7905_v9  ;;  %v11945_v19 = vor.u32 %v11944_v17, %v11943_v16  ;;  %v7924_v23 = vld [vmem:[%s17111_s1 + $0x80] sm:$0xf]  ;;  %v8084_v41 = vld [vmem:[%s17112_s2 + $0x234] sm:$0xf] }
  0x2a   : > { %v482_v60 = vunpack.c.l.b16 %v465_v56  ;;  %v491_v62 = vrot.slane %v489_v53, 1  ;;  %v456_v7 = vld [vmem:[#allocation2 + $0xc] sm:$0x1]  ;;  %v7925_v26 = vor.u32 %v11252_v24, %v7924_v23  ;;  %v11323_v42 = vld [vmem:[%s17112_s2 + $0x23c] sm:$0xf0]  ;;  %vm865_vm8 = vcmask 24576  }
  0x2b   : > { %v605_v13 = vunpack.c.l.b16 %v456_v7  ;;  %v721_v21 = vrot.slane %v11945_v19, 1  ;;  %v8180_v43 = vld [vmem:[%s17112_s2 + $0x2f4] sm:$0xf]  ;;  %v8085_v44 = vor.u32 %v11323_v42, %v8084_v41  ;;  %v11347_v45 = vld [vmem:[%s17112_s2 + $0x2fc] sm:$0xf0]  ;;  %vm1347_vm9 = vcmask 31744  }
  0x2c   : > { %v484_v3 = vpack.c.b16 %v482_v60, %v481_v57  ;;  %v492_v10 = vor.u32 %v491_v62, %v487_v61  ;;  %v766_v29 = vsel %vm537_vm0, %v7925_v26, 0  ;;  %v8086_v47 = vld [vmem:[%s17112_s2 + $0x240] sm:$0xf0]  ;;  %v8181_v50 = vor.u32 %v11347_v45, %v8180_v43  ;;  %v8072_v53 = vld [vmem:[%s17112_s2 + $0x21c] sm:$0xf]  ;;  %s7765_s20 = sshll.u32 %s7761_s17, 4  ;;  %s7766_s20 = int_to_ptr.hbm [resolvable:$true] %s7765_s20 }
  0x2d   : > { %v606_v15 = vpack.c.b16 %v605_v13, %v481_v57  ;;  %v8089_v51 = vor.u32 %v11322_v46, %v8086_v47  ;;  %v11320_v54 = vld [vmem:[%s17112_s2 + $0x224] sm:$0xf0]  ;;  %v8168_v55 = vld [vmem:[%s17112_s2 + $0x2dc] sm:$0xf]  ;;  %v11319_v58 = vld [vmem:[%s17112_s2 + $0x220] sm:$0xf] }
  0x2e   : > { %v494_v11 = vshll.u32 %v484_v3, 16  ;;  %v498_v18 = vshrl.u32 %v484_v3, 16  ;;  %v722_v22 = vrot.slane %v484_v3, 1  ;;  %v8073_v56 = vor.u32 %v11320_v54, %v8072_v53  ;;  %v11344_v57 = vld [vmem:[%s17112_s2 + $0x2e4] sm:$0xf0]  ;;  %s12004_s27 = sshra.s32 %s7766_s20, 4  ;;  %s12005_s27 = int_to_ptr.hbm [resolvable:$true] %s12004_s27 }
  0x2f   : > { %v8074_v59 = vld [vmem:[%s17112_s2 + $0x228] sm:$0xf0]  ;;  %v8169_v60 = vor.u32 %v11344_v57, %v8168_v55  ;;  %v8060_v63 = vld [vmem:[%s17112_s2 + $0x204] sm:$0xf]  ;;  %v11317_v0 = vld [vmem:[%s17112_s2 + $0x20c] sm:$0xf0]  ;;  %p12011_p0 = scmp.lt.s32.totalorder %s12005_s27, %s17123_s13 }
  0x30   : > { %v496_v12 = vrot.slane %v494_v11, 1  ;;  %v723_v25 = vsel %vm720_vm5, %v721_v21, %v722_v22  ;;  %v8077_v61 = vor.u32 %v11319_v58, %v8074_v59  ;;  %v8156_v1 = vld [vmem:[%s17112_s2 + $0x2c4] sm:$0xf]  ;;  %v8061_v2 = vor.u32 %v11317_v0, %v8060_v63  ;;  %v11341_v3 = vld [vmem:[%s17112_s2 + $0x2cc] sm:$0xf0]  ;;  %s12006_s19 = scalar_lea.hbm %s12005_s27, 1 }
  0x31   : > { %v11316_v4 = vld [vmem:[%s17112_s2 + $0x208] sm:$0xf]  ;;  %v8062_v5 = vld [vmem:[%s17112_s2 + $0x210] sm:$0xf0]  ;;  %v8157_v7 = vor.u32 %v11341_v3, %v8156_v1  ;;  %v8048_v11 = vld [vmem:[%s17112_s2 + $0x1ec] sm:$0xf]  ;;  %p12007_p11 = scmp.ne.s32.totalorder %s12005_s27, %s12006_s19  ;;  %p12012_p1 = scmp.lt.s32.totalorder %s12010_s29, %s12006_s19 }
  0x32   : > { %v497_v14 = vsel %vm485_vm4, %v492_v10, %v496_v12  ;;  %v500_v20 = vor.u32 %v498_v18, %v496_v12  ;;  %v8065_v8 = vor.u32 %v11316_v4, %v8062_v5  ;;  %v11314_v12 = vld [vmem:[%s17112_s2 + $0x1f4] sm:$0xf0]  ;;  %v8144_v13 = vld [vmem:[%s17112_s2 + $0x2ac] sm:$0xf]  ;;  %v11313_v17 = vld [vmem:[%s17112_s2 + $0x1f0] sm:$0xf] }
  0x33   : > { %7858 = vmatmul.msk.bf16.vlgmr.msra.gmra.mxu0 %vm530_vm3, %v497_v14  ;;  %7860 = vmatmul.msk.bf16.vlgmr.msra.gmra.mxu1 %vm530_vm3, %v497_v14  ;;  %v11338_v16 = vld [vmem:[%s17112_s2 + $0x2b4] sm:$0xf0]  ;;  %v8050_v18 = vld [vmem:[%s17112_s2 + $0x1f8] sm:$0xf0]  ;;  %v8036_v21 = vld [vmem:[%s17112_s2 + $0x1d4] sm:$0xf]  ;;  %p12008_p12 = pnand %p12007_p11, %p12162_p5  ;;  %p12013_p2 = por %p12012_p1, %p12011_p0 }
  0x34   : > { %7862 = vmatmul.msk.bf16.vlgmr.msra.gmra.mxu2 %vm530_vm3, %v497_v14  ;;  %812 = vmatpush.bf16.msra.mxu0 %v766_v29  ;;  %v8145_v19 = vor.u32 %v11338_v16, %v8144_v13  ;;  %v8132_v26 = vld [vmem:[%s17112_s2 + $0x294] sm:$0xf]  ;;  %v11335_v27 = vld [vmem:[%s17112_s2 + $0x29c] sm:$0xf0]  ;;  %v8024_v43 = vld [vmem:[%s17112_s2 + $0x1bc] sm:$0xf] }
  0x35   : > { %1364 = vmatpush.bf16.msra.mxu1 %v8085_v44  ;;  %1382 = vmatpush.bf16.msra.mxu2 %v8181_v50  ;;  %v11308_v44 = vld [vmem:[%s17112_s2 + $0x1c4] sm:$0xf0]  ;;  %v8120_v45 = vld [vmem:[%s17112_s2 + $0x27c] sm:$0xf]  ;;  %v11307_v54 = vld [vmem:[%s17112_s2 + $0x1c0] sm:$0xf]  ;;  %p12009_p13 = pneg %p12008_p12 }
  0x36   : > { %v11332_v53 = vld [vmem:[%s17112_s2 + $0x284] sm:$0xf0]  ;;  %v8026_v57 = vld [vmem:[%s17112_s2 + $0x1c8] sm:$0xf0]  ;;  %v8012_v59 = vld [vmem:[%s17112_s2 + $0x1a4] sm:$0xf] }
  0x37   : > { %v8108_v0 = vld [vmem:[%s17112_s2 + $0x264] sm:$0xf]  ;;  %v11329_v1 = vld [vmem:[%s17112_s2 + $0x26c] sm:$0xf0]  ;;  %v11304_v4 = vld [vmem:[%s17112_s2 + $0x1a8] sm:$0xf]  ;;  %p12014_p3 = pnand %p12013_p2, %p12009_p13 }
  0x38   : > { %7889 = vmatmul.msk.bf16.gmra.mxu3 %vm530_vm3, %v606_v15  ;;  %813 = vmatpush.bf16.msra.mxu0 %v7913_v30  ;;  %v8133_v30 = vor.u32 %v11335_v27, %v8132_v26  ;;  %v8109_v3 = vor.u32 %v11329_v1, %v8108_v0  ;;  %v8182_v26 = vld [vmem:[%s17112_s2 + $0x300] sm:$0xf0]  ;;  %v8152_v1 = vld [vmem:[%s17112_s2 + $0x2b4] sm:$0xf]  ;;  %vm4654_vm10 = vcmask 1042432   ;;  %vm4606_vm11 = vcmask 781312  }
  0x39   : > { %1365 = vmatpush.bf16.msra.mxu1 %v8073_v56  ;;  %1383 = vmatpush.bf16.msra.mxu2 %v8169_v60  ;;  %v8121_v56 = vor.u32 %v11332_v53, %v8120_v45  ;;  %v11305_v60 = vld [vmem:[%s17112_s2 + $0x1ac] sm:$0xf0]  ;;  %v8176_v45 = vld [vmem:[%s17112_s2 + $0x2e4] sm:$0xf]  ;;  %vm4650_vm12 = vcmask 179200   ;;  %vm4611_vm13 = vcmask 780288  }
  0x3a   : > { %v8013_v63 = vor.u32 %v11305_v60, %v8012_v59  ;;  %vm5031_vm14 = vcmask 785408   ;;  %vm5473_vm15 = vcmask 1043456   ;;  %vm5474_vm0 = vcmask 392196  }
  0x3b   : > { %vm15882_vm1 = vmor %vm5474_vm0, %vm5473_vm15  ;;  %vm5478_vm2 = vsmask.f32 1280  ;;  %vm6330_vm0 = vsmask.f32 4352 }
  0x3d   : > { %1366 = vmatpush.bf16.msra.mxu1 %v8061_v2  ;;  %1384 = vmatpush.bf16.msra.mxu2 %v8157_v7 }
  0x41   : > { %1385 = vmatpush.bf16.msra.mxu2 %v8145_v19 }
  0x43   : > { %7859 = vmatmul.msk.bf16.gmra.mxu0 %vm530_vm3, %v500_v20  ;;  %7861 = vmatmul.msk.bf16.gmra.mxu1 %vm530_vm3, %v500_v20 }
  0x44   : > { %7863 = vmatmul.msk.bf16.gmra.mxu2 %vm530_vm3, %v500_v20  ;;  %v8053_v20 = vor.u32 %v11313_v17, %v8050_v18  ;;  %v11326_v17 = vld [vmem:[%s17112_s2 + $0x254] sm:$0xf0]  ;;  %v11301_v18 = vld [vmem:[%s17112_s2 + $0x190] sm:$0xf] }
  0x45   : > { %1386 = vmatpush.bf16.msra.mxu2 %v8133_v30 }
  0x48   : > { %7928 = vmatmul.msk.bf16.vlgmr.msrb.gmra.mxu3 %vm530_vm3, %v723_v25 }
  0x49   : > { %1387 = vmatpush.bf16.msra.mxu2 %v8121_v56  ;;  %v8158_v56 = vld [vmem:[%s17112_s2 + $0x2d0] sm:$0xf0] }
  0x4d   : > { %1388 = vmatpush.bf16.msra.mxu2 %v8109_v3 }
  0x53   : > { %7890 = vmatmul.msk.bf16.vlgmr.msrb.gmra.mxu0 %vm530_vm3, %v12256_v48  ;;  %7892 = vmatmul.msk.bf16.vlgmr.msrb.gmra.mxu1 %vm530_vm3, %v12256_v48 }
  0x54   : > { %7926 = vmatmul.msk.bf16.vlgmr.msrb.gmra.mxu2 %vm530_vm3, %v723_v25  ;;  %1418 = vmatpush.bf16.msrb.mxu0 %v8089_v51  ;;  %v8025_v51 = vor.u32 %v11308_v44, %v8024_v43  ;;  %v8170_v44 = vld [vmem:[%s17112_s2 + $0x2e8] sm:$0xf0] }
  0x58   : > { %7929 = vmatmul.msk.bf16.gmra.mxu3 %vm530_vm3, %v722_v22  ;;  %1419 = vmatpush.bf16.msrb.mxu0 %v8077_v61 }
  0x5c   : > { %1420 = vmatpush.bf16.msrb.mxu0 %v8065_v8 }
  0x60   : > { %1421 = vmatpush.bf16.msrb.mxu0 %v8053_v20  ;;  %v8002_v20 = vld [vmem:[%s17112_s2 + $0x198] sm:$0xf0] }
  0x63   : > { %7891 = vmatmul.msk.bf16.gmra.mxu0 %vm530_vm3, %v606_v15  ;;  %7893 = vmatmul.msk.bf16.gmra.mxu1 %vm530_vm3, %v606_v15  ;;  %v8049_v15 = vor.u32 %v11314_v12, %v8048_v11  ;;  %v11302_v11 = vld [vmem:[%s17112_s2 + $0x194] sm:$0xf0]  ;;  %v8096_v12 = vld [vmem:[%s17112_s2 + $0x24c] sm:$0xf] }
  0x64   : > { %7927 = vmatmul.msk.bf16.gmra.mxu2 %vm530_vm3, %v722_v22  ;;  %v8097_v19 = vor.u32 %v11326_v17, %v8096_v12  ;;  %v8134_v17 = vld [vmem:[%s17112_s2 + $0x2a0] sm:$0xf0] }
  0x65   : > { %1367 = vmatpush.bf16.msra.mxu1 %v8049_v15 }
  0x66   : > { %1389 = vmatpush.bf16.msra.mxu2 %v8097_v19 }
  0x73   : > { %7930 = vmatmul.msk.bf16.vlgmr.msra.gmra.mxu0 %vm530_vm3, %v723_v25 }
  0x83   : > { %7931 = vmatmul.msk.bf16.gmra.mxu0 %vm530_vm3, %v722_v22  ;;  %v11311_v22 = vld [vmem:[%s17112_s2 + $0x1dc] sm:$0xf0]  ;;  %vm5480_vm3 = vcmask 390148  }
  0x84   : > { %v8037_v25 = vor.u32 %v11311_v22, %v8036_v21  ;;  %v8005_v22 = vor.u32 %v11301_v18, %v8002_v20  ;;  %v8140_v20 = vld [vmem:[%s17112_s2 + $0x29c] sm:$0xf] }
  0x86   : > { %1368 = vmatpush.bf16.msra.mxu1 %v8037_v25  ;;  %v11346_v25 = vld [vmem:[%s17112_s2 + $0x2f8] sm:$0xf] }
  0x8a   : > { %1369 = vmatpush.bf16.msra.mxu1 %v8025_v51 }
  0x8e   : > { %1370 = vmatpush.bf16.msra.mxu1 %v8013_v63 }
  0xab   : > { %v12321_v31 = vpop.f32.mrf.mxu3 }
  0xb0   : > { %v12323_v32 = vpop.f32.mrf.mxu0  ;;  %v575_v37 = vpop.f32.mrf.mxu1 }
  0xb1   : > { %v660_v23 = vadd.f32 %v12321_v31, %v12323_v32  ;;  %v8038_v31 = vld [vmem:[%s17112_s2 + $0x1e0] sm:$0xf0] }
  0xb3   : > { %v12325_v33 = vpop.f32.mrf.mxu3 }
  0xb7   : > { %v12327_v34 = vpop.f32.mrf.mxu2 }
  0xb8   : > { %v12329_v35 = vpop.f32.mrf.mxu0  ;;  %v12357_v48 = vpop.f32.mrf.mxu1 }
  0xb9   : > { %v662_v61 = vadd.f32 %v12325_v33, %v12329_v35  ;;  %v8014_v33 = vld [vmem:[%s17112_s2 + $0x1b0] sm:$0xf0] }
  0xba   : > { %v8017_v7 = vor.u32 %v11304_v4, %v8014_v33 }
  0xbb   : > { %v12331_v36 = vpop.f32.mrf.mxu3 }
  0xbf   : > { %v12333_v38 = vpop.f32.mrf.mxu2 }
  0xc0   : > { %v12335_v39 = vpop.f32.mrf.mxu0  ;;  %v12401_v10 = vpop.f32.mrf.mxu1 }
  0xc3   : > { %v12337_v40 = vpop.f32.mrf.mxu3 }
  0xc7   : > { %v12359_v49 = vpop.f32.mrf.mxu2 }
  0xc8   : > { %v12361_v52 = vpop.f32.mrf.mxu0  ;;  %v582_v55 = vpop.f32.mrf.mxu1 }
  0xc9   : > { %v667_v53 = vadd.f32 %v12337_v40, %v12361_v52  ;;  %v8164_v40 = vld [vmem:[%s17112_s2 + $0x2cc] sm:$0xf]  ;;  %v11342_v52 = vld [vmem:[%s17112_s2 + $0x2d4] sm:$0xf0] }
  0xca   : > { %v8165_v0 = vor.u32 %v11342_v52, %v8164_v40 }
  0xcb   : > { %v796_v62 = vpop.f32.mrf.mxu3 }
  0xcf   : > { %v12399_v6 = vpop.f32.mrf.mxu2 }
  0xd0   : > { %v678_v9 = vpop.f32.mrf.mxu0 }
  0xd1   : > { %v679_v14 = vadd.f32 %v678_v9, %v575_v37  ;;  %v11310_v37 = vld [vmem:[%s17112_s2 + $0x1d8] sm:$0xf]  ;;  %v8000_v9 = vld [vmem:[%s17112_s2 + $0x18c] sm:$0xf] }
  0xd2   : > { %v8041_v42 = vor.u32 %v11310_v37, %v8038_v31  ;;  %v8001_v16 = vor.u32 %v11302_v11, %v8000_v9 }
  0xd3   : > { %v826_v24 = vadd.f32 %v796_v62, %v679_v14  ;;  %v798_v29 = vpop.f32.mrf.mxu3 }
  0xd4   : > { %1422 = vmatpush.bf16.msrb.mxu0 %v8041_v42  ;;  %1371 = vmatpush.bf16.msra.mxu1 %v8001_v16  ;;  %v11343_v42 = vld [vmem:[%s17112_s2 + $0x2e0] sm:$0xf]  ;;  %v11334_v16 = vld [vmem:[%s17112_s2 + $0x298] sm:$0xf] }
  0xd5   : > { %v838_v46 = vmax.f32 %v826_v24, 0.0  ;;  %v8137_v19 = vor.u32 %v11334_v16, %v8134_v17 }
  0xd7   : > { %v777_v28 = vpop.f32.mrf.mxu2 }
  0xd8   : > { %v825_v32 = vadd.f32 %v777_v28, %v660_v23  ;;  %v680_v41 = vpop.f32.mrf.mxu0  ;;  %v665_v23 = vadd.f32 %v12331_v36, %v12335_v39  ;;  %v8185_v28 = vor.u32 %v11346_v25, %v8182_v26  ;;  %v11348_v36 = vld [vmem:[%s17112_s2 + $0x304] sm:$0xf0] }
  0xd9   : > { %v681_v50 = vadd.f32 %v680_v41, %v12357_v48  ;;  %v8029_v48 = vor.u32 %v11307_v54, %v8026_v57 }
  0xda   : > { %v837_v47 = vmax.f32 %v825_v32, 0.0  ;;  %1436 = vmatpush.bf16.msrb.mxu1 %v8185_v28  ;;  %v8122_v28 = vld [vmem:[%s17112_s2 + $0x288] sm:$0xf0] }
  0xdb   : > { %v829_v62 = vadd.f32 %v798_v29, %v681_v50  ;;  %1423 = vmatpush.bf16.msrb.mxu0 %v8029_v48  ;;  %v801_v8 = vpop.f32.mrf.mxu3  ;;  %v8188_v29 = vld [vmem:[%s17112_s2 + $0x2fc] sm:$0xf]  ;;  %v11345_v50 = vld [vmem:[%s17112_s2 + $0x2ec] sm:$0xf0] }
  0xdc   : > { %v12460_v58 = vpack.c.bf16 %v838_v46, %v837_v47  ;;  %v8189_v37 = vor.u32 %v11348_v36, %v8188_v29  ;;  %v8173_v47 = vor.u32 %v11343_v42, %v8170_v44  ;;  %v8177_v51 = vor.u32 %v11345_v50, %v8176_v45  ;;  %v8128_v29 = vld [vmem:[%s17112_s2 + $0x284] sm:$0xf]  ;;  %v11333_v36 = vld [vmem:[%s17112_s2 + $0x28c] sm:$0xf0]  ;;  %v8110_v44 = vld [vmem:[%s17112_s2 + $0x270] sm:$0xf0] }
  0xdd   : > { %v841_v13 = vmax.f32 %v829_v62, 0.0  ;;  %v8129_v42 = vor.u32 %v11333_v36, %v8128_v29  ;;  %v11330_v50 = vld [vmem:[%s17112_s2 + $0x274] sm:$0xf0]  ;;  %v8282_v36 = vld [vmem:[%s17112_s2 + $0xa8] sm:$0xf] }
  0xde   : > { %857 = vst [vmem:[#allocation3] sm:$0xff] %v12460_v58  ;;  %1437 = vmatpush.bf16.msrb.mxu1 %v8173_v47  ;;  %v1016_v12 = vunpack.c.l.b16 %v12460_v58  ;;  %v8116_v47 = vld [vmem:[%s17112_s2 + $0x26c] sm:$0xf] }
  0xdf   : > { %v779_v2 = vpop.f32.mrf.mxu2  ;;  %1424 = vmatpush.bf16.msrb.mxu0 %v8017_v7 }
  0xe0   : > { %v828_v35 = vadd.f32 %v779_v2, %v662_v61  ;;  %v683_v5 = vpop.f32.mrf.mxu0  ;;  %v11337_v61 = vld [vmem:[%s17112_s2 + $0x2b0] sm:$0xf]  ;;  %v11339_v2 = vld [vmem:[%s17112_s2 + $0x2bc] sm:$0xf0] }
  0xe1   : > { %v684_v15 = vadd.f32 %v683_v5, %v12401_v10  ;;  %v697_v10 = vpop.f32.mrf.mxu1  ;;  %v8153_v9 = vor.u32 %v11339_v2, %v8152_v1  ;;  %v11325_v1 = vld [vmem:[%s17112_s2 + $0x250] sm:$0xf] }
  0xe2   : > { %v840_v14 = vmax.f32 %v828_v35, 0.0  ;;  %v698_v57 = vadd.f32 %v697_v10, %v12327_v34  ;;  %v8146_v34 = vld [vmem:[%s17112_s2 + $0x2b8] sm:$0xf0] }
  0xe3   : > { %v832_v24 = vadd.f32 %v801_v8, %v684_v15  ;;  %1425 = vmatpush.bf16.msrb.mxu0 %v8005_v22  ;;  %v803_v43 = vpop.f32.mrf.mxu3  ;;  %v8149_v5 = vor.u32 %v11337_v61, %v8146_v34  ;;  %v11336_v22 = vld [vmem:[%s17112_s2 + $0x2a4] sm:$0xf0]  ;;  %v8117_v61 = vor.u32 %v11330_v50, %v8116_v47  ;;  %v11272_v50 = vld [vmem:[%s17112_s2 + $0x98] sm:$0xf0] }
  0xe4   : > { %v12502_v21 = vpack.c.bf16 %v841_v13, %v840_v14  ;;  %v1017_v14 = vunpack.c.h.b16 %v12460_v58  ;;  %v11324_v34 = vld [vmem:[%s17112_s2 + $0x244] sm:$0xf0] }
  0xe5   : > { %v844_v31 = vmax.f32 %v832_v24, 0.0  ;;  %v11331_v24 = vld [vmem:[%s17112_s2 + $0x280] sm:$0xf] }
  0xe6   : > { %v1019_v35 = vunpack.c.l.b16 %v12502_v21  ;;  %v1020_v8 = vunpack.c.h.b16 %v12502_v21 }
  0xe7   : > { %v782_v27 = vpop.f32.mrf.mxu2  ;;  %1490 = vmatpush.bf16.msra.mxu0 %v8189_v37  ;;  %v12604_v37 = vld [vmem:[#allocation3] sm:$0xee] }
  0xe8   : > { %v831_v39 = vadd.f32 %v782_v27, %v665_v23  ;;  %v685_v30 = vpop.f32.mrf.mxu0  ;;  %v12565_v15 = vpack.c.b16 %v1019_v35, %v1016_v12  ;;  %v12577_v58 = vpack.c.b16 %v1020_v8, %v1017_v14  ;;  %v8141_v23 = vor.u32 %v11336_v22, %v8140_v20  ;;  %v11321_v20 = vld [vmem:[%s17112_s2 + $0x22c] sm:$0xf0] }
  0xe9   : > { %v686_v41 = vadd.f32 %v685_v30, %v582_v55  ;;  %v11340_v55 = vld [vmem:[%s17112_s2 + $0x2c8] sm:$0xf]  ;;  %v699_v48 = vpop.f32.mrf.mxu1  ;;  %v8125_v30 = vor.u32 %v11331_v24, %v8122_v28 }
  0xea   : > { %v843_v32 = vmax.f32 %v831_v39, 0.0  ;;  %v8161_v60 = vor.u32 %v11340_v55, %v8158_v56  ;;  %v700_v18 = vadd.f32 %v699_v48, %v12333_v38  ;;  %v12588_v38 = vld [vmem:[%s17112_s2 + $0x30c] sm:$0x33]  ;;  %v1037_v39 = vshll.u32 %v12565_v15, 16 }
  0xeb   : > { %v835_v54 = vadd.f32 %v803_v43, %v686_v41  ;;  %1491 = vmatpush.bf16.msra.mxu0 %v8177_v51  ;;  %v1245_v27 = vunpack.c.l.b16 %v12588_v38  ;;  %v11328_v43 = vld [vmem:[%s17112_s2 + $0x268] sm:$0xf]  ;;  %v2044_v56 = vunpack.c.l.b16 %v12604_v37  ;;  %v1246_v2 = vunpack.c.h.b16 %v12588_v38 }
  0xec   : > { %v12527_v46 = vpack.c.bf16 %v844_v31, %v843_v32  ;;  %1438 = vmatpush.bf16.msrb.mxu1 %v8161_v60  ;;  %v1049_v32 = vshll.u32 %v12577_v58, 16  ;;  %v1035_v60 = vshrl.u32 %v12565_v15, 16  ;;  %v1039_v40 = vrot.slane %v1037_v39, 1  ;;  %v11275_v39 = vld [vmem:[%s17112_s2 + $0xb0] sm:$0xf0] }
  0xed   : > { %v847_v4 = vmax.f32 %v835_v54, 0.0  ;;  %v1296_v41 = vpack.c.b16 %v1245_v27, %v1245_v27  ;;  %v2047_v14 = vpack.c.b16 %v1019_v35, %v2044_v56  ;;  %v11315_v56 = vld [vmem:[%s17112_s2 + $0x1fc] sm:$0xf0] }
  0xee   : > { %v12621_v54 = vunpack.c.l.b16 %v12527_v46  ;;  %v1051_v52 = vrot.slane %v1049_v32, 1  ;;  %v1040_v17 = vor.u32 %v1039_v40, %v1035_v60  ;;  %v8283_v32 = vor.u32 %v11275_v39, %v8282_v36  ;;  %v11260_v39 = vld [vmem:[%s17112_s2 + $0x38] sm:$0xf0] }
  0xef   : > { %v784_v59 = vpop.f32.mrf.mxu2  ;;  %1492 = vmatpush.bf16.msra.mxu0 %v8165_v0  ;;  %v1356_v55 = vsel %vm1354_vm7, %v1296_v41, 0 }
  0xf0   : > { %v834_v62 = vadd.f32 %v784_v59, %v667_v53  ;;  %v815_v63 = vpop.f32.mrf.mxu0  ;;  %1439 = vmatpush.bf16.msrb.mxu1 %v8149_v5  ;;  %1407 = vmatpush.bf16.msra.mxu3 %v1356_v55  ;;  %v8113_v59 = vor.u32 %v11328_v43, %v8110_v44  ;;  %v8104_v5 = vld [vmem:[%s17112_s2 + $0x254] sm:$0xf]  ;;  %v11318_v43 = vld [vmem:[%s17112_s2 + $0x214] sm:$0xf0] }
  0xf1   : > { %v827_v3 = vadd.f32 %v815_v63, %v698_v57  ;;  %v702_v25 = vpop.f32.mrf.mxu1  ;;  %v8056_v55 = vld [vmem:[%s17112_s2 + $0x1f4] sm:$0xf] }
  0xf2   : > { %v846_v33 = vmax.f32 %v834_v62, 0.0  ;;  %v703_v45 = vadd.f32 %v702_v25, %v12359_v49  ;;  %v12626_v49 = vunpack.c.h.b16 %v12527_v46  ;;  %v8092_v46 = vld [vmem:[%s17112_s2 + $0x23c] sm:$0xf] }
  0xf3   : > { %v839_v7 = vmax.f32 %v827_v3, 0.0  ;;  %1493 = vmatpush.bf16.msra.mxu0 %v8153_v9 }
  0xf4   : > { %v855_v11 = vpack.c.bf16 %v847_v4, %v846_v33  ;;  %1440 = vmatpush.bf16.msrb.mxu1 %v8137_v19  ;;  %v8093_v4 = vor.u32 %v11324_v34, %v8092_v46  ;;  %v8098_v33 = vld [vmem:[%s17112_s2 + $0x258] sm:$0xf0]  ;;  %v1297_v19 = vpack.c.b16 %v1246_v2, %v1246_v2  ;;  %v8246_v2 = vld [vmem:[%s17112_s2 + $0x60] sm:$0xf] }
  0xf5   : > { %v850_v13 = vpack.c.bf16 %v839_v7, %v839_v7  ;;  %v11327_v7 = vld [vmem:[%s17112_s2 + $0x25c] sm:$0xf0]  ;;  %v8044_v34 = vld [vmem:[%s17112_s2 + $0x1dc] sm:$0xf] }
  0xf6   : > { %864 = vst [vmem:[#allocation3 + $0x24] sm:$0x11] %v855_v11  ;;  %v1047_v11 = vshrl.u32 %v12577_v58, 16  ;;  %1472 = vmatpush.bf16.msrb.mxu3 %v8093_v4  ;;  %v8105_v24 = vor.u32 %v11327_v7, %v8104_v5  ;;  %v8032_v7 = vld [vmem:[%s17112_s2 + $0x1c4] sm:$0xf] }
  0xf7   : > { %859 = vst.msk [vmem:[#allocation3 + $0x8] sm:$0xf] %vm858_vm6, %v850_v13  ;;  %1494 = vmatpush.bf16.msra.mxu0 %v8141_v23  ;;  %v8080_v13 = vld [vmem:[%s17112_s2 + $0x224] sm:$0xf] }
  0xf8   : > { %v817_v10 = vpop.f32.mrf.mxu0  ;;  %1441 = vmatpush.bf16.msrb.mxu1 %v8125_v30  ;;  %v1052_v23 = vor.u32 %v1051_v52, %v1047_v11  ;;  %v8081_v35 = vor.u32 %v11321_v20, %v8080_v13  ;;  %v2050_v30 = vrot.slane %v2047_v14, 1  ;;  %v8234_v20 = vld [vmem:[%s17112_s2 + $0x48] sm:$0xf] }
  0xf9   : > { %v830_v26 = vadd.f32 %v817_v10, %v700_v18  ;;  %v8101_v18 = vor.u32 %v11325_v1, %v8098_v33  ;;  %v704_v22 = vpop.f32.mrf.mxu1  ;;  %v11312_v1 = vld [vmem:[%s17112_s2 + $0x1e4] sm:$0xf0]  ;;  %v11266_v33 = vld [vmem:[%s17112_s2 + $0x68] sm:$0xf0] }
  0xfa   : > { %1473 = vmatpush.bf16.msrb.mxu3 %v8081_v35  ;;  %v8045_v4 = vor.u32 %v11312_v1, %v8044_v34  ;;  %v8247_v5 = vor.u32 %v11266_v33, %v8246_v2  ;;  %v8366_v34 = vld [vmem:[%s17112_s2 + $0x150] sm:$0xf]  ;;  %v11296_v1 = vld [vmem:[%s17112_s2 + $0x158] sm:$0xf0] }
  0xfb   : > { %v842_v31 = vmax.f32 %v830_v26, 0.0  ;;  %1495 = vmatpush.bf16.msra.mxu0 %v8129_v42  ;;  %v1359_v26 = vsel %vm1354_vm7, %v1297_v19, 0  ;;  %v8068_v42 = vld [vmem:[%s17112_s2 + $0x20c] sm:$0xf] }
  0xfc   : > { %1442 = vmatpush.bf16.msrb.mxu1 %v8113_v59  ;;  %1461 = vmatpush.bf16.msrb.mxu2 %v1359_v26  ;;  %v8069_v47 = vor.u32 %v11318_v43, %v8068_v42  ;;  %v11269_v59 = vld [vmem:[%s17112_s2 + $0x80] sm:$0xf0]  ;;  %v8210_v43 = vld [vmem:[%s17112_s2 + $0x18] sm:$0xf] }
  0xfd   : > { %v852_v51 = vpack.c.bf16 %v842_v31, %v842_v31  ;;  %v939_v53 = vld [vmem:[#allocation3 + $0x24] sm:$0x11]  ;;  %v705_v31 = vadd.f32 %v704_v22, %v12399_v6  ;;  %v8270_v6 = vld [vmem:[%s17112_s2 + $0x90] sm:$0xf] }
  0xfe   : > { %v1025_v57 = vunpack.c.l.b16 %v939_v53  ;;  %v1026_v48 = vunpack.c.h.b16 %v939_v53  ;;  %v8271_v53 = vor.u32 %v11272_v50, %v8270_v6  ;;  %v868_v60 = vld [vmem:[#allocation3 + $0x8] sm:$0xf]  ;;  %1474 = vmatpush.bf16.msrb.mxu3 %v8069_v47  ;;  %v11257_v6 = vld [vmem:[%s17112_s2 + $0x20] sm:$0xf0] }
  0xff   : > { %861 = vst.msk [vmem:[#allocation3 + $0x14] sm:$0xf] %vm858_vm6, %v852_v51  ;;  %1496 = vmatpush.bf16.msra.mxu0 %v8117_v61  ;;  %v8057_v61 = vor.u32 %v11315_v56, %v8056_v55  ;;  %v1018_v46 = vunpack.c.l.b16 %v868_v60  ;;  %v7997_v56 = vld [vmem:[%s17112_s2 + $0x314] sm:$0x3] }
 0x100   : > { %v820_v62 = vpop.f32.mrf.mxu0  ;;  %v12631_v63 = vpack.c.b16 %v1025_v57, %v12621_v54  ;;  %v12634_v0 = vpack.c.b16 %v1026_v48, %v12626_v49  ;;  %1443 = vmatpush.bf16.msrb.mxu1 %v8101_v18  ;;  %v8258_v48 = vld [vmem:[%s17112_s2 + $0x78] sm:$0xf]  ;;  %v1247_v60 = vunpack.c.l.b16 %v7997_v56  ;;  %v8356_v56 = vld [vmem:[%s17112_s2 + $0x144] sm:$0xf0] }
 0x101   : > { %v833_v3 = vadd.f32 %v820_v62, %v703_v45  ;;  %v8259_v62 = vor.u32 %v11269_v59, %v8258_v48  ;;  %v8378_v48 = vld [vmem:[%s17112_s2 + $0x168] sm:$0xf]  ;;  %v11299_v59 = vld [vmem:[%s17112_s2 + $0x170] sm:$0xf0] }
 0x102   : > { %v1042_v9 = vshll.u32 %v12631_v63, 16  ;;  %v1054_v12 = vshll.u32 %v12634_v0, 16  ;;  %v12670_v27 = vrot.slane %v12631_v63, 1  ;;  %1475 = vmatpush.bf16.msrb.mxu3 %v8057_v61  ;;  %v1070_v11 = vshrl.u32 %v12631_v63, 16  ;;  %v11263_v63 = vld [vmem:[%s17112_s2 + $0x50] sm:$0xf0] }
 0x103   : > { %v845_v16 = vmax.f32 %v833_v3, 0.0  ;;  %1497 = vmatpush.bf16.msra.mxu0 %v8105_v24  ;;  %v11306_v24 = vld [vmem:[%s17112_s2 + $0x1b4] sm:$0xf0]  ;;  %v1298_v2 = vpack.c.b16 %v1247_v60, %v1247_v60 }
 0x104   : > { %v12666_v10 = vrot.slane %v1042_v9, 1  ;;  %v1056_v38 = vrot.slane %v1054_v12, 1  ;;  %v12701_v44 = vsel %vm720_vm5, %v2050_v30, %v12670_v27  ;;  %v11309_v9 = vld [vmem:[%s17112_s2 + $0x1cc] sm:$0xf0]  ;;  %v1073_v12 = vshrl.u32 %v12634_v0, 16 }
 0x105   : > { %v854_v25 = vpack.c.bf16 %v845_v16, %v845_v16  ;;  %v8033_v18 = vor.u32 %v11309_v9, %v8032_v7  ;;  %v8367_v9 = vor.u32 %v11296_v1, %v8366_v34  ;;  %v8330_v34 = vld [vmem:[%s17112_s2 + $0x108] sm:$0xf]  ;;  %v11287_v1 = vld [vmem:[%s17112_s2 + $0x110] sm:$0xf0] }
 0x106   : > { %v12674_v28 = vsel %vm485_vm4, %v1040_v17, %v12666_v10  ;;  %v12677_v29 = vsel %vm485_vm4, %v1052_v23, %v1056_v38  ;;  %v12706_v51 = vld [vmem:[#allocation3 + $0x14] sm:$0xf]  ;;  %v12746_v14 = vor.u32 %v1070_v11, %v12666_v10  ;;  %v12748_v16 = vor.u32 %v1073_v12, %v1056_v38  ;;  %1476 = vmatpush.bf16.msrb.mxu3 %v8045_v4  ;;  %v8020_v38 = vld [vmem:[%s17112_s2 + $0x1ac] sm:$0xf] }
 0x107   : > { %863 = vst.msk [vmem:[#allocation3 + $0x20] sm:$0xf] %vm858_vm6, %v854_v25  ;;  %1372 = vmatmul.bf16.vlgmr.msra.gmra.mxu1 %v12674_v28  ;;  %1390 = vmatmul.bf16.vlgmr.msra.gmra.mxu2 %v12677_v29  ;;  %v1021_v52 = vunpack.c.l.b16 %v12706_v51  ;;  %v8235_v23 = vor.u32 %v11263_v63, %v8234_v20  ;;  %v8222_v25 = vld [vmem:[%s17112_s2 + $0x30] sm:$0xf]  ;;  %v8021_v36 = vor.u32 %v11306_v24, %v8020_v38  ;;  %v11274_v12 = vld [vmem:[%s17112_s2 + $0xac] sm:$0xf]  ;;  %vm15893_vm6 = vmand %vm1354_vm7, %vm5478_vm2 }
 0x108   : > { %1426 = vmatmul.bf16.vlgmr.msrb.gmra.mxu0 %v12674_v28  ;;  %v822_v41 = vpop.f32.mrf.mxu0  ;;  %1811 = vmatpush.bf16.msra.mxu2 %v8283_v32  ;;  %v8223_v30 = vor.u32 %v11260_v39, %v8222_v25  ;;  %v11303_v32 = vld [vmem:[%s17112_s2 + $0x19c] sm:$0xf0]  ;;  %v8290_v20 = vld [vmem:[%s17112_s2 + $0xb0] sm:$0xf]  ;;  %v11276_v63 = vld [vmem:[%s17112_s2 + $0xb8] sm:$0xf0] }
 0x109   : > { %v836_v45 = vadd.f32 %v822_v41, %v705_v31  ;;  %v12732_v3 = vpack.c.b16 %v1021_v52, %v1018_v46  ;;  %v8008_v31 = vld [vmem:[%s17112_s2 + $0x194] sm:$0xf]  ;;  %v11254_v46 = vld [vmem:[%s17112_s2 + $0x8] sm:$0xf0]  ;;  %v8354_v38 = vld [vmem:[%s17112_s2 + $0x138] sm:$0xf] }
 0x10a   : > { %1477 = vmatpush.bf16.msrb.mxu3 %v8033_v18  ;;  %v8009_v50 = vor.u32 %v11303_v32, %v8008_v31  ;;  %v11293_v24 = vld [vmem:[%s17112_s2 + $0x140] sm:$0xf0]  ;;  %v11271_v25 = vld [vmem:[%s17112_s2 + $0x94] sm:$0xf]  ;;  %v8368_v39 = vld [vmem:[%s17112_s2 + $0x15c] sm:$0xf0] }
 0x10b   : > { %v848_v57 = vmax.f32 %v836_v45, 0.0  ;;  %v1061_v17 = vshll.u32 %v12732_v3, 16  ;;  %v1059_v41 = vshrl.u32 %v12732_v3, 16  ;;  %v8278_v32 = vld [vmem:[%s17112_s2 + $0x98] sm:$0xf] }
 0x10c   : > { %1812 = vmatpush.bf16.msra.mxu2 %v8271_v53  ;;  %v8211_v53 = vor.u32 %v11257_v6, %v8210_v43  ;;  %v11290_v6 = vld [vmem:[%s17112_s2 + $0x128] sm:$0xf0] }
 0x10d   : > { %v856_v40 = vpack.c.bf16 %v848_v57, %v848_v57  ;;  %v1063_v35 = vrot.slane %v1061_v17, 1  ;;  %v12803_v57 = vld [vmem:[%s17112_s2 + $0x180] sm:$0x33]  ;;  %v11298_v17 = vld [vmem:[%s17112_s2 + $0x16c] sm:$0xf] }
 0x10e   : > { %v872_v13 = vld [vmem:[#allocation3 + $0x20] sm:$0xf]  ;;  %1478 = vmatpush.bf16.msrb.mxu3 %v8021_v36  ;;  %v1695_v61 = vunpack.c.l.b16 %v12803_v57  ;;  %v11295_v36 = vld [vmem:[%s17112_s2 + $0x154] sm:$0xf] }
 0x10f   : > { %866 = vst.msk [vmem:[#allocation3 + $0x2c] sm:$0x1] %vm865_vm8, %v856_v40  ;;  %v12759_v22 = vunpack.c.l.b16 %v872_v13  ;;  %v1064_v45 = vor.u32 %v1063_v35, %v1059_v41  ;;  %v8198_v40 = vld [vmem:[%s17112_s2] sm:$0xf]  ;;  %v8284_v13 = vld [vmem:[%s17112_s2 + $0xb4] sm:$0xf0]  ;;  %v8355_v35 = vor.u32 %v11293_v24, %v8354_v38  ;;  %v8371_v31 = vor.u32 %v11295_v36, %v8368_v39 }
 0x110   : > { %1813 = vmatpush.bf16.msra.mxu2 %v8259_v62  ;;  %v8379_v62 = vor.u32 %v11299_v59, %v8378_v48  ;;  %v8199_v4 = vor.u32 %v11254_v46, %v8198_v40  ;;  %v1746_v33 = vpack.c.b16 %v1695_v61, %v1695_v61  ;;  %v8287_v18 = vor.u32 %v11274_v12, %v8284_v13  ;;  %v11273_v41 = vld [vmem:[%s17112_s2 + $0xa0] sm:$0xf0]  ;;  %v8266_v48 = vld [vmem:[%s17112_s2 + $0x80] sm:$0xf]  ;;  %v11270_v40 = vld [vmem:[%s17112_s2 + $0x88] sm:$0xf0] }
 0x111   : > { %v8279_v43 = vor.u32 %v11273_v41, %v8278_v32  ;;  %v8267_v46 = vor.u32 %v11270_v40, %v8266_v48  ;;  %v11267_v12 = vld [vmem:[%s17112_s2 + $0x70] sm:$0xf0]  ;;  %v8318_v13 = vld [vmem:[%s17112_s2 + $0xf0] sm:$0xf]  ;;  %v8332_v38 = vld [vmem:[%s17112_s2 + $0x114] sm:$0xf0] }
 0x112   : > { %1479 = vmatpush.bf16.msrb.mxu3 %v8009_v50  ;;  %v1803_v7 = vsel %vm1354_vm7, %v1746_v33, 0  ;;  %v8260_v50 = vld [vmem:[%s17112_s2 + $0x84] sm:$0xf0]  ;;  %v11289_v33 = vld [vmem:[%s17112_s2 + $0x124] sm:$0xf] }
 0x113   : > { %1854 = vmatpush.bf16.msrb.mxu0 %v1803_v7  ;;  %v8242_v24 = vld [vmem:[%s17112_s2 + $0x50] sm:$0xf]  ;;  %v8306_v36 = vld [vmem:[%s17112_s2 + $0xd8] sm:$0xf]  ;;  %v11281_v39 = vld [vmem:[%s17112_s2 + $0xe0] sm:$0xf0] }
 0x114   : > { %1814 = vmatpush.bf16.msra.mxu2 %v8247_v5  ;;  %v1362_v5 = vsel %vm1354_vm7, %v1298_v2, 0  ;;  %v8331_v2 = vor.u32 %v11287_v1, %v8330_v34  ;;  %v11283_v32 = vld [vmem:[%s17112_s2 + $0xf4] sm:$0xf]  ;;  %v8320_v41 = vld [vmem:[%s17112_s2 + $0xfc] sm:$0xf0] }
 0x115   : > { %1515 = vmatpush.bf16.msra.mxu1 %v1362_v5  ;;  %v8344_v5 = vld [vmem:[%s17112_s2 + $0x12c] sm:$0xf0]  ;;  %v11256_v48 = vld [vmem:[%s17112_s2 + $0x1c] sm:$0xf]  ;;  %v8308_v40 = vld [vmem:[%s17112_s2 + $0xe4] sm:$0xf0] }
 0x116   : > { %v940_v19 = vld [vmem:[#allocation3 + $0x2c] sm:$0x1]  ;;  %v11258_v1 = vld [vmem:[%s17112_s2 + $0x28] sm:$0xf0] }
 0x117   : > { %1377 = vmatmul.bf16.gmra.mxu1 %v12746_v14  ;;  %1395 = vmatmul.bf16.gmra.mxu2 %v12748_v16  ;;  %v1027_v10 = vunpack.c.l.b16 %v940_v19  ;;  %v8380_v19 = vld [vmem:[%s17112_s2 + $0x174] sm:$0xf0] }
 0x118   : > { %1431 = vmatmul.bf16.gmra.mxu0 %v12746_v14  ;;  %1815 = vmatpush.bf16.msra.mxu2 %v8235_v23  ;;  %v8291_v23 = vor.u32 %v11276_v63, %v8290_v20  ;;  %v11262_v20 = vld [vmem:[%s17112_s2 + $0x4c] sm:$0xf]  ;;  %v8236_v63 = vld [vmem:[%s17112_s2 + $0x54] sm:$0xf0] }
 0x119   : > { %v12772_v26 = vpack.c.b16 %v1027_v10, %v12759_v22  ;;  %v8383_v10 = vor.u32 %v11298_v17, %v8380_v19 }
 0x11b   : > { %v1066_v42 = vshll.u32 %v12772_v26, 16  ;;  %v1076_v11 = vshrl.u32 %v12772_v26, 16 }
 0x11c   : > { %1816 = vmatpush.bf16.msra.mxu2 %v8223_v30 }
 0x11d   : > { %v12791_v47 = vrot.slane %v1066_v42, 1  ;;  %v8342_v42 = vld [vmem:[%s17112_s2 + $0x120] sm:$0xf] }
 0x11e   : > { %v8343_v59 = vor.u32 %v11290_v6, %v8342_v42  ;;  %v8230_v6 = vld [vmem:[%s17112_s2 + $0x38] sm:$0xf] }
 0x11f   : > { %v12795_v55 = vsel %vm485_vm4, %v1064_v45, %v12791_v47  ;;  %v11268_v45 = vld [vmem:[%s17112_s2 + $0x7c] sm:$0xf]  ;;  %v12900_v61 = vor.u32 %v1076_v11, %v12791_v47  ;;  %v11265_v47 = vld [vmem:[%s17112_s2 + $0x64] sm:$0xf]  ;;  %v8254_v11 = vld [vmem:[%s17112_s2 + $0x68] sm:$0xf] }
 0x120   : > { %8190 = vmatmul.msk.bf16.vlgmr.msra.gmra.mxu3 %vm1347_vm9, %v12795_v55  ;;  %1817 = vmatpush.bf16.msra.mxu2 %v8211_v53  ;;  %v11292_v53 = vld [vmem:[%s17112_s2 + $0x13c] sm:$0xf]  ;;  %v8263_v60 = vor.u32 %v11268_v45, %v8260_v50  ;;  %v8255_v17 = vor.u32 %v11267_v12, %v8254_v11  ;;  %v11261_v45 = vld [vmem:[%s17112_s2 + $0x40] sm:$0xf0]  ;;  %v8294_v50 = vld [vmem:[%s17112_s2 + $0xc0] sm:$0xf] }
 0x121   : > { %1829 = vmatpush.bf16.msra.mxu3 %v8379_v62  ;;  %v8359_v62 = vor.u32 %v11292_v53, %v8356_v56  ;;  %v8231_v53 = vor.u32 %v11261_v45, %v8230_v6  ;;  %v11278_v56 = vld [vmem:[%s17112_s2 + $0xc8] sm:$0xf0]  ;;  %v11255_v11 = vld [vmem:[%s17112_s2 + $0x10] sm:$0xf0]  ;;  %v11386_v6 = vld [vmem:[%s17112_s2 + $0x440] sm:$0xf0]  ;;  %v13079_v45 = vpack.c.b16 %v12621_v54, %v12621_v54 }
 0x124   : > { %1818 = vmatpush.bf16.msra.mxu2 %v8199_v4  ;;  %v8248_v4 = vld [vmem:[%s17112_s2 + $0x6c] sm:$0xf0] }
 0x125   : > { %1830 = vmatpush.bf16.msra.mxu3 %v8367_v9  ;;  %v8251_v7 = vor.u32 %v11265_v47, %v8248_v4  ;;  %v8347_v9 = vor.u32 %v11289_v33, %v8344_v5  ;;  %v11253_v4 = vld [vmem:[%s17112_s2 + $0x4] sm:$0xf]  ;;  %v8200_v33 = vld [vmem:[%s17112_s2 + $0xc] sm:$0xf0] }
 0x126   : > { %v11277_v5 = vld [vmem:[%s17112_s2 + $0xc4] sm:$0xf] }
 0x127   : > { %1444 = vmatmul.bf16.vlgmr.msrb.gmra.mxu1 %v12677_v29  ;;  %8192 = vmatmul.msk.bf16.vlgmr.msrb.gmra.mxu2 %vm1347_vm9, %v12795_v55 }
 0x128   : > { %1498 = vmatmul.bf16.vlgmr.msra.gmra.mxu0 %v12677_v29  ;;  %1865 = vmatpush.bf16.msrb.mxu1 %v8287_v18  ;;  %v8272_v29 = vld [vmem:[%s17112_s2 + $0x9c] sm:$0xf0]  ;;  %v11284_v18 = vld [vmem:[%s17112_s2 + $0xf8] sm:$0xf0] }
 0x129   : > { %1883 = vmatpush.bf16.msrb.mxu2 %v8383_v10  ;;  %1919 = vmatpush.bf16.msra.mxu0 %v8291_v23  ;;  %v8275_v30 = vor.u32 %v11271_v25, %v8272_v29  ;;  %v8319_v19 = vor.u32 %v11284_v18, %v8318_v13  ;;  %v11286_v10 = vld [vmem:[%s17112_s2 + $0x10c] sm:$0xf]  ;;  %v8239_v23 = vor.u32 %v11262_v20, %v8236_v63  ;;  %v11264_v25 = vld [vmem:[%s17112_s2 + $0x58] sm:$0xf0] }
 0x12a   : > { %1831 = vmatpush.bf16.msra.mxu3 %v8355_v35  ;;  %v8335_v35 = vor.u32 %v11286_v10, %v8332_v38  ;;  %v8243_v29 = vor.u32 %v11264_v25, %v8242_v24  ;;  %v11300_v18 = vld [vmem:[%s17112_s2 + $0x178] sm:$0xf0]  ;;  %v11395_v63 = vld [vmem:[%s17112_s2 + $0x488] sm:$0xf0]  ;;  %v11297_v38 = vld [vmem:[%s17112_s2 + $0x160] sm:$0xf0] }
 0x12b   : > { %v11392_v25 = vld [vmem:[%s17112_s2 + $0x470] sm:$0xf0] }
 0x12c   : > { %1866 = vmatpush.bf16.msrb.mxu1 %v8275_v30  ;;  %v11259_v30 = vld [vmem:[%s17112_s2 + $0x34] sm:$0xf] }
 0x12d   : > { %1884 = vmatpush.bf16.msrb.mxu2 %v8371_v31  ;;  %1920 = vmatpush.bf16.msra.mxu0 %v8279_v43  ;;  %v8307_v31 = vor.u32 %v11281_v39, %v8306_v36  ;;  %v8323_v43 = vor.u32 %v11283_v32, %v8320_v41  ;;  %v11294_v36 = vld [vmem:[%s17112_s2 + $0x148] sm:$0xf0]  ;;  %v8618_v39 = vld [vmem:[%s17112_s2 + $0x450] sm:$0xf]  ;;  %v8350_v32 = vld [vmem:[%s17112_s2 + $0x128] sm:$0xf] }
 0x12e   : > { %1832 = vmatpush.bf16.msra.mxu3 %v8343_v59  ;;  %v8212_v59 = vld [vmem:[%s17112_s2 + $0x24] sm:$0xf0]  ;;  %v11291_v41 = vld [vmem:[%s17112_s2 + $0x130] sm:$0xf0] }
 0x12f   : > { %v8215_v34 = vor.u32 %v11256_v48, %v8212_v59  ;;  %v8594_v48 = vld [vmem:[%s17112_s2 + $0x420] sm:$0xf] }
 0x130   : > { %8191 = vmatmul.msk.bf16.gmra.mxu3 %vm1347_vm9, %v12900_v61  ;;  %1867 = vmatpush.bf16.msrb.mxu1 %v8263_v60  ;;  %v11280_v60 = vld [vmem:[%s17112_s2 + $0xdc] sm:$0xf] }
 0x131   : > { %1885 = vmatpush.bf16.msrb.mxu2 %v8359_v62  ;;  %1921 = vmatpush.bf16.msra.mxu0 %v8267_v46  ;;  %v8218_v62 = vld [vmem:[%s17112_s2 + $0x20] sm:$0xf]  ;;  %v8295_v46 = vor.u32 %v11278_v56, %v8294_v50  ;;  %v8311_v47 = vor.u32 %v11280_v60, %v8308_v40  ;;  %v13083_v50 = vpack.c.b16 %v12759_v22, %v12759_v22  ;;  %v11288_v56 = vld [vmem:[%s17112_s2 + $0x118] sm:$0xf0]  ;;  %v11383_v22 = vld [vmem:[%s17112_s2 + $0x428] sm:$0xf0]  ;;  %v1696_v60 = vunpack.c.h.b16 %v12803_v57 }
 0x132   : > { %1833 = vmatpush.bf16.msra.mxu3 %v8331_v2  ;;  %v8219_v2 = vor.u32 %v11258_v1, %v8218_v62  ;;  %v8595_v59 = vor.u32 %v11383_v22, %v8594_v48  ;;  %v8326_v40 = vld [vmem:[%s17112_s2 + $0xf8] sm:$0xf]  ;;  %v8582_v62 = vld [vmem:[%s17112_s2 + $0x408] sm:$0xf]  ;;  %v11359_v22 = vld [vmem:[%s17112_s2 + $0x368] sm:$0xf0] }
 0x133   : > { %v1747_v57 = vpack.c.b16 %v1696_v60, %v1696_v60  ;;  %v8512_v60 = vld [vmem:[%s17112_s2 + $0x384] sm:$0xf0] }
 0x134   : > { %1868 = vmatpush.bf16.msrb.mxu1 %v8251_v7  ;;  %v8203_v7 = vor.u32 %v11253_v4, %v8200_v33  ;;  %v8570_v4 = vld [vmem:[%s17112_s2 + $0x3f0] sm:$0xf]  ;;  %v11377_v33 = vld [vmem:[%s17112_s2 + $0x3f8] sm:$0xf0] }
 0x135   : > { %1886 = vmatpush.bf16.msrb.mxu2 %v8347_v9  ;;  %1922 = vmatpush.bf16.msra.mxu0 %v8255_v17  ;;  %v8296_v9 = vld [vmem:[%s17112_s2 + $0xcc] sm:$0xf0] }
 0x136   : > { %1834 = vmatpush.bf16.msra.mxu3 %v8319_v19  ;;  %v8299_v12 = vor.u32 %v11277_v5, %v8296_v9  ;;  %v8386_v17 = vld [vmem:[%s17112_s2 + $0x170] sm:$0xf]  ;;  %v8642_v19 = vld [vmem:[%s17112_s2 + $0x480] sm:$0xf]  ;;  %v1806_v5 = vsel %vm1354_vm7, %v1747_v57, 0  ;;  %v8571_v9 = vor.u32 %v11377_v33, %v8570_v4  ;;  %v2045_v4 = vunpack.c.h.b16 %v12604_v37 }
 0x137   : > { %1449 = vmatmul.bf16.gmra.mxu1 %v12748_v16  ;;  %8193 = vmatmul.msk.bf16.gmra.mxu2 %vm1347_vm9, %v12900_v61  ;;  %v8387_v20 = vor.u32 %v11300_v18, %v8386_v17  ;;  %v8643_v10 = vor.u32 %v11395_v63, %v8642_v19  ;;  %v8302_v18 = vld [vmem:[%s17112_s2 + $0xc8] sm:$0xf]  ;;  %v11279_v19 = vld [vmem:[%s17112_s2 + $0xd0] sm:$0xf0]  ;;  %v8558_v63 = vld [vmem:[%s17112_s2 + $0x3d8] sm:$0xf] }
 0x138   : > { %1503 = vmatmul.bf16.gmra.mxu0 %v12748_v16  ;;  %1869 = vmatpush.bf16.msrb.mxu1 %v8239_v23  ;;  %v8224_v16 = vld [vmem:[%s17112_s2 + $0x3c] sm:$0xf0]  ;;  %v8374_v23 = vld [vmem:[%s17112_s2 + $0x158] sm:$0xf]  ;;  %v8500_v57 = vld [vmem:[%s17112_s2 + $0x36c] sm:$0xf0] }
 0x139   : > { %1887 = vmatpush.bf16.msrb.mxu2 %v8335_v35  ;;  %1923 = vmatpush.bf16.msra.mxu0 %v8243_v29  ;;  %v8227_v42 = vor.u32 %v11259_v30, %v8224_v16  ;;  %v8375_v24 = vor.u32 %v11297_v38, %v8374_v23  ;;  %v8362_v29 = vld [vmem:[%s17112_s2 + $0x140] sm:$0xf]  ;;  %v11389_v30 = vld [vmem:[%s17112_s2 + $0x458] sm:$0xf0]  ;;  %v11374_v23 = vld [vmem:[%s17112_s2 + $0x3e0] sm:$0xf0] }
 0x13a   : > { %1835 = vmatpush.bf16.msra.mxu3 %v8307_v31  ;;  %v8363_v31 = vor.u32 %v11294_v36, %v8362_v29  ;;  %v8619_v16 = vor.u32 %v11389_v30, %v8618_v39  ;;  %v11370_v29 = vld [vmem:[%s17112_s2 + $0x3c4] sm:$0xf]  ;;  %v8548_v36 = vld [vmem:[%s17112_s2 + $0x3cc] sm:$0xf0]  ;;  %v11355_v33 = vld [vmem:[%s17112_s2 + $0x34c] sm:$0xf] }
 0x13b   : > { %v8551_v39 = vor.u32 %v11370_v29, %v8548_v36  ;;  %v8522_v30 = vld [vmem:[%s17112_s2 + $0x390] sm:$0xf]  ;;  %v11352_v37 = vld [vmem:[%s17112_s2 + $0x334] sm:$0xf]  ;;  %v11391_v29 = vld [vmem:[%s17112_s2 + $0x46c] sm:$0xf] }
 0x13c   : > { %1870 = vmatpush.bf16.msrb.mxu1 %v8227_v42  ;;  %v8606_v42 = vld [vmem:[%s17112_s2 + $0x438] sm:$0xf] }
 0x13d   : > { %1888 = vmatpush.bf16.msrb.mxu2 %v8323_v43  ;;  %1924 = vmatpush.bf16.msra.mxu0 %v8231_v53  ;;  %v8351_v43 = vor.u32 %v11291_v41, %v8350_v32  ;;  %v8338_v53 = vld [vmem:[%s17112_s2 + $0x110] sm:$0xf]  ;;  %v8536_v32 = vld [vmem:[%s17112_s2 + $0x3b4] sm:$0xf0] }
 0x13e   : > { %1836 = vmatpush.bf16.msra.mxu3 %v8295_v46  ;;  %v8339_v54 = vor.u32 %v11288_v56, %v8338_v53  ;;  %v8524_v56 = vld [vmem:[%s17112_s2 + $0x39c] sm:$0xf0] }
 0x140   : > { %1480 = vmatmul.bf16.vlgmr.msrb.gmra.mxu3 %v12674_v28  ;;  %1871 = vmatpush.bf16.msrb.mxu1 %v8215_v34  ;;  %v8206_v28 = vld [vmem:[%s17112_s2 + $0x8] sm:$0xf]  ;;  %v11380_v34 = vld [vmem:[%s17112_s2 + $0x410] sm:$0xf0] }
 0x141   : > { %1889 = vmatpush.bf16.msrb.mxu2 %v8311_v47  ;;  %1925 = vmatpush.bf16.msra.mxu0 %v8219_v2  ;;  %v8207_v13 = vor.u32 %v11255_v11, %v8206_v28  ;;  %v8583_v1 = vor.u32 %v11380_v34, %v8582_v62  ;;  %v8314_v47 = vld [vmem:[%s17112_s2 + $0xe0] sm:$0xf]  ;;  %v11282_v2 = vld [vmem:[%s17112_s2 + $0xe8] sm:$0xf0]  ;;  %v938_v28 = vld [vmem:[%s17112_s2 + $0x188] sm:$0x3] }
 0x142   : > { %1908 = vmatpush.bf16.msrb.mxu3 %v1806_v5  ;;  %v8546_v11 = vld [vmem:[%s17112_s2 + $0x3c0] sm:$0xf]  ;;  %v11356_v62 = vld [vmem:[%s17112_s2 + $0x350] sm:$0xf0]  ;;  %v11358_v34 = vld [vmem:[%s17112_s2 + $0x364] sm:$0xf] }
 0x143   : > { %v8488_v5 = vld [vmem:[%s17112_s2 + $0x354] sm:$0xf0] }
 0x144   : > { %1872 = vmatpush.bf16.msrb.mxu1 %v8203_v7  ;;  %v8315_v7 = vor.u32 %v11282_v2, %v8314_v47  ;;  %v8474_v47 = vld [vmem:[%s17112_s2 + $0x330] sm:$0xf]  ;;  %v11353_v2 = vld [vmem:[%s17112_s2 + $0x338] sm:$0xf0] }
 0x145   : > { %1890 = vmatpush.bf16.msrb.mxu2 %v8299_v12  ;;  %1926 = vmatpush.bf16.msra.mxu0 %v8207_v13  ;;  %v11371_v12 = vld [vmem:[%s17112_s2 + $0x3c8] sm:$0xf0]  ;;  %v1697_v13 = vunpack.c.l.b16 %v938_v28  ;;  %v11350_v28 = vld [vmem:[%s17112_s2 + $0x320] sm:$0xf0] }
 0x146   : > { %v8547_v17 = vor.u32 %v11371_v12, %v8546_v11  ;;  %v8476_v12 = vld [vmem:[%s17112_s2 + $0x33c] sm:$0xf0] }
 0x147   : > { %8194 = vmatmul.msk.bf16.vlgmr.msra.gmra.mxu1 %vm1347_vm9, %v12795_v55  ;;  %1819 = vmatmul.bf16.vlgmr.msra.gmra.mxu2 %v12565_v15  ;;  %v8630_v55 = vld [vmem:[%s17112_s2 + $0x468] sm:$0xf] }
 0x148   : > { %8388 = vmatmul.msk.bf16.vlgmr.msrb.gmra.mxu0 %vm1347_vm9, %v12732_v3  ;;  %1937 = vmatpush.bf16.msra.mxu1 %v8387_v20  ;;  %v8631_v35 = vor.u32 %v11392_v25, %v8630_v55  ;;  %v1748_v20 = vpack.c.b16 %v1697_v13, %v1697_v13  ;;  %v8559_v55 = vor.u32 %v11374_v23, %v8558_v63  ;;  %v11368_v25 = vld [vmem:[%s17112_s2 + $0x3b0] sm:$0xf0]  ;;  %v13261_v63 = vrot.slane %v12634_v0, 1 }
 0x149   : > { %2360 = vmatpush.bf16.msrb.mxu0 %v8643_v10  ;;  %v8303_v10 = vor.u32 %v11279_v19, %v8302_v18  ;;  %v2048_v13 = vpack.c.b16 %v1020_v8, %v2045_v4  ;;  %v11394_v18 = vld [vmem:[%s17112_s2 + $0x484] sm:$0xf]  ;;  %v8644_v19 = vld [vmem:[%s17112_s2 + $0x48c] sm:$0xf0] }
 0x14a   : > { %v1809_v38 = vsel %vm1354_vm7, %v1748_v20, 0  ;;  %v8458_v20 = vld [vmem:[%s17112_s2 + $0x498] sm:$0x33]  ;;  %v8647_v21 = vor.u32 %v11394_v18, %v8644_v19  ;;  %v11363_v18 = vld [vmem:[%s17112_s2 + $0x388] sm:$0xf0] }
 0x14b   : > { %1962 = vmatpush.bf16.msra.mxu2 %v1809_v38  ;;  %v2225_v8 = vunpack.c.l.b16 %v8458_v20  ;;  %v2053_v38 = vrot.slane %v2048_v13, 1  ;;  %v8614_v19 = vld [vmem:[%s17112_s2 + $0x440] sm:$0xf] }
 0x14c   : > { %1938 = vmatpush.bf16.msra.mxu1 %v8375_v24  ;;  %v8534_v24 = vld [vmem:[%s17112_s2 + $0x3a8] sm:$0xf] }
 0x14d   : > { %2361 = vmatpush.bf16.msrb.mxu0 %v8631_v35  ;;  %v8535_v35 = vor.u32 %v11368_v25, %v8534_v24  ;;  %v2276_v24 = vpack.c.b16 %v2225_v8, %v2225_v8  ;;  %v11349_v25 = vld [vmem:[%s17112_s2 + $0x31c] sm:$0xf]  ;;  %v11379_v8 = vld [vmem:[%s17112_s2 + $0x40c] sm:$0xf] }
 0x150   : > { %1485 = vmatmul.bf16.gmra.mxu3 %v12746_v14  ;;  %1939 = vmatpush.bf16.msra.mxu1 %v8363_v31  ;;  %v8607_v14 = vor.u32 %v11386_v6, %v8606_v42  ;;  %v11365_v31 = vld [vmem:[%s17112_s2 + $0x398] sm:$0xf0]  ;;  %v8510_v42 = vld [vmem:[%s17112_s2 + $0x378] sm:$0xf]  ;;  %v11364_v6 = vld [vmem:[%s17112_s2 + $0x394] sm:$0xf] }
 0x151   : > { %2362 = vmatpush.bf16.msrb.mxu0 %v8619_v16  ;;  %v11367_v16 = vld [vmem:[%s17112_s2 + $0x3ac] sm:$0xf]  ;;  %v8527_v48 = vor.u32 %v11364_v6, %v8524_v56  ;;  %v11388_v56 = vld [vmem:[%s17112_s2 + $0x454] sm:$0xf] }
 0x152   : > { %v8539_v41 = vor.u32 %v11367_v16, %v8536_v32  ;;  %v8554_v32 = vld [vmem:[%s17112_s2 + $0x3c8] sm:$0xf] }
 0x154   : > { %1940 = vmatpush.bf16.msra.mxu1 %v8351_v43  ;;  %v11362_v43 = vld [vmem:[%s17112_s2 + $0x380] sm:$0xf0] }
 0x155   : > { %2363 = vmatpush.bf16.msrb.mxu0 %v8607_v14  ;;  %v13189_v14 = vpack.c.b16 %v12626_v49, %v12626_v49  ;;  %v8511_v53 = vor.u32 %v11362_v43, %v8510_v42  ;;  %v11396_v42 = vld [vmem:[%s17112_s2 + $0x490] sm:$0xf0] }
 0x157   : > { %8195 = vmatmul.msk.bf16.gmra.mxu1 %vm1347_vm9, %v12900_v61  ;;  %1824 = vmatmul.bf16.gmra.mxu2 %v13079_v45  ;;  %v11285_v61 = vld [vmem:[%s17112_s2 + $0x100] sm:$0xf0] }
 0x158   : > { %8389 = vmatmul.msk.bf16.gmra.mxu0 %vm1347_vm9, %v13083_v50  ;;  %1941 = vmatpush.bf16.msra.mxu1 %v8339_v54  ;;  %v8327_v46 = vor.u32 %v11285_v61, %v8326_v40  ;;  %v8498_v54 = vld [vmem:[%s17112_s2 + $0x360] sm:$0xf]  ;;  %v8486_v61 = vld [vmem:[%s17112_s2 + $0x348] sm:$0xf] }
 0x159   : > { %2364 = vmatpush.bf16.msrb.mxu0 %v8595_v59  ;;  %v8499_v49 = vor.u32 %v11359_v22, %v8498_v54  ;;  %v11361_v59 = vld [vmem:[%s17112_s2 + $0x37c] sm:$0xf] }
 0x15a   : > { %v8515_v40 = vor.u32 %v11361_v59, %v8512_v60  ;;  %v8542_v59 = vld [vmem:[%s17112_s2 + $0x3b0] sm:$0xf]  ;;  %v11369_v60 = vld [vmem:[%s17112_s2 + $0x3b8] sm:$0xf0] }
 0x15c   : > { %1942 = vmatpush.bf16.msra.mxu1 %v8327_v46  ;;  %v8487_v46 = vor.u32 %v11356_v62, %v8486_v61  ;;  %v8543_v61 = vor.u32 %v11369_v60, %v8542_v59  ;;  %v11393_v62 = vld [vmem:[%s17112_s2 + $0x478] sm:$0xf0]  ;;  %v8482_v60 = vld [vmem:[%s17112_s2 + $0x338] sm:$0xf] }
 0x15d   : > { %2365 = vmatpush.bf16.msrb.mxu0 %v8583_v1  ;;  %v8503_v1 = vor.u32 %v11358_v34, %v8500_v57  ;;  %v8608_v34 = vld [vmem:[%s17112_s2 + $0x444] sm:$0xf0] }
 0x160   : > { %1837 = vmatmul.bf16.vlgmr.msra.gmra.mxu3 %v12577_v58  ;;  %1943 = vmatpush.bf16.msra.mxu1 %v8315_v7  ;;  %v8491_v7 = vor.u32 %v11355_v33, %v8488_v5  ;;  %v11390_v33 = vld [vmem:[%s17112_s2 + $0x460] sm:$0xf0] }
 0x161   : > { %2366 = vmatpush.bf16.msrb.mxu0 %v8571_v9  ;;  %2342 = vmatpush.bf16.msra.mxu3 %v8547_v17  ;;  %v8462_v9 = vld [vmem:[%s17112_s2 + $0x318] sm:$0xf]  ;;  %v8479_v17 = vor.u32 %v11352_v37, %v8476_v12  ;;  %v8596_v37 = vld [vmem:[%s17112_s2 + $0x42c] sm:$0xf0] }
 0x162   : > { %v8463_v11 = vor.u32 %v11350_v28, %v8462_v9  ;;  %v11382_v28 = vld [vmem:[%s17112_s2 + $0x424] sm:$0xf] }
 0x163   : > { %v8599_v12 = vor.u32 %v11382_v28, %v8596_v37 }
 0x164   : > { %1944 = vmatpush.bf16.msra.mxu1 %v8303_v10  ;;  %v2226_v10 = vunpack.c.h.b16 %v8458_v20 }
 0x165   : > { %2367 = vmatpush.bf16.msrb.mxu0 %v8559_v55  ;;  %2343 = vmatpush.bf16.msra.mxu3 %v8535_v35  ;;  %v8464_v35 = vld [vmem:[%s17112_s2 + $0x324] sm:$0xf0] }
 0x166   : > { %v2277_v0 = vpack.c.b16 %v2226_v10, %v2226_v10  ;;  %v8467_v36 = vor.u32 %v11349_v25, %v8464_v35  ;;  %v8584_v10 = vld [vmem:[%s17112_s2 + $0x414] sm:$0xf0]  ;;  %v11360_v25 = vld [vmem:[%s17112_s2 + $0x370] sm:$0xf0] }
 0x167   : > { %1873 = vmatmul.bf16.vlgmr.msrb.gmra.mxu1 %v12565_v15  ;;  %1891 = vmatmul.bf16.vlgmr.msrb.gmra.mxu2 %v12577_v58 }
 0x168   : > { %1927 = vmatmul.bf16.vlgmr.msra.gmra.mxu0 %v12565_v15  ;;  %2396 = vmatpush.bf16.msrb.mxu2 %v8551_v39  ;;  %v8523_v15 = vor.u32 %v11365_v31, %v8522_v30  ;;  %v8632_v39 = vld [vmem:[%s17112_s2 + $0x474] sm:$0xf0]  ;;  %v13282_v30 = vsel %vm720_vm5, %v2053_v38, %v13261_v63  ;;  %v2334_v31 = vsel %vm1354_vm7, %v2276_v24, 0  ;;  %v8587_v38 = vor.u32 %v11379_v8, %v8584_v10  ;;  %v8506_v24 = vld [vmem:[%s17112_s2 + $0x368] sm:$0xf] }
 0x169   : > { %v8635_v16 = vor.u32 %v11391_v29, %v8632_v39  ;;  %2385 = vmatpush.bf16.msrb.mxu1 %v2334_v31  ;;  %v8507_v35 = vor.u32 %v11360_v25, %v8506_v24  ;;  %v1974_v39 = vld [vmem:[#allocation3 + $0x8] sm:$0xe]  ;;  %v11376_v31 = vld [vmem:[%s17112_s2 + $0x3f4] sm:$0xf] }
 0x16a   : > { %2344 = vmatpush.bf16.msra.mxu3 %v8523_v15  ;;  %v2337_v15 = vsel %vm1354_vm7, %v2277_v0, 0 }
 0x16b   : > { %2439 = vmatpush.bf16.msra.mxu0 %v2337_v15  ;;  %v8572_v15 = vld [vmem:[%s17112_s2 + $0x3fc] sm:$0xf0] }
 0x16c   : > { %2397 = vmatpush.bf16.msrb.mxu2 %v8539_v41 }
 0x16e   : > { %2345 = vmatpush.bf16.msra.mxu3 %v8511_v53 }
 0x170   : > { %1842 = vmatmul.bf16.gmra.mxu3 %v13189_v14  ;;  %2398 = vmatpush.bf16.msrb.mxu2 %v8527_v48  ;;  %v8620_v48 = vld [vmem:[%s17112_s2 + $0x45c] sm:$0xf0] }
 0x171   : > { %v8623_v22 = vor.u32 %v11388_v56, %v8620_v48  ;;  %v11381_v56 = vld [vmem:[%s17112_s2 + $0x418] sm:$0xf0] }
 0x172   : > { %2346 = vmatpush.bf16.msra.mxu3 %v8499_v49  ;;  %v11373_v48 = vld [vmem:[%s17112_s2 + $0x3dc] sm:$0xf] }
 0x174   : > { %2399 = vmatpush.bf16.msrb.mxu2 %v8515_v40  ;;  %v8638_v40 = vld [vmem:[%s17112_s2 + $0x470] sm:$0xf] }
 0x175   : > { %v8639_v57 = vor.u32 %v11393_v62, %v8638_v40  ;;  %v11354_v40 = vld [vmem:[%s17112_s2 + $0x340] sm:$0xf0] }
 0x176   : > { %2347 = vmatpush.bf16.msra.mxu3 %v8487_v46  ;;  %v11385_v46 = vld [vmem:[%s17112_s2 + $0x43c] sm:$0xf] }
 0x177   : > { %1878 = vmatmul.bf16.gmra.mxu1 %v13079_v45  ;;  %1896 = vmatmul.bf16.gmra.mxu2 %v13189_v14 }
 0x178   : > { %1932 = vmatmul.bf16.gmra.mxu0 %v13079_v45  ;;  %v8475_v45 = vor.u32 %v11353_v2, %v8474_v47  ;;  %2400 = vmatpush.bf16.msrb.mxu2 %v8503_v1  ;;  %v8611_v1 = vor.u32 %v11385_v46, %v8608_v34  ;;  %v8530_v47 = vld [vmem:[%s17112_s2 + $0x398] sm:$0xf]  ;;  %v11366_v2 = vld [vmem:[%s17112_s2 + $0x3a0] sm:$0xf0]  ;;  %v8483_v46 = vor.u32 %v11354_v40, %v8482_v60 }
 0x179   : > { %v8531_v4 = vor.u32 %v11366_v2, %v8530_v47  ;;  %v11378_v34 = vld [vmem:[%s17112_s2 + $0x400] sm:$0xf0]  ;;  %v13425_v47 = vrot.slane %v12772_v26, 1  ;;  %v11351_v26 = vld [vmem:[%s17112_s2 + $0x328] sm:$0xf0] }
 0x17a   : > { %2348 = vmatpush.bf16.msra.mxu3 %v8475_v45  ;;  %v8626_v45 = vld [vmem:[%s17112_s2 + $0x458] sm:$0xf] }
 0x17b   : > { %v8627_v5 = vor.u32 %v11390_v33, %v8626_v45 }
 0x17c   : > { %2401 = vmatpush.bf16.msrb.mxu2 %v8491_v7 }
 0x17e   : > { %2349 = vmatpush.bf16.msra.mxu3 %v8463_v11 }
 0x180   : > { %8390 = vmatmul.msk.bf16.vlgmr.msrb.gmra.mxu3 %vm1347_vm9, %v12732_v3  ;;  %2402 = vmatpush.bf16.msrb.mxu2 %v8479_v17  ;;  %v8518_v17 = vld [vmem:[%s17112_s2 + $0x380] sm:$0xf] }
 0x181   : > { %v8519_v20 = vor.u32 %v11363_v18, %v8518_v17 }
 0x182   : > { %2414 = vmatpush.bf16.msrb.mxu3 %v8647_v21  ;;  %v11387_v21 = vld [vmem:[%s17112_s2 + $0x448] sm:$0xf0] }
 0x184   : > { %v1373_v23 = vpop.f32.mrf.mxu1  ;;  %2403 = vmatpush.bf16.msrb.mxu2 %v8467_v36 }
 0x185   : > { %v13263_v55 = vpop.f32.mrf.mxu0 }
 0x186   : > { %2415 = vmatpush.bf16.msrb.mxu3 %v8635_v16 }
 0x187   : > { %1945 = vmatmul.bf16.vlgmr.msra.gmra.mxu1 %v12577_v58  ;;  %8392 = vmatmul.msk.bf16.vlgmr.msra.gmra.mxu2 %vm1347_vm9, %v12732_v3  ;;  %v11372_v58 = vld [vmem:[%s17112_s2 + $0x3d0] sm:$0xf0]  ;;  %v8650_v3 = vld [vmem:[%s17112_s2 + $0x488] sm:$0xf] }
 0x188   : > { %2368 = vmatmul.bf16.vlgmr.msrb.gmra.mxu0 %v13282_v30  ;;  %v8555_v41 = vor.u32 %v11372_v58, %v8554_v32  ;;  %v8651_v6 = vor.u32 %v11396_v42, %v8650_v3  ;;  %v8575_v32 = vor.u32 %v11376_v31, %v8572_v15  ;;  %v8494_v3 = vld [vmem:[%s17112_s2 + $0x350] sm:$0xf] }
 0x189   : > { %v8590_v42 = vld [vmem:[%s17112_s2 + $0x410] sm:$0xf] }
 0x18a   : > { %v1391_v43 = vpop.f32.mrf.mxu2  ;;  %2450 = vmatpush.bf16.msra.mxu1 %v8555_v41  ;;  %2468 = vmatpush.bf16.msra.mxu2 %v8651_v6  ;;  %v11357_v41 = vld [vmem:[%s17112_s2 + $0x358] sm:$0xf0] }
 0x18b   : > { %v13299_v53 = vadd.f32 %v1391_v43, %v1373_v23  ;;  %2416 = vmatpush.bf16.msrb.mxu3 %v8623_v22  ;;  %v8615_v23 = vor.u32 %v11387_v21, %v8614_v19  ;;  %v2046_v43 = vunpack.c.l.b16 %v1974_v39  ;;  %v8495_v6 = vor.u32 %v11357_v41, %v8494_v3 }
 0x18c   : > { %v1375_v54 = vpop.f32.mrf.mxu1  ;;  %v8591_v22 = vor.u32 %v11381_v56, %v8590_v42 }
 0x18d   : > { %v13307_v49 = vpop.f32.mrf.mxu0  ;;  %v2049_v62 = vpack.c.b16 %v1021_v52, %v2046_v43 }
 0x18e   : > { %2451 = vmatpush.bf16.msra.mxu1 %v8543_v61  ;;  %2469 = vmatpush.bf16.msra.mxu2 %v8639_v57  ;;  %v8578_v61 = vld [vmem:[%s17112_s2 + $0x3f8] sm:$0xf] }
 0x18f   : > { %2417 = vmatpush.bf16.msrb.mxu3 %v8611_v1  ;;  %v8579_v57 = vor.u32 %v11378_v34, %v8578_v61  ;;  %v2056_v33 = vrot.slane %v2049_v62, 1 }
 0x190   : > { %8391 = vmatmul.msk.bf16.gmra.mxu3 %vm1347_vm9, %v13083_v50 }
 0x192   : > { %v1393_v7 = vpop.f32.mrf.mxu2  ;;  %2452 = vmatpush.bf16.msra.mxu1 %v8531_v4  ;;  %2470 = vmatpush.bf16.msra.mxu2 %v8627_v5  ;;  %v8470_v5 = vld [vmem:[%s17112_s2 + $0x320] sm:$0xf] }
 0x193   : > { %v13341_v9 = vadd.f32 %v1393_v7, %v1375_v54  ;;  %2418 = vmatpush.bf16.msrb.mxu3 %v8599_v12  ;;  %v8560_v54 = vld [vmem:[%s17112_s2 + $0x3e4] sm:$0xf0]  ;;  %v8566_v7 = vld [vmem:[%s17112_s2 + $0x3e0] sm:$0xf]  ;;  %v8471_v28 = vor.u32 %v11351_v26, %v8470_v5 }
 0x194   : > { %v1378_v11 = vpop.f32.mrf.mxu1  ;;  %v8563_v59 = vor.u32 %v11373_v48, %v8560_v54 }
 0x195   : > { %v13349_v13 = vpop.f32.mrf.mxu0 }
 0x196   : > { %2453 = vmatpush.bf16.msra.mxu1 %v8519_v20  ;;  %2471 = vmatpush.bf16.msra.mxu2 %v8615_v23 }
 0x197   : > { %1950 = vmatmul.bf16.gmra.mxu1 %v13189_v14  ;;  %8393 = vmatmul.msk.bf16.gmra.mxu2 %vm1347_vm9, %v13083_v50  ;;  %v8602_v14 = vld [vmem:[%s17112_s2 + $0x428] sm:$0xf]  ;;  %v11384_v50 = vld [vmem:[%s17112_s2 + $0x430] sm:$0xf0] }
 0x198   : > { %2373 = vmatmul.bf16.gmra.mxu0 %v13261_v63  ;;  %2419 = vmatpush.bf16.msrb.mxu3 %v8587_v38  ;;  %v8603_v29 = vor.u32 %v11384_v50, %v8602_v14 }
 0x19a   : > { %v1396_v0 = vpop.f32.mrf.mxu2  ;;  %2454 = vmatpush.bf16.msra.mxu1 %v8507_v35  ;;  %2472 = vmatpush.bf16.msra.mxu2 %v8603_v29  ;;  %v8459_v35 = vld [vmem:[%s17112_s2 + $0x4a0] sm:$0x3] }
 0x19b   : > { %v1397_v36 = vadd.f32 %v1396_v0, %v1378_v11  ;;  %v2227_v0 = vunpack.c.l.b16 %v8459_v35 }
 0x19c   : > { %v1380_v16 = vpop.f32.mrf.mxu1  ;;  %2420 = vmatpush.bf16.msrb.mxu3 %v8575_v32 }
 0x19d   : > { %v1434_v58 = vpop.f32.mrf.mxu0 }
 0x19e   : > { %2455 = vmatpush.bf16.msra.mxu1 %v8495_v6  ;;  %2473 = vmatpush.bf16.msra.mxu2 %v8591_v22 }
 0x1a0   : > { %2350 = vmatmul.bf16.vlgmr.msra.gmra.mxu3 %v12701_v44 }
 0x1a1   : > { %2421 = vmatpush.bf16.msrb.mxu3 %v8563_v59 }
 0x1a2   : > { %v1398_v1 = vpop.f32.mrf.mxu2  ;;  %2456 = vmatpush.bf16.msra.mxu1 %v8483_v46  ;;  %2474 = vmatpush.bf16.msra.mxu2 %v8579_v57 }
 0x1a3   : > { %v1409_v2 = vpop.f32.mrf.mxu3 }
 0x1a4   : > { %v1410_v45 = vadd.f32 %v1409_v2, %v13299_v53  ;;  %v1445_v4 = vpop.f32.mrf.mxu1  ;;  %v13440_v53 = vsel %vm720_vm5, %v2056_v33, %v13425_v47 }
 0x1a5   : > { %v1446_v51 = vadd.f32 %v1445_v4, %v13263_v55  ;;  %v1499_v52 = vpop.f32.mrf.mxu0  ;;  %v11375_v55 = vld [vmem:[%s17112_s2 + $0x3e8] sm:$0xf0] }
 0x1a6   : > { %v8567_v37 = vor.u32 %v11375_v55, %v8566_v7  ;;  %2457 = vmatpush.bf16.msra.mxu1 %v8471_v28 }
 0x1a7   : > { %8652 = vmatmul.msk.bf16.vlgmr.msrb.gmra.mxu1 %vm1347_vm9, %v13440_v53  ;;  %2404 = vmatmul.bf16.vlgmr.msrb.gmra.mxu2 %v12701_v44 }
 0x1a8   : > { %8654 = vmatmul.msk.bf16.vlgmr.msra.gmra.mxu0 %vm1347_vm9, %v13440_v53  ;;  %2475 = vmatpush.bf16.msra.mxu2 %v8567_v37 }
 0x1aa   : > { %v1463_v11 = vpop.f32.mrf.mxu2 }
 0x1ab   : > { %v1464_v12 = vadd.f32 %v1463_v11, %v1446_v51  ;;  %v1411_v17 = vpop.f32.mrf.mxu3 }
 0x1ac   : > { %v13451_v18 = vadd.f32 %v1411_v17, %v13341_v9  ;;  %v13453_v19 = vpop.f32.mrf.mxu1 }
 0x1ad   : > { %v13455_v20 = vpop.f32.mrf.mxu0 }
 0x1b0   : > { %2355 = vmatmul.bf16.gmra.mxu3 %v12670_v27 }
 0x1b2   : > { %v13458_v21 = vpop.f32.mrf.mxu2 }
 0x1b3   : > { %v1414_v8 = vpop.f32.mrf.mxu3 }
 0x1b4   : > { %v1415_v10 = vadd.f32 %v1414_v8, %v1397_v36  ;;  %v1450_v23 = vpop.f32.mrf.mxu1 }
 0x1b5   : > { %v1451_v38 = vadd.f32 %v1450_v23, %v13349_v13  ;;  %v1504_v24 = vpop.f32.mrf.mxu0  ;;  %v2278_v13 = vpack.c.b16 %v2227_v0, %v2227_v0 }
 0x1b7   : > { %8653 = vmatmul.msk.bf16.gmra.mxu1 %vm1347_vm9, %v13425_v47  ;;  %2409 = vmatmul.bf16.gmra.mxu2 %v12670_v27  ;;  %v2340_v36 = vsel %vm1354_vm7, %v2278_v13, 0  ;;  %vm5630_vm7 = vcmask 392192  }
 0x1b8   : > { %8655 = vmatmul.msk.bf16.gmra.mxu0 %vm1347_vm9, %v13425_v47  ;;  %2493 = vmatpush.bf16.msra.mxu3 %v2340_v36 }
 0x1ba   : > { %v1468_v9 = vpop.f32.mrf.mxu2 }
 0x1bb   : > { %v1469_v25 = vadd.f32 %v1468_v9, %v1451_v38  ;;  %v1416_v14 = vpop.f32.mrf.mxu3 }
 0x1bc   : > { %v1452_v50 = vpop.f32.mrf.mxu1 }
 0x1bd   : > { %v1506_v29 = vpop.f32.mrf.mxu0 }
 0x1c0   : > { %2422 = vmatmul.bf16.vlgmr.msrb.gmra.mxu3 %v13282_v30 }
 0x1c2   : > { %v1470_v39 = vpop.f32.mrf.mxu2 }
 0x1c3   : > { %v1481_v31 = vpop.f32.mrf.mxu3 }
 0x1c4   : > { %v1500_v15 = vadd.f32 %v1499_v52, %v1481_v31  ;;  %v1517_v16 = vpop.f32.mrf.mxu1 }
 0x1c5   : > { %v1856_v32 = vpop.f32.mrf.mxu0 }
 0x1c6   : > { %v1518_v58 = vadd.f32 %v1517_v16, %v1500_v15 }
 0x1c7   : > { %2458 = vmatmul.bf16.vlgmr.msra.gmra.mxu1 %v12701_v44  ;;  %2476 = vmatmul.bf16.vlgmr.msra.gmra.mxu2 %v13282_v30 }
 0x1ca   : > { %v1820_v3 = vpop.f32.mrf.mxu2 }
 0x1cb   : > { %v1821_v41 = vadd.f32 %v1820_v3, %v1410_v45  ;;  %v13473_v42 = vpop.f32.mrf.mxu3 }
 0x1cc   : > { %v13475_v43 = vpop.f32.mrf.mxu1 }
 0x1cd   : > { %v13477_v6 = vpop.f32.mrf.mxu0 }
 0x1d0   : > { %2427 = vmatmul.bf16.gmra.mxu3 %v13261_v63 }
 0x1d2   : > { %v13480_v56 = vpop.f32.mrf.mxu2 }
 0x1d3   : > { %v1486_v48 = vpop.f32.mrf.mxu3 }
 0x1d4   : > { %v1505_v54 = vadd.f32 %v1504_v24, %v1486_v48  ;;  %v1522_v22 = vpop.f32.mrf.mxu1 }
 0x1d5   : > { %v1861_v59 = vpop.f32.mrf.mxu0 }
 0x1d6   : > { %v1523_v60 = vadd.f32 %v1522_v22, %v1505_v54 }
 0x1d7   : > { %2463 = vmatmul.bf16.gmra.mxu1 %v12670_v27  ;;  %2481 = vmatmul.bf16.gmra.mxu2 %v13261_v63 }
 0x1da   : > { %v1825_v44 = vpop.f32.mrf.mxu2 }
 0x1db   : > { %v1826_v30 = vadd.f32 %v1825_v44, %v1415_v10  ;;  %v1488_v40 = vpop.f32.mrf.mxu3 }
 0x1dc   : > { %v1524_v61 = vpop.f32.mrf.mxu1 }
 0x1dd   : > { %v1863_v62 = vpop.f32.mrf.mxu0  ;;  %v8840_v61 = vld [vmem:[%s17113_s3 + $0x2e8] sm:$0xf] }
 0x1de   : > { %v11491_v62 = vld [vmem:[%s17113_s3 + $0x2f0] sm:$0xf0] }
 0x1e0   : > { %8656 = vmatmul.msk.bf16.vlgmr.msra.gmra.mxu3 %vm1347_vm9, %v13440_v53 }
 0x1e2   : > { %v1827_v46 = vpop.f32.mrf.mxu2 }
 0x1e3   : > { %v1838_v34 = vpop.f32.mrf.mxu3 }
 0x1e4   : > { %v1839_v57 = vadd.f32 %v1838_v34, %v1821_v41  ;;  %v1874_v1 = vpop.f32.mrf.mxu1  ;;  %v8841_v34 = vor.u32 %v11491_v62, %v8840_v61  ;;  %v11482_v61 = vld [vmem:[%s17113_s3 + $0x2a8] sm:$0xf0]  ;;  %v8900_v62 = vld [vmem:[%s17113_s3 + $0x360] sm:$0xf] }
 0x1e5   : > { %v1875_v2 = vadd.f32 %v1874_v1, %v1464_v12  ;;  %v1928_v45 = vpop.f32.mrf.mxu0  ;;  %v11515_v1 = vld [vmem:[%s17113_s3 + $0x3b0] sm:$0xf0] }
 0x1e6   : > { %v13486_v4 = vadd.f32 %v1856_v32, %v1839_v57  ;;  %v1929_v33 = vadd.f32 %v1928_v45, %v1518_v58  ;;  %v8936_v57 = vld [vmem:[%s17113_s3 + $0x3a8] sm:$0xf]  ;;  %3191 = vmatpush.bf16.msrb.mxu0 %v8841_v34 }
 0x1ea   : > { %v1892_v27 = vpop.f32.mrf.mxu2 }
 0x1eb   : > { %v1893_v51 = vadd.f32 %v1892_v27, %v1875_v2  ;;  %v13488_v63 = vpop.f32.mrf.mxu3  ;;  %v11490_v2 = vld [vmem:[%s17113_s3 + $0x2ec] sm:$0xf]  ;;  %v8842_v27 = vld [vmem:[%s17113_s3 + $0x2f4] sm:$0xf0] }
 0x1ec   : > { %v13490_v52 = vpop.f32.mrf.mxu1 }
 0x1ed   : > { %v13492_v5 = vpop.f32.mrf.mxu0 }
 0x1f0   : > { %8657 = vmatmul.msk.bf16.gmra.mxu3 %vm1347_vm9, %v13425_v47 }
 0x1f2   : > { %v13496_v26 = vpop.f32.mrf.mxu2 }
 0x1f3   : > { %v1843_v7 = vpop.f32.mrf.mxu3 }
 0x1f4   : > { %v1844_v53 = vadd.f32 %v1843_v7, %v1826_v30  ;;  %v1879_v28 = vpop.f32.mrf.mxu1  ;;  %v8845_v7 = vor.u32 %v11490_v2, %v8842_v27  ;;  %v8806_v2 = vld [vmem:[%s17113_s3 + $0x2ac] sm:$0xf0] }
 0x1f5   : > { %v1880_v55 = vadd.f32 %v1879_v28, %v1469_v25  ;;  %v1933_v37 = vpop.f32.mrf.mxu0  ;;  %v11488_v28 = vld [vmem:[%s17113_s3 + $0x2d8] sm:$0xf0] }
 0x1f6   : > { %v13498_v11 = vadd.f32 %v1861_v59, %v1844_v53  ;;  %v1934_v12 = vadd.f32 %v1933_v37, %v1523_v60  ;;  %v8828_v53 = vld [vmem:[%s17113_s3 + $0x2d0] sm:$0xf]  ;;  %3245 = vmatpush.bf16.msrb.mxu3 %v8845_v7 }
 0x1f7   : > { %v8829_v37 = vor.u32 %v11488_v28, %v8828_v53  ;;  %v8792_v53 = vld [vmem:[%s17113_s3 + $0x288] sm:$0xf]  ;;  %v11479_v28 = vld [vmem:[%s17113_s3 + $0x290] sm:$0xf0] }
 0x1f9   : > { %3192 = vmatpush.bf16.msrb.mxu0 %v8829_v37  ;;  %v8793_v37 = vor.u32 %v11479_v28, %v8792_v53  ;;  %v11472_v53 = vld [vmem:[%s17113_s3 + $0x25c] sm:$0xf]  ;;  %v8770_v28 = vld [vmem:[%s17113_s3 + $0x264] sm:$0xf0] }
 0x1fa   : > { %v1897_v17 = vpop.f32.mrf.mxu2 }
 0x1fb   : > { %v1898_v8 = vadd.f32 %v1897_v17, %v1880_v55  ;;  %v1845_v10 = vpop.f32.mrf.mxu3  ;;  %v8924_v55 = vld [vmem:[%s17113_s3 + $0x390] sm:$0xf]  ;;  %v11487_v17 = vld [vmem:[%s17113_s3 + $0x2d4] sm:$0xf] }
 0x1fc   : > { %v1881_v23 = vpop.f32.mrf.mxu1 }
 0x1fd   : > { %v1935_v38 = vpop.f32.mrf.mxu0 }
 0x202   : > { %v1899_v24 = vpop.f32.mrf.mxu2 }
 0x203   : > { %v1910_v9 = vpop.f32.mrf.mxu3  ;;  %v8816_v24 = vld [vmem:[%s17113_s3 + $0x2b8] sm:$0xf] }
 0x204   : > { %v13500_v14 = vadd.f32 %v1910_v9, %v1893_v51  ;;  %v1946_v47 = vpop.f32.mrf.mxu1  ;;  %v11485_v9 = vld [vmem:[%s17113_s3 + $0x2c0] sm:$0xf0] }
 0x205   : > { %v1947_v35 = vadd.f32 %v1946_v47, %v1929_v33  ;;  %v13502_v50 = vpop.f32.mrf.mxu0  ;;  %v8937_v33 = vor.u32 %v11515_v1, %v8936_v57  ;;  %v11506_v57 = vld [vmem:[%s17113_s3 + $0x368] sm:$0xf0]  ;;  %v11481_v1 = vld [vmem:[%s17113_s3 + $0x2a4] sm:$0xf] }
 0x206   : > { %v8809_v27 = vor.u32 %v11481_v1, %v8806_v2  ;;  %v11473_v1 = vld [vmem:[%s17113_s3 + $0x260] sm:$0xf0]  ;;  %v8864_v2 = vld [vmem:[%s17113_s3 + $0x318] sm:$0xf] }
 0x207   : > { %3209 = vmatpush.bf16.msrb.mxu1 %v8937_v33  ;;  %v8901_v33 = vor.u32 %v11506_v57, %v8900_v62  ;;  %v8768_v57 = vld [vmem:[%s17113_s3 + $0x258] sm:$0xf] }
 0x20a   : > { %v1964_v0 = vpop.f32.mrf.mxu2 }
 0x20b   : > { %v13504_v29 = vadd.f32 %v1964_v0, %v1947_v35  ;;  %v13506_v25 = vpop.f32.mrf.mxu3  ;;  %v8817_v35 = vor.u32 %v11485_v9, %v8816_v24  ;;  %v8912_v0 = vld [vmem:[%s17113_s3 + $0x378] sm:$0xf] }
 0x20c   : > { %v13508_v13 = vpop.f32.mrf.mxu1  ;;  %v8794_v24 = vld [vmem:[%s17113_s3 + $0x294] sm:$0xf0] }
 0x20d   : > { %v13510_v36 = vpop.f32.mrf.mxu0  ;;  %3193 = vmatpush.bf16.msrb.mxu0 %v8817_v35 }
 0x212   : > { %v13512_v39 = vpop.f32.mrf.mxu2 }
 0x213   : > { %v1915_v31 = vpop.f32.mrf.mxu3 }
 0x214   : > { %v13514_v15 = vadd.f32 %v1915_v31, %v1898_v8  ;;  %v1951_v16 = vpop.f32.mrf.mxu1  ;;  %v8830_v8 = vld [vmem:[%s17113_s3 + $0x2dc] sm:$0xf0]  ;;  %v11509_v31 = vld [vmem:[%s17113_s3 + $0x380] sm:$0xf0] }
 0x215   : > { %v1952_v32 = vadd.f32 %v1951_v16, %v1934_v12  ;;  %v13516_v58 = vpop.f32.mrf.mxu0  ;;  %v11512_v12 = vld [vmem:[%s17113_s3 + $0x398] sm:$0xf0]  ;;  %v8833_v23 = vor.u32 %v11487_v17, %v8830_v8  ;;  %v11503_v17 = vld [vmem:[%s17113_s3 + $0x350] sm:$0xf0]  ;;  %v11478_v8 = vld [vmem:[%s17113_s3 + $0x28c] sm:$0xf] }
 0x216   : > { %v8925_v10 = vor.u32 %v11512_v12, %v8924_v55  ;;  %v11484_v16 = vld [vmem:[%s17113_s3 + $0x2bc] sm:$0xf]  ;;  %v8888_v12 = vld [vmem:[%s17113_s3 + $0x348] sm:$0xf]  ;;  %v8797_v35 = vor.u32 %v11478_v8, %v8794_v24  ;;  %v1823_v8 = vadd.f32 %v13480_v56, %v13451_v18  ;;  %v11470_v18 = vld [vmem:[%s17113_s3 + $0x248] sm:$0xf0] }
 0x217   : > { %3246 = vmatpush.bf16.msrb.mxu3 %v8833_v23  ;;  %v8889_v23 = vor.u32 %v11503_v17, %v8888_v12  ;;  %v8773_v17 = vor.u32 %v11472_v53, %v8770_v28  ;;  %v11539_v53 = vld [vmem:[%s17113_s3 + $0x470] sm:$0xf0]  ;;  %v11538_v28 = vld [vmem:[%s17113_s3 + $0x46c] sm:$0xf] }
 0x218   : > { %3210 = vmatpush.bf16.msrb.mxu1 %v8925_v10 }
 0x21a   : > { %v1969_v3 = vpop.f32.mrf.mxu2 }
 0x21b   : > { %v13518_v41 = vadd.f32 %v1969_v3, %v1952_v32  ;;  %v1917_v48 = vpop.f32.mrf.mxu3  ;;  %v8913_v3 = vor.u32 %v11509_v31, %v8912_v0  ;;  %v8780_v31 = vld [vmem:[%s17113_s3 + $0x270] sm:$0xf] }
 0x21c   : > { %v1953_v54 = vpop.f32.mrf.mxu1  ;;  %v8818_v48 = vld [vmem:[%s17113_s3 + $0x2c4] sm:$0xf0] }
 0x21d   : > { %v2376_v22 = vpop.f32.mrf.mxu0  ;;  %3211 = vmatpush.bf16.msrb.mxu1 %v8913_v3  ;;  %v8876_v3 = vld [vmem:[%s17113_s3 + $0x330] sm:$0xf] }
 0x21e   : > { %v8821_v22 = vor.u32 %v11484_v16, %v8818_v48  ;;  %v11476_v16 = vld [vmem:[%s17113_s3 + $0x278] sm:$0xf0] }
 0x21f   : > { %v8781_v48 = vor.u32 %v11476_v16, %v8780_v31 }
 0x220   : > { %3247 = vmatpush.bf16.msrb.mxu3 %v8821_v22  ;;  %v11500_v22 = vld [vmem:[%s17113_s3 + $0x338] sm:$0xf0] }
 0x221   : > { %3212 = vmatpush.bf16.msrb.mxu1 %v8901_v33 }
 0x222   : > { %v1971_v59 = vpop.f32.mrf.mxu2 }
 0x223   : > { %v13520_v60 = vpop.f32.mrf.mxu3  ;;  %v8804_v59 = vld [vmem:[%s17113_s3 + $0x2a0] sm:$0xf] }
 0x224   : > { %v13522_v44 = vpop.f32.mrf.mxu1  ;;  %v8805_v34 = vor.u32 %v11482_v61, %v8804_v59  ;;  %3248 = vmatpush.bf16.msrb.mxu3 %v8809_v27  ;;  %v2370_v0 = vadd.f32 %v13502_v50, %v13520_v60  ;;  %v11475_v50 = vld [vmem:[%s17113_s3 + $0x274] sm:$0xf]  ;;  %v8782_v60 = vld [vmem:[%s17113_s3 + $0x27c] sm:$0xf0]  ;;  %v8877_v59 = vor.u32 %v11500_v22, %v8876_v3  ;;  %v8769_v27 = vor.u32 %v11473_v1, %v8768_v57 }
 0x225   : > { %v13524_v30 = vpop.f32.mrf.mxu0  ;;  %3213 = vmatpush.bf16.msrb.mxu1 %v8889_v23  ;;  %v8785_v61 = vor.u32 %v11475_v50, %v8782_v60  ;;  %v11514_v50 = vld [vmem:[%s17113_s3 + $0x3ac] sm:$0xf] }
 0x226   : > { %3194 = vmatpush.bf16.msrb.mxu0 %v8805_v34  ;;  %v2388_v62 = vadd.f32 %v13522_v44, %v2370_v0  ;;  %v11497_v44 = vld [vmem:[%s17113_s3 + $0x320] sm:$0xf0] }
 0x227   : > { %v8865_v12 = vor.u32 %v11497_v44, %v8864_v2 }
 0x228   : > { %3249 = vmatpush.bf16.msrb.mxu3 %v8797_v35  ;;  %v2504_v23 = vadd.f32 %v2388_v62, %v13486_v4  ;;  %v11494_v4 = vld [vmem:[%s17113_s3 + $0x308] sm:$0xf0] }
 0x229   : > { %3214 = vmatpush.bf16.msrb.mxu1 %v8877_v59  ;;  %v11516_v59 = vld [vmem:[%s17113_s3 + $0x3b8] sm:$0xf0] }
 0x22a   : > { %v13526_v40 = vpop.f32.mrf.mxu2  ;;  %3195 = vmatpush.bf16.msrb.mxu0 %v8793_v37  ;;  %v2513_v16 = vmax.f32 %v2504_v23, 0.0 }
 0x22b   : > { %v13534_v46 = vpop.f32.mrf.mxu3 }
 0x22c   : > { %v13545_v45 = vpop.f32.mrf.mxu1  ;;  %3250 = vmatpush.bf16.msrb.mxu3 %v8785_v61  ;;  %v2372_v24 = vadd.f32 %v13510_v36, %v13534_v46  ;;  %v11469_v36 = vld [vmem:[%s17113_s3 + $0x244] sm:$0xf] }
 0x22d   : > { %v13550_v51 = vpop.f32.mrf.mxu0  ;;  %3215 = vmatpush.bf16.msrb.mxu1 %v8865_v12 }
 0x22e   : > { %3196 = vmatpush.bf16.msrb.mxu0 %v8781_v48  ;;  %v2390_v3 = vadd.f32 %v13545_v45, %v2372_v24  ;;  %v8944_v45 = vld [vmem:[%s17113_s3 + $0x3b0] sm:$0xf] }
 0x230   : > { %3251 = vmatpush.bf16.msrb.mxu3 %v8773_v17 }
 0x232   : > { %v13570_v38 = vpop.f32.mrf.mxu2  ;;  %3197 = vmatpush.bf16.msrb.mxu0 %v8769_v27 }
 0x233   : > { %v13578_v47 = vpop.f32.mrf.mxu3 }
 0x234   : > { %v13589_v32 = vpop.f32.mrf.mxu1  ;;  %v2375_v1 = vadd.f32 %v13516_v58, %v13578_v47  ;;  %v8932_v58 = vld [vmem:[%s17113_s3 + $0x398] sm:$0xf] }
 0x235   : > { %v13594_v54 = vpop.f32.mrf.mxu0 }
 0x236   : > { %v2393_v12 = vadd.f32 %v13589_v32, %v2375_v1  ;;  %v8914_v32 = vld [vmem:[%s17113_s3 + $0x384] sm:$0xf0]  ;;  %v11533_v1 = vld [vmem:[%s17113_s3 + $0x440] sm:$0xf0] }
 0x23a   : > { %v13614_v7 = vpop.f32.mrf.mxu2 }
 0x23b   : > { %v2358_v55 = vpop.f32.mrf.mxu3 }
 0x23c   : > { %v2394_v10 = vpop.f32.mrf.mxu1 }
 0x23d   : > { %v2448_v9 = vpop.f32.mrf.mxu0  ;;  %v1448_v10 = vadd.f32 %v13453_v19, %v13307_v49  ;;  %v8852_v49 = vld [vmem:[%s17113_s3 + $0x300] sm:$0xf]  ;;  %v1841_v19 = vadd.f32 %v13488_v63, %v1823_v8  ;;  %v9034_v8 = vld [vmem:[%s17113_s3 + $0x474] sm:$0xf0] }
 0x23e   : > { %v8853_v0 = vor.u32 %v11494_v4, %v8852_v49 }
 0x23f   : > { %v1466_v46 = vadd.f32 %v13458_v21, %v1448_v10  ;;  %v8938_v21 = vld [vmem:[%s17113_s3 + $0x3b4] sm:$0xf0] }
 0x240   : > { %3216 = vmatpush.bf16.msrb.mxu1 %v8853_v0  ;;  %v11535_v0 = vld [vmem:[%s17113_s3 + $0x454] sm:$0xf] }
 0x241   : > { %v1877_v31 = vadd.f32 %v13490_v52, %v1466_v46  ;;  %v8941_v52 = vor.u32 %v11514_v50, %v8938_v21  ;;  %v9020_v46 = vld [vmem:[%s17113_s3 + $0x450] sm:$0xf] }
 0x242   : > { %v2412_v34 = vpop.f32.mrf.mxu2 }
 0x243   : > { %v2423_v33 = vpop.f32.mrf.mxu3  ;;  %v1895_v61 = vadd.f32 %v13496_v26, %v1877_v31  ;;  %v11511_v26 = vld [vmem:[%s17113_s3 + $0x394] sm:$0xf]  ;;  %v2510_v31 = vadd.f32 %v2393_v12, %v13498_v11  ;;  %v11505_v11 = vld [vmem:[%s17113_s3 + $0x364] sm:$0xf] }
 0x244   : > { %v2424_v55 = vadd.f32 %v2423_v33, %v13526_v40  ;;  %v13674_v37 = vpop.f32.mrf.mxu1  ;;  %v8756_v40 = vld [vmem:[%s17113_s3 + $0x240] sm:$0xf] }
 0x245   : > { %v8757_v56 = vor.u32 %v11470_v18, %v8756_v40  ;;  %v1913_v2 = vadd.f32 %v13506_v25, %v1895_v61  ;;  %v11513_v25 = vld [vmem:[%s17113_s3 + $0x3a0] sm:$0xf0]  ;;  %v11508_v40 = vld [vmem:[%s17113_s3 + $0x37c] sm:$0xf] }
 0x246   : > { %v2442_v9 = vadd.f32 %v13524_v30, %v2424_v55  ;;  %v8758_v30 = vld [vmem:[%s17113_s3 + $0x24c] sm:$0xf0]  ;;  %v8933_v55 = vor.u32 %v11513_v25, %v8932_v58  ;;  %v8917_v49 = vor.u32 %v11508_v40, %v8914_v32  ;;  %v11502_v25 = vld [vmem:[%s17113_s3 + $0x34c] sm:$0xf]  ;;  %v1502_v40 = vadd.f32 %v13455_v20, %v13473_v42  ;;  %v8984_v20 = vld [vmem:[%s17113_s3 + $0x408] sm:$0xf] }
 0x247   : > { %v8761_v63 = vor.u32 %v11469_v36, %v8758_v30  ;;  %3198 = vmatpush.bf16.msrb.mxu0 %v8757_v56  ;;  %v11510_v56 = vld [vmem:[%s17113_s3 + $0x388] sm:$0xf0]  ;;  %v11527_v42 = vld [vmem:[%s17113_s3 + $0x410] sm:$0xf0] }
 0x248   : > { %v2505_v35 = vadd.f32 %v2442_v9, %v13500_v14  ;;  %v1859_v14 = vadd.f32 %v13477_v6, %v1841_v19  ;;  %v8945_v6 = vor.u32 %v11516_v59, %v8944_v45  ;;  %v9037_v9 = vor.u32 %v11538_v28, %v9034_v8  ;;  %v8920_v19 = vld [vmem:[%s17113_s3 + $0x380] sm:$0xf]  ;;  %v11507_v59 = vld [vmem:[%s17113_s3 + $0x370] sm:$0xf0]  ;;  %v8890_v28 = vld [vmem:[%s17113_s3 + $0x354] sm:$0xf0] }
 0x249   : > { %3252 = vmatpush.bf16.msrb.mxu3 %v8761_v63  ;;  %v8921_v63 = vor.u32 %v11510_v56, %v8920_v19  ;;  %v11530_v8 = vld [vmem:[%s17113_s3 + $0x428] sm:$0xf0]  ;;  %v8998_v19 = vld [vmem:[%s17113_s3 + $0x42c] sm:$0xf0] }
 0x24a   : > { %v2514_v48 = vmax.f32 %v2505_v35, 0.0  ;;  %v13707_v22 = vpop.f32.mrf.mxu2  ;;  %v2507_v33 = vadd.f32 %v2390_v3, %v1859_v14  ;;  %3281 = vmatpush.bf16.msra.mxu1 %v9037_v9  ;;  %v11536_v35 = vld [vmem:[%s17113_s3 + $0x458] sm:$0xf0] }
 0x24b   : > { %v2425_v60 = vpop.f32.mrf.mxu3  ;;  %3263 = vmatpush.bf16.msra.mxu0 %v8941_v52  ;;  %v9021_v3 = vor.u32 %v11536_v35, %v9020_v46  ;;  %v8902_v52 = vld [vmem:[%s17113_s3 + $0x36c] sm:$0xf0] }
 0x24c   : > { %v13723_v62 = vpack.c.bf16 %v2514_v48, %v2513_v16  ;;  %v2426_v34 = vadd.f32 %v2425_v60, %v13570_v38  ;;  %v13726_v57 = vpop.f32.mrf.mxu1  ;;  %v8926_v38 = vld [vmem:[%s17113_s3 + $0x39c] sm:$0xf0]  ;;  %v2516_v10 = vmax.f32 %v2507_v33, 0.0  ;;  %v8905_v45 = vor.u32 %v11505_v11, %v8902_v52  ;;  %v11499_v11 = vld [vmem:[%s17113_s3 + $0x334] sm:$0xf] }
 0x24d   : > { %3317 = vmatpush.bf16.msra.mxu3 %v8945_v6  ;;  %v8929_v44 = vor.u32 %v11511_v26, %v8926_v38  ;;  %v9022_v48 = vld [vmem:[%s17113_s3 + $0x45c] sm:$0xf0]  ;;  %v9008_v6 = vld [vmem:[%s17113_s3 + $0x438] sm:$0xf]  ;;  %v2519_v26 = vmax.f32 %v2510_v31, 0.0 }
 0x24e   : > { %2528 = vst [vmem:[#allocation4] sm:$0xff] %v13723_v62  ;;  %v2444_v27 = vadd.f32 %v13550_v51, %v2426_v34  ;;  %v9032_v51 = vld [vmem:[%s17113_s3 + $0x468] sm:$0xf]  ;;  %v2742_v16 = vunpack.c.h.b16 %v13723_v62  ;;  %v9025_v60 = vor.u32 %v11535_v0, %v9022_v48  ;;  %v9009_v33 = vor.u32 %v11533_v1, %v9008_v6  ;;  %v8986_v31 = vld [vmem:[%s17113_s3 + $0x414] sm:$0xf0] }
 0x24f   : > { %v9033_v17 = vor.u32 %v11539_v53, %v9032_v51  ;;  %3264 = vmatpush.bf16.msra.mxu0 %v8929_v44  ;;  %v8985_v0 = vor.u32 %v11527_v42, %v8984_v20  ;;  %v1520_v1 = vadd.f32 %v13475_v43, %v1502_v40  ;;  %v8872_v40 = vld [vmem:[%s17113_s3 + $0x320] sm:$0xf]  ;;  %v11493_v20 = vld [vmem:[%s17113_s3 + $0x304] sm:$0xf]  ;;  %v8854_v42 = vld [vmem:[%s17113_s3 + $0x30c] sm:$0xf0] }
 0x250   : > { %v2508_v47 = vadd.f32 %v2444_v27, %v1913_v2  ;;  %3282 = vmatpush.bf16.msra.mxu1 %v9025_v60  ;;  %v9010_v27 = vld [vmem:[%s17113_s3 + $0x444] sm:$0xf0]  ;;  %v11524_v60 = vld [vmem:[%s17113_s3 + $0x3f8] sm:$0xf0] }
 0x251   : > { %3318 = vmatpush.bf16.msra.mxu3 %v8933_v55  ;;  %3227 = vmatpush.bf16.msrb.mxu2 %v9033_v17  ;;  %v8996_v17 = vld [vmem:[%s17113_s3 + $0x420] sm:$0xf] }
 0x252   : > { %v2517_v23 = vmax.f32 %v2508_v47, 0.0  ;;  %v13758_v24 = vpop.f32.mrf.mxu2 }
 0x253   : > { %v2428_v18 = vpop.f32.mrf.mxu3  ;;  %3265 = vmatpush.bf16.msra.mxu0 %v8917_v49  ;;  %v11529_v49 = vld [vmem:[%s17113_s3 + $0x424] sm:$0xf] }
 0x254   : > { %v13772_v4 = vpack.c.bf16 %v2517_v23, %v2516_v10  ;;  %v2429_v36 = vadd.f32 %v2428_v18, %v13614_v7  ;;  %v13775_v30 = vpop.f32.mrf.mxu1  ;;  %v2741_v7 = vunpack.c.l.b16 %v13723_v62  ;;  %v8893_v10 = vor.u32 %v11502_v25, %v8890_v28  ;;  %v8896_v23 = vld [vmem:[%s17113_s3 + $0x350] sm:$0xf] }
 0x255   : > { %3319 = vmatpush.bf16.msra.mxu3 %v8921_v63  ;;  %3228 = vmatpush.bf16.msrb.mxu2 %v9021_v3  ;;  %v3913_v9 = vld [vmem:[#allocation4] sm:$0xee]  ;;  %v8997_v18 = vor.u32 %v11530_v8, %v8996_v17  ;;  %v9001_v35 = vor.u32 %v11529_v49, %v8998_v19  ;;  %v11526_v63 = vld [vmem:[%s17113_s3 + $0x40c] sm:$0xf]  ;;  %v8866_v17 = vld [vmem:[%s17113_s3 + $0x324] sm:$0xf0] }
 0x256   : > { %v2447_v50 = vadd.f32 %v13594_v54, %v2429_v36  ;;  %v2744_v21 = vunpack.c.l.b16 %v13772_v4  ;;  %v2745_v14 = vunpack.c.h.b16 %v13772_v4  ;;  %v8908_v54 = vld [vmem:[%s17113_s3 + $0x368] sm:$0xf]  ;;  %v4014_v6 = vunpack.c.l.b16 %v3913_v9 }
 0x257   : > { %v8909_v2 = vor.u32 %v11507_v59, %v8908_v54  ;;  %3266 = vmatpush.bf16.msra.mxu0 %v8905_v45  ;;  %v8989_v54 = vor.u32 %v11526_v63, %v8986_v31  ;;  %v8878_v59 = vld [vmem:[%s17113_s3 + $0x33c] sm:$0xf0] }
 0x258   : > { %v2511_v61 = vadd.f32 %v2447_v50, %v13514_v15  ;;  %v13810_v62 = vpack.c.b16 %v2744_v21, %v2741_v7  ;;  %v13814_v34 = vpack.c.b16 %v2745_v14, %v2742_v16  ;;  %v11532_v15 = vld [vmem:[%s17113_s3 + $0x43c] sm:$0xf]  ;;  %v8972_v50 = vld [vmem:[%s17113_s3 + $0x3f0] sm:$0xf] }
 0x259   : > { %3320 = vmatpush.bf16.msra.mxu3 %v8909_v2  ;;  %3229 = vmatpush.bf16.msrb.mxu2 %v9009_v33  ;;  %v9013_v53 = vor.u32 %v11532_v15, %v9010_v27  ;;  %v11504_v7 = vld [vmem:[%s17113_s3 + $0x358] sm:$0xf0]  ;;  %v2478_v15 = vadd.f32 %v13707_v22, %v13674_v37  ;;  %v8881_v37 = vor.u32 %v11499_v11, %v8878_v59  ;;  %v11501_v22 = vld [vmem:[%s17113_s3 + $0x340] sm:$0xf0]  ;;  %v11495_v11 = vld [vmem:[%s17113_s3 + $0x310] sm:$0xf0] }
 0x25a   : > { %v2520_v38 = vmax.f32 %v2511_v61, 0.0  ;;  %v13828_v44 = vpop.f32.mrf.mxu2  ;;  %v2759_v58 = vshll.u32 %v13810_v62, 16  ;;  %v2771_v51 = vshll.u32 %v13814_v34, 16  ;;  %v8897_v48 = vor.u32 %v11504_v7, %v8896_v23  ;;  %v11523_v61 = vld [vmem:[%s17113_s3 + $0x3f4] sm:$0xf] }
 0x25b   : > { %v2430_v47 = vpop.f32.mrf.mxu3  ;;  %3283 = vmatpush.bf16.msra.mxu1 %v9013_v53  ;;  %3267 = vmatpush.bf16.msra.mxu0 %v8893_v10  ;;  %v2757_v52 = vshrl.u32 %v13810_v62, 16  ;;  %v2769_v45 = vshrl.u32 %v13814_v34, 16  ;;  %v8960_v10 = vld [vmem:[%s17113_s3 + $0x3d8] sm:$0xf]  ;;  %v11521_v23 = vld [vmem:[%s17113_s3 + $0x3e0] sm:$0xf0] }
 0x25c   : > { %v2526_v55 = vpack.c.bf16 %v2520_v38, %v2519_v26  ;;  %v2466_v12 = vpop.f32.mrf.mxu1  ;;  %v2761_v32 = vrot.slane %v2759_v58, 1  ;;  %v2773_v46 = vrot.slane %v2771_v51, 1  ;;  %v8974_v26 = vld [vmem:[%s17113_s3 + $0x3fc] sm:$0xf0]  ;;  %v8884_v38 = vld [vmem:[%s17113_s3 + $0x338] sm:$0xf]  ;;  %v8973_v47 = vor.u32 %v11524_v60, %v8972_v50 }
 0x25d   : > { %3230 = vmatpush.bf16.msrb.mxu2 %v8997_v18  ;;  %3321 = vmatpush.bf16.msra.mxu3 %v8897_v48  ;;  %v11496_v12 = vld [vmem:[%s17113_s3 + $0x31c] sm:$0xf]  ;;  %v8977_v8 = vor.u32 %v11523_v61, %v8974_v26  ;;  %v1931_v18 = vadd.f32 %v13492_v5, %v1520_v1  ;;  %v11498_v5 = vld [vmem:[%s17113_s3 + $0x328] sm:$0xf0]  ;;  %v8961_v31 = vor.u32 %v11521_v23, %v8960_v10  ;;  %v11517_v7 = vld [vmem:[%s17113_s3 + $0x3c4] sm:$0xf] }
 0x25e   : > { %2532 = vst [vmem:[#allocation4 + $0x18] sm:$0xff] %v2526_v55  ;;  %v2747_v56 = vunpack.c.l.b16 %v2526_v55  ;;  %v2748_v36 = vunpack.c.h.b16 %v2526_v55  ;;  %v2762_v25 = vor.u32 %v2761_v32, %v2757_v52  ;;  %v2774_v43 = vor.u32 %v2773_v46, %v2769_v45  ;;  %v8948_v46 = vld [vmem:[%s17113_s3 + $0x3c0] sm:$0xf]  ;;  %v8860_v48 = vld [vmem:[%s17113_s3 + $0x308] sm:$0xf] }
 0x25f   : > { %3284 = vmatpush.bf16.msra.mxu1 %v9001_v35  ;;  %v8885_v55 = vor.u32 %v11501_v22, %v8884_v38  ;;  %3268 = vmatpush.bf16.msra.mxu0 %v8881_v37  ;;  %v8869_v9 = vor.u32 %v11496_v12, %v8866_v17  ;;  %v4017_v32 = vpack.c.b16 %v2744_v21, %v4014_v6  ;;  %v8962_v21 = vld [vmem:[%s17113_s3 + $0x3e4] sm:$0xf0]  ;;  %v11518_v35 = vld [vmem:[%s17113_s3 + $0x3c8] sm:$0xf0]  ;;  %v9040_v6 = vld [vmem:[%s17113_s3 + $0x470] sm:$0xf] }
 0x260   : > { %v13870_v16 = vpack.c.b16 %v2747_v56, %v2747_v56  ;;  %v13872_v3 = vpack.c.b16 %v2748_v36, %v2748_v36  ;;  %v11520_v36 = vld [vmem:[%s17113_s3 + $0x3dc] sm:$0xf]  ;;  %v8857_v60 = vor.u32 %v11493_v20, %v8854_v42  ;;  %v8861_v61 = vor.u32 %v11495_v11, %v8860_v48  ;;  %v11489_v12 = vld [vmem:[%s17113_s3 + $0x2e0] sm:$0xf0]  ;;  %v9116_v23 = vld [vmem:[%s17113_s3 + $0x90] sm:$0xf] }
 0x261   : > { %3231 = vmatpush.bf16.msrb.mxu2 %v8985_v0  ;;  %3322 = vmatpush.bf16.msra.mxu3 %v8885_v55  ;;  %v1949_v0 = vadd.f32 %v13508_v13, %v1931_v18  ;;  %v8965_v50 = vor.u32 %v11520_v36, %v8962_v21  ;;  %v8950_v13 = vld [vmem:[%s17113_s3 + $0x3cc] sm:$0xf0]  ;;  %v4020_v52 = vrot.slane %v4017_v32, 1  ;;  %v11540_v1 = vld [vmem:[%s17113_s3 + $0x478] sm:$0xf0]  ;;  %v8949_v38 = vor.u32 %v11518_v35, %v8948_v46 }
 0x262   : > { %v2484_v2 = vpop.f32.mrf.mxu2  ;;  %v2764_v33 = vshll.u32 %v13870_v16, 16  ;;  %v2776_v27 = vshll.u32 %v13872_v3, 16  ;;  %v13974_v45 = vrot.slane %v13870_v16, 1  ;;  %v8836_v55 = vld [vmem:[%s17113_s3 + $0x2d8] sm:$0xf]  ;;  %v2792_v36 = vshrl.u32 %v13870_v16, 16 }
 0x263   : > { %v2495_v58 = vpop.f32.mrf.mxu3  ;;  %3285 = vmatpush.bf16.msra.mxu1 %v8989_v54  ;;  %3269 = vmatpush.bf16.msra.mxu0 %v8869_v9  ;;  %v2480_v54 = vadd.f32 %v13758_v24, %v13726_v57  ;;  %v1967_v2 = vadd.f32 %v13512_v39, %v1949_v0  ;;  %v11467_v57 = vld [vmem:[%s17113_s3 + $0x230] sm:$0xf0]  ;;  %v8848_v39 = vld [vmem:[%s17113_s3 + $0x2f0] sm:$0xf]  ;;  %v11537_v10 = vld [vmem:[%s17113_s3 + $0x460] sm:$0xf0] }
 0x264   : > { %v2496_v51 = vadd.f32 %v2495_v58, %v2478_v15  ;;  %v13905_v53 = vrot.slane %v2764_v33, 1  ;;  %v13907_v28 = vrot.slane %v2776_v27, 1  ;;  %v9320_v15 = vld [vmem:[%s17113_s3 + $0x228] sm:$0xf]  ;;  %v9041_v27 = vor.u32 %v11540_v1, %v9040_v6  ;;  %v11416_v32 = vld [vmem:[%s17113_s3 + $0x98] sm:$0xf0] }
 0x265   : > { %3232 = vmatpush.bf16.msrb.mxu2 %v8973_v47  ;;  %v13993_v24 = vsel %vm720_vm5, %v4020_v52, %v13974_v45  ;;  %v9321_v58 = vor.u32 %v11467_v57, %v9320_v15  ;;  %v9128_v47 = vld [vmem:[%s17113_s3 + $0xa8] sm:$0xf]  ;;  %v9308_v18 = vld [vmem:[%s17113_s3 + $0x210] sm:$0xf]  ;;  %v2795_v21 = vshrl.u32 %v13872_v3, 16  ;;  %v9117_v20 = vor.u32 %v11416_v32, %v9116_v23 }
 0x266   : > { %v2506_v49 = vadd.f32 %v2496_v51, %v13504_v29  ;;  %v13930_v19 = vsel %vm485_vm4, %v2762_v25, %v13905_v53  ;;  %v13934_v56 = vsel %vm485_vm4, %v2774_v43, %v13907_v28  ;;  %v8873_v29 = vor.u32 %v11498_v5, %v8872_v40  ;;  %v11492_v43 = vld [vmem:[%s17113_s3 + $0x2f8] sm:$0xf0]  ;;  %v11419_v51 = vld [vmem:[%s17113_s3 + $0xb0] sm:$0xf0]  ;;  %v8824_v46 = vld [vmem:[%s17113_s3 + $0x2c0] sm:$0xf] }
 0x267   : > { %3199 = vmatmul.bf16.vlgmr.msrb.gmra.mxu0 %v13930_v19  ;;  %3217 = vmatmul.bf16.vlgmr.msrb.gmra.mxu1 %v13934_v56  ;;  %v8953_v25 = vor.u32 %v11517_v7, %v8950_v13  ;;  %v8849_v22 = vor.u32 %v11492_v43, %v8848_v39  ;;  %v9129_v17 = vor.u32 %v11419_v51, %v9128_v47  ;;  %v9016_v16 = vld [vmem:[%s17113_s3 + $0x440] sm:$0xf]  ;;  %v11534_v42 = vld [vmem:[%s17113_s3 + $0x448] sm:$0xf0]  ;;  %v11413_v7 = vld [vmem:[%s17113_s3 + $0x80] sm:$0xf0] }
 0x268   : > { %v2515_v63 = vmax.f32 %v2506_v49, 0.0  ;;  %3253 = vmatmul.bf16.vlgmr.msrb.gmra.mxu3 %v13930_v19  ;;  %3286 = vmatpush.bf16.msra.mxu1 %v8977_v8  ;;  %v9028_v8 = vld [vmem:[%s17113_s3 + $0x458] sm:$0xf]  ;;  %v2483_v49 = vadd.f32 %v13828_v44, %v13775_v30  ;;  %v8837_v5 = vor.u32 %v11489_v12, %v8836_v55  ;;  %v11486_v44 = vld [vmem:[%s17113_s3 + $0x2c8] sm:$0xf0]  ;;  %v14060_v13 = vor.u32 %v2792_v36, %v13905_v53 }
 0x269   : > { %3323 = vmatpush.bf16.msra.mxu3 %v8873_v29  ;;  %3233 = vmatpush.bf16.msrb.mxu2 %v8961_v31  ;;  %v9029_v40 = vor.u32 %v11537_v10, %v9028_v8  ;;  %v11464_v29 = vld [vmem:[%s17113_s3 + $0x218] sm:$0xf0]  ;;  %v9104_v31 = vld [vmem:[%s17113_s3 + $0x78] sm:$0xf]  ;;  %v14063_v11 = vor.u32 %v2795_v21, %v13907_v28  ;;  %v8825_v52 = vor.u32 %v11486_v44, %v8824_v46  ;;  %v8812_v28 = vld [vmem:[%s17113_s3 + $0x2a8] sm:$0xf] }
 0x26a   : > { %v2523_v59 = vpack.c.bf16 %v2515_v63, %v2515_v63  ;;  %3270 = vmatpush.bf16.msra.mxu0 %v8857_v60  ;;  %v9309_v30 = vor.u32 %v11464_v29, %v9308_v18  ;;  %v9017_v63 = vor.u32 %v11534_v42, %v9016_v16  ;;  %v9296_v48 = vld [vmem:[%s17113_s3 + $0x1f8] sm:$0xf]  ;;  %v11461_v60 = vld [vmem:[%s17113_s3 + $0x200] sm:$0xf0]  ;;  %v9105_v53 = vor.u32 %v11413_v7, %v9104_v31  ;;  %v11483_v1 = vld [vmem:[%s17113_s3 + $0x2b0] sm:$0xf0] }
 0x26b   : > { %v2497_v33 = vpop.f32.mrf.mxu3  ;;  %v8992_v43 = vld [vmem:[%s17113_s3 + $0x410] sm:$0xf]  ;;  %v11528_v47 = vld [vmem:[%s17113_s3 + $0x418] sm:$0xf0]  ;;  %v11455_v12 = vld [vmem:[%s17113_s3 + $0x1d0] sm:$0xf0] }
 0x26c   : > { %2529 = vst [vmem:[#allocation4 + $0x8] sm:$0xf] %v2523_v59  ;;  %v2498_v26 = vadd.f32 %v2497_v33, %v2480_v54  ;;  %3287 = vmatpush.bf16.msra.mxu1 %v8965_v50  ;;  %v9297_v54 = vor.u32 %v11461_v60, %v9296_v48  ;;  %v9004_v59 = vld [vmem:[%s17113_s3 + $0x428] sm:$0xf]  ;;  %v11410_v33 = vld [vmem:[%s17113_s3 + $0x68] sm:$0xf0]  ;;  %v8993_v55 = vor.u32 %v11528_v47, %v8992_v43 }
 0x26d   : > { %3324 = vmatpush.bf16.msra.mxu3 %v8861_v61  ;;  %3234 = vmatpush.bf16.msrb.mxu2 %v8949_v38  ;;  %v11531_v61 = vld [vmem:[%s17113_s3 + $0x430] sm:$0xf0]  ;;  %v8813_v38 = vor.u32 %v11483_v1, %v8812_v28  ;;  %v8800_v10 = vld [vmem:[%s17113_s3 + $0x290] sm:$0xf]  ;;  %v11480_v23 = vld [vmem:[%s17113_s3 + $0x298] sm:$0xf0] }
 0x26e   : > { %v2509_v37 = vadd.f32 %v2498_v26, %v1967_v2  ;;  %3335 = vmatpush.bf16.msrb.mxu0 %v9041_v27  ;;  %v9005_v15 = vor.u32 %v11531_v61, %v9004_v59  ;;  %v9284_v2 = vld [vmem:[%s17113_s3 + $0x1e0] sm:$0xf]  ;;  %v11458_v27 = vld [vmem:[%s17113_s3 + $0x1e8] sm:$0xf0]  ;;  %v8801_v18 = vor.u32 %v11480_v23, %v8800_v10  ;;  %v8788_v36 = vld [vmem:[%s17113_s3 + $0x278] sm:$0xf] }
 0x26f   : > { %v11477_v21 = vld [vmem:[%s17113_s3 + $0x280] sm:$0xf0]  ;;  %v8980_v29 = vld [vmem:[%s17113_s3 + $0x3f8] sm:$0xf]  ;;  %v9260_v44 = vld [vmem:[%s17113_s3 + $0x1b0] sm:$0xf] }
 0x270   : > { %v2518_v9 = vmax.f32 %v2509_v37, 0.0  ;;  %3288 = vmatpush.bf16.msra.mxu1 %v8953_v25  ;;  %v9272_v37 = vld [vmem:[%s17113_s3 + $0x1c8] sm:$0xf]  ;;  %v11525_v46 = vld [vmem:[%s17113_s3 + $0x400] sm:$0xf0]  ;;  %v8789_v42 = vor.u32 %v11477_v21, %v8788_v36 }
 0x271   : > { %3787 = vmatpush.bf16.msrb.mxu3 %v9321_v58  ;;  %3299 = vmatpush.bf16.msra.mxu2 %v8849_v22  ;;  %v9285_v58 = vor.u32 %v11458_v27, %v9284_v2  ;;  %v11474_v48 = vld [vmem:[%s17113_s3 + $0x268] sm:$0xf0]  ;;  %v9056_v59 = vld [vmem:[%s17113_s3 + $0x18] sm:$0xf]  ;;  %v11401_v61 = vld [vmem:[%s17113_s3 + $0x20] sm:$0xf0] }
 0x272   : > { %v2525_v35 = vpack.c.bf16 %v2518_v9, %v2518_v9  ;;  %3336 = vmatpush.bf16.msrb.mxu0 %v9029_v40  ;;  %v9080_v9 = vld [vmem:[%s17113_s3 + $0x48] sm:$0xf]  ;;  %v9273_v40 = vor.u32 %v11455_v12, %v9272_v37  ;;  %v11522_v60 = vld [vmem:[%s17113_s3 + $0x3e8] sm:$0xf0]  ;;  %v11449_v28 = vld [vmem:[%s17113_s3 + $0x1a0] sm:$0xf0] }
 0x273   : > { %v2500_v0 = vpop.f32.mrf.mxu3  ;;  %v2535_v26 = vld [vmem:[#allocation4 + $0x8] sm:$0xf]  ;;  %v9236_v37 = vld [vmem:[%s17113_s3 + $0x180] sm:$0xf]  ;;  %v9130_v23 = vld [vmem:[%s17113_s3 + $0xb4] sm:$0xf0] }
 0x274   : > { %3751 = vmatpush.bf16.msrb.mxu1 %v9129_v17  ;;  %2531 = vst [vmem:[#allocation4 + $0x14] sm:$0xf] %v2525_v35  ;;  %v2501_v50 = vadd.f32 %v2500_v0, %v2483_v49  ;;  %v2743_v17 = vunpack.c.l.b16 %v2535_v26  ;;  %v11407_v49 = vld [vmem:[%s17113_s3 + $0x50] sm:$0xf0]  ;;  %v9068_v35 = vld [vmem:[%s17113_s3 + $0x30] sm:$0xf] }
 0x275   : > { %3788 = vmatpush.bf16.msrb.mxu3 %v9309_v30  ;;  %3300 = vmatpush.bf16.msra.mxu2 %v8837_v5  ;;  %v9081_v5 = vor.u32 %v11407_v49, %v9080_v9  ;;  %v11404_v30 = vld [vmem:[%s17113_s3 + $0x38] sm:$0xf0]  ;;  %v8956_v2 = vld [vmem:[%s17113_s3 + $0x3c8] sm:$0xf] }
 0x276   : > { %v2512_v6 = vadd.f32 %v2501_v50, %v13518_v41  ;;  %3337 = vmatpush.bf16.msrb.mxu0 %v9017_v63  ;;  %v9092_v41 = vld [vmem:[%s17113_s3 + $0x60] sm:$0xf]  ;;  %v11452_v0 = vld [vmem:[%s17113_s3 + $0x1b8] sm:$0xf0]  ;;  %v9069_v31 = vor.u32 %v11404_v30, %v9068_v35  ;;  %v8764_v26 = vld [vmem:[%s17113_s3 + $0x248] sm:$0xf] }
 0x277   : > { %3204 = vmatmul.bf16.gmra.mxu0 %v14060_v13  ;;  %3222 = vmatmul.bf16.gmra.mxu1 %v14063_v11  ;;  %v9093_v39 = vor.u32 %v11410_v33, %v9092_v41  ;;  %v8776_v63 = vld [vmem:[%s17113_s3 + $0x260] sm:$0xf]  ;;  %v9261_v7 = vor.u32 %v11452_v0, %v9260_v44  ;;  %v11519_v41 = vld [vmem:[%s17113_s3 + $0x3d0] sm:$0xf0]  ;;  %v11420_v49 = vld [vmem:[%s17113_s3 + $0xb8] sm:$0xf0] }
 0x278   : > { %3752 = vmatpush.bf16.msrb.mxu1 %v9117_v20  ;;  %v2521_v57 = vmax.f32 %v2512_v6, 0.0  ;;  %3258 = vmatmul.bf16.gmra.mxu3 %v14060_v13  ;;  %v8981_v20 = vor.u32 %v11525_v46, %v8980_v29  ;;  %v8968_v50 = vld [vmem:[%s17113_s3 + $0x3e0] sm:$0xf]  ;;  %v8777_v1 = vor.u32 %v11474_v48, %v8776_v63  ;;  %v11443_v29 = vld [vmem:[%s17113_s3 + $0x170] sm:$0xf0] }
 0x279   : > { %3301 = vmatpush.bf16.msra.mxu2 %v8825_v52  ;;  %3789 = vmatpush.bf16.msrb.mxu3 %v9297_v54  ;;  %v8969_v54 = vor.u32 %v11522_v60, %v8968_v50  ;;  %v11442_v46 = vld [vmem:[%s17113_s3 + $0x16c] sm:$0xf]  ;;  %v9212_v30 = vld [vmem:[%s17113_s3 + $0x150] sm:$0xf]  ;;  %v11440_v44 = vld [vmem:[%s17113_s3 + $0x158] sm:$0xf0] }
 0x27a   : > { %v2527_v25 = vpack.c.bf16 %v2521_v57, %v2521_v57  ;;  %3338 = vmatpush.bf16.msrb.mxu0 %v9005_v15  ;;  %v9057_v57 = vor.u32 %v11401_v61, %v9056_v59  ;;  %v9118_v0 = vld [vmem:[%s17113_s3 + $0x9c] sm:$0xf0]  ;;  %v11439_v63 = vld [vmem:[%s17113_s3 + $0x154] sm:$0xf]  ;;  %v9124_v50 = vld [vmem:[%s17113_s3 + $0x98] sm:$0xf] }
 0x27b   : > { %v2502_v22 = vpop.f32.mrf.mxu3  ;;  %v14102_v51 = vld [vmem:[#allocation4 + $0x14] sm:$0xf]  ;;  %v9214_v48 = vld [vmem:[%s17113_s3 + $0x15c] sm:$0xf0]  ;;  %v11417_v60 = vld [vmem:[%s17113_s3 + $0xa0] sm:$0xf0] }
 0x27c   : > { %3753 = vmatpush.bf16.msrb.mxu1 %v9105_v53  ;;  %2533 = vst [vmem:[#allocation4 + $0x20] sm:$0xf] %v2527_v25  ;;  %v2746_v8 = vunpack.c.l.b16 %v14102_v51  ;;  %v9248_v53 = vld [vmem:[%s17113_s3 + $0x198] sm:$0xf]  ;;  %v9044_v25 = vld [vmem:[%s17113_s3] sm:$0xf] }
 0x27d   : > { %3302 = vmatpush.bf16.msra.mxu2 %v8813_v38  ;;  %3790 = vmatpush.bf16.msrb.mxu3 %v9285_v58  ;;  %v9249_v15 = vor.u32 %v11449_v28, %v9248_v53  ;;  %v8957_v38 = vor.u32 %v11519_v41, %v8956_v2  ;;  %v11471_v58 = vld [vmem:[%s17113_s3 + $0x250] sm:$0xf0]  ;;  %v11446_v22 = vld [vmem:[%s17113_s3 + $0x188] sm:$0xf0]  ;;  %v9200_v59 = vld [vmem:[%s17113_s3 + $0x138] sm:$0xf] }
 0x27e   : > { %v14119_v32 = vpack.c.b16 %v2746_v8, %v2743_v17  ;;  %3339 = vmatpush.bf16.msrb.mxu0 %v8993_v55  ;;  %v8765_v17 = vor.u32 %v11471_v58, %v8764_v26  ;;  %v9237_v9 = vor.u32 %v11446_v22, %v9236_v37  ;;  %v11437_v61 = vld [vmem:[%s17113_s3 + $0x140] sm:$0xf0]  ;;  %v9106_v53 = vld [vmem:[%s17113_s3 + $0x84] sm:$0xf0]  ;;  %v11436_v28 = vld [vmem:[%s17113_s3 + $0x13c] sm:$0xf] }
 0x27f   : > { %v11414_v2 = vld [vmem:[%s17113_s3 + $0x88] sm:$0xf0]  ;;  %v9201_v41 = vor.u32 %v11437_v61, %v9200_v59  ;;  %v9188_v26 = vld [vmem:[%s17113_s3 + $0x120] sm:$0xf]  ;;  %v9100_v22 = vld [vmem:[%s17113_s3 + $0x68] sm:$0xf] }
 0x280   : > { %3754 = vmatpush.bf16.msrb.mxu1 %v9093_v39  ;;  %v2783_v16 = vshll.u32 %v14119_v32, 16  ;;  %v11398_v39 = vld [vmem:[%s17113_s3 + $0x8] sm:$0xf0]  ;;  %v2781_v43 = vshrl.u32 %v14119_v32, 16  ;;  %v11400_v61 = vld [vmem:[%s17113_s3 + $0x1c] sm:$0xf] }
 0x281   : > { %3303 = vmatpush.bf16.msra.mxu2 %v8801_v18  ;;  %3791 = vmatpush.bf16.msrb.mxu3 %v9273_v40  ;;  %v9045_v10 = vor.u32 %v11398_v39, %v9044_v25  ;;  %v9136_v18 = vld [vmem:[%s17113_s3 + $0xb0] sm:$0xf]  ;;  %v11409_v25 = vld [vmem:[%s17113_s3 + $0x64] sm:$0xf]  ;;  %v11576_v51 = vld [vmem:[%s17113_s3 + $0x598] sm:$0xf0] }
 0x282   : > { %3340 = vmatpush.bf16.msrb.mxu0 %v8981_v20  ;;  %v2785_v27 = vrot.slane %v2783_v16, 1  ;;  %v9137_v21 = vor.u32 %v11420_v49, %v9136_v18  ;;  %v9226_v20 = vld [vmem:[%s17113_s3 + $0x174] sm:$0xf0]  ;;  %v9094_v39 = vld [vmem:[%s17113_s3 + $0x6c] sm:$0xf0] }
 0x283   : > { %v2637_v52 = vld [vmem:[#allocation4 + $0x20] sm:$0xf]  ;;  %v9229_v16 = vor.u32 %v11442_v46, %v9226_v20  ;;  %v9088_v18 = vld [vmem:[%s17113_s3 + $0x50] sm:$0xf]  ;;  %v11408_v49 = vld [vmem:[%s17113_s3 + $0x58] sm:$0xf0] }
 0x284   : > { %3755 = vmatpush.bf16.msrb.mxu1 %v9081_v5  ;;  %v2749_v6 = vunpack.c.l.b16 %v2637_v52  ;;  %v2786_v55 = vor.u32 %v2785_v27, %v2781_v43  ;;  %v9224_v5 = vld [vmem:[%s17113_s3 + $0x168] sm:$0xf]  ;;  %v9217_v52 = vor.u32 %v11439_v63, %v9214_v48  ;;  %v11433_v43 = vld [vmem:[%s17113_s3 + $0x124] sm:$0xf]  ;;  %v9164_v20 = vld [vmem:[%s17113_s3 + $0xf0] sm:$0xf] }
 0x285   : > { %3304 = vmatpush.bf16.msra.mxu2 %v8789_v42  ;;  %3792 = vmatpush.bf16.msrb.mxu3 %v9261_v7  ;;  %v9225_v35 = vor.u32 %v11443_v29, %v9224_v5  ;;  %v11415_v42 = vld [vmem:[%s17113_s3 + $0x94] sm:$0xf]  ;;  %v11430_v5 = vld [vmem:[%s17113_s3 + $0x10c] sm:$0xf]  ;;  %v9076_v48 = vld [vmem:[%s17113_s3 + $0x38] sm:$0xf] }
 0x286   : > { %v14179_v33 = vpack.c.b16 %v2749_v6, %v2749_v6  ;;  %3341 = vmatpush.bf16.msrb.mxu0 %v8969_v54  ;;  %v9121_v7 = vor.u32 %v11415_v42, %v9118_v0  ;;  %v9125_v54 = vor.u32 %v11417_v60, %v9124_v50  ;;  %v11412_v6 = vld [vmem:[%s17113_s3 + $0x7c] sm:$0xf]  ;;  %v11403_v42 = vld [vmem:[%s17113_s3 + $0x34] sm:$0xf]  ;;  %v9070_v0 = vld [vmem:[%s17113_s3 + $0x3c] sm:$0xf0] }
 0x287   : > { %3271 = vmatmul.bf16.vlgmr.msra.gmra.mxu0 %v13934_v56  ;;  %v9109_v27 = vor.u32 %v11412_v6, %v9106_v53  ;;  %v11427_v63 = vld [vmem:[%s17113_s3 + $0xf4] sm:$0xf]  ;;  %v11405_v50 = vld [vmem:[%s17113_s3 + $0x40] sm:$0xf0]  ;;  %v9152_v60 = vld [vmem:[%s17113_s3 + $0xd8] sm:$0xf] }
 0x288   : > { %3756 = vmatpush.bf16.msrb.mxu1 %v9069_v31  ;;  %v2788_v47 = vshll.u32 %v14179_v33, 16  ;;  %3325 = vmatmul.bf16.vlgmr.msra.gmra.mxu3 %v13934_v56  ;;  %v11418_v56 = vld [vmem:[%s17113_s3 + $0xac] sm:$0xf]  ;;  %v9213_v31 = vor.u32 %v11440_v44, %v9212_v30  ;;  %v11428_v30 = vld [vmem:[%s17113_s3 + $0xf8] sm:$0xf0]  ;;  %v9077_v6 = vor.u32 %v11405_v50, %v9076_v48 }
 0x289   : > { %3305 = vmatpush.bf16.msra.mxu2 %v8777_v1  ;;  %3793 = vmatpush.bf16.msrb.mxu3 %v9249_v15  ;;  %v9133_v40 = vor.u32 %v11418_v56, %v9130_v23  ;;  %v9202_v1 = vld [vmem:[%s17113_s3 + $0x144] sm:$0xf0]  ;;  %v9112_v15 = vld [vmem:[%s17113_s3 + $0x80] sm:$0xf]  ;;  %v11584_v48 = vld [vmem:[%s17113_s3 + $0x5d8] sm:$0xf0] }
 0x28a   : > { %v14203_v12 = vrot.slane %v2788_v47, 1  ;;  %3342 = vmatpush.bf16.msrb.mxu0 %v8957_v38  ;;  %v11434_v38 = vld [vmem:[%s17113_s3 + $0x128] sm:$0xf0]  ;;  %v9113_v58 = vor.u32 %v11414_v2, %v9112_v15  ;;  %v9190_v47 = vld [vmem:[%s17113_s3 + $0x12c] sm:$0xf0] }
 0x28b   : > { %v9189_v37 = vor.u32 %v11434_v38, %v9188_v26  ;;  %v9193_v56 = vor.u32 %v11433_v43, %v9190_v47  ;;  %v9058_v53 = vld [vmem:[%s17113_s3 + $0x24] sm:$0xf0]  ;;  %v9064_v2 = vld [vmem:[%s17113_s3 + $0x20] sm:$0xf]  ;;  %v11421_v43 = vld [vmem:[%s17113_s3 + $0xc4] sm:$0xf] }
 0x28c   : > { %3757 = vmatpush.bf16.msrb.mxu1 %v9057_v57  ;;  %v14219_v36 = vsel %vm485_vm4, %v2786_v55, %v14203_v12  ;;  %v9205_v57 = vor.u32 %v11436_v28, %v9202_v1  ;;  %v11411_v55 = vld [vmem:[%s17113_s3 + $0x70] sm:$0xf0]  ;;  %v11424_v28 = vld [vmem:[%s17113_s3 + $0xdc] sm:$0xf]  ;;  %v9154_v1 = vld [vmem:[%s17113_s3 + $0xe4] sm:$0xf0]  ;;  %v9061_v26 = vor.u32 %v11400_v61, %v9058_v53 }
 0x28d   : > { %3235 = vmatmul.bf16.vlgmr.msrb.gmra.mxu2 %v14219_v36  ;;  %3289 = vmatmul.bf16.vlgmr.msra.gmra.mxu1 %v14219_v36  ;;  %v9157_v38 = vor.u32 %v11424_v28, %v9154_v1  ;;  %v9142_v47 = vld [vmem:[%s17113_s3 + $0xcc] sm:$0xf0]  ;;  %v9304_v53 = vld [vmem:[%s17113_s3 + $0x200] sm:$0xf]  ;;  %v11462_v28 = vld [vmem:[%s17113_s3 + $0x208] sm:$0xf0] }
 0x28e   : > { %3306 = vmatpush.bf16.msra.mxu2 %v8765_v17  ;;  %3794 = vmatpush.bf16.msrb.mxu3 %v9237_v9  ;;  %v2798_v17 = vshrl.u32 %v14179_v33, 16  ;;  %v11406_v9 = vld [vmem:[%s17113_s3 + $0x4c] sm:$0xf]  ;;  %v9584_v1 = vld [vmem:[%s17113_s3 + $0x5b8] sm:$0xf] }
 0x28f   : > { %3805 = vmatpush.bf16.msra.mxu0 %v9133_v40  ;;  %v9082_v40 = vld [vmem:[%s17113_s3 + $0x54] sm:$0xf0] }
 0x290   : > { %3758 = vmatpush.bf16.msrb.mxu1 %v9045_v10  ;;  %v9097_v10 = vor.u32 %v11409_v25, %v9094_v39  ;;  %v14311_v23 = vor.u32 %v2798_v17, %v14203_v12  ;;  %v9176_v12 = vld [vmem:[%s17113_s3 + $0x108] sm:$0xf]  ;;  %v9085_v46 = vor.u32 %v11406_v9, %v9082_v40  ;;  %v9046_v39 = vld [vmem:[%s17113_s3 + $0xc] sm:$0xf0]  ;;  %v9145_v17 = vor.u32 %v11421_v43, %v9142_v47  ;;  %v11435_v47 = vld [vmem:[%s17113_s3 + $0x130] sm:$0xf0] }
 0x292   : > { %3769 = vmatpush.bf16.msrb.mxu2 %v9225_v35  ;;  %3859 = vmatpush.bf16.msra.mxu3 %v9137_v21  ;;  %v11431_v21 = vld [vmem:[%s17113_s3 + $0x110] sm:$0xf0]  ;;  %v9178_v35 = vld [vmem:[%s17113_s3 + $0x114] sm:$0xf0] }
 0x293   : > { %3806 = vmatpush.bf16.msra.mxu0 %v9121_v7  ;;  %v9177_v29 = vor.u32 %v11431_v21, %v9176_v12  ;;  %v9181_v44 = vor.u32 %v11430_v5, %v9178_v35  ;;  %v9166_v7 = vld [vmem:[%s17113_s3 + $0xfc] sm:$0xf0]  ;;  %v11466_v21 = vld [vmem:[%s17113_s3 + $0x22c] sm:$0xf]  ;;  %v9322_v5 = vld [vmem:[%s17113_s3 + $0x234] sm:$0xf0] }
 0x294   : > { %3823 = vmatpush.bf16.msra.mxu1 %v9229_v16  ;;  %v9089_v16 = vor.u32 %v11408_v49, %v9088_v18  ;;  %v9169_v59 = vor.u32 %v11427_v63, %v9166_v7  ;;  %v11587_v18 = vld [vmem:[%s17113_s3 + $0x5f0] sm:$0xf0]  ;;  %v2539_v12 = vld [vmem:[#allocation4 + $0x20] sm:$0x7]  ;;  %v9596_v7 = vld [vmem:[%s17113_s3 + $0x5d0] sm:$0xf] }
 0x295   : > { %v11463_v35 = vld [vmem:[%s17113_s3 + $0x214] sm:$0xf]  ;;  %v3357_v61 = vunpack.c.l.b16 %v2539_v12  ;;  %v11454_v12 = vld [vmem:[%s17113_s3 + $0x1cc] sm:$0xf] }
 0x296   : > { %3770 = vmatpush.bf16.msrb.mxu2 %v9213_v31  ;;  %3860 = vmatpush.bf16.msra.mxu3 %v9125_v54  ;;  %v9165_v31 = vor.u32 %v11428_v30, %v9164_v20  ;;  %v9073_v54 = vor.u32 %v11403_v42, %v9070_v0  ;;  %v9310_v20 = vld [vmem:[%s17113_s3 + $0x21c] sm:$0xf0]  ;;  %v9316_v42 = vld [vmem:[%s17113_s3 + $0x218] sm:$0xf] }
 0x297   : > { %3276 = vmatmul.bf16.gmra.mxu0 %v14063_v11  ;;  %v9313_v0 = vor.u32 %v11463_v35, %v9310_v20  ;;  %v9262_v35 = vld [vmem:[%s17113_s3 + $0x1bc] sm:$0xf0] }
 0x298   : > { %3824 = vmatpush.bf16.msra.mxu1 %v9217_v52  ;;  %3330 = vmatmul.bf16.gmra.mxu3 %v14063_v11  ;;  %v9101_v11 = vor.u32 %v11411_v55, %v9100_v22  ;;  %v11425_v52 = vld [vmem:[%s17113_s3 + $0xe0] sm:$0xf0]  ;;  %v11399_v22 = vld [vmem:[%s17113_s3 + $0x10] sm:$0xf0] }
 0x299   : > { %3807 = vmatpush.bf16.msra.mxu0 %v9109_v27  ;;  %v9153_v15 = vor.u32 %v11425_v52, %v9152_v60  ;;  %v9140_v27 = vld [vmem:[%s17113_s3 + $0xc0] sm:$0xf]  ;;  %v9597_v60 = vor.u32 %v11584_v48, %v9596_v7  ;;  %v11460_v52 = vld [vmem:[%s17113_s3 + $0x1fc] sm:$0xf] }
 0x29a   : > { %3771 = vmatpush.bf16.msrb.mxu2 %v9201_v41  ;;  %3861 = vmatpush.bf16.msra.mxu3 %v9113_v58  ;;  %v11402_v41 = vld [vmem:[%s17113_s3 + $0x28] sm:$0xf0]  ;;  %v11397_v58 = vld [vmem:[%s17113_s3 + $0x4] sm:$0xf]  ;;  %v11572_v7 = vld [vmem:[%s17113_s3 + $0x578] sm:$0xf0] }
 0x29b   : > { %v9065_v25 = vor.u32 %v11402_v41, %v9064_v2  ;;  %v9049_v55 = vor.u32 %v11397_v58, %v9046_v39  ;;  %v14487_v2 = vld [vmem:[#allocation4 + $0x18] sm:$0x77]  ;;  %v14495_v58 = vpack.c.b16 %v3357_v61, %v3357_v61  ;;  %v9196_v39 = vld [vmem:[%s17113_s3 + $0x128] sm:$0xf]  ;;  %v11426_v61 = vld [vmem:[%s17113_s3 + $0xe8] sm:$0xf0] }
 0x29c   : > { %3825 = vmatpush.bf16.msra.mxu1 %v9205_v57  ;;  %v11422_v57 = vld [vmem:[%s17113_s3 + $0xc8] sm:$0xf0]  ;;  %v3355_v43 = vunpack.c.l.b16 %v14487_v2  ;;  %v11448_v48 = vld [vmem:[%s17113_s3 + $0x19c] sm:$0xf] }
 0x29d   : > { %3240 = vmatmul.bf16.gmra.mxu2 %v14311_v23  ;;  %3294 = vmatmul.bf16.gmra.mxu1 %v14311_v23 }
 0x29e   : > { %3772 = vmatpush.bf16.msrb.mxu2 %v9189_v37  ;;  %3808 = vmatpush.bf16.msra.mxu0 %v9097_v10  ;;  %v9141_v37 = vor.u32 %v11422_v57, %v9140_v27  ;;  %v9232_v10 = vld [vmem:[%s17113_s3 + $0x170] sm:$0xf]  ;;  %v9305_v57 = vor.u32 %v11462_v28, %v9304_v53  ;;  %v11450_v53 = vld [vmem:[%s17113_s3 + $0x1a8] sm:$0xf0] }
 0x29f   : > { %3862 = vmatpush.bf16.msra.mxu3 %v9101_v11  ;;  %v9608_v11 = vld [vmem:[%s17113_s3 + $0x5e8] sm:$0xf] }
 0x2a0   : > { %3826 = vmatpush.bf16.msra.mxu1 %v9193_v56  ;;  %v11444_v56 = vld [vmem:[%s17113_s3 + $0x178] sm:$0xf0]  ;;  %v9609_v49 = vor.u32 %v11587_v18, %v9608_v11  ;;  %v9560_v18 = vld [vmem:[%s17113_s3 + $0x588] sm:$0xf] }
 0x2a1   : > { %v9233_v40 = vor.u32 %v11444_v56, %v9232_v10  ;;  %v14518_v56 = vpack.c.b16 %v3355_v43, %v3355_v43  ;;  %v9244_v43 = vld [vmem:[%s17113_s3 + $0x188] sm:$0xf] }
 0x2a2   : > { %3773 = vmatpush.bf16.msrb.mxu2 %v9177_v29  ;;  %3809 = vmatpush.bf16.msra.mxu0 %v9085_v46  ;;  %v9328_v29 = vld [vmem:[%s17113_s3 + $0x230] sm:$0xf]  ;;  %v9325_v46 = vor.u32 %v11466_v21, %v9322_v5  ;;  %v9274_v21 = vld [vmem:[%s17113_s3 + $0x1d4] sm:$0xf0] }
 0x2a3   : > { %3863 = vmatpush.bf16.msra.mxu3 %v9089_v16  ;;  %v11441_v16 = vld [vmem:[%s17113_s3 + $0x160] sm:$0xf0]  ;;  %v9280_v5 = vld [vmem:[%s17113_s3 + $0x1d0] sm:$0xf] }
 0x2a4   : > { %3827 = vmatpush.bf16.msra.mxu1 %v9181_v44  ;;  %v9220_v44 = vld [vmem:[%s17113_s3 + $0x158] sm:$0xf] }
 0x2a5   : > { %v9221_v63 = vor.u32 %v11441_v16, %v9220_v44  ;;  %v9172_v44 = vld [vmem:[%s17113_s3 + $0xf8] sm:$0xf]  ;;  %v11429_v16 = vld [vmem:[%s17113_s3 + $0x100] sm:$0xf0] }
 0x2a6   : > { %3774 = vmatpush.bf16.msrb.mxu2 %v9165_v31  ;;  %3810 = vmatpush.bf16.msra.mxu0 %v9073_v54  ;;  %v11465_v31 = vld [vmem:[%s17113_s3 + $0x220] sm:$0xf0]  ;;  %v9298_v54 = vld [vmem:[%s17113_s3 + $0x204] sm:$0xf0] }
 0x2a7   : > { %3343 = vmatmul.bf16.vlgmr.msrb.gmra.mxu0 %v14219_v36  ;;  %3864 = vmatpush.bf16.msra.mxu3 %v9077_v6  ;;  %v9052_v36 = vld [vmem:[%s17113_s3 + $0x8] sm:$0xf]  ;;  %v9317_v50 = vor.u32 %v11465_v31, %v9316_v42  ;;  %v11438_v6 = vld [vmem:[%s17113_s3 + $0x148] sm:$0xf0]  ;;  %v9301_v41 = vor.u32 %v11460_v52, %v9298_v54  ;;  %v9268_v42 = vld [vmem:[%s17113_s3 + $0x1b8] sm:$0xf] }
 0x2a8   : > { %3828 = vmatpush.bf16.msra.mxu1 %v9169_v59  ;;  %3795 = vmatmul.bf16.vlgmr.msrb.gmra.mxu3 %v14119_v32  ;;  %v9053_v9 = vor.u32 %v11399_v22, %v9052_v36  ;;  %v9208_v59 = vld [vmem:[%s17113_s3 + $0x140] sm:$0xf]  ;;  %v11459_v36 = vld [vmem:[%s17113_s3 + $0x1f0] sm:$0xf0]  ;;  %v9548_v31 = vld [vmem:[%s17113_s3 + $0x570] sm:$0xf] }
 0x2a9   : > { %v9209_v27 = vor.u32 %v11438_v6, %v9208_v59  ;;  %v9160_v54 = vld [vmem:[%s17113_s3 + $0xe0] sm:$0xf]  ;;  %v9549_v59 = vor.u32 %v11572_v7, %v9548_v31  ;;  %v9488_v7 = vld [vmem:[%s17113_s3 + $0x4f8] sm:$0xf] }
 0x2aa   : > { %3775 = vmatpush.bf16.msrb.mxu2 %v9153_v15  ;;  %3811 = vmatpush.bf16.msra.mxu0 %v9061_v26  ;;  %v11581_v15 = vld [vmem:[%s17113_s3 + $0x5c0] sm:$0xf0]  ;;  %v9256_v6 = vld [vmem:[%s17113_s3 + $0x1a0] sm:$0xf] }
 0x2ab   : > { %3865 = vmatpush.bf16.msra.mxu3 %v9065_v25  ;;  %v11457_v26 = vld [vmem:[%s17113_s3 + $0x1e4] sm:$0xf]  ;;  %v9585_v25 = vor.u32 %v11581_v15, %v9584_v1  ;;  %v9536_v1 = vld [vmem:[%s17113_s3 + $0x558] sm:$0xf]  ;;  %v9694_v31 = vld [vmem:[%s17113_s3 + $0x69c] sm:$0xf0] }
 0x2ac   : > { %3829 = vmatpush.bf16.msra.mxu1 %v9157_v38  ;;  %v9286_v38 = vld [vmem:[%s17113_s3 + $0x1ec] sm:$0xf0]  ;;  %v11569_v15 = vld [vmem:[%s17113_s3 + $0x560] sm:$0xf0] }
 0x2ad   : > { %3307 = vmatmul.bf16.vlgmr.msra.gmra.mxu2 %v13930_v19  ;;  %3759 = vmatmul.bf16.vlgmr.msrb.gmra.mxu1 %v13810_v62  ;;  %v11468_v19 = vld [vmem:[%s17113_s3 + $0x238] sm:$0xf0]  ;;  %v9289_v22 = vor.u32 %v11457_v26, %v9286_v38  ;;  %v9257_v26 = vor.u32 %v11450_v53, %v9256_v6  ;;  %v9148_v38 = vld [vmem:[%s17113_s3 + $0xc8] sm:$0xf] }
 0x2ae   : > { %3776 = vmatpush.bf16.msrb.mxu2 %v9141_v37  ;;  %3812 = vmatpush.bf16.msra.mxu0 %v9049_v55  ;;  %v9329_v30 = vor.u32 %v11468_v19, %v9328_v29  ;;  %v9292_v37 = vld [vmem:[%s17113_s3 + $0x1e8] sm:$0xf]  ;;  %v11578_v55 = vld [vmem:[%s17113_s3 + $0x5a8] sm:$0xf0]  ;;  %v9277_v29 = vor.u32 %v11454_v12, %v9274_v21  ;;  %v11451_v19 = vld [vmem:[%s17113_s3 + $0x1b4] sm:$0xf] }
 0x2af   : > { %3866 = vmatpush.bf16.msra.mxu3 %v9053_v9  ;;  %v9293_v10 = vor.u32 %v11459_v36, %v9292_v37  ;;  %v9184_v9 = vld [vmem:[%s17113_s3 + $0x110] sm:$0xf]  ;;  %v9524_v36 = vld [vmem:[%s17113_s3 + $0x540] sm:$0xf]  ;;  %v9514_v21 = vld [vmem:[%s17113_s3 + $0x534] sm:$0xf0] }
 0x2b0   : > { %3830 = vmatpush.bf16.msra.mxu1 %v9145_v17  ;;  %v9197_v17 = vor.u32 %v11435_v47, %v9196_v39  ;;  %v11423_v39 = vld [vmem:[%s17113_s3 + $0xd0] sm:$0xf0]  ;;  %v9682_v6 = vld [vmem:[%s17113_s3 + $0x684] sm:$0xf0] }
 0x2b1   : > { %v11447_v47 = vld [vmem:[%s17113_s3 + $0x190] sm:$0xf0] }
 0x2b2   : > { %3877 = vmatpush.bf16.msrb.mxu0 %v9233_v40  ;;  %3841 = vmatpush.bf16.msra.mxu2 %v9325_v46  ;;  %v11432_v40 = vld [vmem:[%s17113_s3 + $0x118] sm:$0xf0] }
 0x2b3   : > { %4437 = vmatpush.bf16.msrb.mxu3 %v9609_v49  ;;  %v11575_v49 = vld [vmem:[%s17113_s3 + $0x590] sm:$0xf0]  ;;  %v9185_v46 = vor.u32 %v11432_v40, %v9184_v9  ;;  %v9512_v9 = vld [vmem:[%s17113_s3 + $0x528] sm:$0xf] }
 0x2b4   : > { %3895 = vmatpush.bf16.msrb.mxu1 %v9329_v30  ;;  %v9561_v30 = vor.u32 %v11575_v49, %v9560_v18  ;;  %v11563_v40 = vld [vmem:[%s17113_s3 + $0x530] sm:$0xf0]  ;;  %v11562_v49 = vld [vmem:[%s17113_s3 + $0x52c] sm:$0xf] }
 0x2b5   : > { %v9513_v12 = vor.u32 %v11563_v40, %v9512_v9  ;;  %v11551_v9 = vld [vmem:[%s17113_s3 + $0x4d0] sm:$0xf0]  ;;  %v11550_v40 = vld [vmem:[%s17113_s3 + $0x4cc] sm:$0xf] }
 0x2b6   : > { %3878 = vmatpush.bf16.msrb.mxu0 %v9221_v63  ;;  %3842 = vmatpush.bf16.msra.mxu2 %v9313_v0  ;;  %v9265_v0 = vor.u32 %v11451_v19, %v9262_v35  ;;  %v11453_v63 = vld [vmem:[%s17113_s3 + $0x1c0] sm:$0xf0]  ;;  %v11560_v19 = vld [vmem:[%s17113_s3 + $0x518] sm:$0xf0]  ;;  %v9692_v35 = vld [vmem:[%s17113_s3 + $0x690] sm:$0xf] }
 0x2b7   : > { %4438 = vmatpush.bf16.msrb.mxu3 %v9597_v60  ;;  %3348 = vmatmul.bf16.gmra.mxu0 %v14311_v23  ;;  %v9572_v23 = vld [vmem:[%s17113_s3 + $0x5a0] sm:$0xf]  ;;  %v9173_v60 = vor.u32 %v11429_v16, %v9172_v44  ;;  %v9269_v52 = vor.u32 %v11453_v63, %v9268_v42  ;;  %v11559_v16 = vld [vmem:[%s17113_s3 + $0x514] sm:$0xf] }
 0x2b8   : > { %3896 = vmatpush.bf16.msrb.mxu1 %v9317_v50  ;;  %3800 = vmatmul.bf16.gmra.mxu3 %v14495_v58  ;;  %v9573_v11 = vor.u32 %v11578_v55, %v9572_v23  ;;  %v9250_v50 = vld [vmem:[%s17113_s3 + $0x1a4] sm:$0xf0]  ;;  %v9149_v23 = vor.u32 %v11423_v39, %v9148_v38  ;;  %v9245_v55 = vor.u32 %v11447_v47, %v9244_v43  ;;  %v9502_v42 = vld [vmem:[%s17113_s3 + $0x51c] sm:$0xf0]  ;;  %v11602_v38 = vld [vmem:[%s17113_s3 + $0x668] sm:$0xf0] }
 0x2b9   : > { %v9253_v28 = vor.u32 %v11448_v48, %v9250_v50  ;;  %v9505_v63 = vor.u32 %v11559_v16, %v9502_v42  ;;  %v11557_v48 = vld [vmem:[%s17113_s3 + $0x500] sm:$0xf0]  ;;  %v9478_v39 = vld [vmem:[%s17113_s3 + $0x4ec] sm:$0xf0]  ;;  %v11595_v16 = vld [vmem:[%s17113_s3 + $0x634] sm:$0xf] }
 0x2ba   : > { %3843 = vmatpush.bf16.msra.mxu2 %v9301_v41  ;;  %3879 = vmatpush.bf16.msrb.mxu0 %v9209_v27  ;;  %v11445_v41 = vld [vmem:[%s17113_s3 + $0x184] sm:$0xf]  ;;  %v9238_v27 = vld [vmem:[%s17113_s3 + $0x18c] sm:$0xf0]  ;;  %v9489_v53 = vor.u32 %v11557_v48, %v9488_v7  ;;  %v14782_v7 = vrot.slane %v13872_v3, 1 }
 0x2bb   : > { %4439 = vmatpush.bf16.msrb.mxu3 %v9585_v25  ;;  %v9537_v25 = vor.u32 %v11569_v15, %v9536_v1  ;;  %v9241_v37 = vor.u32 %v11445_v41, %v9238_v27  ;;  %v9476_v15 = vld [vmem:[%s17113_s3 + $0x4e0] sm:$0xf]  ;;  %v11554_v41 = vld [vmem:[%s17113_s3 + $0x4e8] sm:$0xf0]  ;;  %v9670_v47 = vld [vmem:[%s17113_s3 + $0x66c] sm:$0xf0] }
 0x2bc   : > { %3897 = vmatpush.bf16.msrb.mxu1 %v9305_v57  ;;  %v9161_v57 = vor.u32 %v11426_v61, %v9160_v54  ;;  %v11556_v54 = vld [vmem:[%s17113_s3 + $0x4fc] sm:$0xf]  ;;  %v9477_v43 = vor.u32 %v11554_v41, %v9476_v15  ;;  %v9442_v3 = vld [vmem:[%s17113_s3 + $0x4a4] sm:$0xf0]  ;;  %v9428_v15 = vld [vmem:[%s17113_s3 + $0x480] sm:$0xf] }
 0x2bd   : > { %3312 = vmatmul.bf16.gmra.mxu2 %v14060_v13  ;;  %3764 = vmatmul.bf16.gmra.mxu1 %v14518_v56  ;;  %v11456_v13 = vld [vmem:[%s17113_s3 + $0x1d8] sm:$0xf0]  ;;  %v11542_v41 = vld [vmem:[%s17113_s3 + $0x488] sm:$0xf0] }
 0x2be   : > { %3844 = vmatpush.bf16.msra.mxu2 %v9289_v22  ;;  %3880 = vmatpush.bf16.msrb.mxu0 %v9197_v17  ;;  %v9281_v20 = vor.u32 %v11456_v13, %v9280_v5  ;;  %v11566_v22 = vld [vmem:[%s17113_s3 + $0x548] sm:$0xf0]  ;;  %v9706_v5 = vld [vmem:[%s17113_s3 + $0x6b4] sm:$0xf0]  ;;  %v11604_v61 = vld [vmem:[%s17113_s3 + $0x67c] sm:$0xf] }
 0x2bf   : > { %4440 = vmatpush.bf16.msrb.mxu3 %v9573_v11  ;;  %v9525_v17 = vor.u32 %v11566_v22, %v9524_v36  ;;  %v11610_v11 = vld [vmem:[%s17113_s3 + $0x6ac] sm:$0xf]  ;;  %v9685_v27 = vor.u32 %v11604_v61, %v9682_v6  ;;  %v11592_v6 = vld [vmem:[%s17113_s3 + $0x61c] sm:$0xf] }
 0x2c0   : > { %3898 = vmatpush.bf16.msrb.mxu1 %v9293_v10  ;;  %v11611_v10 = vld [vmem:[%s17113_s3 + $0x6b0] sm:$0xf0]  ;;  %v9709_v13 = vor.u32 %v11610_v11, %v9706_v5  ;;  %v9464_v11 = vld [vmem:[%s17113_s3 + $0x4c8] sm:$0xf]  ;;  %v9452_v5 = vld [vmem:[%s17113_s3 + $0x4b0] sm:$0xf] }
 0x2c2   : > { %3845 = vmatpush.bf16.msra.mxu2 %v9277_v29  ;;  %3881 = vmatpush.bf16.msrb.mxu0 %v9185_v46  ;;  %v9500_v29 = vld [vmem:[%s17113_s3 + $0x510] sm:$0xf]  ;;  %v9517_v46 = vor.u32 %v11562_v49, %v9514_v21  ;;  %v9658_v21 = vld [vmem:[%s17113_s3 + $0x654] sm:$0xf0] }
 0x2c3   : > { %4441 = vmatpush.bf16.msrb.mxu3 %v9561_v30  ;;  %v9501_v30 = vor.u32 %v11560_v19, %v9500_v29  ;;  %v9644_v19 = vld [vmem:[%s17113_s3 + $0x630] sm:$0xf] }
 0x2c4   : > { %3899 = vmatpush.bf16.msrb.mxu1 %v9281_v20  ;;  %v11608_v20 = vld [vmem:[%s17113_s3 + $0x698] sm:$0xf0] }
 0x2c5   : > { %v9693_v44 = vor.u32 %v11608_v20, %v9692_v35  ;;  %v11596_v35 = vld [vmem:[%s17113_s3 + $0x638] sm:$0xf0] }
 0x2c6   : > { %3846 = vmatpush.bf16.msra.mxu2 %v9265_v0  ;;  %3882 = vmatpush.bf16.msrb.mxu0 %v9173_v60  ;;  %v11607_v0 = vld [vmem:[%s17113_s3 + $0x694] sm:$0xf]  ;;  %v9680_v60 = vld [vmem:[%s17113_s3 + $0x678] sm:$0xf]  ;;  %v9645_v48 = vor.u32 %v11596_v35, %v9644_v19  ;;  %v9598_v35 = vld [vmem:[%s17113_s3 + $0x5dc] sm:$0xf0] }
 0x2c7   : > { %3813 = vmatmul.bf16.vlgmr.msra.gmra.mxu0 %v13810_v62  ;;  %4442 = vmatpush.bf16.msrb.mxu3 %v9549_v59  ;;  %v9697_v50 = vor.u32 %v11607_v0, %v9694_v31  ;;  %v9490_v59 = vld [vmem:[%s17113_s3 + $0x504] sm:$0xf0]  ;;  %v9646_v0 = vld [vmem:[%s17113_s3 + $0x63c] sm:$0xf0]  ;;  %v11545_v31 = vld [vmem:[%s17113_s3 + $0x4a0] sm:$0xf0] }
 0x2c8   : > { %3900 = vmatpush.bf16.msrb.mxu1 %v9269_v52  ;;  %3867 = vmatmul.bf16.vlgmr.msra.gmra.mxu3 %v13810_v62  ;;  %v9704_v62 = vld [vmem:[%s17113_s3 + $0x6a8] sm:$0xf]  ;;  %v11605_v52 = vld [vmem:[%s17113_s3 + $0x680] sm:$0xf0]  ;;  %v9493_v1 = vor.u32 %v11556_v54, %v9490_v59 }
 0x2c9   : > { %v9705_v18 = vor.u32 %v11611_v10, %v9704_v62  ;;  %v11989_v62 = vld [vmem:[#allocation4] sm:$0xee] }
 0x2ca   : > { %3847 = vmatpush.bf16.msra.mxu2 %v9253_v28  ;;  %3883 = vmatpush.bf16.msrb.mxu0 %v9161_v57  ;;  %v9681_v28 = vor.u32 %v11605_v52, %v9680_v60  ;;  %v9668_v57 = vld [vmem:[%s17113_s3 + $0x660] sm:$0xf]  ;;  %v4015_v10 = vunpack.c.h.b16 %v11989_v62  ;;  %v11593_v60 = vld [vmem:[%s17113_s3 + $0x620] sm:$0xf0]  ;;  %v11544_v52 = vld [vmem:[%s17113_s3 + $0x49c] sm:$0xf] }
 0x2cb   : > { %4443 = vmatpush.bf16.msrb.mxu3 %v9537_v25  ;;  %v11553_v25 = vld [vmem:[%s17113_s3 + $0x4e4] sm:$0xf] }
 0x2cc   : > { %3901 = vmatpush.bf16.msrb.mxu1 %v9257_v26  ;;  %v3356_v26 = vunpack.c.h.b16 %v14487_v2  ;;  %v11601_v2 = vld [vmem:[%s17113_s3 + $0x664] sm:$0xf]  ;;  %v9481_v36 = vor.u32 %v11553_v25, %v9478_v39  ;;  %v4018_v42 = vpack.c.b16 %v2745_v14, %v4015_v10  ;;  %v9632_v14 = vld [vmem:[%s17113_s3 + $0x618] sm:$0xf]  ;;  %v9429_v25 = vor.u32 %v11542_v41, %v9428_v15  ;;  %v9620_v39 = vld [vmem:[%s17113_s3 + $0x600] sm:$0xf] }
 0x2cd   : > { %3777 = vmatmul.bf16.vlgmr.msrb.gmra.mxu2 %v13814_v34  ;;  %3831 = vmatmul.bf16.vlgmr.msra.gmra.mxu1 %v13814_v34  ;;  %v9520_v10 = vld [vmem:[%s17113_s3 + $0x530] sm:$0xf]  ;;  %v3914_v41 = vld [vmem:[#allocation4 + $0x8] sm:$0xe] }
 0x2ce   : > { %3848 = vmatpush.bf16.msra.mxu2 %v9241_v37  ;;  %3884 = vmatpush.bf16.msrb.mxu0 %v9149_v23  ;;  %v9669_v37 = vor.u32 %v11602_v38, %v9668_v57  ;;  %v14721_v22 = vpack.c.b16 %v3356_v26, %v3356_v26  ;;  %v9673_v23 = vor.u32 %v11601_v2, %v9670_v47  ;;  %v9622_v2 = vld [vmem:[%s17113_s3 + $0x60c] sm:$0xf0] }
 0x2cf   : > { %4444 = vmatpush.bf16.msrb.mxu3 %v9525_v17  ;;  %v11598_v17 = vld [vmem:[%s17113_s3 + $0x64c] sm:$0xf]  ;;  %v9445_v57 = vor.u32 %v11544_v52, %v9442_v3  ;;  %v9484_v3 = vld [vmem:[%s17113_s3 + $0x4e8] sm:$0xf] }
 0x2d0   : > { %3902 = vmatpush.bf16.msrb.mxu1 %v9245_v55  ;;  %v11599_v55 = vld [vmem:[%s17113_s3 + $0x650] sm:$0xf0] }
 0x2d2   : > { %4455 = vmatpush.bf16.msra.mxu0 %v9705_v18  ;;  %4419 = vmatpush.bf16.msrb.mxu2 %v9513_v12  ;;  %v9465_v18 = vor.u32 %v11551_v9, %v9464_v11  ;;  %v9466_v12 = vld [vmem:[%s17113_s3 + $0x4d4] sm:$0xf0]  ;;  %v11564_v11 = vld [vmem:[%s17113_s3 + $0x538] sm:$0xf0] }
 0x2d3   : > { %4509 = vmatpush.bf16.msra.mxu3 %v9709_v13  ;;  %v9469_v29 = vor.u32 %v11550_v40, %v9466_v12  ;;  %v11548_v13 = vld [vmem:[%s17113_s3 + $0x4b8] sm:$0xf0]  ;;  %v11586_v40 = vld [vmem:[%s17113_s3 + $0x5ec] sm:$0xf] }
 0x2d4   : > { %4473 = vmatpush.bf16.msra.mxu1 %v9517_v46  ;;  %v9661_v46 = vor.u32 %v11598_v17, %v9658_v21  ;;  %v9453_v20 = vor.u32 %v11548_v13, %v9452_v5  ;;  %v11561_v21 = vld [vmem:[%s17113_s3 + $0x520] sm:$0xf0]  ;;  %v9616_v5 = vld [vmem:[%s17113_s3 + $0x5f0] sm:$0xf] }
 0x2d6   : > { %4456 = vmatpush.bf16.msra.mxu0 %v9693_v44  ;;  %4420 = vmatpush.bf16.msrb.mxu2 %v9501_v30  ;;  %v11547_v30 = vld [vmem:[%s17113_s3 + $0x4b4] sm:$0xf]  ;;  %v9454_v44 = vld [vmem:[%s17113_s3 + $0x4bc] sm:$0xf0] }
 0x2d7   : > { %4510 = vmatpush.bf16.msra.mxu3 %v9697_v50  ;;  %3818 = vmatmul.bf16.gmra.mxu0 %v14518_v56  ;;  %v9457_v4 = vor.u32 %v11547_v30, %v9454_v44  ;;  %v9649_v50 = vor.u32 %v11595_v16, %v9646_v0  ;;  %v9604_v44 = vld [vmem:[%s17113_s3 + $0x5d8] sm:$0xf]  ;;  %v11585_v16 = vld [vmem:[%s17113_s3 + $0x5e0] sm:$0xf0] }
 0x2d8   : > { %4474 = vmatpush.bf16.msra.mxu1 %v9505_v63  ;;  %3872 = vmatmul.bf16.gmra.mxu3 %v14518_v56  ;;  %v9656_v56 = vld [vmem:[%s17113_s3 + $0x648] sm:$0xf]  ;;  %v9440_v63 = vld [vmem:[%s17113_s3 + $0x498] sm:$0xf] }
 0x2d9   : > { %v9657_v49 = vor.u32 %v11599_v55, %v9656_v56  ;;  %v9441_v61 = vor.u32 %v11545_v31, %v9440_v63  ;;  %v9605_v31 = vor.u32 %v11585_v16, %v9604_v44 }
 0x2da   : > { %4421 = vmatpush.bf16.msrb.mxu2 %v9489_v53  ;;  %4457 = vmatpush.bf16.msra.mxu0 %v9681_v28  ;;  %v9634_v53 = vld [vmem:[%s17113_s3 + $0x624] sm:$0xf0] }
 0x2db   : > { %4511 = vmatpush.bf16.msra.mxu3 %v9685_v27  ;;  %v9633_v27 = vor.u32 %v11593_v60, %v9632_v14  ;;  %v9637_v38 = vor.u32 %v11592_v6, %v9634_v53  ;;  %v11558_v14 = vld [vmem:[%s17113_s3 + $0x508] sm:$0xf0]  ;;  %v9574_v53 = vld [vmem:[%s17113_s3 + $0x5ac] sm:$0xf0] }
 0x2dc   : > { %4475 = vmatpush.bf16.msra.mxu1 %v9493_v1  ;;  %v4023_v1 = vrot.slane %v4018_v42, 1  ;;  %v11580_v42 = vld [vmem:[%s17113_s3 + $0x5bc] sm:$0xf] }
 0x2dd   : > { %3782 = vmatmul.bf16.gmra.mxu2 %v14721_v22  ;;  %3836 = vmatmul.bf16.gmra.mxu1 %v14721_v22 }
 0x2de   : > { %4422 = vmatpush.bf16.msrb.mxu2 %v9477_v43  ;;  %4458 = vmatpush.bf16.msra.mxu0 %v9669_v37  ;;  %v14813_v26 = vsel %vm720_vm5, %v4023_v1, %v14782_v7  ;;  %v11590_v43 = vld [vmem:[%s17113_s3 + $0x608] sm:$0xf0] }
 0x2df   : > { %4512 = vmatpush.bf16.msra.mxu3 %v9673_v23  ;;  %v9621_v47 = vor.u32 %v11590_v43, %v9620_v39  ;;  %v9430_v23 = vld [vmem:[%s17113_s3 + $0x48c] sm:$0xf0] }
 0x2e0   : > { %4476 = vmatpush.bf16.msra.mxu1 %v9481_v36  ;;  %v11541_v36 = vld [vmem:[%s17113_s3 + $0x484] sm:$0xf] }
 0x2e1   : > { %v9433_v62 = vor.u32 %v11541_v36, %v9430_v23  ;;  %v9562_v36 = vld [vmem:[%s17113_s3 + $0x594] sm:$0xf0]  ;;  %v4016_v23 = vunpack.c.l.b16 %v3914_v41  ;;  %v9712_v41 = vld [vmem:[%s17113_s3 + $0x6b0] sm:$0xf] }
 0x2e2   : > { %4423 = vmatpush.bf16.msrb.mxu2 %v9465_v18  ;;  %4459 = vmatpush.bf16.msra.mxu0 %v9657_v49  ;;  %v9610_v18 = vld [vmem:[%s17113_s3 + $0x5f4] sm:$0xf0]  ;;  %v9521_v49 = vor.u32 %v11564_v11, %v9520_v10  ;;  %v11549_v10 = vld [vmem:[%s17113_s3 + $0x4c0] sm:$0xf0]  ;;  %v9568_v11 = vld [vmem:[%s17113_s3 + $0x590] sm:$0xf] }
 0x2e3   : > { %4513 = vmatpush.bf16.msra.mxu3 %v9661_v46  ;;  %v9613_v12 = vor.u32 %v11586_v40, %v9610_v18  ;;  %v11583_v46 = vld [vmem:[%s17113_s3 + $0x5d4] sm:$0xf]  ;;  %v9550_v40 = vld [vmem:[%s17113_s3 + $0x57c] sm:$0xf0] }
 0x2e4   : > { %4477 = vmatpush.bf16.msra.mxu1 %v9469_v29  ;;  %v3200_v54 = vpop.f32.mrf.mxu0  ;;  %v3218_v59 = vpop.f32.mrf.mxu1  ;;  %v11588_v29 = vld [vmem:[%s17113_s3 + $0x5f8] sm:$0xf0]  ;;  %v9601_v30 = vor.u32 %v11583_v46, %v9598_v35  ;;  %v9448_v35 = vld [vmem:[%s17113_s3 + $0x4a0] sm:$0xf] }
 0x2e5   : > { %v14802_v28 = vadd.f32 %v3218_v59, %v3200_v54  ;;  %v9617_v19 = vor.u32 %v11588_v29, %v9616_v5  ;;  %v11555_v54 = vld [vmem:[%s17113_s3 + $0x4f0] sm:$0xf0]  ;;  %v9592_v59 = vld [vmem:[%s17113_s3 + $0x5c0] sm:$0xf]  ;;  %v11568_v5 = vld [vmem:[%s17113_s3 + $0x55c] sm:$0xf] }
 0x2e6   : > { %4424 = vmatpush.bf16.msrb.mxu2 %v9453_v20  ;;  %4460 = vmatpush.bf16.msra.mxu0 %v9645_v48  ;;  %v9586_v48 = vld [vmem:[%s17113_s3 + $0x5c4] sm:$0xf0]  ;;  %v9485_v1 = vor.u32 %v11555_v54, %v9484_v3 }
 0x2e7   : > { %3885 = vmatmul.bf16.vlgmr.msrb.gmra.mxu0 %v13814_v34  ;;  %4514 = vmatpush.bf16.msra.mxu3 %v9649_v50  ;;  %v11589_v34 = vld [vmem:[%s17113_s3 + $0x604] sm:$0xf]  ;;  %v9589_v60 = vor.u32 %v11580_v42, %v9586_v48  ;;  %v9538_v29 = vld [vmem:[%s17113_s3 + $0x564] sm:$0xf0] }
 0x2e8   : > { %4478 = vmatpush.bf16.msra.mxu1 %v9457_v4  ;;  %4445 = vmatmul.bf16.vlgmr.msrb.gmra.mxu3 %v14813_v26  ;;  %v9625_v56 = vor.u32 %v11589_v34, %v9622_v2  ;;  %v9496_v4 = vld [vmem:[%s17113_s3 + $0x500] sm:$0xf]  ;;  %v9472_v34 = vld [vmem:[%s17113_s3 + $0x4d0] sm:$0xf]  ;;  %v11552_v2 = vld [vmem:[%s17113_s3 + $0x4d8] sm:$0xf0]  ;;  %v9541_v42 = vor.u32 %v11568_v5, %v9538_v29 }
 0x2e9   : > { %v9497_v52 = vor.u32 %v11558_v14, %v9496_v4  ;;  %v9526_v4 = vld [vmem:[%s17113_s3 + $0x54c] sm:$0xf0]  ;;  %v9436_v14 = vld [vmem:[%s17113_s3 + $0x488] sm:$0xf]  ;;  %v11597_v5 = vld [vmem:[%s17113_s3 + $0x640] sm:$0xf0] }
 0x2ea   : > { %4425 = vmatpush.bf16.msrb.mxu2 %v9441_v61  ;;  %4461 = vmatpush.bf16.msra.mxu0 %v9633_v27  ;;  %v11577_v61 = vld [vmem:[%s17113_s3 + $0x5a4] sm:$0xf] }
 0x2eb   : > { %v14828_v37 = vpop.f32.mrf.mxu3  ;;  %4515 = vmatpush.bf16.msra.mxu3 %v9637_v38  ;;  %v9577_v27 = vor.u32 %v11577_v61, %v9574_v53  ;;  %v11579_v38 = vld [vmem:[%s17113_s3 + $0x5b0] sm:$0xf0]  ;;  %v9532_v61 = vld [vmem:[%s17113_s3 + $0x548] sm:$0xf] }
 0x2ec   : > { %4479 = vmatpush.bf16.msra.mxu1 %v9445_v57  ;;  %v3202_v55 = vpop.f32.mrf.mxu0  ;;  %v3220_v17 = vpop.f32.mrf.mxu1  ;;  %v9580_v57 = vld [vmem:[%s17113_s3 + $0x5a8] sm:$0xf] }
 0x2ed   : > { %3849 = vmatmul.bf16.vlgmr.msra.gmra.mxu2 %v14119_v32  ;;  %3903 = vmatmul.bf16.vlgmr.msrb.gmra.mxu1 %v14119_v32  ;;  %v14844_v9 = vadd.f32 %v3220_v17, %v3202_v55  ;;  %v9508_v32 = vld [vmem:[%s17113_s3 + $0x518] sm:$0xf]  ;;  %v9581_v43 = vor.u32 %v11579_v38, %v9580_v57  ;;  %v9473_v55 = vor.u32 %v11552_v2, %v9472_v34 }
 0x2ee   : > { %4426 = vmatpush.bf16.msrb.mxu2 %v9429_v25  ;;  %4462 = vmatpush.bf16.msra.mxu0 %v9621_v47  ;;  %v9509_v13 = vor.u32 %v11561_v21, %v9508_v32  ;;  %v11574_v47 = vld [vmem:[%s17113_s3 + $0x58c] sm:$0xf]  ;;  %v4019_v17 = vpack.c.b16 %v2746_v8, %v4016_v23  ;;  %v11571_v8 = vld [vmem:[%s17113_s3 + $0x574] sm:$0xf] }
 0x2ef   : > { %4516 = vmatpush.bf16.msra.mxu3 %v9625_v56  ;;  %v9565_v56 = vor.u32 %v11574_v47, %v9562_v36  ;;  %v9553_v21 = vor.u32 %v11571_v8, %v9550_v40  ;;  %v9688_v36 = vld [vmem:[%s17113_s3 + $0x680] sm:$0xf] }
 0x2f0   : > { %4480 = vmatpush.bf16.msra.mxu1 %v9433_v62  ;;  %v14937_v62 = vrot.slane %v14179_v33, 1  ;;  %v9569_v33 = vor.u32 %v11576_v51, %v9568_v11  ;;  %v11603_v11 = vld [vmem:[%s17113_s3 + $0x670] sm:$0xf0] }
 0x2f2   : > { %4527 = vmatpush.bf16.msrb.mxu0 %v9521_v49  ;;  %4491 = vmatpush.bf16.msra.mxu2 %v9613_v12  ;;  %v9556_v49 = vld [vmem:[%s17113_s3 + $0x578] sm:$0xf]  ;;  %v11573_v12 = vld [vmem:[%s17113_s3 + $0x580] sm:$0xf0] }
 0x2f3   : > { %v14870_v20 = vpop.f32.mrf.mxu3 }
 0x2f4   : > { %v3205_v0 = vpop.f32.mrf.mxu0  ;;  %v3223_v63 = vpop.f32.mrf.mxu1  ;;  %4545 = vmatpush.bf16.msrb.mxu1 %v9617_v19  ;;  %v9557_v19 = vor.u32 %v11573_v12, %v9556_v49 }
 0x2f5   : > { %v14890_v50 = vadd.f32 %v3223_v63, %v3205_v0  ;;  %v9544_v63 = vld [vmem:[%s17113_s3 + $0x560] sm:$0xf] }
 0x2f6   : > { %4528 = vmatpush.bf16.msrb.mxu0 %v9509_v13  ;;  %4492 = vmatpush.bf16.msra.mxu2 %v9601_v30  ;;  %v4026_v13 = vrot.slane %v4019_v17, 1  ;;  %v11546_v30 = vld [vmem:[%s17113_s3 + $0x4a8] sm:$0xf0] }
 0x2f7   : > { %3890 = vmatmul.bf16.gmra.mxu0 %v14721_v22  ;;  %v11582_v22 = vld [vmem:[%s17113_s3 + $0x5c8] sm:$0xf0]  ;;  %v9449_v0 = vor.u32 %v11546_v30, %v9448_v35 }
 0x2f8   : > { %4450 = vmatmul.bf16.gmra.mxu3 %v14782_v7  ;;  %4546 = vmatpush.bf16.msrb.mxu1 %v9605_v31  ;;  %v9593_v6 = vor.u32 %v11582_v22, %v9592_v59  ;;  %v14978_v16 = vsel %vm720_vm5, %v4026_v13, %v14937_v62  ;;  %v11565_v31 = vld [vmem:[%s17113_s3 + $0x544] sm:$0xf]  ;;  %v9640_v13 = vld [vmem:[%s17113_s3 + $0x620] sm:$0xf]  ;;  %vm5481_vm5 = vsmask.f32 5376 }
 0x2f9   : > { %v9529_v3 = vor.u32 %v11565_v31, %v9526_v4  ;;  %vm15899_vm8 = vmand %vm5480_vm3, %vm5481_vm5  ;;  %vm6547_vm5 = vcmask 719872  }
 0x2fa   : > { %4493 = vmatpush.bf16.msra.mxu2 %v9589_v60  ;;  %4529 = vmatpush.bf16.msrb.mxu0 %v9497_v52  ;;  %v11543_v60 = vld [vmem:[%s17113_s3 + $0x490] sm:$0xf0]  ;;  %vm5483_vm9 = vmor %vm15899_vm8, %vm15893_vm6  ;;  %vm7048_vm6 = vsmask.f32 3328  ;;  %vm7050_vm8 = vcmask 326660  }
 0x2fb   : > { %v14912_v15 = vpop.f32.mrf.mxu3  ;;  %v9437_v54 = vor.u32 %v11543_v60, %v9436_v14 }
 0x2fc   : > { %v3207_v25 = vpop.f32.mrf.mxu0  ;;  %v3225_v39 = vpop.f32.mrf.mxu1  ;;  %4547 = vmatpush.bf16.msrb.mxu1 %v9593_v6  ;;  %v11567_v6 = vld [vmem:[%s17113_s3 + $0x550] sm:$0xf0] }
 0x2fd   : > { %3854 = vmatmul.bf16.gmra.mxu2 %v14495_v58  ;;  %3908 = vmatmul.bf16.gmra.mxu1 %v14495_v58  ;;  %v9460_v58 = vld [vmem:[%s17113_s3 + $0x4b8] sm:$0xf] }
 0x2fe   : > { %4494 = vmatpush.bf16.msra.mxu2 %v9577_v27  ;;  %4530 = vmatpush.bf16.msrb.mxu0 %v9485_v1  ;;  %v9461_v18 = vor.u32 %v11549_v10, %v9460_v58  ;;  %v9533_v1 = vor.u32 %v11567_v6, %v9532_v61  ;;  %v11612_v27 = vld [vmem:[%s17113_s3 + $0x6b8] sm:$0xf0]  ;;  %v9700_v39 = vld [vmem:[%s17113_s3 + $0x698] sm:$0xf]  ;;  %v9676_v10 = vld [vmem:[%s17113_s3 + $0x668] sm:$0xf] }
 0x2ff   : > { %v9713_v57 = vor.u32 %v11612_v27, %v9712_v41  ;;  %v9677_v8 = vor.u32 %v11603_v11, %v9676_v10 }
 0x300   : > { %4548 = vmatpush.bf16.msrb.mxu1 %v9581_v43  ;;  %v11609_v43 = vld [vmem:[%s17113_s3 + $0x6a0] sm:$0xf0] }
 0x301   : > { %v9701_v2 = vor.u32 %v11609_v43, %v9700_v39 }
 0x302   : > { %4495 = vmatpush.bf16.msra.mxu2 %v9565_v56  ;;  %4531 = vmatpush.bf16.msrb.mxu0 %v9473_v55 }
 0x303   : > { %v3261_v32 = vpop.f32.mrf.mxu3 }
 0x304   : > { %v3272_v46 = vpop.f32.mrf.mxu0  ;;  %4549 = vmatpush.bf16.msrb.mxu1 %v9569_v33 }
 0x305   : > { %v3273_v44 = vadd.f32 %v3272_v46, %v14828_v37  ;;  %v11570_v37 = vld [vmem:[%s17113_s3 + $0x568] sm:$0xf0] }
 0x306   : > { %4496 = vmatpush.bf16.msra.mxu2 %v9553_v21  ;;  %4532 = vmatpush.bf16.msrb.mxu0 %v9461_v18  ;;  %v9545_v48 = vor.u32 %v11570_v37, %v9544_v63  ;;  %v11600_v18 = vld [vmem:[%s17113_s3 + $0x658] sm:$0xf0]  ;;  %v9652_v21 = vld [vmem:[%s17113_s3 + $0x638] sm:$0xf] }
 0x307   : > { %4463 = vmatmul.bf16.vlgmr.msra.gmra.mxu0 %v14978_v16  ;;  %v9653_v46 = vor.u32 %v11597_v5, %v9652_v21 }
 0x308   : > { %4517 = vmatmul.bf16.vlgmr.msra.gmra.mxu3 %v14978_v16  ;;  %4550 = vmatpush.bf16.msrb.mxu1 %v9557_v19  ;;  %v11594_v19 = vld [vmem:[%s17113_s3 + $0x628] sm:$0xf0] }
 0x309   : > { %v9641_v30 = vor.u32 %v11594_v19, %v9640_v13 }
 0x30a   : > { %v3290_v52 = vpop.f32.mrf.mxu1  ;;  %4497 = vmatpush.bf16.msra.mxu2 %v9541_v42  ;;  %4533 = vmatpush.bf16.msrb.mxu0 %v9449_v0  ;;  %v9628_v42 = vld [vmem:[%s17113_s3 + $0x608] sm:$0xf]  ;;  %v11591_v0 = vld [vmem:[%s17113_s3 + $0x610] sm:$0xf0] }
 0x30b   : > { %v15000_v59 = vadd.f32 %v3290_v52, %v3273_v44  ;;  %v15002_v22 = vpop.f32.mrf.mxu3  ;;  %v9629_v63 = vor.u32 %v11591_v0, %v9628_v42 }
 0x30c   : > { %v15010_v53 = vpop.f32.mrf.mxu0  ;;  %4551 = vmatpush.bf16.msrb.mxu1 %v9545_v48 }
 0x30d   : > { %4427 = vmatmul.bf16.vlgmr.msrb.gmra.mxu2 %v13993_v24  ;;  %4481 = vmatmul.bf16.vlgmr.msra.gmra.mxu1 %v13993_v24 }
 0x30e   : > { %4498 = vmatpush.bf16.msra.mxu2 %v9529_v3  ;;  %4534 = vmatpush.bf16.msrb.mxu0 %v9437_v54 }
 0x310   : > { %v3236_v38 = vpop.f32.mrf.mxu2  ;;  %4552 = vmatpush.bf16.msrb.mxu1 %v9533_v1 }
 0x311   : > { %v3237_v25 = vadd.f32 %v3236_v38, %v14802_v28  ;;  %v11606_v28 = vld [vmem:[%s17113_s3 + $0x688] sm:$0xf0] }
 0x312   : > { %4563 = vmatpush.bf16.msrb.mxu2 %v9713_v57  ;;  %v15027_v34 = vpop.f32.mrf.mxu1  ;;  %v9689_v56 = vor.u32 %v11606_v28, %v9688_v36 }
 0x313   : > { %v15029_v47 = vpop.f32.mrf.mxu3 }
 0x314   : > { %v3277_v23 = vpop.f32.mrf.mxu0 }
 0x315   : > { %v3278_v55 = vadd.f32 %v3277_v23, %v14912_v15 }
 0x316   : > { %4564 = vmatpush.bf16.msrb.mxu2 %v9701_v2 }
 0x317   : > { %4468 = vmatmul.bf16.gmra.mxu0 %v14937_v62 }
 0x318   : > { %v3238_v17 = vpop.f32.mrf.mxu2  ;;  %4522 = vmatmul.bf16.gmra.mxu3 %v14937_v62 }
 0x319   : > { %v15041_v58 = vadd.f32 %v3238_v17, %v14844_v9  ;;  %v9664_v9 = vld [vmem:[%s17113_s3 + $0x650] sm:$0xf] }
 0x31a   : > { %4565 = vmatpush.bf16.msrb.mxu2 %v9689_v56  ;;  %v3295_v51 = vpop.f32.mrf.mxu1  ;;  %v9665_v49 = vor.u32 %v11600_v18, %v9664_v9 }
 0x31b   : > { %v15049_v15 = vadd.f32 %v3295_v51, %v3278_v55  ;;  %v3331_v33 = vpop.f32.mrf.mxu3 }
 0x31c   : > { %v3279_v40 = vpop.f32.mrf.mxu0 }
 0x31d   : > { %4432 = vmatmul.bf16.gmra.mxu2 %v13974_v45  ;;  %4486 = vmatmul.bf16.gmra.mxu1 %v13974_v45 }
 0x31e   : > { %4566 = vmatpush.bf16.msrb.mxu2 %v9677_v8 }
 0x320   : > { %v3241_v12 = vpop.f32.mrf.mxu2 }
 0x321   : > { %v3242_v32 = vadd.f32 %v3241_v12, %v14890_v50 }
 0x322   : > { %4567 = vmatpush.bf16.msrb.mxu2 %v9665_v49  ;;  %v3297_v29 = vpop.f32.mrf.mxu1 }
 0x323   : > { %v3333_v35 = vpop.f32.mrf.mxu3 }
 0x324   : > { %v3344_v50 = vpop.f32.mrf.mxu0 }
 0x326   : > { %4568 = vmatpush.bf16.msrb.mxu2 %v9653_v46 }
 0x327   : > { %4535 = vmatmul.bf16.vlgmr.msrb.gmra.mxu0 %v13993_v24 }
 0x328   : > { %v3243_v44 = vpop.f32.mrf.mxu2 }
 0x32a   : > { %4569 = vmatpush.bf16.msrb.mxu2 %v9641_v30  ;;  %v3760_v37 = vpop.f32.mrf.mxu1 }
 0x32b   : > { %v3761_v31 = vadd.f32 %v3760_v37, %v3237_v25  ;;  %v3796_v48 = vpop.f32.mrf.mxu3 }
 0x32c   : > { %v15079_v4 = vpop.f32.mrf.mxu0 }
 0x32d   : > { %4499 = vmatmul.bf16.vlgmr.msra.gmra.mxu2 %v14813_v26  ;;  %4553 = vmatmul.bf16.vlgmr.msrb.gmra.mxu1 %v14813_v26 }
 0x32e   : > { %4570 = vmatpush.bf16.msrb.mxu2 %v9629_v63 }
 0x330   : > { %v3308_v24 = vpop.f32.mrf.mxu2 }
 0x331   : > { %v3327_v14 = vadd.f32 %v15002_v22, %v3308_v24 }
 0x332   : > { %v15084_v60 = vpop.f32.mrf.mxu1 }
 0x333   : > { %v15086_v52 = vpop.f32.mrf.mxu3  ;;  %v3345_v3 = vadd.f32 %v3344_v50, %v3327_v14 }
 0x334   : > { %v3349_v54 = vpop.f32.mrf.mxu0 }
 0x337   : > { %4540 = vmatmul.bf16.gmra.mxu0 %v13974_v45 }
 0x338   : > { %v15089_v61 = vpop.f32.mrf.mxu2 }
 0x33a   : > { %v3765_v6 = vpop.f32.mrf.mxu1 }
 0x33b   : > { %v3766_v1 = vadd.f32 %v3765_v6, %v3242_v32  ;;  %v3801_v41 = vpop.f32.mrf.mxu3 }
 0x33c   : > { %v3351_v27 = vpop.f32.mrf.mxu0 }
 0x33d   : > { %4504 = vmatmul.bf16.gmra.mxu2 %v14782_v7  ;;  %4558 = vmatmul.bf16.gmra.mxu1 %v14782_v7 }
 0x340   : > { %v3313_v26 = vpop.f32.mrf.mxu2 }
 0x341   : > { %v3332_v22 = vadd.f32 %v3331_v33, %v3313_v26 }
 0x342   : > { %v3767_v57 = vpop.f32.mrf.mxu1 }
 0x343   : > { %v3803_v38 = vpop.f32.mrf.mxu3  ;;  %v3350_v25 = vadd.f32 %v3349_v54, %v3332_v22 }
 0x344   : > { %v3814_v39 = vpop.f32.mrf.mxu0 }
 0x345   : > { %v3815_v43 = vadd.f32 %v3814_v39, %v15000_v59 }
 0x348   : > { %v3315_v2 = vpop.f32.mrf.mxu2 }
 0x34a   : > { %v3832_v45 = vpop.f32.mrf.mxu1 }
 0x34b   : > { %v3833_v36 = vadd.f32 %v3832_v45, %v3815_v43  ;;  %v3868_v28 = vpop.f32.mrf.mxu3 }
 0x34c   : > { %v3869_v23 = vadd.f32 %v3868_v28, %v3345_v3  ;;  %v15094_v56 = vpop.f32.mrf.mxu0 }
 0x34d   : > { %4571 = vmatmul.bf16.vlgmr.msrb.gmra.mxu2 %v14978_v16 }
 0x350   : > { %v3778_v55 = vpop.f32.mrf.mxu2 }
 0x351   : > { %v3779_v17 = vadd.f32 %v3778_v55, %v3761_v31 }
 0x352   : > { %v15097_v7 = vpop.f32.mrf.mxu1 }
 0x353   : > { %v3797_v10 = vadd.f32 %v3796_v48, %v3779_v17  ;;  %v15099_v11 = vpop.f32.mrf.mxu3 }
 0x354   : > { %v3819_v51 = vpop.f32.mrf.mxu0 }
 0x355   : > { %v3820_v8 = vadd.f32 %v3819_v51, %v15049_v15 }
 0x358   : > { %v15102_v59 = vpop.f32.mrf.mxu2 }
 0x35a   : > { %v3837_v33 = vpop.f32.mrf.mxu1 }
 0x35b   : > { %v3838_v40 = vadd.f32 %v3837_v33, %v3820_v8  ;;  %v3873_v9 = vpop.f32.mrf.mxu3 }
 0x35c   : > { %v3874_v18 = vadd.f32 %v3873_v9, %v3350_v25  ;;  %v3821_v49 = vpop.f32.mrf.mxu0 }
 0x35d   : > { %4576 = vmatmul.bf16.gmra.mxu2 %v14937_v62 }
 0x360   : > { %v3783_v16 = vpop.f32.mrf.mxu2 }
 0x361   : > { %v3784_v12 = vadd.f32 %v3783_v16, %v3766_v1 }
 0x362   : > { %v3839_v32 = vpop.f32.mrf.mxu1 }
 0x363   : > { %v3802_v21 = vadd.f32 %v3801_v41, %v3784_v12  ;;  %v3875_v5 = vpop.f32.mrf.mxu3 }
 0x364   : > { %v3886_v29 = vpop.f32.mrf.mxu0 }
 0x365   : > { %v3887_v46 = vadd.f32 %v3886_v29, %v3869_v23 }
 0x368   : > { %v3785_v13 = vpop.f32.mrf.mxu2 }
 0x369   : > { %v3763_v13 = vadd.f32 %v15084_v60, %v15041_v58 }
 0x36a   : > { %v3904_v19 = vpop.f32.mrf.mxu1 }
 0x36b   : > { %v15105_v35 = vadd.f32 %v3904_v19, %v3887_v46  ;;  %v4446_v15 = vpop.f32.mrf.mxu3 }
 0x36c   : > { %v15107_v50 = vpop.f32.mrf.mxu0 }
 0x370   : > { %v3850_v30 = vpop.f32.mrf.mxu2 }
 0x371   : > { %v3851_v44 = vadd.f32 %v3850_v30, %v3833_v36 }
 0x372   : > { %v15109_v42 = vpop.f32.mrf.mxu1 }
 0x373   : > { %v4448_v0 = vpop.f32.mrf.mxu3 }
 0x374   : > { %v3891_v62 = vpop.f32.mrf.mxu0 }
 0x375   : > { %v3892_v63 = vadd.f32 %v3891_v62, %v3874_v18 }
 0x378   : > { %v3852_v37 = vpop.f32.mrf.mxu2 }
 0x37a   : > { %v3909_v31 = vpop.f32.mrf.mxu1 }
 0x37b   : > { %v15111_v48 = vadd.f32 %v3909_v31, %v3892_v63  ;;  %v4451_v24 = vpop.f32.mrf.mxu3 }
 0x37c   : > { %v3893_v14 = vpop.f32.mrf.mxu0 }
 0x380   : > { %v3855_v3 = vpop.f32.mrf.mxu2 }
 0x381   : > { %v15113_v54 = vadd.f32 %v3855_v3, %v3838_v40 }
 0x382   : > { %v3911_v6 = vpop.f32.mrf.mxu1 }
 0x383   : > { %v4453_v1 = vpop.f32.mrf.mxu3 }
 0x384   : > { %v4464_v41 = vpop.f32.mrf.mxu0 }
 0x388   : > { %v3857_v27 = vpop.f32.mrf.mxu2 }
 0x38a   : > { %v4482_v26 = vpop.f32.mrf.mxu1 }
 0x38b   : > { %v4518_v22 = vpop.f32.mrf.mxu3 }
 0x38c   : > { %v4466_v57 = vpop.f32.mrf.mxu0 }
 0x390   : > { %v4428_v38 = vpop.f32.mrf.mxu2 }
 0x391   : > { %v4447_v25 = vadd.f32 %v4446_v15, %v4428_v38 }
 0x392   : > { %v4484_v39 = vpop.f32.mrf.mxu1 }
 0x393   : > { %v4465_v43 = vadd.f32 %v4464_v41, %v4447_v25  ;;  %v4520_v2 = vpop.f32.mrf.mxu3 }
 0x394   : > { %v4469_v45 = vpop.f32.mrf.mxu0 }
 0x395   : > { %v4581_v36 = vadd.f32 %v4465_v43, %v3797_v10  ;;  %v3275_v10 = vadd.f32 %v15010_v53, %v14870_v20 }
 0x397   : > { %v3293_v62 = vadd.f32 %v15027_v34, %v3275_v10 }
 0x398   : > { %v4430_v28 = vpop.f32.mrf.mxu2 }
 0x399   : > { %v4449_v19 = vadd.f32 %v4448_v0, %v4430_v28  ;;  %v3817_v31 = vadd.f32 %v15094_v56, %v3293_v62 }
 0x39a   : > { %v4487_v23 = vpop.f32.mrf.mxu1 }
 0x39b   : > { %v4523_v55 = vpop.f32.mrf.mxu3  ;;  %v4467_v14 = vadd.f32 %v4466_v57, %v4449_v19  ;;  %v3835_v20 = vadd.f32 %v15097_v7, %v3817_v31 }
 0x39c   : > { %v4471_v17 = vpop.f32.mrf.mxu0 }
 0x39d   : > { %v3853_v1 = vadd.f32 %v3852_v37, %v3835_v20  ;;  %v3329_v37 = vadd.f32 %v15029_v47, %v15089_v61  ;;  %v9716_v47 = vld [vmem:[%s17114_s4] sm:$0xf] }
 0x39e   : > { %v9854_v20 = vld [vmem:[%s17116_s6 + $0xe0] sm:$0xf] }
 0x39f   : > { %v3347_v17 = vadd.f32 %v15079_v4, %v3329_v37 }
 0x3a0   : > { %v4433_v51 = vpop.f32.mrf.mxu2 }
 0x3a1   : > { %v4452_v8 = vadd.f32 %v4451_v24, %v4433_v51  ;;  %v4590_v24 = vmax.f32 %v4581_v36, 0.0 }
 0x3a2   : > { %v4489_v33 = vpop.f32.mrf.mxu1 }
 0x3a3   : > { %v4470_v40 = vadd.f32 %v4469_v45, %v4452_v8  ;;  %v4525_v9 = vpop.f32.mrf.mxu3 }
 0x3a4   : > { %v4536_v18 = vpop.f32.mrf.mxu0 }
 0x3a5   : > { %v4587_v49 = vadd.f32 %v4470_v40, %v3802_v21  ;;  %v3781_v21 = vadd.f32 %v15102_v59, %v3763_v13 }
 0x3a7   : > { %v3799_v53 = vadd.f32 %v15086_v52, %v3781_v21  ;;  %v4596_v25 = vmax.f32 %v4587_v49, 0.0 }
 0x3a8   : > { %v4435_v16 = vpop.f32.mrf.mxu2 }
 0x3a9   : > { %v4584_v41 = vadd.f32 %v4467_v14, %v3799_v53  ;;  %v9862_v14 = vld [vmem:[%s17116_s6 + $0xf0] sm:$0xf] }
 0x3aa   : > { %v4554_v12 = vpop.f32.mrf.mxu1 }
 0x3ab   : > { %v4593_v27 = vmax.f32 %v4584_v41, 0.0  ;;  %v11645_v41 = vld [vmem:[%s17116_s6 + $0xd4] sm:$0xf0] }
 0x3ac   : > { %v4538_v32 = vpop.f32.mrf.mxu0 }
 0x3b0   : > { %v4500_v5 = vpop.f32.mrf.mxu2 }
 0x3b1   : > { %v4501_v29 = vadd.f32 %v4500_v5, %v4482_v26  ;;  %v9735_v5 = vld [vmem:[%s17115_s5] sm:$0xf] }
 0x3b2   : > { %v4556_v46 = vpop.f32.mrf.mxu1 }
 0x3b3   : > { %v4519_v15 = vadd.f32 %v4518_v22, %v4501_v29  ;;  %v4557_v61 = vadd.f32 %v4556_v46, %v4538_v32  ;;  %v11617_v32 = vld [vmem:[%s17115_s5] sm:$0x30] }
 0x3b4   : > { %v15119_v30 = vpop.f32.mrf.mxu0 }
 0x3b5   : > { %v4582_v63 = vadd.f32 %v4519_v15, %v3851_v44 }
 0x3b7   : > { %v4591_v3 = vmax.f32 %v4582_v63, 0.0  ;;  %v15153_v63 = vor.u32 %v11617_v32, %v9735_v5  ;;  %v11629_v5 = vld [vmem:[%s17116_s6 + $0x54] sm:$0xf0]  ;;  %v11628_v32 = vld [vmem:[%s17116_s6 + $0x54] sm:$0xf] }
 0x3b8   : > { %v4502_v6 = vpop.f32.mrf.mxu2 }
 0x3b9   : > { %v4599_v58 = vpack.c.bf16 %v4591_v3, %v4590_v24  ;;  %v4503_v60 = vadd.f32 %v4502_v6, %v4484_v39  ;;  %v11649_v3 = vld [vmem:[%s17116_s6 + $0xf4] sm:$0xf0] }
 0x3ba   : > { %v15126_v0 = vpop.f32.mrf.mxu1 }
 0x3bb   : > { %4605 = vst [vmem:[#allocation5] sm:$0xff] %v4599_v58  ;;  %v4521_v34 = vadd.f32 %v4520_v2, %v4503_v60  ;;  %v4555_v2 = vadd.f32 %v4554_v12, %v4536_v18  ;;  %v11647_v58 = vld [vmem:[%s17116_s6 + $0xe4] sm:$0xf0] }
 0x3bc   : > { %v4543_v59 = vpop.f32.mrf.mxu0  ;;  %v9855_v60 = vor.u32 %v11647_v58, %v9854_v20  ;;  %v9744_v20 = vld [vmem:[%s17116_s6 + $0x8] sm:$0xf0]  ;;  %v10040_v58 = vld [vmem:[%s17117_s7 + $0xf0] sm:$0xf] }
 0x3bd   : > { %v4585_v44 = vadd.f32 %v4521_v34, %v3853_v1  ;;  %v9846_v1 = vld [vmem:[%s17116_s6 + $0xd0] sm:$0xf] }
 0x3be   : > { %v9847_v59 = vor.u32 %v11645_v41, %v9846_v1  ;;  %v11627_v1 = vld [vmem:[%s17116_s6 + $0x44] sm:$0xf0] }
 0x3bf   : > { %v4594_v56 = vmax.f32 %v4585_v44, 0.0 }
 0x3c0   : > { %v4505_v26 = vpop.f32.mrf.mxu2 }
 0x3c1   : > { %v4601_v22 = vpack.c.bf16 %v4594_v56, %v4593_v27  ;;  %v4506_v57 = vadd.f32 %v4505_v26, %v4487_v23  ;;  %v9838_v27 = vld [vmem:[%s17116_s6 + $0xc0] sm:$0xf] }
 0x3c2   : > { %v4561_v38 = vpop.f32.mrf.mxu1  ;;  %v9720_v10 = vld [vmem:[#allocation5] sm:$0xf]  ;;  %v11613_v19 = vld [vmem:[#allocation5 + $0x4] sm:$0xf] }
 0x3c3   : > { %4608 = vst [vmem:[#allocation5 + $0xc] sm:$0xff] %v4601_v22  ;;  %v4524_v7 = vadd.f32 %v4523_v55, %v4506_v57  ;;  %v9830_v22 = vld [vmem:[%s17116_s6 + $0xb0] sm:$0xf]  ;;  %v11641_v57 = vld [vmem:[%s17116_s6 + $0xb4] sm:$0xf0] }
 0x3c4   : > { %v9831_v38 = vor.u32 %v11641_v57, %v9830_v22  ;;  %v11677_v22 = vld [vmem:[%s17117_s7 + $0x74] sm:$0xf0] }
 0x3c5   : > { %v4588_v52 = vadd.f32 %v4524_v7, %v15113_v54  ;;  %v3871_v54 = vadd.f32 %v15099_v11, %v3347_v17  ;;  %v11616_v11 = vld [vmem:[%s17114_s4] sm:$0x30] }
 0x3c6   : > { %v15151_v21 = vor.u32 %v11616_v11, %v9716_v47 }
 0x3c7   : > { %v4597_v39 = vmax.f32 %v4588_v52, 0.0  ;;  %v3889_v49 = vadd.f32 %v15107_v50, %v3871_v54  ;;  %v9822_v52 = vld [vmem:[%s17116_s6 + $0xa0] sm:$0xf]  ;;  %v9814_v54 = vld [vmem:[%s17116_s6 + $0x90] sm:$0xf] }
 0x3c8   : > { %v4507_v43 = vpop.f32.mrf.mxu2 }
 0x3c9   : > { %v4603_v45 = vpack.c.bf16 %v4597_v39, %v4596_v25  ;;  %v3907_v29 = vadd.f32 %v15109_v42, %v3889_v49  ;;  %v4560_v42 = vadd.f32 %v15126_v0, %v15119_v30  ;;  %v9863_v30 = vor.u32 %v11649_v3, %v9862_v14  ;;  %v11639_v25 = vld [vmem:[%s17116_s6 + $0xa4] sm:$0xf0]  ;;  %v9910_v43 = vld [vmem:[%s17116_s6 + $0x150] sm:$0xf]  ;;  %v11620_v14 = vld [vmem:[%s17116_s6 + $0x14] sm:$0xf] }
 0x3ca   : > { %v11614_v16 = vld [vmem:[#allocation5 + $0x8] sm:$0xf0]  ;;  %v9722_v50 = vld [vmem:[#allocation5 + $0xc] sm:$0xf0]  ;;  %v9752_v3 = vld [vmem:[%s17116_s6 + $0x18] sm:$0xf0] }
 0x3cb   : > { %4610 = vst [vmem:[#allocation5 + $0x18] sm:$0x77] %v4603_v45  ;;  %v9721_v13 = vor.u32 %v11614_v16, %v9720_v10  ;;  %v9725_v62 = vor.u32 %v11613_v19, %v9722_v50  ;;  %v11661_v45 = vld [vmem:[%s17116_s6 + $0x154] sm:$0xf0]  ;;  %v9792_v16 = vld [vmem:[%s17116_s6 + $0x68] sm:$0xf0] }
 0x3cc   : > { %v9911_v17 = vor.u32 %v11661_v45, %v9910_v43  ;;  %v9782_v50 = vld [vmem:[%s17116_s6 + $0x50] sm:$0xf]  ;;  %v9776_v19 = vld [vmem:[%s17116_s6 + $0x48] sm:$0xf0]  ;;  %v11657_v43 = vld [vmem:[%s17116_s6 + $0x134] sm:$0xf0] }
 0x3cd   : > { %v9968_v45 = vld [vmem:[%s17117_s7 + $0x60] sm:$0xf] }
 0x3d0   : > { %v4572_v36 = vpop.f32.mrf.mxu2 }
 0x3d1   : > { %v4573_v28 = vadd.f32 %v4572_v36, %v4555_v2  ;;  %v11632_v2 = vld [vmem:[%s17116_s6 + $0x74] sm:$0xf]  ;;  %v9800_v36 = vld [vmem:[%s17116_s6 + $0x78] sm:$0xf0] }
 0x3d2   : > { %v4617_v51 = vld [vmem:[#allocation5 + $0x18] sm:$0x77] }
 0x3d3   : > { %v4583_v23 = vadd.f32 %v4573_v28, %v15105_v35  ;;  %v4638_v8 = vunpack.c.l.b16 %v4617_v51  ;;  %v4639_v55 = vunpack.c.h.b16 %v4617_v51  ;;  %v9823_v28 = vor.u32 %v11639_v25, %v9822_v52  ;;  %v11625_v52 = vld [vmem:[%s17116_s6 + $0x34] sm:$0xf0]  ;;  %v9894_v25 = vld [vmem:[%s17116_s6 + $0x130] sm:$0xf] }
 0x3d5   : > { %v4592_v33 = vmax.f32 %v4583_v23, 0.0  ;;  %v4644_v40 = vpack.c.b16 %v4638_v8, %v4638_v8  ;;  %v4645_v9 = vpack.c.b16 %v4639_v55, %v4639_v55  ;;  %v9798_v23 = vld [vmem:[%s17116_s6 + $0x70] sm:$0xf]  ;;  %v11633_v8 = vld [vmem:[%s17116_s6 + $0x74] sm:$0xf0] }
 0x3d6   : > { %v9799_v49 = vor.u32 %v11633_v8, %v9798_v23  ;;  %v10024_v23 = vld [vmem:[%s17117_s7 + $0xd0] sm:$0xf]  ;;  %v11689_v8 = vld [vmem:[%s17117_s7 + $0xd4] sm:$0xf0] }
 0x3d7   : > { %v4600_v4 = vpack.c.bf16 %v4592_v33, %v4592_v33  ;;  %v4656_v18 = vsel %vm4654_vm10, %v4644_v40, 0  ;;  %v4659_v35 = vsel %vm4654_vm10, %v4645_v9, 0  ;;  %v11637_v33 = vld [vmem:[%s17116_s6 + $0x94] sm:$0xf0]  ;;  %v9803_v9 = vor.u32 %v11632_v2, %v9800_v36 }
 0x3d8   : > { %v4574_v12 = vpop.f32.mrf.mxu2  ;;  %4670 = vmatpush.bf16.msrb.mxu3 %v4656_v18  ;;  %4722 = vmatpush.bf16.msra.mxu1 %v4656_v18  ;;  %v9815_v18 = vor.u32 %v11637_v33, %v9814_v54  ;;  %v9895_v2 = vor.u32 %v11657_v43, %v9894_v25  ;;  %v11623_v54 = vld [vmem:[%s17116_s6 + $0x24] sm:$0xf0]  ;;  %v9992_v25 = vld [vmem:[%s17117_s7 + $0x90] sm:$0xf] }
 0x3d9   : > { %4607 = vst.msk [vmem:[#allocation5 + $0x8] sm:$0xf] %vm4606_vm11, %v4600_v4  ;;  %v4575_v46 = vadd.f32 %v4574_v12, %v4557_v61  ;;  %4736 = vmatpush.bf16.msra.mxu2 %v4659_v35  ;;  %v9790_v61 = vld [vmem:[%s17116_s6 + $0x60] sm:$0xf]  ;;  %v11631_v4 = vld [vmem:[%s17116_s6 + $0x64] sm:$0xf0] }
 0x3da   : > { %v9791_v11 = vor.u32 %v11631_v4, %v9790_v61  ;;  %v11673_v4 = vld [vmem:[%s17117_s7 + $0x54] sm:$0xf0] }
 0x3db   : > { %v4586_v15 = vadd.f32 %v4575_v46, %v3907_v29  ;;  %v9784_v29 = vld [vmem:[%s17116_s6 + $0x58] sm:$0xf0]  ;;  %v9783_v46 = vor.u32 %v11629_v5, %v9782_v50  ;;  %v11653_v50 = vld [vmem:[%s17116_s6 + $0x114] sm:$0xf0]  ;;  %v9952_v5 = vld [vmem:[%s17117_s7 + $0x40] sm:$0xf] }
 0x3dc   : > { %4671 = vmatpush.bf16.msrb.mxu3 %v9721_v13  ;;  %4723 = vmatpush.bf16.msra.mxu1 %v9721_v13  ;;  %v9787_v10 = vor.u32 %v11628_v32, %v9784_v29  ;;  %v11626_v13 = vld [vmem:[%s17116_s6 + $0x44] sm:$0xf]  ;;  %v11671_v32 = vld [vmem:[%s17117_s7 + $0x44] sm:$0xf0]  ;;  %v10016_v29 = vld [vmem:[%s17117_s7 + $0xc0] sm:$0xf] }
 0x3dd   : > { %v4595_v31 = vmax.f32 %v4586_v15, 0.0  ;;  %4737 = vmatpush.bf16.msra.mxu2 %v9725_v62  ;;  %v9779_v15 = vor.u32 %v11626_v13, %v9776_v19  ;;  %v9953_v13 = vor.u32 %v11671_v32, %v9952_v5  ;;  %v9832_v5 = vld [vmem:[%s17116_s6 + $0xb8] sm:$0xf0]  ;;  %v11652_v32 = vld [vmem:[%s17116_s6 + $0x114] sm:$0xf] }
 0x3df   : > { %v4602_v24 = vpack.c.bf16 %v4595_v31, %v4595_v31  ;;  %9730 = vmatmul.msk.bf16.vlgmr.msrb.gmra.mxu3 %vm4650_vm12, %v15151_v21  ;;  %9737 = vmatmul.msk.bf16.vlgmr.msra.gmra.mxu1 %vm4650_vm12, %v15153_v63  ;;  %v11622_v31 = vld [vmem:[%s17116_s6 + $0x24] sm:$0xf] }
 0x3e0   : > { %4684 = vmatpush.bf16.msra.mxu3 %v4659_v35  ;;  %v4577_v6 = vpop.f32.mrf.mxu2  ;;  %9738 = vmatmul.msk.bf16.vlgmr.msra.gmra.mxu2 %vm4650_vm12, %v15153_v63  ;;  %v9728_v40 = vld [vmem:[#allocation5 + $0x8] sm:$0xf]  ;;  %v11630_v35 = vld [vmem:[%s17116_s6 + $0x64] sm:$0xf] }
 0x3e1   : > { %4609 = vst.msk [vmem:[#allocation5 + $0x14] sm:$0xf] %vm4606_vm11, %v4602_v24  ;;  %v4578_v53 = vadd.f32 %v4577_v6, %v4560_v42  ;;  %5049 = vmatpush.bf16.msrb.mxu1 %v9863_v30  ;;  %5065 = vmatpush.bf16.msrb.mxu2 %v9911_v17  ;;  %v9795_v12 = vor.u32 %v11630_v35, %v9792_v16  ;;  %v9760_v42 = vld [vmem:[%s17116_s6 + $0x28] sm:$0xf0]  ;;  %v11618_v30 = vld [vmem:[%s17116_s6 + $0x4] sm:$0xf] }
 0x3e2   : > { %v9763_v24 = vor.u32 %v11622_v31, %v9760_v42  ;;  %v9755_v6 = vor.u32 %v11620_v14, %v9752_v3  ;;  %v11691_v17 = vld [vmem:[%s17117_s7 + $0xe4] sm:$0xf0]  ;;  %v11621_v35 = vld [vmem:[%s17116_s6 + $0x14] sm:$0xf0]  ;;  %v11648_v3 = vld [vmem:[%s17116_s6 + $0xf4] sm:$0xf] }
 0x3e3   : > { %v4589_v0 = vadd.f32 %v4578_v53, %v15111_v48  ;;  %v11643_v48 = vld [vmem:[%s17116_s6 + $0xc4] sm:$0xf0]  ;;  %v9747_v53 = vor.u32 %v11618_v30, %v9744_v20  ;;  %v9864_v30 = vld [vmem:[%s17116_s6 + $0xf8] sm:$0xf0]  ;;  %v11660_v20 = vld [vmem:[%s17116_s6 + $0x154] sm:$0xf] }
 0x3e4   : > { %4685 = vmatpush.bf16.msra.mxu3 %v9725_v62  ;;  %v9839_v26 = vor.u32 %v11643_v48, %v9838_v27  ;;  %v11624_v62 = vld [vmem:[%s17116_s6 + $0x34] sm:$0xf]  ;;  %v9902_v27 = vld [vmem:[%s17116_s6 + $0x140] sm:$0xf]  ;;  %v11651_v14 = vld [vmem:[%s17116_s6 + $0x104] sm:$0xf0] }
 0x3e5   : > { %v4598_v34 = vmax.f32 %v4589_v0, 0.0  ;;  %5050 = vmatpush.bf16.msrb.mxu1 %v9855_v60  ;;  %v11693_v60 = vld [vmem:[%s17117_s7 + $0xf4] sm:$0xf0]  ;;  %v9774_v0 = vld [vmem:[%s17116_s6 + $0x40] sm:$0xf] }
 0x3e6   : > { %v10041_v41 = vor.u32 %v11693_v60, %v10040_v58  ;;  %v9867_v58 = vor.u32 %v11648_v3, %v9864_v30  ;;  %v11705_v3 = vld [vmem:[%s17117_s7 + $0x154] sm:$0xf0] }
 0x3e7   : > { %v4604_v44 = vpack.c.bf16 %v4598_v34, %v4598_v34  ;;  %v9775_v34 = vor.u32 %v11627_v1, %v9774_v0  ;;  %v9944_v0 = vld [vmem:[%s17117_s7 + $0x30] sm:$0xf]  ;;  %v11669_v1 = vld [vmem:[%s17117_s7 + $0x34] sm:$0xf0] }
 0x3e8   : > { %v4579_v56 = vpop.f32.mrf.mxu2  ;;  %v11615_v51 = vld [vmem:[#allocation5 + $0x10] sm:$0xf0] }
 0x3e9   : > { %4612 = vst.msk [vmem:[#allocation5 + $0x20] sm:$0x7] %vm4611_vm13, %v4604_v44  ;;  %5051 = vmatpush.bf16.msrb.mxu1 %v9847_v59  ;;  %v9729_v47 = vor.u32 %v11615_v51, %v9728_v40  ;;  %v9806_v59 = vld [vmem:[%s17116_s6 + $0x80] sm:$0xf]  ;;  %v11635_v44 = vld [vmem:[%s17116_s6 + $0x84] sm:$0xf0]  ;;  %v10025_v40 = vor.u32 %v11689_v8, %v10024_v23 }
 0x3ea   : > { %v9807_v48 = vor.u32 %v11635_v44, %v9806_v59  ;;  %v11659_v56 = vld [vmem:[%s17116_s6 + $0x144] sm:$0xf0]  ;;  %v9856_v59 = vld [vmem:[%s17116_s6 + $0xe8] sm:$0xf0]  ;;  %v11658_v44 = vld [vmem:[%s17116_s6 + $0x144] sm:$0xf] }
 0x3eb   : > { %v9903_v57 = vor.u32 %v11659_v56, %v9902_v27  ;;  %v9904_v27 = vld [vmem:[%s17116_s6 + $0x148] sm:$0xf0]  ;;  %v9896_v23 = vld [vmem:[%s17116_s6 + $0x138] sm:$0xf0]  ;;  %v9928_v8 = vld [vmem:[%s17117_s7 + $0x10] sm:$0xf] }
 0x3ec   : > { %v9907_v56 = vor.u32 %v11658_v44, %v9904_v27  ;;  %vm6327_vm13 = vsmask.f32 256 }
 0x3ed   : > { %5052 = vmatpush.bf16.msrb.mxu1 %v9839_v26  ;;  %v9976_v26 = vld [vmem:[%s17117_s7 + $0x70] sm:$0xf]  ;;  %5066 = vmatpush.bf16.msrb.mxu2 %v9903_v57  ;;  %v10000_v57 = vld [vmem:[%s17117_s7 + $0xa0] sm:$0xf] }
 0x3ef   : > { %9731 = vmatmul.msk.bf16.vlgmr.msra.gmra.mxu3 %vm4650_vm12, %v15151_v21 }
 0x3f0   : > { %v4618_v7 = vld [vmem:[#allocation5 + $0x20] sm:$0x7] }
 0x3f1   : > { %v4640_v39 = vunpack.c.l.b16 %v4618_v7  ;;  %5053 = vmatpush.bf16.msrb.mxu1 %v9831_v38  ;;  %v9977_v38 = vor.u32 %v11677_v22, %v9976_v26  ;;  %v9766_v7 = vld [vmem:[%s17116_s6 + $0x30] sm:$0xf]  ;;  %5067 = vmatpush.bf16.msrb.mxu2 %v9895_v2  ;;  %v9936_v26 = vld [vmem:[%s17117_s7 + $0x20] sm:$0xf]  ;;  %v11667_v22 = vld [vmem:[%s17117_s7 + $0x24] sm:$0xf0] }
 0x3f2   : > { %v11644_v2 = vld [vmem:[%s17116_s6 + $0xd4] sm:$0xf] }
 0x3f3   : > { %v4646_v37 = vpack.c.b16 %v4640_v39, %v4640_v39  ;;  %v9767_v39 = vor.u32 %v11625_v52, %v9766_v7  ;;  %v11683_v7 = vld [vmem:[%s17117_s7 + $0xa4] sm:$0xf0] }
 0x3f4   : > { %v10001_v52 = vor.u32 %v11683_v7, %v10000_v57  ;;  %v11700_v57 = vld [vmem:[%s17117_s7 + $0x134] sm:$0xf]  ;;  %v10074_v7 = vld [vmem:[%s17117_s7 + $0x138] sm:$0xf0] }
 0x3f5   : > { %v4662_v55 = vsel %vm4654_vm10, %v4646_v37, 0  ;;  %5054 = vmatpush.bf16.msrb.mxu1 %v9823_v28  ;;  %v11675_v37 = vld [vmem:[%s17117_s7 + $0x64] sm:$0xf0]  ;;  %v10032_v28 = vld [vmem:[%s17117_s7 + $0xe0] sm:$0xf]  ;;  %vm6323_vm10 = vcmask 719876  }
 0x3f6   : > { %4698 = vmatpush.bf16.msra.mxu0 %v4662_v55  ;;  %4750 = vmatpush.bf16.msrb.mxu3 %v4662_v55  ;;  %v9969_v36 = vor.u32 %v11675_v37, %v9968_v45  ;;  %v10033_v51 = vor.u32 %v11691_v17, %v10032_v28  ;;  %v9758_v55 = vld [vmem:[%s17116_s6 + $0x20] sm:$0xf]  ;;  %v11679_v37 = vld [vmem:[%s17117_s7 + $0x84] sm:$0xf0]  ;;  %v11656_v28 = vld [vmem:[%s17116_s6 + $0x134] sm:$0xf] }
 0x3f7   : > { %v9759_v33 = vor.u32 %v11623_v54, %v9758_v55  ;;  %v9984_v45 = vld [vmem:[%s17117_s7 + $0x80] sm:$0xf]  ;;  %v11665_v55 = vld [vmem:[%s17117_s7 + $0x14] sm:$0xf0]  ;;  %v9899_v54 = vor.u32 %v11656_v28, %v9896_v23  ;;  %v11692_v23 = vld [vmem:[%s17117_s7 + $0xf4] sm:$0xf] }
 0x3f8   : > { %v10064_v28 = vld [vmem:[%s17117_s7 + $0x120] sm:$0xf]  ;;  %vm6324_vm11 = vmor %vm6323_vm10, %vm5473_vm15 }
 0x3f9   : > { %5055 = vmatpush.bf16.msrb.mxu1 %v9815_v18  ;;  %v9750_v18 = vld [vmem:[%s17116_s6 + $0x10] sm:$0xf] }
 0x3fa   : > { %4699 = vmatpush.bf16.msra.mxu0 %v9729_v47  ;;  %4751 = vmatpush.bf16.msrb.mxu3 %v9729_v47  ;;  %v9960_v47 = vld [vmem:[%s17117_s7 + $0x50] sm:$0xf] }
 0x3fb   : > { %v9961_v16 = vor.u32 %v11673_v4, %v9960_v47  ;;  %v9920_v4 = vld [vmem:[%s17117_s7] sm:$0xf] }
 0x3fd   : > { %9732 = vmatmul.msk.bf16.vlgmr.msra.gmra.mxu0 %vm4650_vm12, %v15151_v21  ;;  %v9768_v21 = vld [vmem:[%s17116_s6 + $0x38] sm:$0xf0]  ;;  %5056 = vmatpush.bf16.msrb.mxu1 %v9807_v48 }
 0x3fe   : > { %5077 = vmatpush.bf16.msra.mxu3 %v9803_v9  ;;  %5035 = vmatpush.bf16.msrb.mxu0 %v9799_v49  ;;  %v9886_v9 = vld [vmem:[%s17116_s6 + $0x120] sm:$0xf]  ;;  %v11655_v49 = vld [vmem:[%s17116_s6 + $0x124] sm:$0xf0] }
 0x3ff   : > { %9739 = vmatmul.msk.bf16.vlgmr.msrb.gmra.mxu3 %vm4650_vm12, %v15153_v63  ;;  %v9771_v63 = vor.u32 %v11624_v62, %v9768_v21  ;;  %v9887_v61 = vor.u32 %v11655_v49, %v9886_v9  ;;  %v11685_v62 = vld [vmem:[%s17117_s7 + $0xb4] sm:$0xf0]  ;;  %v9742_v21 = vld [vmem:[%s17116_s6] sm:$0xf]  ;;  %v9840_v9 = vld [vmem:[%s17116_s6 + $0xc8] sm:$0xf0] }
 0x400   : > { %v11654_v49 = vld [vmem:[%s17116_s6 + $0x124] sm:$0xf]  ;;  %vm6326_vm12 = vcmask 1040384  }
 0x401   : > { %5383 = vmatpush.bf16.msra.mxu1 %v9977_v38  ;;  %5068 = vmatpush.bf16.msrb.mxu2 %v9887_v61  ;;  %v9937_v38 = vor.u32 %v11667_v22, %v9936_v26  ;;  %v9888_v61 = vld [vmem:[%s17116_s6 + $0x128] sm:$0xf0] }
 0x402   : > { %5036 = vmatpush.bf16.msrb.mxu0 %v9791_v11  ;;  %5078 = vmatpush.bf16.msra.mxu3 %v9795_v12  ;;  %v9751_v11 = vor.u32 %v11621_v35, %v9750_v18  ;;  %v9878_v12 = vld [vmem:[%s17116_s6 + $0x110] sm:$0xf]  ;;  %v11663_v18 = vld [vmem:[%s17117_s7 + $0x4] sm:$0xf0]  ;;  %v9985_v35 = vor.u32 %v11679_v37, %v9984_v45  ;;  %v9808_v26 = vld [vmem:[%s17116_s6 + $0x88] sm:$0xf0]  ;;  %v10077_v45 = vor.u32 %v11700_v57, %v10074_v7 }
 0x403   : > { %v11698_v37 = vld [vmem:[%s17117_s7 + $0x124] sm:$0xf]  ;;  %v11672_v57 = vld [vmem:[%s17117_s7 + $0x54] sm:$0xf] }
 0x404   : > { %v11680_v7 = vld [vmem:[%s17117_s7 + $0x94] sm:$0xf] }
 0x405   : > { %5384 = vmatpush.bf16.msra.mxu1 %v9969_v36  ;;  %v9848_v36 = vld [vmem:[%s17116_s6 + $0xd8] sm:$0xf0] }
 0x406   : > { %5037 = vmatpush.bf16.msrb.mxu0 %v9783_v46  ;;  %5079 = vmatpush.bf16.msra.mxu3 %v9787_v10  ;;  %v11687_v46 = vld [vmem:[%s17117_s7 + $0xc4] sm:$0xf0]  ;;  %v9879_v10 = vor.u32 %v11653_v50, %v9878_v12  ;;  %v11640_v50 = vld [vmem:[%s17116_s6 + $0xb4] sm:$0xf] }
 0x407   : > { %v10017_v19 = vor.u32 %v11687_v46, %v10016_v29  ;;  %v9835_v29 = vor.u32 %v11640_v50, %v9832_v5  ;;  %v9880_v46 = vld [vmem:[%s17116_s6 + $0x118] sm:$0xf0]  ;;  %v11694_v50 = vld [vmem:[%s17117_s7 + $0x104] sm:$0xf]  ;;  %v10050_v5 = vld [vmem:[%s17117_s7 + $0x108] sm:$0xf0] }
 0x408   : > { %5069 = vmatpush.bf16.msrb.mxu2 %v9879_v10  ;;  %v9883_v10 = vor.u32 %v11652_v32, %v9880_v46  ;;  %v11695_v46 = vld [vmem:[%s17117_s7 + $0x104] sm:$0xf0] }
 0x409   : > { %5385 = vmatpush.bf16.msra.mxu1 %v9961_v16  ;;  %v9891_v16 = vor.u32 %v11654_v49, %v9888_v61  ;;  %v10056_v49 = vld [vmem:[%s17117_s7 + $0x110] sm:$0xf] }
 0x40a   : > { %5080 = vmatpush.bf16.msra.mxu3 %v9779_v15  ;;  %5038 = vmatpush.bf16.msrb.mxu0 %v9775_v34  ;;  %v10008_v15 = vld [vmem:[%s17117_s7 + $0xb0] sm:$0xf]  ;;  %v9945_v34 = vor.u32 %v11669_v1, %v9944_v0 }
 0x40b   : > { %v10009_v42 = vor.u32 %v11685_v62, %v10008_v15  ;;  %v11650_v15 = vld [vmem:[%s17116_s6 + $0x104] sm:$0xf]  ;;  %v9872_v62 = vld [vmem:[%s17116_s6 + $0x108] sm:$0xf0] }
 0x40d   : > { %5386 = vmatpush.bf16.msra.mxu1 %v9953_v13  ;;  %v11638_v13 = vld [vmem:[%s17116_s6 + $0xa4] sm:$0xf] }
 0x40e   : > { %5081 = vmatpush.bf16.msra.mxu3 %v9771_v63  ;;  %5039 = vmatpush.bf16.msrb.mxu0 %v9767_v39  ;;  %v11619_v63 = vld [vmem:[%s17116_s6 + $0x4] sm:$0xf0]  ;;  %v11681_v39 = vld [vmem:[%s17117_s7 + $0x94] sm:$0xf0] }
 0x40f   : > { %v9743_v31 = vor.u32 %v11619_v63, %v9742_v21  ;;  %v9993_v43 = vor.u32 %v11681_v39, %v9992_v25  ;;  %v11704_v63 = vld [vmem:[%s17117_s7 + $0x154] sm:$0xf]  ;;  %v10072_v25 = vld [vmem:[%s17117_s7 + $0x130] sm:$0xf]  ;;  %v11701_v39 = vld [vmem:[%s17117_s7 + $0x134] sm:$0xf0] }
 0x411   : > { %5387 = vmatpush.bf16.msra.mxu1 %v9945_v34  ;;  %v9816_v34 = vld [vmem:[%s17116_s6 + $0x98] sm:$0xf0] }
 0x412   : > { %5082 = vmatpush.bf16.msra.mxu3 %v9763_v24  ;;  %5040 = vmatpush.bf16.msrb.mxu0 %v9759_v33  ;;  %v9870_v24 = vld [vmem:[%s17116_s6 + $0x100] sm:$0xf]  ;;  %v9929_v33 = vor.u32 %v11665_v55, %v9928_v8 }
 0x415   : > { %5388 = vmatpush.bf16.msra.mxu1 %v9937_v38 }
 0x416   : > { %5083 = vmatpush.bf16.msra.mxu3 %v9755_v6  ;;  %5041 = vmatpush.bf16.msrb.mxu0 %v9751_v11  ;;  %v9871_v6 = vor.u32 %v11651_v14, %v9870_v24  ;;  %v9921_v11 = vor.u32 %v11663_v18, %v9920_v4  ;;  %v9875_v24 = vor.u32 %v11650_v15, %v9872_v62  ;;  %v10088_v14 = vld [vmem:[%s17117_s7 + $0x150] sm:$0xf]  ;;  %v11688_v15 = vld [vmem:[%s17117_s7 + $0xd4] sm:$0xf]  ;;  %v10026_v62 = vld [vmem:[%s17117_s7 + $0xd8] sm:$0xf0] }
 0x417   : > { %v10089_v0 = vor.u32 %v11705_v3, %v10088_v14  ;;  %v11676_v3 = vld [vmem:[%s17117_s7 + $0x74] sm:$0xf] }
 0x418   : > { %5070 = vmatpush.bf16.msrb.mxu2 %v9871_v6 }
 0x419   : > { %5389 = vmatpush.bf16.msra.mxu1 %v9929_v33  ;;  %v11696_v33 = vld [vmem:[%s17117_s7 + $0x114] sm:$0xf] }
 0x41a   : > { %5084 = vmatpush.bf16.msra.mxu3 %v9747_v53  ;;  %5042 = vmatpush.bf16.msrb.mxu0 %v9743_v31  ;;  %v9912_v53 = vld [vmem:[%s17116_s6 + $0x158] sm:$0xf0] }
 0x41b   : > { %v9915_v60 = vor.u32 %v11660_v20, %v9912_v53 }
 0x41c   : > { %5091 = vmatpush.bf16.msra.mxu2 %v9867_v58  ;;  %v11702_v58 = vld [vmem:[%s17117_s7 + $0x144] sm:$0xf] }
 0x41d   : > { %5390 = vmatpush.bf16.msra.mxu1 %v9921_v11 }
 0x41e   : > { %5397 = vmatpush.bf16.msrb.mxu3 %v10041_v41  ;;  %v11646_v41 = vld [vmem:[%s17116_s6 + $0xe4] sm:$0xf]  ;;  %5107 = vmatpush.bf16.msra.mxu0 %v9915_v60  ;;  %v10082_v60 = vld [vmem:[%s17117_s7 + $0x148] sm:$0xf0] }
 0x41f   : > { %v9859_v48 = vor.u32 %v11646_v41, %v9856_v59  ;;  %v11636_v41 = vld [vmem:[%s17116_s6 + $0x94] sm:$0xf]  ;;  %v10080_v59 = vld [vmem:[%s17117_s7 + $0x140] sm:$0xf]  ;;  %v10085_v22 = vor.u32 %v11702_v58, %v10082_v60  ;;  %v10010_v58 = vld [vmem:[%s17117_s7 + $0xb8] sm:$0xf0] }
 0x420   : > { %v9819_v27 = vor.u32 %v11636_v41, %v9816_v34 }
 0x421   : > { %5092 = vmatpush.bf16.msra.mxu2 %v9859_v48  ;;  %v11703_v48 = vld [vmem:[%s17117_s7 + $0x144] sm:$0xf0] }
 0x422   : > { %5398 = vmatpush.bf16.msrb.mxu3 %v10033_v51  ;;  %5108 = vmatpush.bf16.msra.mxu0 %v9907_v56  ;;  %v9851_v51 = vor.u32 %v11644_v2, %v9848_v36  ;;  %v11634_v56 = vld [vmem:[%s17116_s6 + $0x84] sm:$0xf]  ;;  %v10081_v38 = vor.u32 %v11703_v48, %v10080_v59  ;;  %v10073_v2 = vor.u32 %v11701_v39, %v10072_v25  ;;  %v10066_v36 = vld [vmem:[%s17117_s7 + $0x128] sm:$0xf0] }
 0x423   : > { %v10069_v8 = vor.u32 %v11698_v37, %v10066_v36  ;;  %v11682_v48 = vld [vmem:[%s17117_s7 + $0xa4] sm:$0xf] }
 0x424   : > { %v11678_v37 = vld [vmem:[%s17117_s7 + $0x84] sm:$0xf] }
 0x425   : > { %5093 = vmatpush.bf16.msra.mxu2 %v9851_v51 }
 0x426   : > { %5399 = vmatpush.bf16.msrb.mxu3 %v10025_v40  ;;  %v11642_v40 = vld [vmem:[%s17116_s6 + $0xc4] sm:$0xf]  ;;  %5109 = vmatpush.bf16.msra.mxu0 %v9899_v54  ;;  %v10042_v54 = vld [vmem:[%s17117_s7 + $0xf8] sm:$0xf0] }
 0x427   : > { %v9843_v47 = vor.u32 %v11642_v40, %v9840_v9  ;;  %v10058_v40 = vld [vmem:[%s17117_s7 + $0x118] sm:$0xf0]  ;;  %v10045_v18 = vor.u32 %v11692_v23, %v10042_v54 }
 0x429   : > { %5094 = vmatpush.bf16.msra.mxu2 %v9843_v47  ;;  %v11697_v47 = vld [vmem:[%s17117_s7 + $0x114] sm:$0xf0] }
 0x42a   : > { %5400 = vmatpush.bf16.msrb.mxu3 %v10017_v19  ;;  %5110 = vmatpush.bf16.msra.mxu0 %v9891_v16  ;;  %v9824_v19 = vld [vmem:[%s17116_s6 + $0xa8] sm:$0xf0]  ;;  %v10061_v16 = vor.u32 %v11696_v33, %v10058_v40  ;;  %v10057_v32 = vor.u32 %v11697_v47, %v10056_v49  ;;  %v11664_v33 = vld [vmem:[%s17117_s7 + $0x14] sm:$0xf]  ;;  %v9930_v40 = vld [vmem:[%s17117_s7 + $0x18] sm:$0xf0] }
 0x42b   : > { %v9827_v31 = vor.u32 %v11638_v13, %v9824_v19  ;;  %v10053_v19 = vor.u32 %v11694_v50, %v10050_v5  ;;  %v11662_v49 = vld [vmem:[%s17117_s7 + $0x4] sm:$0xf]  ;;  %v9922_v47 = vld [vmem:[%s17117_s7 + $0x8] sm:$0xf0] }
 0x42d   : > { %5095 = vmatpush.bf16.msra.mxu2 %v9835_v29  ;;  %v10048_v29 = vld [vmem:[%s17117_s7 + $0x100] sm:$0xf] }
 0x42e   : > { %5401 = vmatpush.bf16.msrb.mxu3 %v10009_v42  ;;  %v10090_v42 = vld [vmem:[%s17117_s7 + $0x158] sm:$0xf0]  ;;  %5111 = vmatpush.bf16.msra.mxu0 %v9883_v10 }
 0x42f   : > { %v10093_v53 = vor.u32 %v11704_v63, %v10090_v42  ;;  %v11686_v42 = vld [vmem:[%s17117_s7 + $0xc4] sm:$0xf] }
 0x431   : > { %5096 = vmatpush.bf16.msra.mxu2 %v9827_v31  ;;  %v10029_v31 = vor.u32 %v11688_v15, %v10026_v62  ;;  %v11720_v15 = vld [vmem:[%s17118_s8 + $0x64] sm:$0xf] }
 0x432   : > { %5402 = vmatpush.bf16.msrb.mxu3 %v10001_v52  ;;  %5112 = vmatpush.bf16.msra.mxu0 %v9875_v24  ;;  %v9811_v52 = vor.u32 %v11634_v56, %v9808_v26  ;;  %v10018_v24 = vld [vmem:[%s17117_s7 + $0xc8] sm:$0xf0] }
 0x433   : > { %v10021_v14 = vor.u32 %v11686_v42, %v10018_v24  ;;  %v10002_v56 = vld [vmem:[%s17117_s7 + $0xa8] sm:$0xf0]  ;;  %v10146_v24 = vld [vmem:[%s17118_s8 + $0x50] sm:$0xf] }
 0x435   : > { %5097 = vmatpush.bf16.msra.mxu2 %v9819_v27  ;;  %v9970_v27 = vld [vmem:[%s17117_s7 + $0x68] sm:$0xf0] }
 0x436   : > { %5403 = vmatpush.bf16.msrb.mxu3 %v9993_v43 }
 0x439   : > { %5098 = vmatpush.bf16.msra.mxu2 %v9811_v52  ;;  %v9994_v52 = vld [vmem:[%s17117_s7 + $0x98] sm:$0xf0] }
 0x43a   : > { %5404 = vmatpush.bf16.msrb.mxu3 %v9985_v35  ;;  %v11690_v35 = vld [vmem:[%s17117_s7 + $0xe4] sm:$0xf]  ;;  %v9997_v39 = vor.u32 %v11680_v7, %v9994_v52  ;;  %v10122_v52 = vld [vmem:[%s17118_s8 + $0x20] sm:$0xf] }
 0x45c   : > { %v4725_v17 = vpop.f32.mrf.mxu1 }
 0x462   : > { %v4673_v12 = vpop.f32.mrf.mxu3 }
 0x463   : > { %v4758_v30 = vmax.f32 %v4673_v12, %v4725_v17  ;;  %v4739_v44 = vpop.f32.mrf.mxu2  ;;  %v11699_v17 = vld [vmem:[%s17117_s7 + $0x124] sm:$0xf0]  ;;  %v10034_v12 = vld [vmem:[%s17117_s7 + $0xe8] sm:$0xf0] }
 0x464   : > { %v4727_v21 = vpop.f32.mrf.mxu1  ;;  %v10065_v55 = vor.u32 %v11699_v17, %v10064_v28  ;;  %v10037_v13 = vor.u32 %v11690_v35, %v10034_v12  ;;  %v11668_v17 = vld [vmem:[%s17117_s7 + $0x34] sm:$0xf] }
 0x465   : > { %v11722_v12 = vld [vmem:[%s17118_s8 + $0x74] sm:$0xf] }
 0x46a   : > { %v4675_v6 = vpop.f32.mrf.mxu3 }
 0x46b   : > { %v4761_v20 = vmax.f32 %v4675_v6, %v4727_v21  ;;  %v4741_v51 = vpop.f32.mrf.mxu2  ;;  %v10049_v21 = vor.u32 %v11695_v46, %v10048_v29  ;;  %v9978_v6 = vld [vmem:[%s17117_s7 + $0x78] sm:$0xf0] }
 0x46c   : > { %v9981_v41 = vor.u32 %v11676_v3, %v9978_v6  ;;  %v11718_v3 = vld [vmem:[%s17118_s8 + $0x54] sm:$0xf] }
 0x46d   : > { %v15538_v1 = vpack.c.bf16 %v4761_v20, %v4758_v30 }
 0x46f   : > { %5043 = vmatmul.bf16.vlgmr.msrb.gmra.mxu0 %v15538_v1  ;;  %5085 = vmatmul.bf16.vlgmr.msra.gmra.mxu3 %v15538_v1 }
 0x470   : > { %5455 = vmatpush.bf16.msra.mxu3 %v10093_v53  ;;  %5413 = vmatpush.bf16.msrb.mxu0 %v10089_v0  ;;  %v11684_v53 = vld [vmem:[%s17117_s7 + $0xb4] sm:$0xf] }
 0x471   : > { %v10013_v59 = vor.u32 %v11684_v53, %v10010_v58 }
 0x472   : > { %v4687_v43 = vpop.f32.mrf.mxu3 }
 0x473   : > { %v4759_v61 = vmax.f32 %v4687_v43, %v4739_v44  ;;  %v11674_v44 = vld [vmem:[%s17117_s7 + $0x64] sm:$0xf] }
 0x474   : > { %5456 = vmatpush.bf16.msra.mxu3 %v10085_v22  ;;  %5414 = vmatpush.bf16.msrb.mxu0 %v10081_v38  ;;  %v9973_v26 = vor.u32 %v11674_v44, %v9970_v27  ;;  %v10005_v22 = vor.u32 %v11682_v48, %v10002_v56  ;;  %v9962_v38 = vld [vmem:[%s17117_s7 + $0x58] sm:$0xf0]  ;;  %v11670_v43 = vld [vmem:[%s17117_s7 + $0x44] sm:$0xf]  ;;  %v10130_v48 = vld [vmem:[%s17118_s8 + $0x30] sm:$0xf] }
 0x475   : > { %v9965_v25 = vor.u32 %v11672_v57, %v9962_v38  ;;  %v11715_v56 = vld [vmem:[%s17118_s8 + $0x34] sm:$0xf0]  ;;  %v11714_v57 = vld [vmem:[%s17118_s8 + $0x34] sm:$0xf]  ;;  %v10132_v38 = vld [vmem:[%s17118_s8 + $0x38] sm:$0xf0] }
 0x476   : > { %v10135_v7 = vor.u32 %v11714_v57, %v10132_v38 }
 0x478   : > { %5457 = vmatpush.bf16.msra.mxu3 %v10077_v45  ;;  %5415 = vmatpush.bf16.msrb.mxu0 %v10073_v2  ;;  %v9954_v45 = vld [vmem:[%s17117_s7 + $0x48] sm:$0xf0] }
 0x479   : > { %v9986_v2 = vld [vmem:[%s17117_s7 + $0x88] sm:$0xf0]  ;;  %v9957_v36 = vor.u32 %v11670_v43, %v9954_v45 }
 0x47a   : > { %v4689_v9 = vpop.f32.mrf.mxu3  ;;  %v4701_v10 = vpop.f32.mrf.mxu0  ;;  %v9989_v28 = vor.u32 %v11678_v37, %v9986_v2  ;;  %v11729_v37 = vld [vmem:[%s17118_s8 + $0xa4] sm:$0xf0]  ;;  %v11712_v2 = vld [vmem:[%s17118_s8 + $0x24] sm:$0xf] }
 0x47b   : > { %v4762_v4 = vmax.f32 %v4689_v9, %v4741_v51  ;;  %v9946_v51 = vld [vmem:[%s17117_s7 + $0x38] sm:$0xf0]  ;;  %v9933_v9 = vor.u32 %v11664_v33, %v9930_v40  ;;  %v11711_v33 = vld [vmem:[%s17118_s8 + $0x14] sm:$0xf0]  ;;  %v10178_v40 = vld [vmem:[%s17118_s8 + $0x90] sm:$0xf] }
 0x47c   : > { %5458 = vmatpush.bf16.msra.mxu3 %v10069_v8  ;;  %5416 = vmatpush.bf16.msrb.mxu0 %v10065_v55  ;;  %v9949_v23 = vor.u32 %v11668_v17, %v9946_v51  ;;  %v11666_v8 = vld [vmem:[%s17117_s7 + $0x24] sm:$0xf]  ;;  %v9938_v55 = vld [vmem:[%s17117_s7 + $0x28] sm:$0xf0] }
 0x47d   : > { %v15605_v11 = vpack.c.bf16 %v4762_v4, %v4759_v61  ;;  %v9941_v54 = vor.u32 %v11666_v8, %v9938_v55  ;;  %v9925_v61 = vor.u32 %v11662_v49, %v9922_v47  ;;  %v11728_v51 = vld [vmem:[%s17118_s8 + $0xa4] sm:$0xf]  ;;  %v10114_v8 = vld [vmem:[%s17118_s8 + $0x10] sm:$0xf]  ;;  %v11710_v47 = vld [vmem:[%s17118_s8 + $0x14] sm:$0xf] }
 0x47f   : > { %5057 = vmatmul.bf16.vlgmr.msrb.gmra.mxu1 %v15605_v11  ;;  %5405 = vmatmul.bf16.vlgmr.msrb.gmra.mxu3 %v15605_v11 }
 0x480   : > { %5439 = vmatpush.bf16.msrb.mxu1 %v10045_v18  ;;  %5459 = vmatpush.bf16.msra.mxu3 %v10061_v16  ;;  %v10162_v16 = vld [vmem:[%s17118_s8 + $0x70] sm:$0xf] }
 0x481   : > { %5417 = vmatpush.bf16.msrb.mxu0 %v10057_v32 }
 0x482   : > { %v4753_v63 = vpop.f32.mrf.mxu3  ;;  %v4703_v30 = vpop.f32.mrf.mxu0 }
 0x483   : > { %v4760_v60 = vmax.f32 %v4701_v10, %v4753_v63 }
 0x484   : > { %5440 = vmatpush.bf16.msrb.mxu1 %v10037_v13  ;;  %5460 = vmatpush.bf16.msra.mxu3 %v10053_v19  ;;  %v10154_v13 = vld [vmem:[%s17118_s8 + $0x60] sm:$0xf]  ;;  %v11721_v19 = vld [vmem:[%s17118_s8 + $0x64] sm:$0xf0] }
 0x485   : > { %5418 = vmatpush.bf16.msrb.mxu0 %v10049_v21  ;;  %v10155_v62 = vor.u32 %v11721_v19, %v10154_v13  ;;  %v10156_v21 = vld [vmem:[%s17118_s8 + $0x68] sm:$0xf0] }
 0x486   : > { %v10159_v63 = vor.u32 %v11720_v15, %v10156_v21  ;;  %v10170_v15 = vld [vmem:[%s17118_s8 + $0x80] sm:$0xf]  ;;  %v11708_v21 = vld [vmem:[%s17118_s8 + $0x4] sm:$0xf] }
 0x488   : > { %5441 = vmatpush.bf16.msrb.mxu1 %v10029_v31 }
 0x48a   : > { %v4755_v20 = vpop.f32.mrf.mxu3 }
 0x48b   : > { %v4763_v0 = vmax.f32 %v4703_v30, %v4755_v20  ;;  %v10148_v20 = vld [vmem:[%s17118_s8 + $0x58] sm:$0xf0] }
 0x48c   : > { %5442 = vmatpush.bf16.msrb.mxu1 %v10021_v14  ;;  %v11719_v14 = vld [vmem:[%s17118_s8 + $0x54] sm:$0xf0]  ;;  %v10151_v53 = vor.u32 %v11718_v3, %v10148_v20 }
 0x48d   : > { %v4766_v34 = vpack.c.bf16 %v4763_v0, %v4760_v60  ;;  %v10147_v30 = vor.u32 %v11719_v14, %v10146_v24  ;;  %v10138_v60 = vld [vmem:[%s17118_s8 + $0x40] sm:$0xf]  ;;  %v11717_v0 = vld [vmem:[%s17118_s8 + $0x44] sm:$0xf0]  ;;  %v11724_v24 = vld [vmem:[%s17118_s8 + $0x84] sm:$0xf] }
 0x48e   : > { %v10172_v14 = vld [vmem:[%s17118_s8 + $0x88] sm:$0xf0] }
 0x48f   : > { %9916 = vmatmul.msk.bf16.vlgmr.msrb.gmra.mxu2 %vm5031_vm14, %v4766_v34  ;;  %9917 = vmatmul.msk.bf16.vlgmr.msra.gmra.mxu0 %vm5031_vm14, %v4766_v34 }
 0x490   : > { %5391 = vmatmul.bf16.vlgmr.msra.gmra.mxu1 %v15538_v1  ;;  %5425 = vmatpush.bf16.msrb.mxu2 %v9981_v41  ;;  %v11716_v41 = vld [vmem:[%s17118_s8 + $0x44] sm:$0xf] }
 0x491   : > { %5443 = vmatpush.bf16.msrb.mxu1 %v10013_v59  ;;  %10095 = vmatmul.msk.bf16.vlgmr.msra.gmra.mxu3 %vm5031_vm14, %v4766_v34  ;;  %v10140_v59 = vld [vmem:[%s17118_s8 + $0x48] sm:$0xf0] }
 0x492   : > { %v10143_v44 = vor.u32 %v11716_v41, %v10140_v59 }
 0x494   : > { %5426 = vmatpush.bf16.msrb.mxu2 %v9973_v26 }
 0x495   : > { %5444 = vmatpush.bf16.msrb.mxu1 %v10005_v22  ;;  %v10131_v22 = vor.u32 %v11715_v56, %v10130_v48 }
 0x498   : > { %5427 = vmatpush.bf16.msrb.mxu2 %v9965_v25  ;;  %v11713_v25 = vld [vmem:[%s17118_s8 + $0x24] sm:$0xf0] }
 0x499   : > { %5445 = vmatpush.bf16.msrb.mxu1 %v9997_v39  ;;  %v10186_v39 = vld [vmem:[%s17118_s8 + $0xa0] sm:$0xf]  ;;  %v10123_v45 = vor.u32 %v11713_v25, %v10122_v52 }
 0x49c   : > { %5428 = vmatpush.bf16.msrb.mxu2 %v9957_v36  ;;  %v10124_v36 = vld [vmem:[%s17118_s8 + $0x28] sm:$0xf0] }
 0x49d   : > { %5446 = vmatpush.bf16.msrb.mxu1 %v9989_v28  ;;  %v10187_v28 = vor.u32 %v11729_v37, %v10186_v39  ;;  %v10127_v17 = vor.u32 %v11712_v2, %v10124_v36 }
 0x49f   : > { %5099 = vmatmul.bf16.vlgmr.msra.gmra.mxu2 %v15605_v11  ;;  %10094 = vmatmul.msk.bf16.vlgmr.msrb.gmra.mxu0 %vm5031_vm14, %v4766_v34  ;;  %v10139_v34 = vor.u32 %v11717_v0, %v10138_v60  ;;  %vm6329_vm14 = vcmask 716804  }
 0x4a0   : > { %5447 = vmatmul.bf16.vlgmr.msrb.gmra.mxu1 %v15605_v11  ;;  %5429 = vmatpush.bf16.msrb.mxu2 %v9949_v23  ;;  %v11723_v11 = vld [vmem:[%s17118_s8 + $0x74] sm:$0xf0]  ;;  %v10188_v23 = vld [vmem:[%s17118_s8 + $0xa8] sm:$0xf0]  ;;  %vm6331_vm2 = vmand %vm6329_vm14, %vm6330_vm0 }
 0x4a1   : > { %v10163_v50 = vor.u32 %v11723_v11, %v10162_v16  ;;  %v11726_v16 = vld [vmem:[%s17118_s8 + $0x94] sm:$0xf] }
 0x4a3   : > { %5634 = vmatpush.bf16.msra.mxu0 %v10163_v50  ;;  %v10180_v50 = vld [vmem:[%s17118_s8 + $0x98] sm:$0xf0] }
 0x4a4   : > { %5430 = vmatpush.bf16.msrb.mxu2 %v9941_v54  ;;  %v10191_v54 = vor.u32 %v11728_v51, %v10188_v23  ;;  %v10183_v19 = vor.u32 %v11726_v16, %v10180_v50  ;;  %v10274_v16 = vld [vmem:[%s17119_s9 + $0x110] sm:$0xf]  ;;  %v11766_v50 = vld [vmem:[%s17119_s9 + $0x114] sm:$0xf] }
 0x4a6   : > { %5681 = vmatpush.bf16.msra.mxu1 %v10191_v54 }
 0x4a7   : > { %5635 = vmatpush.bf16.msra.mxu0 %v10155_v62  ;;  %v11725_v62 = vld [vmem:[%s17118_s8 + $0x84] sm:$0xf0] }
 0x4a8   : > { %5431 = vmatpush.bf16.msrb.mxu2 %v9933_v9  ;;  %v11727_v9 = vld [vmem:[%s17118_s8 + $0x94] sm:$0xf0]  ;;  %v10171_v3 = vor.u32 %v11725_v62, %v10170_v15  ;;  %v11765_v15 = vld [vmem:[%s17119_s9 + $0x104] sm:$0xf0]  ;;  %v11764_v62 = vld [vmem:[%s17119_s9 + $0x104] sm:$0xf] }
 0x4a9   : > { %v10179_v49 = vor.u32 %v11727_v9, %v10178_v40  ;;  %v10282_v40 = vld [vmem:[%s17119_s9 + $0x120] sm:$0xf]  ;;  %v11769_v9 = vld [vmem:[%s17119_s9 + $0x124] sm:$0xf0] }
 0x4aa   : > { %5682 = vmatpush.bf16.msra.mxu1 %v10183_v19  ;;  %v10266_v19 = vld [vmem:[%s17119_s9 + $0x100] sm:$0xf] }
 0x4ab   : > { %5636 = vmatpush.bf16.msra.mxu0 %v10147_v30 }
 0x4ac   : > { %5432 = vmatpush.bf16.msrb.mxu2 %v9925_v61  ;;  %v10116_v61 = vld [vmem:[%s17118_s8 + $0x18] sm:$0xf0] }
 0x4ad   : > { %v10119_v13 = vor.u32 %v11710_v47, %v10116_v61  ;;  %v10283_v47 = vor.u32 %v11769_v9, %v10282_v40  ;;  %v10284_v61 = vld [vmem:[%s17119_s9 + $0x128] sm:$0xf0]  ;;  %v11757_v40 = vld [vmem:[%s17119_s9 + $0xc4] sm:$0xf0]  ;;  %v11756_v9 = vld [vmem:[%s17119_s9 + $0xc4] sm:$0xf] }
 0x4af   : > { %5433 = vmatmul.bf16.vlgmr.msrb.gmra.mxu2 %v15538_v1  ;;  %v10164_v1 = vld [vmem:[%s17118_s8 + $0x78] sm:$0xf0]  ;;  %5637 = vmatpush.bf16.msra.mxu0 %v10139_v34 }
 0x4b0   : > { %v10167_v5 = vor.u32 %v11722_v12, %v10164_v1  ;;  %5653 = vmatpush.bf16.msra.mxu2 %v10187_v28  ;;  %v10115_v12 = vor.u32 %v11711_v33, %v10114_v8  ;;  %v10106_v1 = vld [vmem:[%s17118_s8] sm:$0xf]  ;;  %v11793_v28 = vld [vmem:[%s17119_s9 + $0x1d4] sm:$0xf0] }
 0x4b2   : > { %5662 = vmatpush.bf16.msrb.mxu3 %v10167_v5  ;;  %v11709_v5 = vld [vmem:[%s17118_s8 + $0x4] sm:$0xf0] }
 0x4b3   : > { %5638 = vmatpush.bf16.msra.mxu0 %v10131_v22  ;;  %v10107_v20 = vor.u32 %v11709_v5, %v10106_v1  ;;  %v10276_v1 = vld [vmem:[%s17119_s9 + $0x118] sm:$0xf0] }
 0x4b4   : > { %5654 = vmatpush.bf16.msra.mxu2 %v10179_v49  ;;  %v11768_v49 = vld [vmem:[%s17119_s9 + $0x124] sm:$0xf] }
 0x4b6   : > { %5663 = vmatpush.bf16.msrb.mxu3 %v10159_v63  ;;  %v10108_v63 = vld [vmem:[%s17118_s8 + $0x8] sm:$0xf0] }
 0x4b7   : > { %5639 = vmatpush.bf16.msra.mxu0 %v10123_v45  ;;  %v10111_v60 = vor.u32 %v11708_v21, %v10108_v63  ;;  %v10267_v21 = vor.u32 %v11765_v15, %v10266_v19  ;;  %v10268_v63 = vld [vmem:[%s17119_s9 + $0x108] sm:$0xf0]  ;;  %v11754_v15 = vld [vmem:[%s17119_s9 + $0xb4] sm:$0xf] }
 0x4b8   : > { %5655 = vmatpush.bf16.msra.mxu2 %v10171_v3  ;;  %v10271_v3 = vor.u32 %v11764_v62, %v10268_v63  ;;  %v10228_v62 = vld [vmem:[%s17119_s9 + $0xb8] sm:$0xf0] }
 0x4ba   : > { %5664 = vmatpush.bf16.msrb.mxu3 %v10151_v53  ;;  %v10175_v53 = vor.u32 %v11724_v24, %v10172_v14  ;;  %v10258_v24 = vld [vmem:[%s17119_s9 + $0xf0] sm:$0xf]  ;;  %v11763_v14 = vld [vmem:[%s17119_s9 + $0xf4] sm:$0xf0] }
 0x4bb   : > { %5640 = vmatpush.bf16.msra.mxu0 %v10115_v12  ;;  %v10287_v12 = vor.u32 %v11768_v49, %v10284_v61  ;;  %v10236_v49 = vld [vmem:[%s17119_s9 + $0xc8] sm:$0xf0] }
 0x4bc   : > { %5683 = vmatpush.bf16.msra.mxu1 %v10175_v53  ;;  %5883 = vmatpush.bf16.msrb.mxu2 %v10283_v47  ;;  %v10259_v53 = vor.u32 %v11763_v14, %v10258_v24  ;;  %v10239_v61 = vor.u32 %v11756_v9, %v10236_v49  ;;  %v11753_v24 = vld [vmem:[%s17119_s9 + $0xa4] sm:$0xf0]  ;;  %v11752_v14 = vld [vmem:[%s17119_s9 + $0xa4] sm:$0xf]  ;;  %v10332_v9 = vld [vmem:[%s17119_s9 + $0x20] sm:$0xf] }
 0x4bd   : > { %v11737_v49 = vld [vmem:[%s17119_s9 + $0x24] sm:$0xf0] }
 0x4be   : > { %5665 = vmatpush.bf16.msrb.mxu3 %v10143_v44 }
 0x4bf   : > { %5641 = vmatpush.bf16.msra.mxu0 %v10107_v20  ;;  %v10260_v20 = vld [vmem:[%s17119_s9 + $0xf8] sm:$0xf0] }
 0x4c0   : > { %5911 = vmatpush.bf16.msrb.mxu1 %v10287_v12  ;;  %v11744_v12 = vld [vmem:[%s17119_s9 + $0x64] sm:$0xf] }
 0x4c2   : > { %5666 = vmatpush.bf16.msrb.mxu3 %v10135_v7 }
 0x4c6   : > { %5667 = vmatpush.bf16.msrb.mxu3 %v10127_v17  ;;  %v5484_v17 = vld [vmem:[#allocation6 + $0x8] sm:$0x33] }
 0x4ca   : > { %5668 = vmatpush.bf16.msrb.mxu3 %v10119_v13  ;;  %v10279_v13 = vor.u32 %v11766_v50, %v10276_v1  ;;  %v10366_v1 = vld [vmem:[%s17119_s9 + $0x68] sm:$0xf0] }
 0x4cb   : > { %v10369_v19 = vor.u32 %v11744_v12, %v10366_v1  ;;  %v10333_v12 = vor.u32 %v11737_v49, %v10332_v9  ;;  %v10476_v49 = vld [vmem:[%s17119_s9 + $0x1b0] sm:$0xf] }
 0x4cc   : > { %5912 = vmatpush.bf16.msrb.mxu1 %v10279_v13  ;;  %v11755_v13 = vld [vmem:[%s17119_s9 + $0xb4] sm:$0xf0] }
 0x4ce   : > { %5669 = vmatpush.bf16.msrb.mxu3 %v10111_v60 }
 0x4d0   : > { %5913 = vmatpush.bf16.msrb.mxu1 %v10271_v3  ;;  %v10398_v3 = vld [vmem:[%s17119_s9 + $0xa8] sm:$0xf0] }
 0x4ec   : > { %v15716_v4 = vpop.f32.mrf.mxu0 }
 0x4f2   : > { %v15720_v35 = vpop.f32.mrf.mxu3 }
 0x4f4   : > { %v15734_v32 = vpop.f32.mrf.mxu0 }
 0x4fa   : > { %v15740_v10 = vpop.f32.mrf.mxu3 }
 0x4fc   : > { %v15718_v18 = vpop.f32.mrf.mxu1 }
 0x4fd   : > { %v5059_v59 = vadd.f32 %v15718_v18, %v15716_v4  ;;  %v11735_v4 = vld [vmem:[%s17119_s9 + $0x14] sm:$0xf0] }
 0x502   : > { %v15772_v58 = vpop.f32.mrf.mxu3 }
 0x504   : > { %v15736_v29 = vpop.f32.mrf.mxu1 }
 0x50a   : > { %v5408_v55 = vpop.f32.mrf.mxu3 }
 0x50c   : > { %v15754_v31 = vpop.f32.mrf.mxu0 }
 0x50d   : > { %v15767_v6 = vpop.f32.mrf.mxu1 }
 0x50e   : > { %v5407_v41 = vadd.f32 %v15772_v58, %v15767_v6 }
 0x512   : > { %v15738_v46 = vpop.f32.mrf.mxu2 }
 0x513   : > { %v5073_v57 = vadd.f32 %v15738_v46, %v5059_v59 }
 0x514   : > { %v15792_v26 = vpop.f32.mrf.mxu0  ;;  %v5462_v44 = vpop.f32.mrf.mxu3 }
 0x515   : > { %v15809_v43 = vpop.f32.mrf.mxu1 }
 0x516   : > { %v5409_v18 = vadd.f32 %v5408_v55, %v15809_v43  ;;  %v10492_v43 = vld [vmem:[%s17119_s9 + $0x1d0] sm:$0xf] }
 0x51a   : > { %v15756_v42 = vpop.f32.mrf.mxu2 }
 0x51c   : > { %v5420_v30 = vpop.f32.mrf.mxu0  ;;  %v5464_v37 = vpop.f32.mrf.mxu3 }
 0x51d   : > { %v5448_v0 = vpop.f32.mrf.mxu1  ;;  %v5421_v56 = vadd.f32 %v5420_v30, %v5407_v41  ;;  %v11762_v30 = vld [vmem:[%s17119_s9 + $0xf4] sm:$0xf]  ;;  %v11775_v41 = vld [vmem:[%s17119_s9 + $0x154] sm:$0xf0] }
 0x51e   : > { %v10263_v60 = vor.u32 %v11762_v30, %v10260_v20  ;;  %v10231_v30 = vor.u32 %v11754_v15, %v10228_v62  ;;  %v11734_v62 = vld [vmem:[%s17119_s9 + $0x14] sm:$0xf] }
 0x51f   : > { %v5467_v6 = vmax.f32 %v5073_v57, %v5421_v56  ;;  %v10250_v56 = vld [vmem:[%s17119_s9 + $0xe0] sm:$0xf]  ;;  %v11760_v57 = vld [vmem:[%s17119_s9 + $0xe4] sm:$0xf] }
 0x520   : > { %5914 = vmatpush.bf16.msrb.mxu1 %v10263_v60  ;;  %v11743_v60 = vld [vmem:[%s17119_s9 + $0x54] sm:$0xf0] }
 0x522   : > { %v5100_v27 = vpop.f32.mrf.mxu2 }
 0x523   : > { %v5101_v34 = vadd.f32 %v5100_v27, %v15720_v35 }
 0x524   : > { %v5422_v58 = vpop.f32.mrf.mxu0 }
 0x525   : > { %v5115_v38 = vadd.f32 %v15754_v31, %v5101_v34  ;;  %v5450_v46 = vpop.f32.mrf.mxu1  ;;  %v5061_v31 = vadd.f32 %v15736_v29, %v15734_v32  ;;  %v5423_v39 = vadd.f32 %v5422_v58, %v5409_v18  ;;  %v11774_v34 = vld [vmem:[%s17119_s9 + $0x154] sm:$0xf] }
 0x52a   : > { %v5102_v11 = vpop.f32.mrf.mxu2 }
 0x52b   : > { %v5103_v27 = vadd.f32 %v5102_v11, %v15740_v10  ;;  %v5075_v10 = vadd.f32 %v15756_v42, %v5061_v31  ;;  %v11767_v11 = vld [vmem:[%s17119_s9 + $0x114] sm:$0xf0] }
 0x52c   : > { %v10275_v5 = vor.u32 %v11767_v11, %v10274_v16  ;;  %v11759_v31 = vld [vmem:[%s17119_s9 + $0xd4] sm:$0xf0]  ;;  %v10364_v16 = vld [vmem:[%s17119_s9 + $0x60] sm:$0xf]  ;;  %v11745_v11 = vld [vmem:[%s17119_s9 + $0x64] sm:$0xf0] }
 0x52d   : > { %v5117_v2 = vadd.f32 %v15792_v26, %v5103_v27  ;;  %v5469_v32 = vmax.f32 %v5075_v10, %v5423_v39  ;;  %v11772_v27 = vld [vmem:[%s17119_s9 + $0x144] sm:$0xf]  ;;  %v11758_v39 = vld [vmem:[%s17119_s9 + $0xd4] sm:$0xf]  ;;  %v10365_v50 = vor.u32 %v11745_v11, %v10364_v16 }
 0x52e   : > { %5884 = vmatpush.bf16.msrb.mxu2 %v10275_v5  ;;  %v10226_v5 = vld [vmem:[%s17119_s9 + $0xb0] sm:$0xf] }
 0x52f   : > { %v10227_v63 = vor.u32 %v11755_v13, %v10226_v5 }
 0x532   : > { %v5434_v48 = vpop.f32.mrf.mxu2  ;;  %5885 = vmatpush.bf16.msrb.mxu2 %v10267_v21  ;;  %v10396_v21 = vld [vmem:[%s17119_s9 + $0xa0] sm:$0xf] }
 0x533   : > { %v5449_v22 = vadd.f32 %v5448_v0, %v5434_v48  ;;  %v10306_v0 = vld [vmem:[%s17119_s9 + $0x150] sm:$0xf]  ;;  %v10397_v20 = vor.u32 %v11753_v24, %v10396_v21  ;;  %v10326_v21 = vld [vmem:[%s17119_s9 + $0x18] sm:$0xf0] }
 0x534   : > { %v10307_v59 = vor.u32 %v11775_v41, %v10306_v0  ;;  %v11742_v0 = vld [vmem:[%s17119_s9 + $0x54] sm:$0xf]  ;;  %v10401_v41 = vor.u32 %v11752_v14, %v10398_v3  ;;  %v5697_v3 = vld [vmem:[#allocation7 + $0x8] sm:$0x33] }
 0x535   : > { %v5463_v7 = vadd.f32 %v5462_v44, %v5449_v22  ;;  %v10308_v44 = vld [vmem:[%s17119_s9 + $0x158] sm:$0xf0]  ;;  %v11761_v22 = vld [vmem:[%s17119_s9 + $0xe4] sm:$0xf0] }
 0x536   : > { %5886 = vmatpush.bf16.msrb.mxu2 %v10259_v53  ;;  %v10311_v48 = vor.u32 %v11774_v34, %v10308_v44  ;;  %5902 = vmatpush.bf16.msrb.mxu0 %v10307_v59  ;;  %v10356_v53 = vld [vmem:[%s17119_s9 + $0x50] sm:$0xf]  ;;  %v10358_v59 = vld [vmem:[%s17119_s9 + $0x58] sm:$0xf0] }
 0x537   : > { %v5468_v35 = vmax.f32 %v5115_v38, %v5463_v7  ;;  %v10251_v38 = vor.u32 %v11761_v22, %v10250_v56  ;;  %v10252_v7 = vld [vmem:[%s17119_s9 + $0xe8] sm:$0xf0]  ;;  %v10357_v34 = vor.u32 %v11743_v60, %v10356_v53  ;;  %v10388_v44 = vld [vmem:[%s17119_s9 + $0x90] sm:$0xf]  ;;  %v10361_v56 = vor.u32 %v11742_v0, %v10358_v59  ;;  %v11750_v22 = vld [vmem:[%s17119_s9 + $0x94] sm:$0xf] }
 0x538   : > { %5930 = vmatpush.bf16.msra.mxu3 %v10311_v48  ;;  %v10255_v58 = vor.u32 %v11760_v57, %v10252_v7  ;;  %v11751_v48 = vld [vmem:[%s17119_s9 + $0x94] sm:$0xf0]  ;;  %v10390_v57 = vld [vmem:[%s17119_s9 + $0x98] sm:$0xf0]  ;;  %v11733_v53 = vld [vmem:[%s17119_s9 + $0x4] sm:$0xf0] }
 0x539   : > { %v5471_v52 = vpack.c.bf16 %v5468_v35, %v5467_v6  ;;  %v10298_v6 = vld [vmem:[%s17119_s9 + $0x140] sm:$0xf]  ;;  %v11773_v35 = vld [vmem:[%s17119_s9 + $0x144] sm:$0xf0]  ;;  %v11732_v0 = vld [vmem:[%s17119_s9 + $0x4] sm:$0xf] }
 0x53a   : > { %v5436_v25 = vpop.f32.mrf.mxu2  ;;  %v10299_v18 = vor.u32 %v11773_v35, %v10298_v6  ;;  %5887 = vmatpush.bf16.msrb.mxu2 %v10251_v38  ;;  %5915 = vmatpush.bf16.msrb.mxu1 %v10255_v58  ;;  %v10348_v38 = vld [vmem:[%s17119_s9 + $0x40] sm:$0xf]  ;;  %v11741_v6 = vld [vmem:[%s17119_s9 + $0x44] sm:$0xf0]  ;;  %v11740_v35 = vld [vmem:[%s17119_s9 + $0x44] sm:$0xf] }
 0x53b   : > { %5476 = vst.msk [vmem:[#allocation6] sm:$0xff] %vm15882_vm1, %v5471_v52  ;;  %v5451_v45 = vadd.f32 %v5450_v46, %v5436_v25  ;;  %v10300_v52 = vld [vmem:[%s17119_s9 + $0x148] sm:$0xf0]  ;;  %v10242_v46 = vld [vmem:[%s17119_s9 + $0xd0] sm:$0xf] }
 0x53c   : > { %v10303_v25 = vor.u32 %v11772_v27, %v10300_v52  ;;  %5903 = vmatpush.bf16.msrb.mxu0 %v10299_v18  ;;  %v10350_v58 = vld [vmem:[%s17119_s9 + $0x48] sm:$0xf0]  ;;  %v10389_v27 = vor.u32 %v11751_v48, %v10388_v44 }
 0x53d   : > { %v5465_v36 = vadd.f32 %v5464_v37, %v5451_v45  ;;  %v10244_v45 = vld [vmem:[%s17119_s9 + $0xd8] sm:$0xf0]  ;;  %v10243_v37 = vor.u32 %v11759_v31, %v10242_v46  ;;  %v10393_v46 = vor.u32 %v11750_v22, %v10390_v57 }
 0x53e   : > { %v10247_v10 = vor.u32 %v11758_v39, %v10244_v45  ;;  %5931 = vmatpush.bf16.msra.mxu3 %v10303_v25  ;;  %v10349_v25 = vor.u32 %v11741_v6, %v10348_v38  ;;  %v10353_v45 = vor.u32 %v11740_v35, %v10350_v58  ;;  %v11792_v58 = vld [vmem:[%s17119_s9 + $0x1d4] sm:$0xf] }
 0x53f   : > { %v5470_v29 = vmax.f32 %v5117_v2, %v5465_v36  ;;  %v10290_v2 = vld [vmem:[%s17119_s9 + $0x130] sm:$0xf]  ;;  %v11771_v36 = vld [vmem:[%s17119_s9 + $0x134] sm:$0xf0]  ;;  %5888 = vmatpush.bf16.msrb.mxu2 %v10243_v37 }
 0x540   : > { %5916 = vmatpush.bf16.msrb.mxu1 %v10247_v10  ;;  %v10380_v10 = vld [vmem:[%s17119_s9 + $0x80] sm:$0xf] }
 0x541   : > { %v5472_v51 = vpack.c.bf16 %v5470_v29, %v5469_v32  ;;  %v11770_v32 = vld [vmem:[%s17119_s9 + $0x134] sm:$0xf]  ;;  %v10291_v29 = vor.u32 %v11771_v36, %v10290_v2  ;;  %v11749_v2 = vld [vmem:[%s17119_s9 + $0x84] sm:$0xf0]  ;;  %v11748_v36 = vld [vmem:[%s17119_s9 + $0x84] sm:$0xf] }
 0x542   : > { %v10098_v26 = vld [vmem:[#allocation6] sm:$0xf]  ;;  %v11706_v8 = vld [vmem:[#allocation6 + $0x4] sm:$0xf] }
 0x543   : > { %v5485_v42 = vsel %vm5483_vm9, %v5472_v51, %v5484_v17  ;;  %v10292_v17 = vld [vmem:[%s17119_s9 + $0x138] sm:$0xf0]  ;;  %v10372_v51 = vld [vmem:[%s17119_s9 + $0x70] sm:$0xf]  ;;  %5904 = vmatpush.bf16.msrb.mxu0 %v10291_v29  ;;  %v10381_v29 = vor.u32 %v11749_v2, %v10380_v10 }
 0x544   : > { %5486 = vst [vmem:[#allocation6 + $0x8] sm:$0x33] %v5485_v42  ;;  %v11747_v42 = vld [vmem:[%s17119_s9 + $0x74] sm:$0xf0]  ;;  %5917 = vmatpush.bf16.msrb.mxu1 %v10239_v61  ;;  %v10334_v61 = vld [vmem:[%s17119_s9 + $0x28] sm:$0xf0] }
 0x548   : > { %5918 = vmatpush.bf16.msrb.mxu1 %v10231_v30  ;;  %v10329_v30 = vor.u32 %v11734_v62, %v10326_v21  ;;  %v11787_v62 = vld [vmem:[%s17119_s9 + $0x1a4] sm:$0xf0]  ;;  %v11786_v21 = vld [vmem:[%s17119_s9 + $0x1a4] sm:$0xf] }
 0x54b   : > { %v11707_v23 = vld [vmem:[#allocation6 + $0x4] sm:$0x30]  ;;  %v10100_v55 = vld [vmem:[#allocation6 + $0x8] sm:$0x30] }
 0x54c   : > { %v10099_v54 = vor.u32 %v11707_v23, %v10098_v26  ;;  %v10103_v33 = vor.u32 %v11706_v8, %v10100_v55  ;;  %v10295_v26 = vor.u32 %v11770_v32, %v10292_v17  ;;  %v10373_v23 = vor.u32 %v11747_v42, %v10372_v51  ;;  %v11746_v8 = vld [vmem:[%s17119_s9 + $0x74] sm:$0xf]  ;;  %v10374_v55 = vld [vmem:[%s17119_s9 + $0x78] sm:$0xf0]  ;;  %v10382_v17 = vld [vmem:[%s17119_s9 + $0x88] sm:$0xf0] }
 0x54d   : > { %v10340_v51 = vld [vmem:[%s17119_s9 + $0x30] sm:$0xf] }
 0x54e   : > { %5642 = vmatmul.bf16.vlgmr.msra.gmra.mxu0 %v10099_v54  ;;  %10192 = vmatmul.msk.bf16.vlgmr.msra.gmra.mxu2 %vm5630_vm7, %v10103_v33 }
 0x54f   : > { %5670 = vmatmul.bf16.vlgmr.msrb.gmra.mxu3 %v10099_v54  ;;  %10193 = vmatmul.msk.bf16.vlgmr.msra.gmra.mxu1 %vm5630_vm7, %v10103_v33  ;;  %v10234_v54 = vld [vmem:[%s17119_s9 + $0xc0] sm:$0xf]  ;;  %v10377_v33 = vor.u32 %v11746_v8, %v10374_v55  ;;  %v11738_v8 = vld [vmem:[%s17119_s9 + $0x34] sm:$0xf] }
 0x550   : > { %v10235_v47 = vor.u32 %v11757_v40, %v10234_v54  ;;  %5932 = vmatpush.bf16.msra.mxu3 %v10295_v26  ;;  %6052 = vmatpush.bf16.msra.mxu0 %v10373_v23  ;;  %v10385_v26 = vor.u32 %v11748_v36, %v10382_v17  ;;  %v11739_v23 = vld [vmem:[%s17119_s9 + $0x34] sm:$0xf0]  ;;  %v10342_v54 = vld [vmem:[%s17119_s9 + $0x38] sm:$0xf0]  ;;  %v10493_v36 = vor.u32 %v11793_v28, %v10492_v43  ;;  %v11791_v17 = vld [vmem:[%s17119_s9 + $0x1c4] sm:$0xf0] }
 0x551   : > { %6099 = vmatpush.bf16.msra.mxu1 %v10401_v41  ;;  %v10341_v55 = vor.u32 %v11739_v23, %v10340_v51  ;;  %v10345_v40 = vor.u32 %v11738_v8, %v10342_v54  ;;  %v10318_v41 = vld [vmem:[%s17119_s9 + $0x8] sm:$0xf0]  ;;  %v11790_v51 = vld [vmem:[%s17119_s9 + $0x1c4] sm:$0xf]  ;;  %v10508_v8 = vld [vmem:[%s17119_s9 + $0x1f0] sm:$0xf] }
 0x552   : > { %5889 = vmatpush.bf16.msrb.mxu2 %v10235_v47  ;;  %v11736_v47 = vld [vmem:[%s17119_s9 + $0x24] sm:$0xf]  ;;  %v10321_v44 = vor.u32 %v11732_v0, %v10318_v41  ;;  %v11796_v54 = vld [vmem:[%s17119_s9 + $0x1f4] sm:$0xf]  ;;  %v10462_v0 = vld [vmem:[%s17119_s9 + $0x198] sm:$0xf0] }
 0x553   : > { %v10337_v13 = vor.u32 %v11736_v47, %v10334_v61  ;;  %v11789_v47 = vld [vmem:[%s17119_s9 + $0x1b4] sm:$0xf0]  ;;  %v11788_v61 = vld [vmem:[%s17119_s9 + $0x1b4] sm:$0xf]  ;;  %v10444_v43 = vld [vmem:[%s17119_s9 + $0x170] sm:$0xf] }
 0x554   : > { %6080 = vmatpush.bf16.msrb.mxu3 %v10377_v33  ;;  %6053 = vmatpush.bf16.msra.mxu0 %v10365_v50  ;;  %v11781_v28 = vld [vmem:[%s17119_s9 + $0x174] sm:$0xf0] }
 0x555   : > { %6100 = vmatpush.bf16.msra.mxu1 %v10393_v46  ;;  %v11798_v46 = vld [vmem:[%s17119_s9 + $0x204] sm:$0xf] }
 0x556   : > { %5890 = vmatpush.bf16.msrb.mxu2 %v10227_v63 }
 0x558   : > { %6081 = vmatpush.bf16.msrb.mxu3 %v10369_v19  ;;  %6054 = vmatpush.bf16.msra.mxu0 %v10357_v34  ;;  %v10324_v19 = vld [vmem:[%s17119_s9 + $0x10] sm:$0xf] }
 0x559   : > { %6101 = vmatpush.bf16.msra.mxu1 %v10385_v26  ;;  %v10325_v14 = vor.u32 %v11735_v4, %v10324_v19  ;;  %v10477_v19 = vor.u32 %v11789_v47, %v10476_v49  ;;  %v10468_v4 = vld [vmem:[%s17119_s9 + $0x1a0] sm:$0xf]  ;;  %v10550_v49 = vld [vmem:[%s17120_s10 + $0x1a8] sm:$0xff] }
 0x55a   : > { %6071 = vmatpush.bf16.msra.mxu2 %v10397_v20  ;;  %v10316_v20 = vld [vmem:[%s17119_s9] sm:$0xf]  ;;  %v6491_v47 = vunpack.c.l.b16 %v10550_v49 }
 0x55b   : > { %v10317_v59 = vor.u32 %v11733_v53, %v10316_v20  ;;  %v10460_v20 = vld [vmem:[%s17119_s9 + $0x190] sm:$0xf]  ;;  %v11785_v53 = vld [vmem:[%s17119_s9 + $0x194] sm:$0xf0] }
 0x55c   : > { %6082 = vmatpush.bf16.msrb.mxu3 %v10361_v56  ;;  %6055 = vmatpush.bf16.msra.mxu0 %v10349_v25  ;;  %v10461_v41 = vor.u32 %v11785_v53, %v10460_v20  ;;  %v11850_v20 = vld [vmem:[%s17120_s10 + $0x19c] sm:$0xf] }
 0x55e   : > { %6072 = vmatpush.bf16.msra.mxu2 %v10389_v27  ;;  %v10516_v27 = vld [vmem:[%s17119_s9 + $0x200] sm:$0xf] }
 0x560   : > { %6083 = vmatpush.bf16.msrb.mxu3 %v10353_v45  ;;  %6056 = vmatpush.bf16.msra.mxu0 %v10341_v55  ;;  %v11797_v55 = vld [vmem:[%s17119_s9 + $0x1f4] sm:$0xf0] }
 0x562   : > { %6073 = vmatpush.bf16.msra.mxu2 %v10381_v29  ;;  %v10484_v29 = vld [vmem:[%s17119_s9 + $0x1c0] sm:$0xf] }
 0x564   : > { %6084 = vmatpush.bf16.msrb.mxu3 %v10345_v40  ;;  %6057 = vmatpush.bf16.msra.mxu0 %v10333_v12  ;;  %v10485_v40 = vor.u32 %v11791_v17, %v10484_v29  ;;  %v10609_v29 = vld [vmem:[%s17120_s10 + $0x148] sm:$0xf]  ;;  %v11841_v17 = vld [vmem:[%s17120_s10 + $0x14c] sm:$0xf0] }
 0x568   : > { %6085 = vmatpush.bf16.msrb.mxu3 %v10337_v13  ;;  %6058 = vmatpush.bf16.msra.mxu0 %v10325_v14  ;;  %v10502_v13 = vld [vmem:[%s17119_s9 + $0x1e8] sm:$0xf0] }
 0x56c   : > { %6086 = vmatpush.bf16.msrb.mxu3 %v10329_v30  ;;  %6059 = vmatpush.bf16.msra.mxu0 %v10317_v59  ;;  %v10452_v59 = vld [vmem:[%s17119_s9 + $0x180] sm:$0xf] }
 0x570   : > { %6087 = vmatpush.bf16.msrb.mxu3 %v10321_v44  ;;  %v11783_v44 = vld [vmem:[%s17119_s9 + $0x184] sm:$0xf0] }
 0x5cb   : > { %v5643_v7 = vpop.f32.mrf.mxu0 }
 0x5cc   : > { %v5685_v18 = vpop.f32.mrf.mxu1 }
 0x5d1   : > { %v5657_v52 = vpop.f32.mrf.mxu2 }
 0x5d2   : > { %v5658_v31 = vadd.f32 %v5657_v52, %v5643_v7  ;;  %v5671_v39 = vpop.f32.mrf.mxu3  ;;  %v11799_v52 = vld [vmem:[%s17119_s9 + $0x204] sm:$0xf0] }
 0x5d3   : > { %v5686_v37 = vadd.f32 %v5685_v18, %v5671_v39  ;;  %v5645_v16 = vpop.f32.mrf.mxu0  ;;  %v10494_v18 = vld [vmem:[%s17119_s9 + $0x1d8] sm:$0xf0]  ;;  %v10517_v26 = vor.u32 %v11799_v52, %v10516_v27  ;;  %v11779_v27 = vld [vmem:[%s17119_s9 + $0x164] sm:$0xf0]  ;;  %v11778_v52 = vld [vmem:[%s17119_s9 + $0x164] sm:$0xf] }
 0x5d4   : > { %v5690_v32 = vmax.f32 %v5658_v31, 0.0  ;;  %v5687_v50 = vpop.f32.mrf.mxu1 }
 0x5d5   : > { %v5691_v42 = vmax.f32 %v5686_v37, 0.0  ;;  %v10518_v37 = vld [vmem:[%s17119_s9 + $0x208] sm:$0xf0] }
 0x5d6   : > { %v10521_v23 = vor.u32 %v11798_v46, %v10518_v37  ;;  %v10438_v46 = vld [vmem:[%s17119_s9 + $0x168] sm:$0xf0] }
 0x5d7   : > { %v5694_v33 = vpack.c.bf16 %v5691_v42, %v5690_v32  ;;  %v10497_v32 = vor.u32 %v11792_v58, %v10494_v18  ;;  %v10486_v42 = vld [vmem:[%s17119_s9 + $0x1c8] sm:$0xf0]  ;;  %v10436_v58 = vld [vmem:[%s17119_s9 + $0x160] sm:$0xf] }
 0x5d8   : > { %v10489_v9 = vor.u32 %v11790_v51, %v10486_v42  ;;  %v11840_v51 = vld [vmem:[%s17120_s10 + $0x14c] sm:$0xf]  ;;  %v10610_v42 = vor.u32 %v11841_v17, %v10609_v29 }
 0x5d9   : > { %5696 = vst.msk [vmem:[#allocation7] sm:$0xff] %vm15882_vm1, %v5694_v33  ;;  %v5659_v11 = vpop.f32.mrf.mxu2  ;;  %v10510_v33 = vld [vmem:[%s17119_s9 + $0x1f8] sm:$0xf0]  ;;  %vm6328_vm1 = vmand %vm6326_vm12, %vm6327_vm13  ;;  %vm7265_vm13 = vcmask 916480  }
 0x5da   : > { %v5660_v1 = vadd.f32 %v5659_v11, %v5645_v16  ;;  %v5673_v5 = vpop.f32.mrf.mxu3  ;;  %v10478_v16 = vld [vmem:[%s17119_s9 + $0x1b8] sm:$0xf0]  ;;  %v10509_v11 = vor.u32 %v11797_v55, %v10508_v8  ;;  %v10513_v12 = vor.u32 %v11796_v54, %v10510_v33  ;;  %v11839_v8 = vld [vmem:[%s17120_s10 + $0x13c] sm:$0xf0]  ;;  %v10603_v33 = vld [vmem:[%s17120_s10 + $0x140] sm:$0xf0] }
 0x5db   : > { %v5688_v15 = vadd.f32 %v5687_v50, %v5673_v5  ;;  %v10500_v50 = vld [vmem:[%s17119_s9 + $0x1e0] sm:$0xf]  ;;  %v11794_v5 = vld [vmem:[%s17119_s9 + $0x1e4] sm:$0xf]  ;;  %v11838_v54 = vld [vmem:[%s17120_s10 + $0x13c] sm:$0xf] }
 0x5dc   : > { %v5692_v63 = vmax.f32 %v5660_v1, 0.0  ;;  %v11795_v1 = vld [vmem:[%s17119_s9 + $0x1e4] sm:$0xf0]  ;;  %v10505_v14 = vor.u32 %v11794_v5, %v10502_v13  ;;  %v10595_v5 = vld [vmem:[%s17120_s10 + $0x130] sm:$0xf0]  ;;  %vm6332_vm3 = vmor %vm6331_vm2, %vm6328_vm1 }
 0x5dd   : > { %v5693_v24 = vmax.f32 %v5688_v15, 0.0  ;;  %v10481_v15 = vor.u32 %v11788_v61, %v10478_v16  ;;  %v6492_v61 = vunpack.c.h.b16 %v10550_v49  ;;  %v10593_v16 = vld [vmem:[%s17120_s10 + $0x128] sm:$0xf]  ;;  %v11844_v49 = vld [vmem:[%s17120_s10 + $0x16c] sm:$0xf] }
 0x5df   : > { %v5695_v60 = vpack.c.bf16 %v5693_v24, %v5692_v63  ;;  %v10470_v63 = vld [vmem:[%s17119_s9 + $0x1a8] sm:$0xf0]  ;;  %v10501_v24 = vor.u32 %v11795_v1, %v10500_v50  ;;  %v6519_v1 = vpack.c.b16 %v6491_v47, %v6491_v47  ;;  %v6520_v13 = vpack.c.b16 %v6492_v61, %v6492_v61  ;;  %v10627_v47 = vld [vmem:[%s17120_s10 + $0x170] sm:$0xf0] }
 0x5e0   : > { %v10218_v48 = vld [vmem:[#allocation7] sm:$0xf]  ;;  %v11730_v22 = vld [vmem:[#allocation7 + $0x4] sm:$0xf]  ;;  %v10473_v30 = vor.u32 %v11786_v21, %v10470_v63  ;;  %v11851_v21 = vld [vmem:[%s17120_s10 + $0x19c] sm:$0xf0] }
 0x5e1   : > { %v5698_v34 = vsel %vm5483_vm9, %v5695_v60, %v5697_v3  ;;  %v10469_v3 = vor.u32 %v11787_v62, %v10468_v4  ;;  %v11784_v60 = vld [vmem:[%s17119_s9 + $0x194] sm:$0xf]  ;;  %v10428_v37 = vld [vmem:[#allocation7] sm:$0xe]  ;;  %v11834_v63 = vld [vmem:[%s17120_s10 + $0x11c] sm:$0xf] }
 0x5e2   : > { %5699 = vst [vmem:[#allocation7 + $0x8] sm:$0x33] %v5698_v34  ;;  %v10465_v34 = vor.u32 %v11784_v60, %v10462_v0  ;;  %v10649_v62 = vld [vmem:[%s17120_s10 + $0x198] sm:$0xf]  ;;  %v10651_v0 = vld [vmem:[%s17120_s10 + $0x1a0] sm:$0xf0]  ;;  %vm7049_vm9 = vmand %vm5473_vm15, %vm7048_vm6 }
 0x5e3   : > { %v10650_v53 = vor.u32 %v11851_v21, %v10649_v62  ;;  %v6363_v61 = vld [vmem:[%s17120_s10 + $0xd0] sm:$0xff] }
 0x5e9   : > { %v11731_v56 = vld [vmem:[#allocation7 + $0x4] sm:$0x10]  ;;  %v10220_v57 = vld [vmem:[#allocation7 + $0x8] sm:$0x10] }
 0x5ea   : > { %v16185_v38 = vor.u32 %v11731_v56, %v10218_v48  ;;  %v16187_v7 = vor.u32 %v11730_v22, %v10220_v57  ;;  %v11782_v48 = vld [vmem:[%s17119_s9 + $0x184] sm:$0xf]  ;;  %v10454_v56 = vld [vmem:[%s17119_s9 + $0x188] sm:$0xf0]  ;;  %v10453_v22 = vor.u32 %v11783_v44, %v10452_v59  ;;  %v10577_v44 = vld [vmem:[%s17120_s10 + $0x108] sm:$0xf] }
 0x5eb   : > { %v10457_v57 = vor.u32 %v11782_v48, %v10454_v56  ;;  %v10430_v18 = vld [vmem:[#allocation7 + $0x8] sm:$0x30]  ;;  %v11833_v48 = vld [vmem:[%s17120_s10 + $0x10c] sm:$0xf0]  ;;  %v10641_v56 = vld [vmem:[%s17120_s10 + $0x188] sm:$0xf] }
 0x5ec   : > { %v5758_v6 = vshll.u32 %v16185_v38, 16  ;;  %v5765_v35 = vshll.u32 %v16187_v7, 16  ;;  %v5756_v25 = vshrl.u32 %v16185_v38, 16  ;;  %v5763_v39 = vshrl.u32 %v16187_v7, 16 }
 0x5ee   : > { %v5760_v31 = vrot.slane %v5758_v6, 1  ;;  %v5767_v45 = vrot.slane %v5765_v35, 1  ;;  %v11780_v6 = vld [vmem:[%s17119_s9 + $0x174] sm:$0xf] }
 0x5f0   : > { %v5761_v10 = vor.u32 %v5760_v31, %v5756_v25  ;;  %v5768_v2 = vor.u32 %v5767_v45, %v5763_v39  ;;  %v11777_v25 = vld [vmem:[#allocation7 + $0x4] sm:$0x30]  ;;  %v11776_v31 = vld [vmem:[#allocation7 + $0x4] sm:$0xe]  ;;  %v10437_v39 = vor.u32 %v11779_v27, %v10436_v58  ;;  %v10441_v45 = vor.u32 %v11778_v52, %v10438_v46  ;;  %v10569_v58 = vld [vmem:[%s17120_s10 + $0xf8] sm:$0xf] }
 0x5f1   : > { %v11831_v27 = vld [vmem:[%s17120_s10 + $0xfc] sm:$0xf0]  ;;  %v10633_v52 = vld [vmem:[%s17120_s10 + $0x178] sm:$0xf] }
 0x5f2   : > { %5891 = vmatmul.bf16.vlgmr.msrb.gmra.mxu2 %v5761_v10  ;;  %10312 = vmatmul.msk.bf16.vlgmr.msrb.gmra.mxu0 %vm5630_vm7, %v5768_v2  ;;  %v11847_v46 = vld [vmem:[%s17120_s10 + $0x17c] sm:$0xf0] }
 0x5f3   : > { %5919 = vmatmul.bf16.vlgmr.msrb.gmra.mxu1 %v5761_v10  ;;  %10313 = vmatmul.msk.bf16.vlgmr.msra.gmra.mxu3 %vm5630_vm7, %v5768_v2  ;;  %v10433_v10 = vor.u32 %v11776_v31, %v10430_v18  ;;  %v10429_v2 = vor.u32 %v11777_v25, %v10428_v37  ;;  %v10570_v31 = vor.u32 %v11831_v27, %v10569_v58  ;;  %v10571_v37 = vld [vmem:[%s17120_s10 + $0x100] sm:$0xf0]  ;;  %v11825_v58 = vld [vmem:[%s17120_s10 + $0xc4] sm:$0xf0]  ;;  %v10709_v27 = vld [vmem:[%s17120_s10 + $0x68] sm:$0xf0] }
 0x5f4   : > { %6257 = vmatpush.bf16.msrb.mxu2 %v10493_v36  ;;  %6285 = vmatpush.bf16.msrb.mxu1 %v10497_v32 }
 0x5f5   : > { %6276 = vmatpush.bf16.msrb.mxu0 %v10517_v26  ;;  %6304 = vmatpush.bf16.msra.mxu3 %v10521_v23  ;;  %v6142_v36 = vrot.slane %v10433_v10, 1  ;;  %v6141_v32 = vrot.slane %v10429_v2, 1  ;;  %v10611_v26 = vld [vmem:[%s17120_s10 + $0x150] sm:$0xf0]  ;;  %v10601_v23 = vld [vmem:[%s17120_s10 + $0x138] sm:$0xf] }
 0x5f6   : > { %v10614_v55 = vor.u32 %v11840_v51, %v10611_v26  ;;  %v11846_v10 = vld [vmem:[%s17120_s10 + $0x17c] sm:$0xf]  ;;  %v11829_v26 = vld [vmem:[%s17120_s10 + $0xec] sm:$0xf0] }
 0x5f8   : > { %6258 = vmatpush.bf16.msrb.mxu2 %v10485_v40  ;;  %6286 = vmatpush.bf16.msrb.mxu1 %v10489_v9  ;;  %v10602_v40 = vor.u32 %v11839_v8, %v10601_v23  ;;  %v10606_v9 = vor.u32 %v11838_v54, %v10603_v33  ;;  %v10625_v23 = vld [vmem:[%s17120_s10 + $0x168] sm:$0xf]  ;;  %v11828_v54 = vld [vmem:[%s17120_s10 + $0xec] sm:$0xf]  ;;  %v10563_v33 = vld [vmem:[%s17120_s10 + $0xf0] sm:$0xf0] }
 0x5f9   : > { %6277 = vmatpush.bf16.msrb.mxu0 %v10509_v11  ;;  %6305 = vmatpush.bf16.msra.mxu3 %v10513_v12  ;;  %v11837_v11 = vld [vmem:[%s17120_s10 + $0x12c] sm:$0xf0]  ;;  %v11836_v12 = vld [vmem:[%s17120_s10 + $0x12c] sm:$0xf] }
 0x5fa   : > { %v10594_v50 = vor.u32 %v11837_v11, %v10593_v16  ;;  %v10598_v4 = vor.u32 %v11836_v12, %v10595_v5  ;;  %v10630_v11 = vor.u32 %v11844_v49, %v10627_v47  ;;  %v6689_v12 = vunpack.c.l.b16 %v6363_v61  ;;  %v10553_v5 = vld [vmem:[%s17120_s10 + $0xd8] sm:$0xf]  ;;  %v10691_v49 = vld [vmem:[%s17120_s10 + $0x40] sm:$0xf] }
 0x5fc   : > { %6259 = vmatpush.bf16.msrb.mxu2 %v10477_v19  ;;  %6287 = vmatpush.bf16.msrb.mxu1 %v10481_v15  ;;  %v10585_v19 = vld [vmem:[%s17120_s10 + $0x118] sm:$0xf]  ;;  %v11835_v15 = vld [vmem:[%s17120_s10 + $0x11c] sm:$0xf0]  ;;  %v6717_v62 = vpack.c.b16 %v6689_v12, %v6689_v12 }
 0x5fd   : > { %6278 = vmatpush.bf16.msrb.mxu0 %v10501_v24  ;;  %6306 = vmatpush.bf16.msra.mxu3 %v10505_v14  ;;  %v6552_v24 = vsel %vm5473_vm15, %v6519_v1, 0  ;;  %v6555_v14 = vsel %vm5473_vm15, %v6520_v13, 0  ;;  %v11827_v13 = vld [vmem:[%s17120_s10 + $0xdc] sm:$0xf0] }
 0x5fe   : > { %v10739_v12 = vld [vmem:[%s17120_s10 + $0xa0] sm:$0xf] }
 0x600   : > { %6260 = vmatpush.bf16.msrb.mxu2 %v10469_v3  ;;  %6288 = vmatpush.bf16.msrb.mxu1 %v10473_v30  ;;  %v10586_v3 = vor.u32 %v11835_v15, %v10585_v19  ;;  %v10587_v30 = vld [vmem:[%s17120_s10 + $0x120] sm:$0xf0]  ;;  %v10554_v19 = vor.u32 %v11827_v13, %v10553_v5  ;;  %v10617_v15 = vld [vmem:[%s17120_s10 + $0x158] sm:$0xf] }
 0x601   : > { %v10590_v60 = vor.u32 %v11834_v63, %v10587_v30  ;;  %v11842_v30 = vld [vmem:[%s17120_s10 + $0x15c] sm:$0xf] }
 0x602   : > { %6060 = vmatmul.bf16.vlgmr.msra.gmra.mxu0 %v16185_v38  ;;  %10402 = vmatmul.msk.bf16.vlgmr.msra.gmra.mxu2 %vm5630_vm7, %v16187_v7 }
 0x603   : > { %6088 = vmatmul.bf16.vlgmr.msrb.gmra.mxu3 %v16185_v38  ;;  %10403 = vmatmul.msk.bf16.vlgmr.msra.gmra.mxu1 %vm5630_vm7, %v16187_v7  ;;  %v10446_v38 = vld [vmem:[%s17119_s9 + $0x178] sm:$0xf0]  ;;  %v10445_v7 = vor.u32 %v11781_v28, %v10444_v43  ;;  %v11832_v43 = vld [vmem:[%s17120_s10 + $0x10c] sm:$0xf]  ;;  %v10579_v28 = vld [vmem:[%s17120_s10 + $0x110] sm:$0xf0] }
 0x604   : > { %6261 = vmatpush.bf16.msrb.mxu2 %v10461_v41  ;;  %6289 = vmatpush.bf16.msrb.mxu1 %v10465_v34  ;;  %v10449_v35 = vor.u32 %v11780_v6, %v10446_v38  ;;  %v10654_v41 = vor.u32 %v11850_v20, %v10651_v0  ;;  %v10582_v38 = vor.u32 %v11832_v43, %v10579_v28  ;;  %v10715_v0 = vld [vmem:[%s17120_s10 + $0x70] sm:$0xf] }
 0x605   : > { %6557 = vmatpush.bf16.msra.mxu0 %v10610_v42  ;;  %6583 = vmatpush.bf16.msrb.mxu3 %v10614_v55  ;;  %v10561_v42 = vld [vmem:[%s17120_s10 + $0xe8] sm:$0xf]  ;;  %v11845_v55 = vld [vmem:[%s17120_s10 + $0x16c] sm:$0xf0] }
 0x606   : > { %v10562_v8 = vor.u32 %v11829_v26, %v10561_v42  ;;  %v10747_v42 = vld [vmem:[%s17120_s10 + $0xb0] sm:$0xf]  ;;  %v11823_v26 = vld [vmem:[%s17120_s10 + $0xb4] sm:$0xf0] }
 0x608   : > { %6262 = vmatpush.bf16.msrb.mxu2 %v10453_v22  ;;  %6290 = vmatpush.bf16.msrb.mxu1 %v10457_v57  ;;  %v10578_v22 = vor.u32 %v11833_v48, %v10577_v44  ;;  %v11849_v57 = vld [vmem:[%s17120_s10 + $0x18c] sm:$0xf0] }
 0x609   : > { %6558 = vmatpush.bf16.msra.mxu0 %v10602_v40  ;;  %6584 = vmatpush.bf16.msrb.mxu3 %v10606_v9  ;;  %v10642_v6 = vor.u32 %v11849_v57, %v10641_v56  ;;  %v10626_v40 = vor.u32 %v11845_v55, %v10625_v23  ;;  %v10566_v9 = vor.u32 %v11828_v54, %v10563_v33  ;;  %v6748_v56 = vsel %vm5473_vm15, %v6717_v62, 0  ;;  %v10717_v57 = vld [vmem:[%s17120_s10 + $0x78] sm:$0xf0] }
 0x60a   : > { %v10748_v23 = vor.u32 %v11823_v26, %v10747_v42  ;;  %v10701_v55 = vld [vmem:[%s17120_s10 + $0x58] sm:$0xf0] }
 0x60c   : > { %6263 = vmatpush.bf16.msrb.mxu2 %v10445_v7  ;;  %6291 = vmatpush.bf16.msrb.mxu1 %v10449_v35  ;;  %v11848_v7 = vld [vmem:[%s17120_s10 + $0x18c] sm:$0xf]  ;;  %v10643_v35 = vld [vmem:[%s17120_s10 + $0x190] sm:$0xf0] }
 0x60d   : > { %6559 = vmatpush.bf16.msra.mxu0 %v10594_v50  ;;  %6585 = vmatpush.bf16.msrb.mxu3 %v10598_v4  ;;  %v10646_v18 = vor.u32 %v11848_v7, %v10643_v35  ;;  %v6690_v50 = vunpack.c.h.b16 %v6363_v61  ;;  %v11843_v4 = vld [vmem:[%s17120_s10 + $0x15c] sm:$0xf0] }
 0x60e   : > { %v10755_v7 = vld [vmem:[%s17120_s10 + $0xc0] sm:$0xf] }
 0x60f   : > { %v6718_v21 = vpack.c.b16 %v6690_v50, %v6690_v50  ;;  %v11821_v50 = vld [vmem:[%s17120_s10 + $0xa4] sm:$0xf0] }
 0x610   : > { %6264 = vmatpush.bf16.msrb.mxu2 %v10437_v39  ;;  %6292 = vmatpush.bf16.msrb.mxu1 %v10441_v45  ;;  %v10634_v39 = vor.u32 %v11847_v46, %v10633_v52  ;;  %v11830_v45 = vld [vmem:[%s17120_s10 + $0xfc] sm:$0xf]  ;;  %v10756_v46 = vor.u32 %v11825_v58, %v10755_v7  ;;  %v10740_v13 = vor.u32 %v11821_v50, %v10739_v12  ;;  %v10675_v7 = vld [vmem:[%s17120_s10 + $0x20] sm:$0xf]  ;;  %v11801_v12 = vld [vmem:[%s17120_s10 + $0x4] sm:$0xf0] }
 0x611   : > { %6560 = vmatpush.bf16.msra.mxu0 %v10586_v3  ;;  %6586 = vmatpush.bf16.msrb.mxu3 %v10590_v60  ;;  %v10555_v3 = vld [vmem:[%s17120_s10 + $0xe0] sm:$0xf0]  ;;  %v6751_v43 = vsel %vm5473_vm15, %v6718_v21, 0  ;;  %v10723_v58 = vld [vmem:[%s17120_s10 + $0x80] sm:$0xf] }
 0x612   : > { %10522 = vmatmul.msk.bf16.vlgmr.msrb.gmra.mxu0 %vm5630_vm7, %v6142_v36  ;;  %v10619_v60 = vld [vmem:[%s17120_s10 + $0x160] sm:$0xf0] }
 0x613   : > { %6265 = vmatmul.bf16.vlgmr.msrb.gmra.mxu2 %v6141_v32  ;;  %6293 = vmatmul.bf16.vlgmr.msrb.gmra.mxu1 %v6141_v32  ;;  %v10635_v32 = vld [vmem:[%s17120_s10 + $0x180] sm:$0xf0]  ;;  %v10622_v44 = vor.u32 %v11842_v30, %v10619_v60  ;;  %v10731_v60 = vld [vmem:[%s17120_s10 + $0x90] sm:$0xf] }
 0x614   : > { %10523 = vmatmul.msk.bf16.vlgmr.msra.gmra.mxu3 %vm5630_vm7, %v6142_v36  ;;  %6572 = vmatpush.bf16.msra.mxu2 %v6552_v24  ;;  %v10574_v36 = vor.u32 %v11830_v45, %v10571_v37  ;;  %v10638_v17 = vor.u32 %v11846_v10, %v10635_v32  ;;  %v10618_v24 = vor.u32 %v11843_v4, %v10617_v15  ;;  %v10757_v45 = vld [vmem:[%s17120_s10 + $0xc8] sm:$0xf0]  ;;  %v11811_v32 = vld [vmem:[%s17120_s10 + $0x54] sm:$0xf0]  ;;  %v11820_v4 = vld [vmem:[%s17120_s10 + $0xa4] sm:$0xf] }
 0x615   : > { %6598 = vmatpush.bf16.msra.mxu1 %v6555_v14  ;;  %6561 = vmatpush.bf16.msra.mxu0 %v10578_v22  ;;  %v11826_v14 = vld [vmem:[%s17120_s10 + $0xdc] sm:$0xf]  ;;  %v11814_v22 = vld [vmem:[%s17120_s10 + $0x74] sm:$0xf]  ;;  %v10693_v15 = vld [vmem:[%s17120_s10 + $0x48] sm:$0xf0] }
 0x616   : > { %6587 = vmatpush.bf16.msrb.mxu3 %v10582_v38  ;;  %v10720_v28 = vor.u32 %v11814_v22, %v10717_v57  ;;  %v11813_v38 = vld [vmem:[%s17120_s10 + $0x64] sm:$0xf0]  ;;  %v10733_v22 = vld [vmem:[%s17120_s10 + $0x98] sm:$0xf0]  ;;  %v11800_v50 = vld [vmem:[%s17120_s10 + $0x4] sm:$0xf] }
 0x617   : > { %vm7051_vm7 = vmand %vm7050_vm8, %vm485_vm4  ;;  %vm7182_vm4 = vcmask 912384  }
 0x618   : > { %6573 = vmatpush.bf16.msra.mxu2 %v10650_v53  ;;  %v10558_v53 = vor.u32 %v11826_v14, %v10555_v3  ;;  %v10683_v14 = vld [vmem:[%s17120_s10 + $0x30] sm:$0xf]  ;;  %v11807_v3 = vld [vmem:[%s17120_s10 + $0x34] sm:$0xf0]  ;;  %vm7052_vm10 = vmor %vm7051_vm7, %vm7049_vm9 }
 0x619   : > { %6599 = vmatpush.bf16.msra.mxu1 %v10654_v41  ;;  %6562 = vmatpush.bf16.msra.mxu0 %v10570_v31  ;;  %v11815_v41 = vld [vmem:[%s17120_s10 + $0x74] sm:$0xf0]  ;;  %v10684_v57 = vor.u32 %v11807_v3, %v10683_v14 }
 0x61a   : > { %6588 = vmatpush.bf16.msrb.mxu3 %v10574_v36  ;;  %v10716_v48 = vor.u32 %v11815_v41, %v10715_v0  ;;  %v10699_v36 = vld [vmem:[%s17120_s10 + $0x50] sm:$0xf]  ;;  %v11819_v0 = vld [vmem:[%s17120_s10 + $0x94] sm:$0xf0]  ;;  %v11806_v41 = vld [vmem:[%s17120_s10 + $0x34] sm:$0xf] }
 0x61c   : > { %6574 = vmatpush.bf16.msra.mxu2 %v10642_v6  ;;  %v10707_v6 = vld [vmem:[%s17120_s10 + $0x60] sm:$0xf] }
 0x61d   : > { %6600 = vmatpush.bf16.msra.mxu1 %v10646_v18  ;;  %6563 = vmatpush.bf16.msra.mxu0 %v10562_v8  ;;  %v10708_v35 = vor.u32 %v11813_v38, %v10707_v6  ;;  %v11812_v18 = vld [vmem:[%s17120_s10 + $0x64] sm:$0xf]  ;;  %v11810_v8 = vld [vmem:[%s17120_s10 + $0x54] sm:$0xf] }
 0x61e   : > { %6589 = vmatpush.bf16.msrb.mxu3 %v10566_v9  ;;  %v10712_v31 = vor.u32 %v11812_v18, %v10709_v27  ;;  %v10704_v33 = vor.u32 %v11810_v8, %v10701_v55  ;;  %v10749_v9 = vld [vmem:[%s17120_s10 + $0xb8] sm:$0xf0]  ;;  %v11802_v8 = vld [vmem:[%s17120_s10 + $0x14] sm:$0xf] }
 0x620   : > { %6575 = vmatpush.bf16.msra.mxu2 %v10634_v39  ;;  %v11824_v39 = vld [vmem:[%s17120_s10 + $0xc4] sm:$0xf] }
 0x621   : > { %6601 = vmatpush.bf16.msra.mxu1 %v10638_v17  ;;  %6564 = vmatpush.bf16.msra.mxu0 %v10554_v19  ;;  %v10760_v10 = vor.u32 %v11824_v39, %v10757_v45  ;;  %v10700_v17 = vor.u32 %v11811_v32, %v10699_v36  ;;  %v11808_v19 = vld [vmem:[%s17120_s10 + $0x44] sm:$0xf] }
 0x622   : > { %6590 = vmatpush.bf16.msrb.mxu3 %v10558_v53  ;;  %v10696_v21 = vor.u32 %v11808_v19, %v10693_v15 }
 0x624   : > { %6576 = vmatpush.bf16.msra.mxu2 %v10626_v40  ;;  %v11822_v40 = vld [vmem:[%s17120_s10 + $0xb4] sm:$0xf] }
 0x625   : > { %6602 = vmatpush.bf16.msra.mxu1 %v10630_v11  ;;  %6753 = vmatpush.bf16.msrb.mxu0 %v10716_v48  ;;  %v10752_v61 = vor.u32 %v11822_v40, %v10749_v9  ;;  %v11809_v11 = vld [vmem:[%s17120_s10 + $0x44] sm:$0xf0]  ;;  %v10685_v48 = vld [vmem:[%s17120_s10 + $0x38] sm:$0xf0] }
 0x626   : > { %6794 = vmatpush.bf16.msra.mxu3 %v6751_v43  ;;  %v10692_v5 = vor.u32 %v11809_v11, %v10691_v49  ;;  %v10688_v43 = vor.u32 %v11806_v41, %v10685_v48  ;;  %v10669_v40 = vld [vmem:[%s17120_s10 + $0x18] sm:$0xf0] }
 0x627   : > { %v10672_v49 = vor.u32 %v11802_v8, %v10669_v40  ;;  %v11878_v40 = vld [vmem:[%s17120_s10 + $0x274] sm:$0xf] }
 0x628   : > { %6577 = vmatpush.bf16.msra.mxu2 %v10618_v24  ;;  %v10741_v24 = vld [vmem:[%s17120_s10 + $0xa8] sm:$0xf0] }
 0x629   : > { %6603 = vmatpush.bf16.msra.mxu1 %v10622_v44  ;;  %6754 = vmatpush.bf16.msrb.mxu0 %v10708_v35  ;;  %v10744_v53 = vor.u32 %v11820_v4, %v10741_v24  ;;  %v10732_v44 = vor.u32 %v11819_v0, %v10731_v60  ;;  %v11805_v35 = vld [vmem:[%s17120_s10 + $0x24] sm:$0xf0] }
 0x62a   : > { %6795 = vmatpush.bf16.msra.mxu3 %v10760_v10  ;;  %v10725_v10 = vld [vmem:[%s17120_s10 + $0x88] sm:$0xf0] }
 0x62c   : > { %6768 = vmatpush.bf16.msrb.mxu2 %v6748_v56  ;;  %v11818_v56 = vld [vmem:[%s17120_s10 + $0x94] sm:$0xf] }
 0x62d   : > { %6779 = vmatpush.bf16.msrb.mxu1 %v10720_v28  ;;  %6755 = vmatpush.bf16.msrb.mxu0 %v10700_v17  ;;  %v10736_v28 = vor.u32 %v11818_v56, %v10733_v22  ;;  %v10789_v22 = vld [vmem:[%s17120_s10 + $0x280] sm:$0xff] }
 0x62e   : > { %6796 = vmatpush.bf16.msra.mxu3 %v10752_v61  ;;  %v10659_v61 = vld [vmem:[%s17120_s10] sm:$0xf] }
 0x630   : > { %6769 = vmatpush.bf16.msrb.mxu2 %v10756_v46 }
 0x631   : > { %6780 = vmatpush.bf16.msrb.mxu1 %v10712_v31  ;;  %6756 = vmatpush.bf16.msrb.mxu0 %v10692_v5  ;;  %v10661_v5 = vld [vmem:[%s17120_s10 + $0x8] sm:$0xf0] }
 0x632   : > { %6797 = vmatpush.bf16.msra.mxu3 %v10744_v53 }
 0x634   : > { %6770 = vmatpush.bf16.msrb.mxu2 %v10748_v23  ;;  %v11803_v23 = vld [vmem:[%s17120_s10 + $0x14] sm:$0xf0] }
 0x635   : > { %6781 = vmatpush.bf16.msrb.mxu1 %v10704_v33  ;;  %6757 = vmatpush.bf16.msrb.mxu0 %v10684_v57 }
 0x636   : > { %6798 = vmatpush.bf16.msra.mxu3 %v10736_v28 }
 0x638   : > { %6771 = vmatpush.bf16.msrb.mxu2 %v10740_v13 }
 0x639   : > { %6782 = vmatpush.bf16.msrb.mxu1 %v10696_v21  ;;  %v10664_v21 = vor.u32 %v11800_v50, %v10661_v5  ;;  %v10842_v50 = vld [vmem:[%s17120_s10 + $0x208] sm:$0xf0] }
 0x63c   : > { %6772 = vmatpush.bf16.msrb.mxu2 %v10732_v44 }
 0x63d   : > { %6783 = vmatpush.bf16.msrb.mxu1 %v10688_v43 }
 0x66f   : > { %v16400_v34 = vpop.f32.mrf.mxu0 }
 0x670   : > { %v16402_v59 = vpop.f32.mrf.mxu1 }
 0x675   : > { %v16440_v25 = vpop.f32.mrf.mxu2 }
 0x676   : > { %v16451_v2 = vpop.f32.mrf.mxu3  ;;  %v5907_v38 = vadd.f32 %v16400_v34, %v16440_v25  ;;  %v11817_v34 = vld [vmem:[%s17120_s10 + $0x84] sm:$0xf0]  ;;  %v11804_v25 = vld [vmem:[%s17120_s10 + $0x24] sm:$0xf] }
 0x677   : > { %v16456_v29 = vpop.f32.mrf.mxu0  ;;  %v5935_v6 = vadd.f32 %v16451_v2, %v16402_v59  ;;  %v10676_v59 = vor.u32 %v11805_v35, %v10675_v7  ;;  %v10677_v2 = vld [vmem:[%s17120_s10 + $0x28] sm:$0xf0]  ;;  %v10724_v39 = vor.u32 %v11817_v34, %v10723_v58  ;;  %v11868_v34 = vld [vmem:[%s17120_s10 + $0x224] sm:$0xf] }
 0x678   : > { %v16458_v51 = vpop.f32.mrf.mxu1  ;;  %v10680_v45 = vor.u32 %v11804_v25, %v10677_v2  ;;  %v10858_v25 = vld [vmem:[%s17120_s10 + $0x228] sm:$0xf0] }
 0x679   : > { %6773 = vmatpush.bf16.msrb.mxu2 %v10724_v39  ;;  %6758 = vmatpush.bf16.msrb.mxu0 %v10676_v59  ;;  %v11869_v59 = vld [vmem:[%s17120_s10 + $0x224] sm:$0xf0] }
 0x67a   : > { %6784 = vmatpush.bf16.msrb.mxu1 %v10680_v45 }
 0x67d   : > { %v16487_v16 = vpop.f32.mrf.mxu2 }
 0x67e   : > { %v16489_v1 = vpop.f32.mrf.mxu3  ;;  %v5909_v13 = vadd.f32 %v16456_v29, %v16487_v16  ;;  %6785 = vmatpush.bf16.msrb.mxu1 %v10672_v49 }
 0x67f   : > { %v16503_v63 = vpop.f32.mrf.mxu0  ;;  %v5937_v11 = vadd.f32 %v16489_v1, %v16458_v51  ;;  %v10660_v1 = vor.u32 %v11801_v12, %v10659_v61  ;;  %v11864_v12 = vld [vmem:[%s17120_s10 + $0x204] sm:$0xf] }
 0x680   : > { %v16514_v20 = vpop.f32.mrf.mxu1  ;;  %v6062_v46 = vadd.f32 %v16503_v63, %v5907_v38  ;;  %v10667_v63 = vld [vmem:[%s17120_s10 + $0x10] sm:$0xf]  ;;  %v6926_v38 = vunpack.c.h.b16 %v10789_v22 }
 0x682   : > { %6786 = vmatpush.bf16.msrb.mxu1 %v10664_v21  ;;  %v10845_v21 = vor.u32 %v11864_v12, %v10842_v50 }
 0x685   : > { %v16551_v52 = vpop.f32.mrf.mxu2 }
 0x686   : > { %v6089_v37 = vpop.f32.mrf.mxu3  ;;  %v6076_v17 = vadd.f32 %v16551_v52, %v6062_v46  ;;  %v10668_v52 = vor.u32 %v11803_v23, %v10667_v63  ;;  %v6954_v46 = vpack.c.b16 %v6926_v38, %v6926_v38  ;;  %v11866_v63 = vld [vmem:[%s17120_s10 + $0x214] sm:$0xf]  ;;  %v10850_v23 = vld [vmem:[%s17120_s10 + $0x218] sm:$0xf0]  ;;  %v10874_v38 = vld [vmem:[%s17120_s10 + $0x248] sm:$0xf0] }
 0x687   : > { %v16577_v54 = vpop.f32.mrf.mxu0  ;;  %v6090_v18 = vadd.f32 %v6089_v37, %v5935_v6  ;;  %v11816_v37 = vld [vmem:[%s17120_s10 + $0x84] sm:$0xf]  ;;  %v6925_v6 = vunpack.c.l.b16 %v10789_v22  ;;  %v10853_v61 = vor.u32 %v11866_v63, %v10850_v23  ;;  %v10826_v22 = vld [vmem:[%s17120_s10 + $0x1e8] sm:$0xf0] }
 0x688   : > { %v16588_v47 = vpop.f32.mrf.mxu1  ;;  %v10728_v32 = vor.u32 %v11816_v37, %v10725_v10  ;;  %6759 = vmatpush.bf16.msrb.mxu0 %v10668_v52  ;;  %v6064_v4 = vadd.f32 %v16577_v54, %v5909_v13  ;;  %v11879_v52 = vld [vmem:[%s17120_s10 + $0x274] sm:$0xf0] }
 0x689   : > { %v6104_v55 = vadd.f32 %v16514_v20, %v6090_v18  ;;  %v6953_v2 = vpack.c.b16 %v6925_v6, %v6925_v6  ;;  %v11872_v6 = vld [vmem:[%s17120_s10 + $0x244] sm:$0xf] }
 0x68a   : > { %6799 = vmatpush.bf16.msra.mxu3 %v10728_v32 }
 0x68b   : > { %v6985_v8 = vsel %vm5473_vm15, %v6953_v2, 0 }
 0x68c   : > { %6760 = vmatpush.bf16.msrb.mxu0 %v10660_v1  ;;  %v10890_v1 = vld [vmem:[%s17120_s10 + $0x268] sm:$0xf0] }
 0x68d   : > { %v16608_v62 = vpop.f32.mrf.mxu2 }
 0x68e   : > { %v16619_v30 = vpop.f32.mrf.mxu3  ;;  %v6078_v29 = vadd.f32 %v16608_v62, %v6064_v4  ;;  %v6333_v62 = vld [vmem:[#allocation8 + $0x8] sm:$0x11] }
 0x68f   : > { %v6280_v27 = vpop.f32.mrf.mxu0  ;;  %v6092_v15 = vadd.f32 %v16619_v30, %v5937_v11  ;;  %v10840_v11 = vld [vmem:[%s17120_s10 + $0x200] sm:$0xf] }
 0x690   : > { %v6294_v31 = vpop.f32.mrf.mxu1 }
 0x691   : > { %v6106_v60 = vadd.f32 %v16588_v47, %v6092_v15  ;;  %v11877_v15 = vld [vmem:[%s17120_s10 + $0x264] sm:$0xf0] }
 0x696   : > { %v6266_v36 = vpop.f32.mrf.mxu2 }
 0x697   : > { %v6281_v42 = vadd.f32 %v6280_v27, %v6266_v36  ;;  %v6308_v26 = vpop.f32.mrf.mxu3  ;;  %v6282_v14 = vpop.f32.mrf.mxu0  ;;  %v10856_v27 = vld [vmem:[%s17120_s10 + $0x220] sm:$0xf] }
 0x698   : > { %v6309_v33 = vadd.f32 %v6308_v26, %v6294_v31  ;;  %v6296_v16 = vpop.f32.mrf.mxu1  ;;  %v10857_v32 = vor.u32 %v11869_v59, %v10856_v27  ;;  %v11867_v26 = vld [vmem:[%s17120_s10 + $0x214] sm:$0xf0]  ;;  %v10816_v27 = vld [vmem:[%s17120_s10 + $0x1d0] sm:$0xf] }
 0x699   : > { %v6313_v9 = vadd.f32 %v6281_v42, %v6076_v17  ;;  %v10861_v17 = vor.u32 %v11868_v34, %v10858_v25  ;;  %v10848_v42 = vld [vmem:[%s17120_s10 + $0x210] sm:$0xf]  ;;  %v11859_v59 = vld [vmem:[%s17120_s10 + $0x1d4] sm:$0xf0]  ;;  %v11858_v34 = vld [vmem:[%s17120_s10 + $0x1d4] sm:$0xf] }
 0x69a   : > { %v6314_v20 = vadd.f32 %v6309_v33, %v6104_v55  ;;  %v6988_v55 = vsel %vm5473_vm15, %v6954_v46, 0  ;;  %v10896_v33 = vld [vmem:[%s17120_s10 + $0x270] sm:$0xf]  ;;  %v10849_v49 = vor.u32 %v11867_v26, %v10848_v42  ;;  %v10818_v25 = vld [vmem:[%s17120_s10 + $0x1d8] sm:$0xf0]  ;;  %v10877_v46 = vor.u32 %v11872_v6, %v10874_v38  ;;  %v11910_v38 = vld [vmem:[%s17122_s12 + $0xa0] sm:$0xff] }
 0x69b   : > { %v6317_v19 = vmax.f32 %v6313_v9, 0.0  ;;  %v10898_v9 = vld [vmem:[%s17120_s10 + $0x278] sm:$0xf0]  ;;  %v10897_v5 = vor.u32 %v11879_v52, %v10896_v33  ;;  %v11854_v33 = vld [vmem:[%s17120_s10 + $0x1b4] sm:$0xf] }
 0x69c   : > { %v6318_v51 = vmax.f32 %v6314_v20, 0.0  ;;  %v11865_v20 = vld [vmem:[%s17120_s10 + $0x204] sm:$0xf0]  ;;  %v10901_v13 = vor.u32 %v11878_v40, %v10898_v9  ;;  %v10802_v52 = vld [vmem:[%s17120_s10 + $0x1b8] sm:$0xf0] }
 0x69d   : > { %v10841_v4 = vor.u32 %v11865_v20, %v10840_v11  ;;  %v10805_v11 = vor.u32 %v11854_v33, %v10802_v52 }
 0x69e   : > { %v6321_v24 = vpack.c.bf16 %v6318_v51, %v6317_v19  ;;  %v6268_v3 = vpop.f32.mrf.mxu2  ;;  %v10888_v19 = vld [vmem:[%s17120_s10 + $0x260] sm:$0xf]  ;;  %v11876_v51 = vld [vmem:[%s17120_s10 + $0x264] sm:$0xf] }
 0x69f   : > { %v6283_v53 = vadd.f32 %v6282_v14, %v6268_v3  ;;  %v6310_v30 = vpop.f32.mrf.mxu3  ;;  %v11863_v14 = vld [vmem:[%s17120_s10 + $0x1f4] sm:$0xf0]  ;;  %v11862_v3 = vld [vmem:[%s17120_s10 + $0x1f4] sm:$0xf] }
 0x6a0   : > { %6325 = vst.msk [vmem:[#allocation8] sm:$0xff] %vm6324_vm11, %v6321_v24  ;;  %v6311_v54 = vadd.f32 %v6310_v30, %v6296_v16  ;;  %v10832_v24 = vld [vmem:[%s17120_s10 + $0x1f0] sm:$0xf]  ;;  %v10889_v16 = vor.u32 %v11877_v15, %v10888_v19  ;;  %v11887_v19 = vld [vmem:[%s17121_s11 + $0x38] sm:$0xff]  ;;  %vm7147_vm11 = vcmask 326656  }
 0x6a1   : > { %v6315_v0 = vadd.f32 %v6283_v53, %v6078_v29  ;;  %v10834_v29 = vld [vmem:[%s17120_s10 + $0x1f8] sm:$0xf0]  ;;  %v10893_v53 = vor.u32 %v11876_v51, %v10890_v1  ;;  %v10880_v30 = vld [vmem:[%s17120_s10 + $0x250] sm:$0xf]  ;;  %v11885_v51 = vld [vmem:[%s17121_s11 + $0x28] sm:$0xff] }
 0x6a2   : > { %v6316_v41 = vadd.f32 %v6311_v54, %v6106_v60  ;;  %v11875_v60 = vld [vmem:[%s17120_s10 + $0x254] sm:$0xf0]  ;;  %v11874_v54 = vld [vmem:[%s17120_s10 + $0x254] sm:$0xf] }
 0x6a3   : > { %v6319_v44 = vmax.f32 %v6315_v0, 0.0  ;;  %v10882_v0 = vld [vmem:[%s17120_s10 + $0x258] sm:$0xf0]  ;;  %v11886_v15 = vld [vmem:[%s17121_s11 + $0x30] sm:$0xff] }
 0x6a4   : > { %v6320_v48 = vmax.f32 %v6316_v41, 0.0  ;;  %v10833_v41 = vor.u32 %v11863_v14, %v10832_v24 }
 0x6a6   : > { %v6322_v56 = vpack.c.bf16 %v6320_v48, %v6319_v44  ;;  %v10837_v44 = vor.u32 %v11862_v3, %v10834_v29  ;;  %v10824_v48 = vld [vmem:[%s17120_s10 + $0x1e0] sm:$0xf]  ;;  %v11883_v3 = vld [vmem:[%s17121_s11 + $0x18] sm:$0xff]  ;;  %v7077_v29 = vld [vmem:[%s17121_s11 + $0x50] sm:$0xf] }
 0x6a7   : > { %v6336_v57 = vld [vmem:[#allocation8] sm:$0xff] }
 0x6a8   : > { %v6334_v47 = vsel %vm6332_vm3, %v6322_v56, %v6333_v62  ;;  %v6393_v43 = vunpack.c.l.b16 %v6336_v57  ;;  %v6394_v28 = vunpack.c.h.b16 %v6336_v57  ;;  %v11861_v62 = vld [vmem:[%s17120_s10 + $0x1e4] sm:$0xf0]  ;;  %v11860_v56 = vld [vmem:[%s17120_s10 + $0x1e4] sm:$0xf]  ;;  %v10881_v57 = vor.u32 %v11875_v60, %v10880_v30 }
 0x6a9   : > { %6335 = vst [vmem:[#allocation8 + $0x8] sm:$0x11] %v6334_v47  ;;  %v10885_v47 = vor.u32 %v11874_v54, %v10882_v0  ;;  %v10792_v20 = vld [vmem:[#allocation8] sm:$0xe]  ;;  %v11882_v54 = vld [vmem:[%s17121_s11 + $0x10] sm:$0xff] }
 0x6aa   : > { %v16708_v7 = vpack.c.b16 %v6393_v43, %v6393_v43  ;;  %v16710_v35 = vpack.c.b16 %v6394_v28, %v6394_v28  ;;  %v10872_v43 = vld [vmem:[%s17120_s10 + $0x240] sm:$0xf]  ;;  %v11873_v28 = vld [vmem:[%s17120_s10 + $0x244] sm:$0xf0] }
 0x6ab   : > { %v10873_v2 = vor.u32 %v11873_v28, %v10872_v43  ;;  %v11896_v43 = vld [vmem:[%s17122_s12 + $0x30] sm:$0xff]  ;;  %v11903_v28 = vld [vmem:[%s17122_s12 + $0x68] sm:$0xff] }
 0x6ac   : > { %v6400_v58 = vshll.u32 %v16708_v7, 16  ;;  %v6407_v18 = vshll.u32 %v16710_v35, 16  ;;  %v6398_v31 = vshrl.u32 %v16708_v7, 16  ;;  %v6405_v45 = vshrl.u32 %v16710_v35, 16 }
 0x6ae   : > { %v6402_v39 = vrot.slane %v6400_v58, 1  ;;  %v6409_v37 = vrot.slane %v6407_v18, 1  ;;  %v10825_v58 = vor.u32 %v11861_v62, %v10824_v48  ;;  %v10829_v18 = vor.u32 %v11860_v56, %v10826_v22  ;;  %v11881_v48 = vld [vmem:[%s17121_s11 + $0x8] sm:$0xff] }
 0x6af   : > { %v11889_v62 = vld [vmem:[%s17121_s11 + $0x48] sm:$0xff] }
 0x6b0   : > { %v6403_v10 = vor.u32 %v6402_v39, %v6398_v31  ;;  %v6410_v36 = vor.u32 %v6409_v37, %v6405_v45  ;;  %v10864_v31 = vld [vmem:[%s17120_s10 + $0x230] sm:$0xf]  ;;  %v11871_v39 = vld [vmem:[%s17120_s10 + $0x234] sm:$0xf0]  ;;  %v11870_v45 = vld [vmem:[%s17120_s10 + $0x234] sm:$0xf] }
 0x6b1   : > { %v10866_v37 = vld [vmem:[%s17120_s10 + $0x238] sm:$0xf0]  ;;  %v10865_v42 = vor.u32 %v11871_v39, %v10864_v31  ;;  %v10794_v40 = vld [vmem:[#allocation8 + $0x8] sm:$0x10]  ;;  %v11853_v9 = vld [vmem:[#allocation8 + $0x4] sm:$0x10] }
 0x6b2   : > { %6565 = vmatmul.bf16.vlgmr.msra.gmra.mxu0 %v6403_v10  ;;  %10655 = vmatmul.msk.bf16.vlgmr.msra.gmra.mxu2 %vm6547_vm5, %v6410_v36  ;;  %v10869_v26 = vor.u32 %v11870_v45, %v10866_v37  ;;  %v10793_v50 = vor.u32 %v11853_v9, %v10792_v20  ;;  %v11893_v39 = vld [vmem:[%s17122_s12 + $0x18] sm:$0xff] }
 0x6b3   : > { %6591 = vmatmul.bf16.vlgmr.msrb.gmra.mxu3 %v6403_v10  ;;  %10656 = vmatmul.msk.bf16.vlgmr.msra.gmra.mxu1 %vm6547_vm5, %v6410_v36  ;;  %v10817_v10 = vor.u32 %v11859_v59, %v10816_v27  ;;  %v10821_v36 = vor.u32 %v11858_v34, %v10818_v25  ;;  %v11902_v27 = vld [vmem:[%s17122_s12 + $0x60] sm:$0xff]  ;;  %v11909_v34 = vld [vmem:[%s17122_s12 + $0x98] sm:$0xff] }
 0x6b4   : > { %6990 = vmatpush.bf16.msra.mxu2 %v10857_v32  ;;  %7016 = vmatpush.bf16.msrb.mxu3 %v10861_v17  ;;  %v10808_v32 = vld [vmem:[%s17120_s10 + $0x1c0] sm:$0xf]  ;;  %v11857_v17 = vld [vmem:[%s17120_s10 + $0x1c4] sm:$0xf0] }
 0x6b5   : > { %7005 = vmatpush.bf16.msra.mxu0 %v6985_v8  ;;  %7031 = vmatpush.bf16.msra.mxu1 %v6988_v55  ;;  %v10809_v63 = vor.u32 %v11857_v17, %v10808_v32  ;;  %v10800_v8 = vld [vmem:[%s17120_s10 + $0x1b0] sm:$0xf]  ;;  %v11855_v55 = vld [vmem:[%s17120_s10 + $0x1b4] sm:$0xf0] }
 0x6b8   : > { %6991 = vmatpush.bf16.msra.mxu2 %v10849_v49  ;;  %7017 = vmatpush.bf16.msrb.mxu3 %v10853_v61  ;;  %v11852_v49 = vld [vmem:[#allocation8 + $0x4] sm:$0xe]  ;;  %v10801_v61 = vor.u32 %v11855_v55, %v10800_v8 }
 0x6b9   : > { %7006 = vmatpush.bf16.msra.mxu0 %v10897_v5  ;;  %7032 = vmatpush.bf16.msra.mxu1 %v10901_v13  ;;  %v10797_v12 = vor.u32 %v11852_v49, %v10794_v40  ;;  %v6843_v13 = vrot.slane %v10793_v50, 1  ;;  %v7053_v49 = vld [vmem:[#allocation9] sm:$0xff] }
 0x6bb   : > { %v6844_v5 = vrot.slane %v10797_v12, 1 }
 0x6bc   : > { %6992 = vmatpush.bf16.msra.mxu2 %v10841_v4  ;;  %7018 = vmatpush.bf16.msrb.mxu3 %v10845_v21  ;;  %v11884_v21 = vld [vmem:[%s17121_s11 + $0x20] sm:$0xff] }
 0x6bd   : > { %7007 = vmatpush.bf16.msra.mxu0 %v10889_v16  ;;  %7033 = vmatpush.bf16.msra.mxu1 %v10893_v53  ;;  %v7125_v53 = vunpack.c.l.b16 %v7077_v29  ;;  %v11899_v29 = vld [vmem:[%s17122_s12 + $0x48] sm:$0xff] }
 0x6bf   : > { %v7136_v60 = vpack.c.b16 %v7125_v53, %v7125_v53  ;;  %v11890_v53 = vld [vmem:[%s17122_s12] sm:$0xff] }
 0x6c0   : > { %6993 = vmatpush.bf16.msra.mxu2 %v10833_v41  ;;  %7019 = vmatpush.bf16.msrb.mxu3 %v10837_v44 }
 0x6c1   : > { %7008 = vmatpush.bf16.msra.mxu0 %v10881_v57  ;;  %7034 = vmatpush.bf16.msra.mxu1 %v10885_v47  ;;  %v7152_v0 = vsel %vm5473_vm15, %v7136_v60, 0  ;;  %v11880_v57 = vld [vmem:[%s17121_s11] sm:$0xff]  ;;  %v11931_v60 = vld [vmem:[%s17122_s12 + $0x148] sm:$0xff]  ;;  %vm7183_vm15 = vmand %vm7182_vm4, %vm7048_vm6 }
 0x6c2   : > { %6761 = vmatmul.bf16.vlgmr.msrb.gmra.mxu0 %v16708_v7  ;;  %10761 = vmatmul.msk.bf16.vlgmr.msrb.gmra.mxu2 %vm6547_vm5, %v16710_v35  ;;  %v11888_v47 = vld [vmem:[%s17121_s11 + $0x40] sm:$0xff] }
 0x6c3   : > { %6787 = vmatmul.bf16.vlgmr.msrb.gmra.mxu1 %v16708_v7  ;;  %10762 = vmatmul.msk.bf16.vlgmr.msra.gmra.mxu3 %vm6547_vm5, %v16710_v35  ;;  %v11856_v7 = vld [vmem:[%s17120_s10 + $0x1c4] sm:$0xf]  ;;  %v10810_v35 = vld [vmem:[%s17120_s10 + $0x1c8] sm:$0xf0] }
 0x6c4   : > { %6994 = vmatpush.bf16.msra.mxu2 %v10825_v58  ;;  %7020 = vmatpush.bf16.msrb.mxu3 %v10829_v18  ;;  %v10813_v23 = vor.u32 %v11856_v7, %v10810_v35  ;;  %v11895_v18 = vld [vmem:[%s17122_s12 + $0x28] sm:$0xff] }
 0x6c5   : > { %7009 = vmatpush.bf16.msra.mxu0 %v10873_v2  ;;  %7035 = vmatpush.bf16.msra.mxu1 %v10877_v46  ;;  %v11894_v2 = vld [vmem:[%s17122_s12 + $0x20] sm:$0xff] }
 0x6c8   : > { %6995 = vmatpush.bf16.msra.mxu2 %v10817_v10  ;;  %7021 = vmatpush.bf16.msrb.mxu3 %v10821_v36 }
 0x6c9   : > { %7010 = vmatpush.bf16.msra.mxu0 %v10865_v42  ;;  %7036 = vmatpush.bf16.msra.mxu1 %v10869_v26 }
 0x6cc   : > { %6996 = vmatpush.bf16.msra.mxu2 %v10809_v63  ;;  %7022 = vmatpush.bf16.msrb.mxu3 %v10813_v23 }
 0x6cd   : > { %7154 = vmatpush.bf16.msrb.mxu0 %v11887_v19  ;;  %7270 = vmatpush.bf16.msrb.mxu1 %v11903_v28  ;;  %v11937_v28 = vld [vmem:[%s17122_s12 + $0x178] sm:$0xff] }
 0x6d0   : > { %6997 = vmatpush.bf16.msra.mxu2 %v10801_v61  ;;  %7023 = vmatpush.bf16.msrb.mxu3 %v10805_v11 }
 0x6d1   : > { %7155 = vmatpush.bf16.msrb.mxu0 %v11886_v15  ;;  %7271 = vmatpush.bf16.msrb.mxu1 %v11902_v27  ;;  %v11901_v15 = vld [vmem:[%s17122_s12 + $0x58] sm:$0xff]  ;;  %v11911_v27 = vld [vmem:[%s17122_s12 + $0xa8] sm:$0xff] }
 0x6d2   : > { %10902 = vmatmul.msk.bf16.vlgmr.msra.gmra.mxu0 %vm6547_vm5, %v6844_v5 }
 0x6d3   : > { %6998 = vmatmul.bf16.vlgmr.msra.gmra.mxu2 %v6843_v13  ;;  %7024 = vmatmul.bf16.vlgmr.msrb.gmra.mxu3 %v6843_v13 }
 0x6d4   : > { %10903 = vmatmul.msk.bf16.vlgmr.msra.gmra.mxu1 %vm6547_vm5, %v6844_v5  ;;  %7172 = vmatpush.bf16.msrb.mxu2 %v7152_v0  ;;  %v11905_v0 = vld [vmem:[%s17122_s12 + $0x78] sm:$0xff] }
 0x6d5   : > { %7156 = vmatpush.bf16.msrb.mxu0 %v11885_v51  ;;  %7328 = vmatpush.bf16.msra.mxu3 %v11896_v43  ;;  %v11908_v51 = vld [vmem:[%s17122_s12 + $0x90] sm:$0xff]  ;;  %v11923_v43 = vld [vmem:[%s17122_s12 + $0x108] sm:$0xff] }
 0x6d6   : > { %7272 = vmatpush.bf16.msrb.mxu1 %v11901_v15 }
 0x6d8   : > { %7173 = vmatpush.bf16.msrb.mxu2 %v11889_v62  ;;  %v11904_v62 = vld [vmem:[%s17122_s12 + $0x70] sm:$0xff] }
 0x6d9   : > { %7157 = vmatpush.bf16.msrb.mxu0 %v11884_v21  ;;  %7329 = vmatpush.bf16.msra.mxu3 %v11895_v18  ;;  %v11900_v21 = vld [vmem:[%s17122_s12 + $0x50] sm:$0xff] }
 0x6da   : > { %7273 = vmatpush.bf16.msrb.mxu1 %v11900_v21  ;;  %v11936_v18 = vld [vmem:[%s17122_s12 + $0x170] sm:$0xff] }
 0x6dc   : > { %7174 = vmatpush.bf16.msrb.mxu2 %v11888_v47  ;;  %v11929_v47 = vld [vmem:[%s17122_s12 + $0x138] sm:$0xff] }
 0x6dd   : > { %7158 = vmatpush.bf16.msrb.mxu0 %v11883_v3  ;;  %7330 = vmatpush.bf16.msra.mxu3 %v11894_v2  ;;  %v11916_v3 = vld [vmem:[%s17122_s12 + $0xd0] sm:$0xff]  ;;  %v11926_v2 = vld [vmem:[%s17122_s12 + $0x120] sm:$0xff] }
 0x6de   : > { %7274 = vmatpush.bf16.msrb.mxu1 %v11899_v29 }
 0x6e0   : > { %7406 = vmatpush.bf16.msra.mxu2 %v11910_v38  ;;  %v11928_v38 = vld [vmem:[%s17122_s12 + $0x130] sm:$0xff] }
 0x6e1   : > { %7159 = vmatpush.bf16.msrb.mxu0 %v11882_v54  ;;  %7331 = vmatpush.bf16.msra.mxu3 %v11893_v39  ;;  %v11898_v54 = vld [vmem:[%s17122_s12 + $0x40] sm:$0xff] }
 0x6e2   : > { %7275 = vmatpush.bf16.msrb.mxu1 %v11898_v54  ;;  %v11934_v39 = vld [vmem:[%s17122_s12 + $0x160] sm:$0xff] }
 0x6e4   : > { %7407 = vmatpush.bf16.msra.mxu2 %v11909_v34  ;;  %v11921_v34 = vld [vmem:[%s17122_s12 + $0xf8] sm:$0xff] }
 0x6e5   : > { %7160 = vmatpush.bf16.msrb.mxu0 %v11881_v48  ;;  %v11897_v48 = vld [vmem:[%s17122_s12 + $0x38] sm:$0xff] }
 0x6e6   : > { %7276 = vmatpush.bf16.msrb.mxu1 %v11897_v48 }
 0x6e8   : > { %7408 = vmatpush.bf16.msra.mxu2 %v11908_v51 }
 0x6e9   : > { %7161 = vmatpush.bf16.msrb.mxu0 %v11880_v57  ;;  %v11913_v57 = vld [vmem:[%s17122_s12 + $0xb8] sm:$0xff] }
 0x72f   : > { %v6566_v1 = vpop.f32.mrf.mxu0 }
 0x730   : > { %v6605_v4 = vpop.f32.mrf.mxu1 }
 0x735   : > { %v6579_v24 = vpop.f32.mrf.mxu2 }
 0x736   : > { %v6592_v14 = vpop.f32.mrf.mxu3  ;;  %v6580_v10 = vadd.f32 %v6579_v24, %v6566_v1  ;;  %v11892_v1 = vld [vmem:[%s17122_s12 + $0x10] sm:$0xff]  ;;  %v11907_v24 = vld [vmem:[%s17122_s12 + $0x88] sm:$0xff] }
 0x737   : > { %v6568_v16 = vpop.f32.mrf.mxu0  ;;  %v6606_v36 = vadd.f32 %v6605_v4, %v6592_v14  ;;  %v11917_v4 = vld [vmem:[%s17122_s12 + $0xd8] sm:$0xff]  ;;  %7332 = vmatpush.bf16.msra.mxu3 %v11892_v1  ;;  %7409 = vmatpush.bf16.msra.mxu2 %v11907_v24  ;;  %v11891_v14 = vld [vmem:[%s17122_s12 + $0x8] sm:$0xff] }
 0x738   : > { %v6607_v30 = vpop.f32.mrf.mxu1  ;;  %7484 = vmatpush.bf16.msra.mxu0 %v11917_v4  ;;  %v11906_v16 = vld [vmem:[%s17122_s12 + $0x80] sm:$0xff] }
 0x739   : > { %v11915_v30 = vld [vmem:[%s17122_s12 + $0xc8] sm:$0xff] }
 0x73b   : > { %7333 = vmatpush.bf16.msra.mxu3 %v11891_v14  ;;  %7410 = vmatpush.bf16.msra.mxu2 %v11906_v16 }
 0x73c   : > { %7485 = vmatpush.bf16.msra.mxu0 %v11916_v3 }
 0x73d   : > { %v6581_v41 = vpop.f32.mrf.mxu2 }
 0x73e   : > { %v6594_v44 = vpop.f32.mrf.mxu3  ;;  %v11914_v41 = vld [vmem:[%s17122_s12 + $0xc0] sm:$0xff] }
 0x73f   : > { %v6762_v56 = vpop.f32.mrf.mxu0  ;;  %7334 = vmatpush.bf16.msra.mxu3 %v11890_v53  ;;  %v11930_v44 = vld [vmem:[%s17122_s12 + $0x140] sm:$0xff]  ;;  %7411 = vmatpush.bf16.msra.mxu2 %v11905_v0 }
 0x740   : > { %v6788_v22 = vpop.f32.mrf.mxu1  ;;  %v6763_v32 = vadd.f32 %v6762_v56, %v6580_v10  ;;  %7486 = vmatpush.bf16.msra.mxu0 %v11915_v30  ;;  %v11924_v56 = vld [vmem:[%s17122_s12 + $0x110] sm:$0xff]  ;;  %v11933_v10 = vld [vmem:[%s17122_s12 + $0x158] sm:$0xff] }
 0x741   : > { %v6789_v17 = vadd.f32 %v6788_v22, %v6606_v36  ;;  %v11938_v22 = vld [vmem:[%s17122_s12 + $0x180] sm:$0xff]  ;;  %7563 = vmatpush.bf16.msra.mxu1 %v11924_v56 }
 0x743   : > { %7641 = vmatpush.bf16.msrb.mxu3 %v11931_v60  ;;  %7412 = vmatpush.bf16.msra.mxu2 %v11904_v62 }
 0x744   : > { %7487 = vmatpush.bf16.msra.mxu0 %v11914_v41 }
 0x745   : > { %v6775_v6 = vpop.f32.mrf.mxu2  ;;  %7564 = vmatpush.bf16.msra.mxu1 %v11923_v43 }
 0x746   : > { %v6801_v58 = vpop.f32.mrf.mxu3  ;;  %v6776_v42 = vadd.f32 %v6775_v6, %v6763_v32  ;;  %v11912_v6 = vld [vmem:[%s17122_s12 + $0xb0] sm:$0xff] }
 0x747   : > { %v6764_v59 = vpop.f32.mrf.mxu0  ;;  %v6802_v26 = vadd.f32 %v6801_v58, %v6789_v17  ;;  %7642 = vmatpush.bf16.msrb.mxu3 %v11930_v44  ;;  %v11922_v58 = vld [vmem:[%s17122_s12 + $0x100] sm:$0xff]  ;;  %v7733_v44 = vlaneseq }
 0x748   : > { %v6790_v25 = vpop.f32.mrf.mxu1  ;;  %7488 = vmatpush.bf16.msra.mxu0 %v11913_v57  ;;  %v11927_v59 = vld [vmem:[%s17122_s12 + $0x128] sm:$0xff] }
 0x749   : > { %7565 = vmatpush.bf16.msra.mxu1 %v11922_v58  ;;  %v11935_v25 = vld [vmem:[%s17122_s12 + $0x168] sm:$0xff]  ;;  %v7734_v57 = vand.u32 127, %v7733_v44 }
 0x74b   : > { %7643 = vmatpush.bf16.msrb.mxu3 %v11929_v47  ;;  %vm7735_vm14 = vcmp.lt.s32.totalorder %v7734_v57, 10 }
 0x74c   : > { %7489 = vmatpush.bf16.msra.mxu0 %v11912_v6 }
 0x74d   : > { %v6777_v46 = vpop.f32.mrf.mxu2  ;;  %7566 = vmatpush.bf16.msra.mxu1 %v11921_v34 }
 0x74e   : > { %v6803_v31 = vpop.f32.mrf.mxu3 }
 0x74f   : > { %v7012_v45 = vpop.f32.mrf.mxu0  ;;  %7644 = vmatpush.bf16.msrb.mxu3 %v11928_v38  ;;  %v11920_v31 = vld [vmem:[%s17122_s12 + $0xf0] sm:$0xff] }
 0x750   : > { %7490 = vmatpush.bf16.msra.mxu0 %v11911_v27 }
 0x751   : > { %v7038_v37 = vpop.f32.mrf.mxu1  ;;  %7567 = vmatpush.bf16.msra.mxu1 %v11920_v31 }
 0x753   : > { %7645 = vmatpush.bf16.msrb.mxu3 %v11927_v59 }
 0x756   : > { %v6999_v7 = vpop.f32.mrf.mxu2  ;;  %v7025_v35 = vpop.f32.mrf.mxu3 }
 0x757   : > { %v7013_v63 = vadd.f32 %v7012_v45, %v6999_v7  ;;  %v7039_v23 = vadd.f32 %v7038_v37, %v7025_v35  ;;  %v7014_v8 = vpop.f32.mrf.mxu0  ;;  %7646 = vmatpush.bf16.msrb.mxu3 %v11926_v2  ;;  %v11925_v45 = vld [vmem:[%s17122_s12 + $0x118] sm:$0xff]  ;;  %v11919_v37 = vld [vmem:[%s17122_s12 + $0xe8] sm:$0xff]  ;;  %v11918_v7 = vld [vmem:[%s17122_s12 + $0xe0] sm:$0xff] }
 0x758   : > { %7568 = vmatpush.bf16.msra.mxu1 %v11919_v37  ;;  %v11932_v35 = vld [vmem:[%s17122_s12 + $0x150] sm:$0xff] }
 0x759   : > { %v7042_v55 = vadd.f32 %v7013_v63, %v6776_v42  ;;  %v7043_v33 = vadd.f32 %v7039_v23, %v6802_v26  ;;  %v7040_v52 = vpop.f32.mrf.mxu1  ;;  %v7184_v26 = vld [vmem:[#allocation10] sm:$0xf] }
 0x75b   : > { %v7044_v40 = vmax.f32 %v7042_v55, 0.0  ;;  %v7045_v9 = vmax.f32 %v7043_v33, 0.0  ;;  %7647 = vmatpush.bf16.msrb.mxu3 %v11925_v45 }
 0x75c   : > { %7569 = vmatpush.bf16.msra.mxu1 %v11918_v7 }
 0x75d   : > { %v7046_v61 = vpack.c.bf16 %v7045_v9, %v7044_v40 }
 0x75e   : > { %v7001_v11 = vpop.f32.mrf.mxu2  ;;  %v7027_v20 = vpop.f32.mrf.mxu3 }
 0x75f   : > { %v7054_v12 = vsel %vm7052_vm10, %v7046_v61, %v7053_v49 }
 0x760   : > { %7055 = vst [vmem:[#allocation9] sm:$0xff] %v7054_v12  ;;  %v7079_v50 = vunpack.c.l.b16 %v7054_v12  ;;  %v7080_v5 = vunpack.c.h.b16 %v7054_v12 }
 0x762   : > { %v7081_v13 = vpack.c.b16 %v7079_v50, %v7079_v50  ;;  %v7082_v19 = vpack.c.b16 %v7080_v5, %v7080_v5 }
 0x764   : > { %7162 = vmatmul.bf16.vlgmr.msrb.gmra.mxu0 %v7081_v13  ;;  %10944 = vmatmul.msk.bf16.vlgmr.msrb.gmra.mxu2 %vm7147_vm11, %v7082_v19 }
 0x765   : > { %7720 = vmatpush.bf16.msrb.mxu2 %v11938_v22 }
 0x769   : > { %7721 = vmatpush.bf16.msrb.mxu2 %v11937_v28 }
 0x76d   : > { %7722 = vmatpush.bf16.msrb.mxu2 %v11936_v18 }
 0x771   : > { %7723 = vmatpush.bf16.msrb.mxu2 %v11935_v25 }
 0x775   : > { %7724 = vmatpush.bf16.msrb.mxu2 %v11934_v39 }
 0x779   : > { %7725 = vmatpush.bf16.msrb.mxu2 %v11933_v10 }
 0x77d   : > { %7726 = vmatpush.bf16.msrb.mxu2 %v11932_v35 }
 0x7e1   : > { %v7163_v46 = vpop.f32.mrf.mxu0 }
 0x7e7   : > { %v7176_v36 = vpop.f32.mrf.mxu2 }
 0x7e8   : > { %v7177_v32 = vadd.f32 %v7176_v36, %v7163_v46 }
 0x7e9   : > { %v7165_v17 = vpop.f32.mrf.mxu0 }
 0x7ea   : > { %v7180_v42 = vmax.f32 %v7177_v32, 0.0 }
 0x7ec   : > { %v7181_v63 = vpack.c.bf16 %v7180_v42, %v7180_v42 }
 0x7ee   : > { %v7185_v23 = vsel %vm7183_vm15, %v7181_v63, %v7184_v26 }
 0x7ef   : > { %7186 = vst [vmem:[#allocation10] sm:$0xf] %v7185_v23  ;;  %v7178_v8 = vpop.f32.mrf.mxu2 }
 0x7f6   : > { %v7187_v55 = vld [vmem:[#allocation10] sm:$0x1]  ;;  %v7340_v33 = vld [vmem:[#allocation10] sm:$0x2]  ;;  %v7497_v52 = vld [vmem:[#allocation10] sm:$0x4] }
 0x7f7   : > { %v7218_v40 = vunpack.c.l.b16 %v7187_v55  ;;  %11016 = vmatmul.msk.bf16.vlgmr.msra.gmra.mxu3 %vm7265_vm13, %v7187_v55  ;;  %v7357_v9 = vunpack.c.l.b16 %v7340_v33  ;;  %v7514_v11 = vunpack.c.l.b16 %v7497_v52  ;;  %v7654_v19 = vld [vmem:[#allocation10] sm:$0x8] }
 0x7f8   : > { %v7671_v51 = vunpack.c.l.b16 %v7654_v19 }
 0x7f9   : > { %v7219_v49 = vpack.c.b16 %v7218_v40, %v7218_v40  ;;  %v7358_v61 = vpack.c.b16 %v7357_v9, %v7357_v9  ;;  %v7515_v13 = vpack.c.b16 %v7514_v11, %v7514_v11 }
 0x7fa   : > { %v7672_v4 = vpack.c.b16 %v7671_v51, %v7671_v51 }
 0x7fb   : > { %v7221_v20 = vshrl.u32 %v7219_v49, 16  ;;  %v7359_v12 = vrot.slane %v7358_v61, 1  ;;  %v7435_v50 = vshrl.u32 %v7358_v61, 16  ;;  %v7592_v15 = vshrl.u32 %v7515_v13, 16 }
 0x7fc   : > { %v7516_v21 = vrot.slane %v7515_v13, 2  ;;  %v7673_v24 = vrot.slane %v7672_v4, 3 }
 0x7fd   : > { %10987 = vmatmul.msk.bf16.vlgmr.msrb.gmra.mxu1 %vm7265_vm13, %v7221_v20  ;;  %11059 = vmatmul.msk.bf16.vlgmr.msra.gmra.mxu2 %vm7265_vm13, %v7359_v12  ;;  %v7437_v5 = vrot.slane %v7435_v50, 1  ;;  %v7594_v1 = vrot.slane %v7592_v15, 2 }
 0x7ff   : > { %11102 = vmatmul.msk.bf16.vlgmr.msra.gmra.mxu0 %vm7265_vm13, %v7437_v5 }
 0x807   : > { %11188 = vmatmul.msk.bf16.vlgmr.msrb.gmra.mxu3 %vm7265_vm13, %v7594_v1 }
 0x80d   : > { %11145 = vmatmul.msk.bf16.vlgmr.msra.gmra.mxu1 %vm7265_vm13, %v7516_v21  ;;  %11231 = vmatmul.msk.bf16.vlgmr.msrb.gmra.mxu2 %vm7265_vm13, %v7673_v24 }
 0x87a   : > { %v7278_v14 = vpop.f32.mrf.mxu1  ;;  %v7336_v3 = vpop.f32.mrf.mxu3 }
 0x87b   : > { %v7337_v60 = vadd.f32 %v7336_v3, %v7278_v14 }
 0x87c   : > { %v7492_v29 = vpop.f32.mrf.mxu0 }
 0x880   : > { %v7414_v16 = vpop.f32.mrf.mxu2 }
 0x881   : > { %v7418_v0 = vadd.f32 %v7414_v16, %v7337_v60 }
 0x882   : > { %v7280_v53 = vpop.f32.mrf.mxu1  ;;  %v7338_v30 = vpop.f32.mrf.mxu3 }
 0x883   : > { %v7496_v48 = vadd.f32 %v7492_v29, %v7418_v0 }
 0x884   : > { %v7494_v54 = vpop.f32.mrf.mxu0 }
 0x888   : > { %v7416_v41 = vpop.f32.mrf.mxu2 }
 0x88a   : > { %v7571_v62 = vpop.f32.mrf.mxu1  ;;  %v7649_v56 = vpop.f32.mrf.mxu3 }
 0x88b   : > { %v7575_v22 = vadd.f32 %v7571_v62, %v7496_v48 }
 0x88d   : > { %v7653_v47 = vadd.f32 %v7649_v56, %v7575_v22 }
 0x890   : > { %v7728_v43 = vpop.f32.mrf.mxu2 }
 0x891   : > { %v7732_v28 = vadd.f32 %v7728_v43, %v7653_v47 }
 0x892   : > { %v7573_v6 = vpop.f32.mrf.mxu1  ;;  %v7651_v38 = vpop.f32.mrf.mxu3 }
 0x893   : > { %v7736_v58 = vsel %vm7735_vm14, %v7732_v28, -1e+30 }
 0x894   : > { %v7738_v18 = vsel %vm6326_vm12, %v7736_v58, -inf }
 0x895   : > { %7739 = vmax.xlane.f32.xlu0 %v7738_v18 }
 0x898   : > { %v7730_v27 = vpop.f32.mrf.mxu2 }
 0x908   : > { %v7740_v59 = vpop.xlane.xlu0 %7739 }
 0x909   : > { %v7741_v34 = vsub.f32 %v7732_v28, %v7740_v59 }
 0x90b   : > { %v7742_v25 = vmul.f32 1.442695, %v7741_v34 }
 0x90d   : > { %11985 = vpow2.f32 %v7742_v25 }
 0x913   : > { %v11986_v2 = vpop.eup %11985 }
 0x914   : > { %v7744_v46 = vsel %vm7735_vm14, %v11986_v2, 0.0 }
 0x915   : > { %v7745_v31 = vsel %vm6326_vm12, %v7744_v46, 0.0 }
 0x916   : > { %7746 = vadd.xlane.f32.xlu0 %v7745_v31 }
 0x989   : > { %v7747_v39 = vpop.xlane.xlu0 %7746 }
 0x98a   : > { %11987 = vlog2.f32 %v7747_v39 }
 0x990   : > { %v11988_v45 = vpop.eup %11987 }
 0x991   : > { %v7749_v37 = vmul.f32 0.6931472, %v11988_v45 }
 0x993   : > { %v7750_v10 = vsub.f32 %v7741_v34, %v7749_v37 }
 0x995   : > { %7751 = vst [vmem:[%s432_s15] sm:$0x1] %v7750_v10 }
 0x996   : > { %12017 = shalt.err (!%p12014_p3)
}
 0x997   : > { %11946 = dma.vmem_to_hbm [thread:$0]  (%p12162_p5), %s7764_s16, 16, %s7766_s20, %s7753_s14  }
 0x998 PF: > { %p11952_p4 = scmp.ge.s32.totalorder %s12052_s28, 2  ;;  %s7777_s17 = sand.u32 1, %s12040_s25  }
 0x999   : > { %s7778_s15 = scalar_lea.sflag [#allocation12], %s7777_s17 }
 0x99a   : > { %p11949_p7 = pnand %p11952_p4, %p12166_p6 }
 0x99c   : > { %p11950_p8 = pneg %p11949_p7 }
 0x99e   : > { %12035 = dma.done.wait (%p11950_p8), %s7778_s15, 16  }
 0x99f   : > { %12037 = vsyncadd (%p11950_p8), %s7778_s15, 4294967280  ;;  %s17141_s28 = sld [smem:[#allocation15_spill]]  ;;  %s17144_s25 = smov %s12044_s26 }
 0x9a0   : > { %s17142_s27 = sld [smem:[#allocation14_spill]] }
 0x9a1   : > { %s17143_s19 = sld [smem:[#allocation16_spill]] }
 0x9a5   : > { %p23_p9 = scmp.ge.s32.totalorder %s17141_s28, 4  }
 0x9a6   : > { %s17145_s26 = smov %s17142_s27 }
 0x9a7   : > { %s17146_s27 = smov %s17143_s19  ;;  %25 = sbr.rel (!%p23_p9) target bundleno = 3 (0x3), region = 123 }
 0x9ac   :  { %7783 = vsyncpa [#allocation12], 1 }
 0x9ad   :  { %7785 = vsyncpa [#allocation12 + $0x1], 1 }

</bundles_post_ra>
